<compile_context>
chip_gen: v7x
topology: tpu7x:2x2x1
jax: 0.10.0
libtpu: 0.0.40
codegen_flags: <defaults>
</compile_context>

<pallas_src>
import functools

import numpy as np
import jax
import jax.numpy as jnp
from jax.experimental import pallas as pl
from jax.experimental.pallas import tpu as pltpu

IN_CH = 3          # RGB input channels
CIN_PAD = 16       # conv_in input channels zero-padded to one bf16 sublane tile
HIDDEN = 32        # block channel count
GROUPS = 8         # GroupNorm groups
LATENT = 4         # latent channels (moments = 2 * LATENT)
EPS = 1e-6


# ----------------------------------------------------------------------------
# Fused encoder kernel (one grid step == one image)
# ----------------------------------------------------------------------------

def encoder_kernel(x_ref, noise_ref,
                   w_in_ref, w_res_ref, b_in_ref, b_res_ref,
                   gn_g_ref, gn_b_ref, gpool_ref,
                   w_head_ref, b_head_ref,
                   m_full_ref, m_half_ref, sel_ref,
                   o_ref,
                   xs_ref, patch_ref, stat_ref,
                   *, H, W, apron):
    f32 = jnp.float32
    bf16 = jnp.bfloat16
    C = HIDDEN
    Hh, Wh = H // 2, W // 2
    P1, P2 = H * W, Hh * Wh
    cpg = C // GROUPS

    # Zero only the two apron strips once per image (the interior is always
    # fully overwritten before it is read); masked junk can then never be NaN.
    xs_ref[:, 0:apron] = jnp.zeros((C, apron), bf16)
    xs_ref[:, apron + P1:2 * apron + P1] = jnp.zeros((C, apron), bf16)

    def im2col_T(act, cin, P, Wimg, mask_ref):
        """(cin, P) activation -> (9*cin, P) bf16 patches^T (spatial in lanes).

        The flattened activation is parked once at lane offset `apron`; every
        3x3 tap is a static lane-offset slice (offset apron + dy*Wimg + dx)
        multiplied by a host-precomputed 0/1 boundary mask that re-creates the
        zero padding and kills row wrap-around.  No reshapes, no halo zeroing.
        """
        xs_ref[0:cin, apron:apron + P] = act.astype(bf16)
        for t in range(9):
            dy, dx = t // 3 - 1, t % 3 - 1
            s = dy * Wimg + dx
            tap = xs_ref[0:cin, apron + s:apron + s + P]
            if s != 0:                                   # centre tap: no mask
                tap = tap * mask_ref[t:t + 1, 0:P]
            patch_ref[t * cin:(t + 1) * cin, 0:P] = tap
        return patch_ref[0:9 * cin, 0:P]

    def conv3x3_T(act, w_t, b_col, cin, P, Wimg, mask_ref):
        """out^T(Cout,P) = W^T(Cout,9cin) @ patches^T(9cin,P), f32 accumulate."""
        pT = im2col_T(act, cin, P, Wimg, mask_ref)
        return jnp.dot(w_t, pT, preferred_element_type=f32) + b_col

    def group_norm_silu(x, idx, P):
        """GroupNorm(GROUPS) + SiLU in f32; channels in sublanes, spatial in lanes."""
        stat_ref[:, 0:1] = jnp.sum(x, axis=1, keepdims=True)          # (C,1)
        stat_ref[:, 1:2] = jnp.sum(x * x, axis=1, keepdims=True)      # (C,1)
        pooled = jnp.dot(gpool_ref[...], stat_ref[...],
                         preferred_element_type=f32) * (1.0 / (cpg * P))
        mean = pooled[:, 0:1]
        var = jnp.maximum(pooled[:, 1:2] - mean * mean, 0.0)          # clamp >= 0
        inv = jax.lax.rsqrt(var + EPS)
        y = (x - mean) * inv * gn_g_ref[:, idx:idx + 1] + gn_b_ref[:, idx:idx + 1]
        return y * jax.nn.sigmoid(y)                                  # fused SiLU

    # --- conv_in (input channels zero-padded to CIN_PAD on the host) ---------
    h = conv3x3_T(x_ref[...], w_in_ref[...], b_in_ref[...],
                  CIN_PAD, P1, W, m_full_ref)                         # (C, P1)

    # --- ResNet block @ HxW (residual add fused in-kernel) -------------------
    r = group_norm_silu(h, 0, P1)
    r = conv3x3_T(r, w_res_ref[0], b_res_ref[:, 0:1], C, P1, W, m_full_ref)
    r = group_norm_silu(r, 1, P1)
    r = conv3x3_T(r, w_res_ref[1], b_res_ref[:, 1:2], C, P1, W, m_full_ref)
    h = h + r

    # --- Downsample (pad (0,1,0,1), stride 2) --------------------------------
    # Full-res conv, then ONE bf16 one-hot matmul picking the odd rows/cols
    # (exactly equivalent).  The selector is precomputed on the host, so no
    # per-step iota/compare build and no f32 selection matmul remain.
    full = conv3x3_T(h, w_res_ref[2], b_res_ref[:, 2:3], C, P1, W, m_full_ref)
    h = jnp.dot(full.astype(bf16), sel_ref[...],
                preferred_element_type=f32)                           # (C, P2)

    # --- mid ResNet block @ (H/2)x(W/2) --------------------------------------
    r = group_norm_silu(h, 2, P2)
    r = conv3x3_T(r, w_res_ref[3], b_res_ref[:, 3:4], C, P2, Wh, m_half_ref)
    r = group_norm_silu(r, 3, P2)
    r = conv3x3_T(r, w_res_ref[4], b_res_ref[:, 4:5], C, P2, Wh, m_half_ref)
    h = h + r

    # --- norm_out + SiLU, fused (conv_out o quant_conv) head, sample ---------
    h = group_norm_silu(h, 4, P2)
    pT = im2col_T(h, C, P2, Wh, m_half_ref)
    moments = (jnp.dot(w_head_ref[...], pT, preferred_element_type=f32)
               + b_head_ref[...])                                     # (2L, P2)
    mean = moments[0:LATENT, :]
    logvar = jnp.clip(moments[LATENT:2 * LATENT, :], -30.0, 20.0)
    # Output block is (LATENT, P2) = (4, 64); only ~1 KB/image so the masked
    # partial store is negligible, and the wrapper reshape is a pure view.
    o_ref[...] = mean + jnp.exp(0.5 * logvar) * noise_ref[...]


# ----------------------------------------------------------------------------
# Host-side constants (0/1 matrices baked at trace time, never rebuilt in-kernel)
# ----------------------------------------------------------------------------

def _build_constants(H, W):
    P1 = H * W
    Hh, Wh = H // 2, W // 2
    P2 = Hh * Wh
    y, x = np.divmod(np.arange(P1), W)
    m_full = np.stack([((y + dy >= 0) & (y + dy < H) & (x + dx >= 0) & (x + dx < W))
                       for dy in (-1, 0, 1) for dx in (-1, 0, 1)]).astype(np.float32)
    yh, xh = np.divmod(np.arange(P2), Wh)
    m_half = np.stack([((yh + dy >= 0) & (yh + dy < Hh) & (xh + dx >= 0) & (xh + dx < Wh))
                       for dy in (-1, 0, 1) for dx in (-1, 0, 1)]).astype(np.float32)
    sel = np.zeros((P1, P2), np.float32)                 # odd-row/col one-hot
    sel[(2 * yh + 1) * W + (2 * xh + 1), np.arange(P2)] = 1.0
    cpg = HIDDEN // GROUPS
    gpool = (np.arange(HIDDEN)[:, None] // cpg
             == np.arange(HIDDEN)[None, :] // cpg).astype(np.float32)
    return (jnp.asarray(m_full, jnp.bfloat16), jnp.asarray(m_half, jnp.bfloat16),
            jnp.asarray(sel, jnp.bfloat16), jnp.asarray(gpool, jnp.float32))


# ----------------------------------------------------------------------------
# Parameter preparation (transpose / fold / bf16 cast)
# ----------------------------------------------------------------------------

def _tconv(w):                      # (3, 3, cin, cout) -> W^T (cout, 9*cin)
    return jnp.transpose(w.reshape(-1, w.shape[-1]))


def _prepare_params(p):
    w_in = jnp.pad(p["conv_in_w"], ((0, 0), (0, 0), (0, CIN_PAD - IN_CH), (0, 0)))
    w_in_t = _tconv(w_in).astype(jnp.bfloat16)                        # (C, 9*CIN_PAD)
    b_in = p["conv_in_b"].reshape(HIDDEN, 1)
    w_res_t = jnp.stack([_tconv(p["res0"]["c1_w"]), _tconv(p["res0"]["c2_w"]),
                         _tconv(p["down_w"]),
                         _tconv(p["res_mid"]["c1_w"]),
                         _tconv(p["res_mid"]["c2_w"])]).astype(jnp.bfloat16)
    b_res = jnp.stack([p["res0"]["c1_b"], p["res0"]["c2_b"], p["down_b"],
                       p["res_mid"]["c1_b"], p["res_mid"]["c2_b"]], axis=1)   # (C,5)
    gn_g = jnp.stack([p["res0"]["n1_g"], p["res0"]["n2_g"],
                      p["res_mid"]["n1_g"], p["res_mid"]["n2_g"],
                      p["norm_out_g"]], axis=1)                               # (C,5)
    gn_b = jnp.stack([p["res0"]["n1_b"], p["res0"]["n2_b"],
                      p["res_mid"]["n1_b"], p["res_mid"]["n2_b"],
                      p["norm_out_b"]], axis=1)
    # Fold quant_conv (1x1) into conv_out (both linear, nothing in between):
    # one (2*LATENT)-wide head, kept unsplit so it is a single MXU matmul.
    w_oq = p["conv_out_w"].reshape(-1, 2 * LATENT) @ p["quant_w"]             # (9C, 2L)
    b_oq = p["conv_out_b"] @ p["quant_w"] + p["quant_b"]                      # (2L,)
    w_head = jnp.transpose(w_oq).astype(jnp.bfloat16)                         # (2L, 9C)
    b_head = b_oq.reshape(2 * LATENT, 1)
    return w_in_t, w_res_t, b_in, b_res, gn_g, gn_b, w_head, b_head


# ----------------------------------------------------------------------------
# Wrapper (equivalent of TorchVAEEncoder.forward)
# ----------------------------------------------------------------------------

@jax.jit
def vae_encode_sample(x_nchw, params, noise_key):
    N, Cin, H, W = x_nchw.shape
    assert Cin == IN_CH and H % 2 == 0 and W % 2 == 0
    Ho, Wo = H // 2, W // 2
    P1, P2 = H * W, Ho * Wo
    C = HIDDEN
    apron = ((W + 1 + 127) // 128) * 128       # lane apron for the 3x3 tap slices

    # NCHW flattened is already the spatial-in-lanes layout: (N, C, H*W).
    # Pad input channels to a bf16 sublane tile so scratch writes stay aligned.
    x = x_nchw.reshape(N, IN_CH, P1)
    x = jnp.pad(x, ((0, 0), (0, CIN_PAD - IN_CH), (0, 0))).astype(jnp.bfloat16)
    noise = jax.random.normal(noise_key, (N, LATENT, P2), jnp.float32)

    m_full, m_half, sel, gpool = _build_constants(H, W)
    (w_in_t, w_res_t, b_in, b_res, gn_g, gn_b,
     w_head, b_head) = _prepare_params(params)

    out = pl.pallas_call(
        functools.partial(encoder_kernel, H=H, W=W, apron=apron),
        out_shape=jax.ShapeDtypeStruct((N, LATENT, P2), jnp.float32),
        grid=(N,),
        in_specs=[
            pl.BlockSpec((None, CIN_PAD, P1), lambda n: (n, 0, 0)),    # x (bf16)
            pl.BlockSpec((None, LATENT, P2), lambda n: (n, 0, 0)),     # noise
            pl.BlockSpec((C, 9 * CIN_PAD), lambda n: (0, 0)),          # conv_in W^T
            pl.BlockSpec((5, C, 9 * C), lambda n: (0, 0, 0)),          # res conv W^T
            pl.BlockSpec((C, 1), lambda n: (0, 0)),                    # conv_in bias
            pl.BlockSpec((C, 5), lambda n: (0, 0)),                    # res conv biases
            pl.BlockSpec((C, 5), lambda n: (0, 0)),                    # GN gammas
            pl.BlockSpec((C, 5), lambda n: (0, 0)),                    # GN betas
            pl.BlockSpec((C, C), lambda n: (0, 0)),                    # group pooling
            pl.BlockSpec((2 * LATENT, 9 * C), lambda n: (0, 0)),       # head W^T
            pl.BlockSpec((2 * LATENT, 1), lambda n: (0, 0)),           # head bias
            pl.BlockSpec((9, P1), lambda n: (0, 0)),                   # full-res masks
            pl.BlockSpec((9, P2), lambda n: (0, 0)),                   # half-res masks
            pl.BlockSpec((P1, P2), lambda n: (0, 0)),                  # stride-2 selector
        ],
        out_specs=pl.BlockSpec((None, LATENT, P2), lambda n: (n, 0, 0)),
        scratch_shapes=[
            pltpu.VMEM((C, P1 + 2 * apron), jnp.bfloat16),   # apron-padded activation
            pltpu.VMEM((9 * C, P1), jnp.bfloat16),           # patches^T
            pltpu.VMEM((C, 2), jnp.float32),                 # GN sum / sum-of-squares
        ],
        compiler_params=pltpu.CompilerParams(
            dimension_semantics=("parallel",)),
    )(x, noise, w_in_t, w_res_t, b_in, b_res, gn_g, gn_b, gpool,
      w_head, b_head, m_full, m_half, sel)

    return out.reshape(N, LATENT, Ho, Wo)                    # already NCHW


# ----------------------------------------------------------------------------
# Deterministic synthetic parameters
# ----------------------------------------------------------------------------

def init_params(key):
    ks = list(jax.random.split(key, 32))

    def w(shape, scale=0.05):
        return scale * jax.random.normal(ks.pop(), shape, jnp.float32)

    def resnet_params(c):
        return dict(
            n1_g=jnp.ones((c,), jnp.float32), n1_b=jnp.zeros((c,), jnp.float32),
            c1_w=w((3, 3, c, c)), c1_b=jnp.zeros((c,), jnp.float32),
            n2_g=jnp.ones((c,), jnp.float32), n2_b=jnp.zeros((c,), jnp.float32),
            c2_w=w((3, 3, c, c)), c2_b=jnp.zeros((c,), jnp.float32),
        )

    return dict(
        conv_in_w=w((3, 3, IN_CH, HIDDEN)),
        conv_in_b=jnp.zeros((HIDDEN,), jnp.float32),
        res0=resnet_params(HIDDEN),
        down_w=w((3, 3, HIDDEN, HIDDEN)),
        down_b=jnp.zeros((HIDDEN,), jnp.float32),
        res_mid=resnet_params(HIDDEN),
        norm_out_g=jnp.ones((HIDDEN,), jnp.float32),
        norm_out_b=jnp.zeros((HIDDEN,), jnp.float32),
        conv_out_w=w((3, 3, HIDDEN, 2 * LATENT)),
        conv_out_b=jnp.zeros((2 * LATENT,), jnp.float32),
        quant_w=w((2 * LATENT, 2 * LATENT)),
        quant_b=jnp.zeros((2 * LATENT,), jnp.float32),
    )


if __name__ == "__main__":
    key = jax.random.PRNGKey(0)
    k_params, k_input, k_noise = jax.random.split(key, 3)

    N, H, W = 2, 16, 16
    x = jax.random.normal(k_input, (N, IN_CH, H, W), jnp.float32)   # NCHW input
    params = init_params(k_params)

    latents = vae_encode_sample(x, params, k_noise)
    latents = jax.block_until_ready(latents)

    assert latents.shape == (N, LATENT, H // 2, W // 2), latents.shape
    assert bool(jnp.all(jnp.isfinite(latents)))
    print("KERNEL_OK")
</pallas_src>

<mosaic_0001>
module attributes {stable_mosaic.version = 11 : i64} {
  func.func @encoder_kernel(%arg0: i32, %arg1: memref<1x16x256xbf16, #tpu.memory_space<vmem>>, %arg2: memref<1x4x64xf32, #tpu.memory_space<vmem>>, %arg3: memref<32x144xbf16, #tpu.memory_space<vmem>>, %arg4: memref<5x32x288xbf16, #tpu.memory_space<vmem>>, %arg5: memref<32x1xf32, #tpu.memory_space<vmem>>, %arg6: memref<32x5xf32, #tpu.memory_space<vmem>>, %arg7: memref<32x5xf32, #tpu.memory_space<vmem>>, %arg8: memref<32x5xf32, #tpu.memory_space<vmem>>, %arg9: memref<32x32xf32, #tpu.memory_space<vmem>>, %arg10: memref<8x288xbf16, #tpu.memory_space<vmem>>, %arg11: memref<8x1xf32, #tpu.memory_space<vmem>>, %arg12: memref<9x256xbf16, #tpu.memory_space<vmem>>, %arg13: memref<9x64xbf16, #tpu.memory_space<vmem>>, %arg14: memref<256x64xbf16, #tpu.memory_space<vmem>>, %arg15: memref<1x4x64xf32, #tpu.memory_space<vmem>>, %arg16: memref<32x512xbf16, #tpu.memory_space<vmem>>, %arg17: memref<288x256xbf16, #tpu.memory_space<vmem>>, %arg18: memref<32x2xf32, #tpu.memory_space<vmem>>) attributes {dimension_semantics = [#tpu.dimension_semantics<parallel>], iteration_bounds = array<i64: 2>, scalar_prefetch = 0 : i64, scratch_operands = 3 : i64, tpu.core_type = #tpu.core_type<tc>, window_params = [{transform_indices = @transform_0, window_bounds = array<i64: 1, 16, 256>}, {transform_indices = @transform_1, window_bounds = array<i64: 1, 4, 64>}, {pipeline_mode = #tpu.pipeline_mode<synchronous>, transform_indices = @transform_2, window_bounds = array<i64: 32, 144>}, {pipeline_mode = #tpu.pipeline_mode<synchronous>, transform_indices = @transform_3, window_bounds = array<i64: 5, 32, 288>}, {pipeline_mode = #tpu.pipeline_mode<synchronous>, transform_indices = @transform_4, window_bounds = array<i64: 32, 1>}, {pipeline_mode = #tpu.pipeline_mode<synchronous>, transform_indices = @transform_5, window_bounds = array<i64: 32, 5>}, {pipeline_mode = #tpu.pipeline_mode<synchronous>, transform_indices = @transform_6, window_bounds = array<i64: 32, 5>}, {pipeline_mode = #tpu.pipeline_mode<synchronous>, transform_indices = @transform_7, window_bounds = array<i64: 32, 5>}, {pipeline_mode = #tpu.pipeline_mode<synchronous>, transform_indices = @transform_8, window_bounds = array<i64: 32, 32>}, {pipeline_mode = #tpu.pipeline_mode<synchronous>, transform_indices = @transform_9, window_bounds = array<i64: 8, 288>}, {pipeline_mode = #tpu.pipeline_mode<synchronous>, transform_indices = @transform_10, window_bounds = array<i64: 8, 1>}, {pipeline_mode = #tpu.pipeline_mode<synchronous>, transform_indices = @transform_11, window_bounds = array<i64: 9, 256>}, {pipeline_mode = #tpu.pipeline_mode<synchronous>, transform_indices = @transform_12, window_bounds = array<i64: 9, 64>}, {pipeline_mode = #tpu.pipeline_mode<synchronous>, transform_indices = @transform_13, window_bounds = array<i64: 256, 64>}, {transform_indices = @transform_14, window_bounds = array<i64: 1, 4, 64>}]} {
    %cst = arith.constant 0.000000e+00 : bf16
    %0 = vector.broadcast %cst : bf16 to vector<32x128xbf16>
    %c0 = arith.constant 0 : index
    %c0_0 = arith.constant 0 : index
    %1 = vector.load %arg16[%c0, %c0_0] : memref<32x512xbf16, #tpu.memory_space<vmem>>, vector<32x128xbf16>
    tpu.vector_store %arg16[%c0, %c0_0], %0 {strides = array<i32>} : memref<32x512xbf16, #tpu.memory_space<vmem>>, vector<32x128xbf16>,
    %cst_1 = arith.constant 0.000000e+00 : bf16
    %2 = vector.broadcast %cst_1 : bf16 to vector<32x128xbf16>
    %c0_2 = arith.constant 0 : index
    %c384 = arith.constant 384 : index
    %3 = vector.load %arg16[%c0_2, %c384] : memref<32x512xbf16, #tpu.memory_space<vmem>>, vector<32x128xbf16>
    tpu.vector_store %arg16[%c0_2, %c384], %2 {strides = array<i32>} : memref<32x512xbf16, #tpu.memory_space<vmem>>, vector<32x128xbf16>,
    %c0_3 = arith.constant 0 : index
    %c0_4 = arith.constant 0 : index
    %c0_5 = arith.constant 0 : index
    %4 = vector.load %arg1[%c0_3, %c0_4, %c0_5] : memref<1x16x256xbf16, #tpu.memory_space<vmem>>, vector<1x16x256xbf16>
    %5 = vector.shape_cast %4 : vector<1x16x256xbf16> to vector<16x256xbf16>
    %c0_6 = arith.constant 0 : index
    %c0_7 = arith.constant 0 : index
    %6 = vector.load %arg3[%c0_6, %c0_7] : memref<32x144xbf16, #tpu.memory_space<vmem>>, vector<32x144xbf16>
    %c0_8 = arith.constant 0 : index
    %c0_9 = arith.constant 0 : index
    %7 = vector.load %arg5[%c0_8, %c0_9] : memref<32x1xf32, #tpu.memory_space<vmem>>, vector<32x1xf32>
    %c0_10 = arith.constant 0 : index
    %c128 = arith.constant 128 : index
    %8 = vector.load %arg16[%c0_10, %c128] : memref<32x512xbf16, #tpu.memory_space<vmem>>, vector<16x256xbf16>
    tpu.vector_store %arg16[%c0_10, %c128], %5 {strides = array<i32>} : memref<32x512xbf16, #tpu.memory_space<vmem>>, vector<16x256xbf16>,
    %c0_11 = arith.constant 0 : index
    %c111 = arith.constant 111 : index
    %9 = vector.load %arg16[%c0_11, %c111] : memref<32x512xbf16, #tpu.memory_space<vmem>>, vector<16x256xbf16>
    %c0_12 = arith.constant 0 : index
    %c0_13 = arith.constant 0 : index
    %10 = vector.load %arg12[%c0_12, %c0_13] : memref<9x256xbf16, #tpu.memory_space<vmem>>, vector<1x256xbf16>
    %11 = vector.broadcast %10 : vector<1x256xbf16> to vector<16x256xbf16>
    %12 = arith.mulf %9, %11 : vector<16x256xbf16>
    %c0_14 = arith.constant 0 : index
    %c0_15 = arith.constant 0 : index
    %13 = vector.load %arg17[%c0_14, %c0_15] : memref<288x256xbf16, #tpu.memory_space<vmem>>, vector<16x256xbf16>
    tpu.vector_store %arg17[%c0_14, %c0_15], %12 {strides = array<i32>} : memref<288x256xbf16, #tpu.memory_space<vmem>>, vector<16x256xbf16>,
    %c0_16 = arith.constant 0 : index
    %c112 = arith.constant 112 : index
    %14 = vector.load %arg16[%c0_16, %c112] : memref<32x512xbf16, #tpu.memory_space<vmem>>, vector<16x256xbf16>
    %c1 = arith.constant 1 : index
    %c0_17 = arith.constant 0 : index
    %15 = vector.load %arg12[%c1, %c0_17] : memref<9x256xbf16, #tpu.memory_space<vmem>>, vector<1x256xbf16>
    %16 = vector.broadcast %15 : vector<1x256xbf16> to vector<16x256xbf16>
    %17 = arith.mulf %14, %16 : vector<16x256xbf16>
    %c16 = arith.constant 16 : index
    %c0_18 = arith.constant 0 : index
    %18 = vector.load %arg17[%c16, %c0_18] : memref<288x256xbf16, #tpu.memory_space<vmem>>, vector<16x256xbf16>
    tpu.vector_store %arg17[%c16, %c0_18], %17 {strides = array<i32>} : memref<288x256xbf16, #tpu.memory_space<vmem>>, vector<16x256xbf16>,
    %c0_19 = arith.constant 0 : index
    %c113 = arith.constant 113 : index
    %19 = vector.load %arg16[%c0_19, %c113] : memref<32x512xbf16, #tpu.memory_space<vmem>>, vector<16x256xbf16>
    %c2 = arith.constant 2 : index
    %c0_20 = arith.constant 0 : index
    %20 = vector.load %arg12[%c2, %c0_20] : memref<9x256xbf16, #tpu.memory_space<vmem>>, vector<1x256xbf16>
    %21 = vector.broadcast %20 : vector<1x256xbf16> to vector<16x256xbf16>
    %22 = arith.mulf %19, %21 : vector<16x256xbf16>
    %c32 = arith.constant 32 : index
    %c0_21 = arith.constant 0 : index
    %23 = vector.load %arg17[%c32, %c0_21] : memref<288x256xbf16, #tpu.memory_space<vmem>>, vector<16x256xbf16>
    tpu.vector_store %arg17[%c32, %c0_21], %22 {strides = array<i32>} : memref<288x256xbf16, #tpu.memory_space<vmem>>, vector<16x256xbf16>,
    %c0_22 = arith.constant 0 : index
    %c127 = arith.constant 127 : index
    %24 = vector.load %arg16[%c0_22, %c127] : memref<32x512xbf16, #tpu.memory_space<vmem>>, vector<16x256xbf16>
    %c3 = arith.constant 3 : index
    %c0_23 = arith.constant 0 : index
    %25 = vector.load %arg12[%c3, %c0_23] : memref<9x256xbf16, #tpu.memory_space<vmem>>, vector<1x256xbf16>
    %26 = vector.broadcast %25 : vector<1x256xbf16> to vector<16x256xbf16>
    %27 = arith.mulf %24, %26 : vector<16x256xbf16>
    %c48 = arith.constant 48 : index
    %c0_24 = arith.constant 0 : index
    %28 = vector.load %arg17[%c48, %c0_24] : memref<288x256xbf16, #tpu.memory_space<vmem>>, vector<16x256xbf16>
    tpu.vector_store %arg17[%c48, %c0_24], %27 {strides = array<i32>} : memref<288x256xbf16, #tpu.memory_space<vmem>>, vector<16x256xbf16>,
    %c0_25 = arith.constant 0 : index
    %c128_26 = arith.constant 128 : index
    %29 = vector.load %arg16[%c0_25, %c128_26] : memref<32x512xbf16, #tpu.memory_space<vmem>>, vector<16x256xbf16>
    %c64 = arith.constant 64 : index
    %c0_27 = arith.constant 0 : index
    %30 = vector.load %arg17[%c64, %c0_27] : memref<288x256xbf16, #tpu.memory_space<vmem>>, vector<16x256xbf16>
    tpu.vector_store %arg17[%c64, %c0_27], %29 {strides = array<i32>} : memref<288x256xbf16, #tpu.memory_space<vmem>>, vector<16x256xbf16>,
    %c0_28 = arith.constant 0 : index
    %c129 = arith.constant 129 : index
    %31 = vector.load %arg16[%c0_28, %c129] : memref<32x512xbf16, #tpu.memory_space<vmem>>, vector<16x256xbf16>
    %c5 = arith.constant 5 : index
    %c0_29 = arith.constant 0 : index
    %32 = vector.load %arg12[%c5, %c0_29] : memref<9x256xbf16, #tpu.memory_space<vmem>>, vector<1x256xbf16>
    %33 = vector.broadcast %32 : vector<1x256xbf16> to vector<16x256xbf16>
    %34 = arith.mulf %31, %33 : vector<16x256xbf16>
    %c80 = arith.constant 80 : index
    %c0_30 = arith.constant 0 : index
    %35 = vector.load %arg17[%c80, %c0_30] : memref<288x256xbf16, #tpu.memory_space<vmem>>, vector<16x256xbf16>
    tpu.vector_store %arg17[%c80, %c0_30], %34 {strides = array<i32>} : memref<288x256xbf16, #tpu.memory_space<vmem>>, vector<16x256xbf16>,
    %c0_31 = arith.constant 0 : index
    %c143 = arith.constant 143 : index
    %36 = vector.load %arg16[%c0_31, %c143] : memref<32x512xbf16, #tpu.memory_space<vmem>>, vector<16x256xbf16>
    %c6 = arith.constant 6 : index
    %c0_32 = arith.constant 0 : index
    %37 = vector.load %arg12[%c6, %c0_32] : memref<9x256xbf16, #tpu.memory_space<vmem>>, vector<1x256xbf16>
    %38 = vector.broadcast %37 : vector<1x256xbf16> to vector<16x256xbf16>
    %39 = arith.mulf %36, %38 : vector<16x256xbf16>
    %c96 = arith.constant 96 : index
    %c0_33 = arith.constant 0 : index
    %40 = vector.load %arg17[%c96, %c0_33] : memref<288x256xbf16, #tpu.memory_space<vmem>>, vector<16x256xbf16>
    tpu.vector_store %arg17[%c96, %c0_33], %39 {strides = array<i32>} : memref<288x256xbf16, #tpu.memory_space<vmem>>, vector<16x256xbf16>,
    %c0_34 = arith.constant 0 : index
    %c144 = arith.constant 144 : index
    %41 = vector.load %arg16[%c0_34, %c144] : memref<32x512xbf16, #tpu.memory_space<vmem>>, vector<16x256xbf16>
    %c7 = arith.constant 7 : index
    %c0_35 = arith.constant 0 : index
    %42 = vector.load %arg12[%c7, %c0_35] : memref<9x256xbf16, #tpu.memory_space<vmem>>, vector<1x256xbf16>
    %43 = vector.broadcast %42 : vector<1x256xbf16> to vector<16x256xbf16>
    %44 = arith.mulf %41, %43 : vector<16x256xbf16>
    %c112_36 = arith.constant 112 : index
    %c0_37 = arith.constant 0 : index
    %45 = vector.load %arg17[%c112_36, %c0_37] : memref<288x256xbf16, #tpu.memory_space<vmem>>, vector<16x256xbf16>
    tpu.vector_store %arg17[%c112_36, %c0_37], %44 {strides = array<i32>} : memref<288x256xbf16, #tpu.memory_space<vmem>>, vector<16x256xbf16>,
    %c0_38 = arith.constant 0 : index
    %c145 = arith.constant 145 : index
    %46 = vector.load %arg16[%c0_38, %c145] : memref<32x512xbf16, #tpu.memory_space<vmem>>, vector<16x256xbf16>
    %c8 = arith.constant 8 : index
    %c0_39 = arith.constant 0 : index
    %47 = vector.load %arg12[%c8, %c0_39] : memref<9x256xbf16, #tpu.memory_space<vmem>>, vector<1x256xbf16>
    %48 = vector.broadcast %47 : vector<1x256xbf16> to vector<16x256xbf16>
    %49 = arith.mulf %46, %48 : vector<16x256xbf16>
    %c128_40 = arith.constant 128 : index
    %c0_41 = arith.constant 0 : index
    %50 = vector.load %arg17[%c128_40, %c0_41] : memref<288x256xbf16, #tpu.memory_space<vmem>>, vector<16x256xbf16>
    tpu.vector_store %arg17[%c128_40, %c0_41], %49 {strides = array<i32>} : memref<288x256xbf16, #tpu.memory_space<vmem>>, vector<16x256xbf16>,
    %c0_42 = arith.constant 0 : index
    %c0_43 = arith.constant 0 : index
    %51 = vector.load %arg17[%c0_42, %c0_43] : memref<288x256xbf16, #tpu.memory_space<vmem>>, vector<144x256xbf16>
    %cst_44 = arith.constant dense<0.000000e+00> : vector<32x256xf32>
    %52 = tpu.matmul %6, %51, %cst_44 {dimension_numbers = #tpu.dot_dimension_numbers<[1], [0], [0], [1], [0, 0, 1, 1], [], []>} : vector<32x144xbf16>, vector<144x256xbf16>, vector<32x256xf32> -> vector<32x256xf32>
    %53 = vector.broadcast %7 : vector<32x1xf32> to vector<32x256xf32>
    %54 = arith.addf %52, %53 : vector<32x256xf32>
    %cst_45 = arith.constant dense<0.000000e+00> : vector<32xf32>
    %55 = vector.multi_reduction <add>, %54, %cst_45 [1] : vector<32x256xf32> to vector<32xf32>
    %56 = vector.shape_cast %55 : vector<32xf32> to vector<32x1xf32>
    %c0_46 = arith.constant 0 : index
    %c0_47 = arith.constant 0 : index
    %57 = vector.load %arg18[%c0_46, %c0_47] : memref<32x2xf32, #tpu.memory_space<vmem>>, vector<32x1xf32>
    tpu.vector_store %arg18[%c0_46, %c0_47], %56 {strides = array<i32>} : memref<32x2xf32, #tpu.memory_space<vmem>>, vector<32x1xf32>,
    %58 = arith.mulf %54, %54 : vector<32x256xf32>
    %cst_48 = arith.constant dense<0.000000e+00> : vector<32xf32>
    %59 = vector.multi_reduction <add>, %58, %cst_48 [1] : vector<32x256xf32> to vector<32xf32>
    %60 = vector.shape_cast %59 : vector<32xf32> to vector<32x1xf32>
    %c0_49 = arith.constant 0 : index
    %c1_50 = arith.constant 1 : index
    %61 = vector.load %arg18[%c0_49, %c1_50] : memref<32x2xf32, #tpu.memory_space<vmem>>, vector<32x1xf32>
    tpu.vector_store %arg18[%c0_49, %c1_50], %60 {strides = array<i32>} : memref<32x2xf32, #tpu.memory_space<vmem>>, vector<32x1xf32>,
    %c0_51 = arith.constant 0 : index
    %c0_52 = arith.constant 0 : index
    %62 = vector.load %arg9[%c0_51, %c0_52] : memref<32x32xf32, #tpu.memory_space<vmem>>, vector<32x32xf32>
    %c0_53 = arith.constant 0 : index
    %c0_54 = arith.constant 0 : index
    %63 = vector.load %arg18[%c0_53, %c0_54] : memref<32x2xf32, #tpu.memory_space<vmem>>, vector<32x2xf32>
    %cst_55 = arith.constant dense<0.000000e+00> : vector<32x2xf32>
    %64 = tpu.matmul %62, %63, %cst_55 {dimension_numbers = #tpu.dot_dimension_numbers<[1], [0], [0], [1], [0, 0, 1, 1], [], []>} : vector<32x32xf32>, vector<32x2xf32>, vector<32x2xf32> -> vector<32x2xf32>
    %cst_56 = arith.constant 9.765625E-4 : f32
    %65 = vector.broadcast %cst_56 : f32 to vector<32x2xf32>
    %66 = arith.mulf %64, %65 : vector<32x2xf32>
    %67 = vector.extract_strided_slice %66 {offsets = [0, 0], sizes = [32, 1], strides = [1, 1]} : vector<32x2xf32> to vector<32x1xf32>
    %68 = vector.extract_strided_slice %66 {offsets = [0, 1], sizes = [32, 1], strides = [1, 1]} : vector<32x2xf32> to vector<32x1xf32>
    %69 = arith.mulf %67, %67 : vector<32x1xf32>
    %70 = arith.subf %68, %69 : vector<32x1xf32>
    %cst_57 = arith.constant 0.000000e+00 : f32
    %71 = vector.broadcast %cst_57 : f32 to vector<32x1xf32>
    %72 = arith.maximumf %70, %71 : vector<32x1xf32>
    %cst_58 = arith.constant 9.99999997E-7 : f32
    %73 = vector.broadcast %cst_58 : f32 to vector<32x1xf32>
    %74 = arith.addf %72, %73 : vector<32x1xf32>
    %75 = math.rsqrt %74 : vector<32x1xf32>
    %76 = vector.broadcast %67 : vector<32x1xf32> to vector<32x256xf32>
    %77 = arith.subf %54, %76 : vector<32x256xf32>
    %78 = vector.broadcast %75 : vector<32x1xf32> to vector<32x256xf32>
    %79 = arith.mulf %77, %78 : vector<32x256xf32>
    %c0_59 = arith.constant 0 : index
    %c0_60 = arith.constant 0 : index
    %80 = vector.load %arg7[%c0_59, %c0_60] : memref<32x5xf32, #tpu.memory_space<vmem>>, vector<32x1xf32>
    %81 = vector.broadcast %80 : vector<32x1xf32> to vector<32x256xf32>
    %82 = arith.mulf %79, %81 : vector<32x256xf32>
    %c0_61 = arith.constant 0 : index
    %c0_62 = arith.constant 0 : index
    %83 = vector.load %arg8[%c0_61, %c0_62] : memref<32x5xf32, #tpu.memory_space<vmem>>, vector<32x1xf32>
    %84 = vector.broadcast %83 : vector<32x1xf32> to vector<32x256xf32>
    %85 = arith.addf %82, %84 : vector<32x256xf32>
    %86 = arith.negf %85 : vector<32x256xf32>
    %87 = math.exp %86 : vector<32x256xf32>
    %cst_63 = arith.constant 1.000000e+00 : f32
    %88 = vector.broadcast %cst_63 : f32 to vector<32x256xf32>
    %89 = arith.addf %88, %87 : vector<32x256xf32>
    %90 = arith.divf %88, %89 : vector<32x256xf32>
    %91 = arith.mulf %85, %90 : vector<32x256xf32>
    %c0_64 = arith.constant 0 : index
    %c0_65 = arith.constant 0 : index
    %c0_66 = arith.constant 0 : index
    %92 = vector.load %arg4[%c0_64, %c0_65, %c0_66] : memref<5x32x288xbf16, #tpu.memory_space<vmem>>, vector<1x32x288xbf16>
    %93 = vector.shape_cast %92 : vector<1x32x288xbf16> to vector<32x288xbf16>
    %c0_67 = arith.constant 0 : index
    %c0_68 = arith.constant 0 : index
    %94 = vector.load %arg6[%c0_67, %c0_68] : memref<32x5xf32, #tpu.memory_space<vmem>>, vector<32x1xf32>
    %95 = arith.truncf %91 : vector<32x256xf32> to vector<32x256xbf16>
    %c0_69 = arith.constant 0 : index
    %c128_70 = arith.constant 128 : index
    %96 = vector.load %arg16[%c0_69, %c128_70] : memref<32x512xbf16, #tpu.memory_space<vmem>>, vector<32x256xbf16>
    tpu.vector_store %arg16[%c0_69, %c128_70], %95 {strides = array<i32>} : memref<32x512xbf16, #tpu.memory_space<vmem>>, vector<32x256xbf16>,
    %c0_71 = arith.constant 0 : index
    %c111_72 = arith.constant 111 : index
    %97 = vector.load %arg16[%c0_71, %c111_72] : memref<32x512xbf16, #tpu.memory_space<vmem>>, vector<32x256xbf16>
    %c0_73 = arith.constant 0 : index
    %c0_74 = arith.constant 0 : index
    %98 = vector.load %arg12[%c0_73, %c0_74] : memref<9x256xbf16, #tpu.memory_space<vmem>>, vector<1x256xbf16>
    %99 = vector.broadcast %98 : vector<1x256xbf16> to vector<32x256xbf16>
    %100 = arith.mulf %97, %99 : vector<32x256xbf16>
    %c0_75 = arith.constant 0 : index
    %c0_76 = arith.constant 0 : index
    %101 = vector.load %arg17[%c0_75, %c0_76] : memref<288x256xbf16, #tpu.memory_space<vmem>>, vector<32x256xbf16>
    tpu.vector_store %arg17[%c0_75, %c0_76], %100 {strides = array<i32>} : memref<288x256xbf16, #tpu.memory_space<vmem>>, vector<32x256xbf16>,
    %c0_77 = arith.constant 0 : index
    %c112_78 = arith.constant 112 : index
    %102 = vector.load %arg16[%c0_77, %c112_78] : memref<32x512xbf16, #tpu.memory_space<vmem>>, vector<32x256xbf16>
    %c1_79 = arith.constant 1 : index
    %c0_80 = arith.constant 0 : index
    %103 = vector.load %arg12[%c1_79, %c0_80] : memref<9x256xbf16, #tpu.memory_space<vmem>>, vector<1x256xbf16>
    %104 = vector.broadcast %103 : vector<1x256xbf16> to vector<32x256xbf16>
    %105 = arith.mulf %102, %104 : vector<32x256xbf16>
    %c32_81 = arith.constant 32 : index
    %c0_82 = arith.constant 0 : index
    %106 = vector.load %arg17[%c32_81, %c0_82] : memref<288x256xbf16, #tpu.memory_space<vmem>>, vector<32x256xbf16>
    tpu.vector_store %arg17[%c32_81, %c0_82], %105 {strides = array<i32>} : memref<288x256xbf16, #tpu.memory_space<vmem>>, vector<32x256xbf16>,
    %c0_83 = arith.constant 0 : index
    %c113_84 = arith.constant 113 : index
    %107 = vector.load %arg16[%c0_83, %c113_84] : memref<32x512xbf16, #tpu.memory_space<vmem>>, vector<32x256xbf16>
    %c2_85 = arith.constant 2 : index
    %c0_86 = arith.constant 0 : index
    %108 = vector.load %arg12[%c2_85, %c0_86] : memref<9x256xbf16, #tpu.memory_space<vmem>>, vector<1x256xbf16>
    %109 = vector.broadcast %108 : vector<1x256xbf16> to vector<32x256xbf16>
    %110 = arith.mulf %107, %109 : vector<32x256xbf16>
    %c64_87 = arith.constant 64 : index
    %c0_88 = arith.constant 0 : index
    %111 = vector.load %arg17[%c64_87, %c0_88] : memref<288x256xbf16, #tpu.memory_space<vmem>>, vector<32x256xbf16>
    tpu.vector_store %arg17[%c64_87, %c0_88], %110 {strides = array<i32>} : memref<288x256xbf16, #tpu.memory_space<vmem>>, vector<32x256xbf16>,
    %c0_89 = arith.constant 0 : index
    %c127_90 = arith.constant 127 : index
    %112 = vector.load %arg16[%c0_89, %c127_90] : memref<32x512xbf16, #tpu.memory_space<vmem>>, vector<32x256xbf16>
    %c3_91 = arith.constant 3 : index
    %c0_92 = arith.constant 0 : index
    %113 = vector.load %arg12[%c3_91, %c0_92] : memref<9x256xbf16, #tpu.memory_space<vmem>>, vector<1x256xbf16>
    %114 = vector.broadcast %113 : vector<1x256xbf16> to vector<32x256xbf16>
    %115 = arith.mulf %112, %114 : vector<32x256xbf16>
    %c96_93 = arith.constant 96 : index
    %c0_94 = arith.constant 0 : index
    %116 = vector.load %arg17[%c96_93, %c0_94] : memref<288x256xbf16, #tpu.memory_space<vmem>>, vector<32x256xbf16>
    tpu.vector_store %arg17[%c96_93, %c0_94], %115 {strides = array<i32>} : memref<288x256xbf16, #tpu.memory_space<vmem>>, vector<32x256xbf16>,
    %c0_95 = arith.constant 0 : index
    %c128_96 = arith.constant 128 : index
    %117 = vector.load %arg16[%c0_95, %c128_96] : memref<32x512xbf16, #tpu.memory_space<vmem>>, vector<32x256xbf16>
    %c128_97 = arith.constant 128 : index
    %c0_98 = arith.constant 0 : index
    %118 = vector.load %arg17[%c128_97, %c0_98] : memref<288x256xbf16, #tpu.memory_space<vmem>>, vector<32x256xbf16>
    tpu.vector_store %arg17[%c128_97, %c0_98], %117 {strides = array<i32>} : memref<288x256xbf16, #tpu.memory_space<vmem>>, vector<32x256xbf16>,
    %c0_99 = arith.constant 0 : index
    %c129_100 = arith.constant 129 : index
    %119 = vector.load %arg16[%c0_99, %c129_100] : memref<32x512xbf16, #tpu.memory_space<vmem>>, vector<32x256xbf16>
    %c5_101 = arith.constant 5 : index
    %c0_102 = arith.constant 0 : index
    %120 = vector.load %arg12[%c5_101, %c0_102] : memref<9x256xbf16, #tpu.memory_space<vmem>>, vector<1x256xbf16>
    %121 = vector.broadcast %120 : vector<1x256xbf16> to vector<32x256xbf16>
    %122 = arith.mulf %119, %121 : vector<32x256xbf16>
    %c160 = arith.constant 160 : index
    %c0_103 = arith.constant 0 : index
    %123 = vector.load %arg17[%c160, %c0_103] : memref<288x256xbf16, #tpu.memory_space<vmem>>, vector<32x256xbf16>
    tpu.vector_store %arg17[%c160, %c0_103], %122 {strides = array<i32>} : memref<288x256xbf16, #tpu.memory_space<vmem>>, vector<32x256xbf16>,
    %c0_104 = arith.constant 0 : index
    %c143_105 = arith.constant 143 : index
    %124 = vector.load %arg16[%c0_104, %c143_105] : memref<32x512xbf16, #tpu.memory_space<vmem>>, vector<32x256xbf16>
    %c6_106 = arith.constant 6 : index
    %c0_107 = arith.constant 0 : index
    %125 = vector.load %arg12[%c6_106, %c0_107] : memref<9x256xbf16, #tpu.memory_space<vmem>>, vector<1x256xbf16>
    %126 = vector.broadcast %125 : vector<1x256xbf16> to vector<32x256xbf16>
    %127 = arith.mulf %124, %126 : vector<32x256xbf16>
    %c192 = arith.constant 192 : index
    %c0_108 = arith.constant 0 : index
    %128 = vector.load %arg17[%c192, %c0_108] : memref<288x256xbf16, #tpu.memory_space<vmem>>, vector<32x256xbf16>
    tpu.vector_store %arg17[%c192, %c0_108], %127 {strides = array<i32>} : memref<288x256xbf16, #tpu.memory_space<vmem>>, vector<32x256xbf16>,
    %c0_109 = arith.constant 0 : index
    %c144_110 = arith.constant 144 : index
    %129 = vector.load %arg16[%c0_109, %c144_110] : memref<32x512xbf16, #tpu.memory_space<vmem>>, vector<32x256xbf16>
    %c7_111 = arith.constant 7 : index
    %c0_112 = arith.constant 0 : index
    %130 = vector.load %arg12[%c7_111, %c0_112] : memref<9x256xbf16, #tpu.memory_space<vmem>>, vector<1x256xbf16>
    %131 = vector.broadcast %130 : vector<1x256xbf16> to vector<32x256xbf16>
    %132 = arith.mulf %129, %131 : vector<32x256xbf16>
    %c224 = arith.constant 224 : index
    %c0_113 = arith.constant 0 : index
    %133 = vector.load %arg17[%c224, %c0_113] : memref<288x256xbf16, #tpu.memory_space<vmem>>, vector<32x256xbf16>
    tpu.vector_store %arg17[%c224, %c0_113], %132 {strides = array<i32>} : memref<288x256xbf16, #tpu.memory_space<vmem>>, vector<32x256xbf16>,
    %c0_114 = arith.constant 0 : index
    %c145_115 = arith.constant 145 : index
    %134 = vector.load %arg16[%c0_114, %c145_115] : memref<32x512xbf16, #tpu.memory_space<vmem>>, vector<32x256xbf16>
    %c8_116 = arith.constant 8 : index
    %c0_117 = arith.constant 0 : index
    %135 = vector.load %arg12[%c8_116, %c0_117] : memref<9x256xbf16, #tpu.memory_space<vmem>>, vector<1x256xbf16>
    %136 = vector.broadcast %135 : vector<1x256xbf16> to vector<32x256xbf16>
    %137 = arith.mulf %134, %136 : vector<32x256xbf16>
    %c256 = arith.constant 256 : index
    %c0_118 = arith.constant 0 : index
    %138 = vector.load %arg17[%c256, %c0_118] : memref<288x256xbf16, #tpu.memory_space<vmem>>, vector<32x256xbf16>
    tpu.vector_store %arg17[%c256, %c0_118], %137 {strides = array<i32>} : memref<288x256xbf16, #tpu.memory_space<vmem>>, vector<32x256xbf16>,
    %c0_119 = arith.constant 0 : index
    %c0_120 = arith.constant 0 : index
    %139 = vector.load %arg17[%c0_119, %c0_120] : memref<288x256xbf16, #tpu.memory_space<vmem>>, vector<288x256xbf16>
    %cst_121 = arith.constant dense<0.000000e+00> : vector<32x256xf32>
    %140 = tpu.matmul %93, %139, %cst_121 {dimension_numbers = #tpu.dot_dimension_numbers<[1], [0], [0], [1], [0, 0, 1, 1], [], []>} : vector<32x288xbf16>, vector<288x256xbf16>, vector<32x256xf32> -> vector<32x256xf32>
    %141 = vector.broadcast %94 : vector<32x1xf32> to vector<32x256xf32>
    %142 = arith.addf %140, %141 : vector<32x256xf32>
    %cst_122 = arith.constant dense<0.000000e+00> : vector<32xf32>
    %143 = vector.multi_reduction <add>, %142, %cst_122 [1] : vector<32x256xf32> to vector<32xf32>
    %144 = vector.shape_cast %143 : vector<32xf32> to vector<32x1xf32>
    %c0_123 = arith.constant 0 : index
    %c0_124 = arith.constant 0 : index
    %145 = vector.load %arg18[%c0_123, %c0_124] : memref<32x2xf32, #tpu.memory_space<vmem>>, vector<32x1xf32>
    tpu.vector_store %arg18[%c0_123, %c0_124], %144 {strides = array<i32>} : memref<32x2xf32, #tpu.memory_space<vmem>>, vector<32x1xf32>,
    %146 = arith.mulf %142, %142 : vector<32x256xf32>
    %cst_125 = arith.constant dense<0.000000e+00> : vector<32xf32>
    %147 = vector.multi_reduction <add>, %146, %cst_125 [1] : vector<32x256xf32> to vector<32xf32>
    %148 = vector.shape_cast %147 : vector<32xf32> to vector<32x1xf32>
    %c0_126 = arith.constant 0 : index
    %c1_127 = arith.constant 1 : index
    %149 = vector.load %arg18[%c0_126, %c1_127] : memref<32x2xf32, #tpu.memory_space<vmem>>, vector<32x1xf32>
    tpu.vector_store %arg18[%c0_126, %c1_127], %148 {strides = array<i32>} : memref<32x2xf32, #tpu.memory_space<vmem>>, vector<32x1xf32>,
    %c0_128 = arith.constant 0 : index
    %c0_129 = arith.constant 0 : index
    %150 = vector.load %arg9[%c0_128, %c0_129] : memref<32x32xf32, #tpu.memory_space<vmem>>, vector<32x32xf32>
    %c0_130 = arith.constant 0 : index
    %c0_131 = arith.constant 0 : index
    %151 = vector.load %arg18[%c0_130, %c0_131] : memref<32x2xf32, #tpu.memory_space<vmem>>, vector<32x2xf32>
    %cst_132 = arith.constant dense<0.000000e+00> : vector<32x2xf32>
    %152 = tpu.matmul %150, %151, %cst_132 {dimension_numbers = #tpu.dot_dimension_numbers<[1], [0], [0], [1], [0, 0, 1, 1], [], []>} : vector<32x32xf32>, vector<32x2xf32>, vector<32x2xf32> -> vector<32x2xf32>
    %cst_133 = arith.constant 9.765625E-4 : f32
    %153 = vector.broadcast %cst_133 : f32 to vector<32x2xf32>
    %154 = arith.mulf %152, %153 : vector<32x2xf32>
    %155 = vector.extract_strided_slice %154 {offsets = [0, 0], sizes = [32, 1], strides = [1, 1]} : vector<32x2xf32> to vector<32x1xf32>
    %156 = vector.extract_strided_slice %154 {offsets = [0, 1], sizes = [32, 1], strides = [1, 1]} : vector<32x2xf32> to vector<32x1xf32>
    %157 = arith.mulf %155, %155 : vector<32x1xf32>
    %158 = arith.subf %156, %157 : vector<32x1xf32>
    %cst_134 = arith.constant 0.000000e+00 : f32
    %159 = vector.broadcast %cst_134 : f32 to vector<32x1xf32>
    %160 = arith.maximumf %158, %159 : vector<32x1xf32>
    %cst_135 = arith.constant 9.99999997E-7 : f32
    %161 = vector.broadcast %cst_135 : f32 to vector<32x1xf32>
    %162 = arith.addf %160, %161 : vector<32x1xf32>
    %163 = math.rsqrt %162 : vector<32x1xf32>
    %164 = vector.broadcast %155 : vector<32x1xf32> to vector<32x256xf32>
    %165 = arith.subf %142, %164 : vector<32x256xf32>
    %166 = vector.broadcast %163 : vector<32x1xf32> to vector<32x256xf32>
    %167 = arith.mulf %165, %166 : vector<32x256xf32>
    %c0_136 = arith.constant 0 : index
    %c1_137 = arith.constant 1 : index
    %168 = vector.load %arg7[%c0_136, %c1_137] : memref<32x5xf32, #tpu.memory_space<vmem>>, vector<32x1xf32>
    %169 = vector.broadcast %168 : vector<32x1xf32> to vector<32x256xf32>
    %170 = arith.mulf %167, %169 : vector<32x256xf32>
    %c0_138 = arith.constant 0 : index
    %c1_139 = arith.constant 1 : index
    %171 = vector.load %arg8[%c0_138, %c1_139] : memref<32x5xf32, #tpu.memory_space<vmem>>, vector<32x1xf32>
    %172 = vector.broadcast %171 : vector<32x1xf32> to vector<32x256xf32>
    %173 = arith.addf %170, %172 : vector<32x256xf32>
    %174 = arith.negf %173 : vector<32x256xf32>
    %175 = math.exp %174 : vector<32x256xf32>
    %cst_140 = arith.constant 1.000000e+00 : f32
    %176 = vector.broadcast %cst_140 : f32 to vector<32x256xf32>
    %177 = arith.addf %176, %175 : vector<32x256xf32>
    %178 = arith.divf %176, %177 : vector<32x256xf32>
    %179 = arith.mulf %173, %178 : vector<32x256xf32>
    %c1_141 = arith.constant 1 : index
    %c0_142 = arith.constant 0 : index
    %c0_143 = arith.constant 0 : index
    %180 = vector.load %arg4[%c1_141, %c0_142, %c0_143] : memref<5x32x288xbf16, #tpu.memory_space<vmem>>, vector<1x32x288xbf16>
    %181 = vector.shape_cast %180 : vector<1x32x288xbf16> to vector<32x288xbf16>
    %c0_144 = arith.constant 0 : index
    %c1_145 = arith.constant 1 : index
    %182 = vector.load %arg6[%c0_144, %c1_145] : memref<32x5xf32, #tpu.memory_space<vmem>>, vector<32x1xf32>
    %183 = arith.truncf %179 : vector<32x256xf32> to vector<32x256xbf16>
    %c0_146 = arith.constant 0 : index
    %c128_147 = arith.constant 128 : index
    %184 = vector.load %arg16[%c0_146, %c128_147] : memref<32x512xbf16, #tpu.memory_space<vmem>>, vector<32x256xbf16>
    tpu.vector_store %arg16[%c0_146, %c128_147], %183 {strides = array<i32>} : memref<32x512xbf16, #tpu.memory_space<vmem>>, vector<32x256xbf16>,
    %c0_148 = arith.constant 0 : index
    %c111_149 = arith.constant 111 : index
    %185 = vector.load %arg16[%c0_148, %c111_149] : memref<32x512xbf16, #tpu.memory_space<vmem>>, vector<32x256xbf16>
    %c0_150 = arith.constant 0 : index
    %c0_151 = arith.constant 0 : index
    %186 = vector.load %arg12[%c0_150, %c0_151] : memref<9x256xbf16, #tpu.memory_space<vmem>>, vector<1x256xbf16>
    %187 = vector.broadcast %186 : vector<1x256xbf16> to vector<32x256xbf16>
    %188 = arith.mulf %185, %187 : vector<32x256xbf16>
    %c0_152 = arith.constant 0 : index
    %c0_153 = arith.constant 0 : index
    %189 = vector.load %arg17[%c0_152, %c0_153] : memref<288x256xbf16, #tpu.memory_space<vmem>>, vector<32x256xbf16>
    tpu.vector_store %arg17[%c0_152, %c0_153], %188 {strides = array<i32>} : memref<288x256xbf16, #tpu.memory_space<vmem>>, vector<32x256xbf16>,
    %c0_154 = arith.constant 0 : index
    %c112_155 = arith.constant 112 : index
    %190 = vector.load %arg16[%c0_154, %c112_155] : memref<32x512xbf16, #tpu.memory_space<vmem>>, vector<32x256xbf16>
    %c1_156 = arith.constant 1 : index
    %c0_157 = arith.constant 0 : index
    %191 = vector.load %arg12[%c1_156, %c0_157] : memref<9x256xbf16, #tpu.memory_space<vmem>>, vector<1x256xbf16>
    %192 = vector.broadcast %191 : vector<1x256xbf16> to vector<32x256xbf16>
    %193 = arith.mulf %190, %192 : vector<32x256xbf16>
    %c32_158 = arith.constant 32 : index
    %c0_159 = arith.constant 0 : index
    %194 = vector.load %arg17[%c32_158, %c0_159] : memref<288x256xbf16, #tpu.memory_space<vmem>>, vector<32x256xbf16>
    tpu.vector_store %arg17[%c32_158, %c0_159], %193 {strides = array<i32>} : memref<288x256xbf16, #tpu.memory_space<vmem>>, vector<32x256xbf16>,
    %c0_160 = arith.constant 0 : index
    %c113_161 = arith.constant 113 : index
    %195 = vector.load %arg16[%c0_160, %c113_161] : memref<32x512xbf16, #tpu.memory_space<vmem>>, vector<32x256xbf16>
    %c2_162 = arith.constant 2 : index
    %c0_163 = arith.constant 0 : index
    %196 = vector.load %arg12[%c2_162, %c0_163] : memref<9x256xbf16, #tpu.memory_space<vmem>>, vector<1x256xbf16>
    %197 = vector.broadcast %196 : vector<1x256xbf16> to vector<32x256xbf16>
    %198 = arith.mulf %195, %197 : vector<32x256xbf16>
    %c64_164 = arith.constant 64 : index
    %c0_165 = arith.constant 0 : index
    %199 = vector.load %arg17[%c64_164, %c0_165] : memref<288x256xbf16, #tpu.memory_space<vmem>>, vector<32x256xbf16>
    tpu.vector_store %arg17[%c64_164, %c0_165], %198 {strides = array<i32>} : memref<288x256xbf16, #tpu.memory_space<vmem>>, vector<32x256xbf16>,
    %c0_166 = arith.constant 0 : index
    %c127_167 = arith.constant 127 : index
    %200 = vector.load %arg16[%c0_166, %c127_167] : memref<32x512xbf16, #tpu.memory_space<vmem>>, vector<32x256xbf16>
    %c3_168 = arith.constant 3 : index
    %c0_169 = arith.constant 0 : index
    %201 = vector.load %arg12[%c3_168, %c0_169] : memref<9x256xbf16, #tpu.memory_space<vmem>>, vector<1x256xbf16>
    %202 = vector.broadcast %201 : vector<1x256xbf16> to vector<32x256xbf16>
    %203 = arith.mulf %200, %202 : vector<32x256xbf16>
    %c96_170 = arith.constant 96 : index
    %c0_171 = arith.constant 0 : index
    %204 = vector.load %arg17[%c96_170, %c0_171] : memref<288x256xbf16, #tpu.memory_space<vmem>>, vector<32x256xbf16>
    tpu.vector_store %arg17[%c96_170, %c0_171], %203 {strides = array<i32>} : memref<288x256xbf16, #tpu.memory_space<vmem>>, vector<32x256xbf16>,
    %c0_172 = arith.constant 0 : index
    %c128_173 = arith.constant 128 : index
    %205 = vector.load %arg16[%c0_172, %c128_173] : memref<32x512xbf16, #tpu.memory_space<vmem>>, vector<32x256xbf16>
    %c128_174 = arith.constant 128 : index
    %c0_175 = arith.constant 0 : index
    %206 = vector.load %arg17[%c128_174, %c0_175] : memref<288x256xbf16, #tpu.memory_space<vmem>>, vector<32x256xbf16>
    tpu.vector_store %arg17[%c128_174, %c0_175], %205 {strides = array<i32>} : memref<288x256xbf16, #tpu.memory_space<vmem>>, vector<32x256xbf16>,
    %c0_176 = arith.constant 0 : index
    %c129_177 = arith.constant 129 : index
    %207 = vector.load %arg16[%c0_176, %c129_177] : memref<32x512xbf16, #tpu.memory_space<vmem>>, vector<32x256xbf16>
    %c5_178 = arith.constant 5 : index
    %c0_179 = arith.constant 0 : index
    %208 = vector.load %arg12[%c5_178, %c0_179] : memref<9x256xbf16, #tpu.memory_space<vmem>>, vector<1x256xbf16>
    %209 = vector.broadcast %208 : vector<1x256xbf16> to vector<32x256xbf16>
    %210 = arith.mulf %207, %209 : vector<32x256xbf16>
    %c160_180 = arith.constant 160 : index
    %c0_181 = arith.constant 0 : index
    %211 = vector.load %arg17[%c160_180, %c0_181] : memref<288x256xbf16, #tpu.memory_space<vmem>>, vector<32x256xbf16>
    tpu.vector_store %arg17[%c160_180, %c0_181], %210 {strides = array<i32>} : memref<288x256xbf16, #tpu.memory_space<vmem>>, vector<32x256xbf16>,
    %c0_182 = arith.constant 0 : index
    %c143_183 = arith.constant 143 : index
    %212 = vector.load %arg16[%c0_182, %c143_183] : memref<32x512xbf16, #tpu.memory_space<vmem>>, vector<32x256xbf16>
    %c6_184 = arith.constant 6 : index
    %c0_185 = arith.constant 0 : index
    %213 = vector.load %arg12[%c6_184, %c0_185] : memref<9x256xbf16, #tpu.memory_space<vmem>>, vector<1x256xbf16>
    %214 = vector.broadcast %213 : vector<1x256xbf16> to vector<32x256xbf16>
    %215 = arith.mulf %212, %214 : vector<32x256xbf16>
    %c192_186 = arith.constant 192 : index
    %c0_187 = arith.constant 0 : index
    %216 = vector.load %arg17[%c192_186, %c0_187] : memref<288x256xbf16, #tpu.memory_space<vmem>>, vector<32x256xbf16>
    tpu.vector_store %arg17[%c192_186, %c0_187], %215 {strides = array<i32>} : memref<288x256xbf16, #tpu.memory_space<vmem>>, vector<32x256xbf16>,
    %c0_188 = arith.constant 0 : index
    %c144_189 = arith.constant 144 : index
    %217 = vector.load %arg16[%c0_188, %c144_189] : memref<32x512xbf16, #tpu.memory_space<vmem>>, vector<32x256xbf16>
    %c7_190 = arith.constant 7 : index
    %c0_191 = arith.constant 0 : index
    %218 = vector.load %arg12[%c7_190, %c0_191] : memref<9x256xbf16, #tpu.memory_space<vmem>>, vector<1x256xbf16>
    %219 = vector.broadcast %218 : vector<1x256xbf16> to vector<32x256xbf16>
    %220 = arith.mulf %217, %219 : vector<32x256xbf16>
    %c224_192 = arith.constant 224 : index
    %c0_193 = arith.constant 0 : index
    %221 = vector.load %arg17[%c224_192, %c0_193] : memref<288x256xbf16, #tpu.memory_space<vmem>>, vector<32x256xbf16>
    tpu.vector_store %arg17[%c224_192, %c0_193], %220 {strides = array<i32>} : memref<288x256xbf16, #tpu.memory_space<vmem>>, vector<32x256xbf16>,
    %c0_194 = arith.constant 0 : index
    %c145_195 = arith.constant 145 : index
    %222 = vector.load %arg16[%c0_194, %c145_195] : memref<32x512xbf16, #tpu.memory_space<vmem>>, vector<32x256xbf16>
    %c8_196 = arith.constant 8 : index
    %c0_197 = arith.constant 0 : index
    %223 = vector.load %arg12[%c8_196, %c0_197] : memref<9x256xbf16, #tpu.memory_space<vmem>>, vector<1x256xbf16>
    %224 = vector.broadcast %223 : vector<1x256xbf16> to vector<32x256xbf16>
    %225 = arith.mulf %222, %224 : vector<32x256xbf16>
    %c256_198 = arith.constant 256 : index
    %c0_199 = arith.constant 0 : index
    %226 = vector.load %arg17[%c256_198, %c0_199] : memref<288x256xbf16, #tpu.memory_space<vmem>>, vector<32x256xbf16>
    tpu.vector_store %arg17[%c256_198, %c0_199], %225 {strides = array<i32>} : memref<288x256xbf16, #tpu.memory_space<vmem>>, vector<32x256xbf16>,
    %c0_200 = arith.constant 0 : index
    %c0_201 = arith.constant 0 : index
    %227 = vector.load %arg17[%c0_200, %c0_201] : memref<288x256xbf16, #tpu.memory_space<vmem>>, vector<288x256xbf16>
    %cst_202 = arith.constant dense<0.000000e+00> : vector<32x256xf32>
    %228 = tpu.matmul %181, %227, %cst_202 {dimension_numbers = #tpu.dot_dimension_numbers<[1], [0], [0], [1], [0, 0, 1, 1], [], []>} : vector<32x288xbf16>, vector<288x256xbf16>, vector<32x256xf32> -> vector<32x256xf32>
    %229 = vector.broadcast %182 : vector<32x1xf32> to vector<32x256xf32>
    %230 = arith.addf %228, %229 : vector<32x256xf32>
    %231 = arith.addf %54, %230 : vector<32x256xf32>
    %c2_203 = arith.constant 2 : index
    %c0_204 = arith.constant 0 : index
    %c0_205 = arith.constant 0 : index
    %232 = vector.load %arg4[%c2_203, %c0_204, %c0_205] : memref<5x32x288xbf16, #tpu.memory_space<vmem>>, vector<1x32x288xbf16>
    %233 = vector.shape_cast %232 : vector<1x32x288xbf16> to vector<32x288xbf16>
    %c0_206 = arith.constant 0 : index
    %c2_207 = arith.constant 2 : index
    %234 = vector.load %arg6[%c0_206, %c2_207] : memref<32x5xf32, #tpu.memory_space<vmem>>, vector<32x1xf32>
    %235 = arith.truncf %231 : vector<32x256xf32> to vector<32x256xbf16>
    %c0_208 = arith.constant 0 : index
    %c128_209 = arith.constant 128 : index
    %236 = vector.load %arg16[%c0_208, %c128_209] : memref<32x512xbf16, #tpu.memory_space<vmem>>, vector<32x256xbf16>
    tpu.vector_store %arg16[%c0_208, %c128_209], %235 {strides = array<i32>} : memref<32x512xbf16, #tpu.memory_space<vmem>>, vector<32x256xbf16>,
    %c0_210 = arith.constant 0 : index
    %c111_211 = arith.constant 111 : index
    %237 = vector.load %arg16[%c0_210, %c111_211] : memref<32x512xbf16, #tpu.memory_space<vmem>>, vector<32x256xbf16>
    %c0_212 = arith.constant 0 : index
    %c0_213 = arith.constant 0 : index
    %238 = vector.load %arg12[%c0_212, %c0_213] : memref<9x256xbf16, #tpu.memory_space<vmem>>, vector<1x256xbf16>
    %239 = vector.broadcast %238 : vector<1x256xbf16> to vector<32x256xbf16>
    %240 = arith.mulf %237, %239 : vector<32x256xbf16>
    %c0_214 = arith.constant 0 : index
    %c0_215 = arith.constant 0 : index
    %241 = vector.load %arg17[%c0_214, %c0_215] : memref<288x256xbf16, #tpu.memory_space<vmem>>, vector<32x256xbf16>
    tpu.vector_store %arg17[%c0_214, %c0_215], %240 {strides = array<i32>} : memref<288x256xbf16, #tpu.memory_space<vmem>>, vector<32x256xbf16>,
    %c0_216 = arith.constant 0 : index
    %c112_217 = arith.constant 112 : index
    %242 = vector.load %arg16[%c0_216, %c112_217] : memref<32x512xbf16, #tpu.memory_space<vmem>>, vector<32x256xbf16>
    %c1_218 = arith.constant 1 : index
    %c0_219 = arith.constant 0 : index
    %243 = vector.load %arg12[%c1_218, %c0_219] : memref<9x256xbf16, #tpu.memory_space<vmem>>, vector<1x256xbf16>
    %244 = vector.broadcast %243 : vector<1x256xbf16> to vector<32x256xbf16>
    %245 = arith.mulf %242, %244 : vector<32x256xbf16>
    %c32_220 = arith.constant 32 : index
    %c0_221 = arith.constant 0 : index
    %246 = vector.load %arg17[%c32_220, %c0_221] : memref<288x256xbf16, #tpu.memory_space<vmem>>, vector<32x256xbf16>
    tpu.vector_store %arg17[%c32_220, %c0_221], %245 {strides = array<i32>} : memref<288x256xbf16, #tpu.memory_space<vmem>>, vector<32x256xbf16>,
    %c0_222 = arith.constant 0 : index
    %c113_223 = arith.constant 113 : index
    %247 = vector.load %arg16[%c0_222, %c113_223] : memref<32x512xbf16, #tpu.memory_space<vmem>>, vector<32x256xbf16>
    %c2_224 = arith.constant 2 : index
    %c0_225 = arith.constant 0 : index
    %248 = vector.load %arg12[%c2_224, %c0_225] : memref<9x256xbf16, #tpu.memory_space<vmem>>, vector<1x256xbf16>
    %249 = vector.broadcast %248 : vector<1x256xbf16> to vector<32x256xbf16>
    %250 = arith.mulf %247, %249 : vector<32x256xbf16>
    %c64_226 = arith.constant 64 : index
    %c0_227 = arith.constant 0 : index
    %251 = vector.load %arg17[%c64_226, %c0_227] : memref<288x256xbf16, #tpu.memory_space<vmem>>, vector<32x256xbf16>
    tpu.vector_store %arg17[%c64_226, %c0_227], %250 {strides = array<i32>} : memref<288x256xbf16, #tpu.memory_space<vmem>>, vector<32x256xbf16>,
    %c0_228 = arith.constant 0 : index
    %c127_229 = arith.constant 127 : index
    %252 = vector.load %arg16[%c0_228, %c127_229] : memref<32x512xbf16, #tpu.memory_space<vmem>>, vector<32x256xbf16>
    %c3_230 = arith.constant 3 : index
    %c0_231 = arith.constant 0 : index
    %253 = vector.load %arg12[%c3_230, %c0_231] : memref<9x256xbf16, #tpu.memory_space<vmem>>, vector<1x256xbf16>
    %254 = vector.broadcast %253 : vector<1x256xbf16> to vector<32x256xbf16>
    %255 = arith.mulf %252, %254 : vector<32x256xbf16>
    %c96_232 = arith.constant 96 : index
    %c0_233 = arith.constant 0 : index
    %256 = vector.load %arg17[%c96_232, %c0_233] : memref<288x256xbf16, #tpu.memory_space<vmem>>, vector<32x256xbf16>
    tpu.vector_store %arg17[%c96_232, %c0_233], %255 {strides = array<i32>} : memref<288x256xbf16, #tpu.memory_space<vmem>>, vector<32x256xbf16>,
    %c0_234 = arith.constant 0 : index
    %c128_235 = arith.constant 128 : index
    %257 = vector.load %arg16[%c0_234, %c128_235] : memref<32x512xbf16, #tpu.memory_space<vmem>>, vector<32x256xbf16>
    %c128_236 = arith.constant 128 : index
    %c0_237 = arith.constant 0 : index
    %258 = vector.load %arg17[%c128_236, %c0_237] : memref<288x256xbf16, #tpu.memory_space<vmem>>, vector<32x256xbf16>
    tpu.vector_store %arg17[%c128_236, %c0_237], %257 {strides = array<i32>} : memref<288x256xbf16, #tpu.memory_space<vmem>>, vector<32x256xbf16>,
    %c0_238 = arith.constant 0 : index
    %c129_239 = arith.constant 129 : index
    %259 = vector.load %arg16[%c0_238, %c129_239] : memref<32x512xbf16, #tpu.memory_space<vmem>>, vector<32x256xbf16>
    %c5_240 = arith.constant 5 : index
    %c0_241 = arith.constant 0 : index
    %260 = vector.load %arg12[%c5_240, %c0_241] : memref<9x256xbf16, #tpu.memory_space<vmem>>, vector<1x256xbf16>
    %261 = vector.broadcast %260 : vector<1x256xbf16> to vector<32x256xbf16>
    %262 = arith.mulf %259, %261 : vector<32x256xbf16>
    %c160_242 = arith.constant 160 : index
    %c0_243 = arith.constant 0 : index
    %263 = vector.load %arg17[%c160_242, %c0_243] : memref<288x256xbf16, #tpu.memory_space<vmem>>, vector<32x256xbf16>
    tpu.vector_store %arg17[%c160_242, %c0_243], %262 {strides = array<i32>} : memref<288x256xbf16, #tpu.memory_space<vmem>>, vector<32x256xbf16>,
    %c0_244 = arith.constant 0 : index
    %c143_245 = arith.constant 143 : index
    %264 = vector.load %arg16[%c0_244, %c143_245] : memref<32x512xbf16, #tpu.memory_space<vmem>>, vector<32x256xbf16>
    %c6_246 = arith.constant 6 : index
    %c0_247 = arith.constant 0 : index
    %265 = vector.load %arg12[%c6_246, %c0_247] : memref<9x256xbf16, #tpu.memory_space<vmem>>, vector<1x256xbf16>
    %266 = vector.broadcast %265 : vector<1x256xbf16> to vector<32x256xbf16>
    %267 = arith.mulf %264, %266 : vector<32x256xbf16>
    %c192_248 = arith.constant 192 : index
    %c0_249 = arith.constant 0 : index
    %268 = vector.load %arg17[%c192_248, %c0_249] : memref<288x256xbf16, #tpu.memory_space<vmem>>, vector<32x256xbf16>
    tpu.vector_store %arg17[%c192_248, %c0_249], %267 {strides = array<i32>} : memref<288x256xbf16, #tpu.memory_space<vmem>>, vector<32x256xbf16>,
    %c0_250 = arith.constant 0 : index
    %c144_251 = arith.constant 144 : index
    %269 = vector.load %arg16[%c0_250, %c144_251] : memref<32x512xbf16, #tpu.memory_space<vmem>>, vector<32x256xbf16>
    %c7_252 = arith.constant 7 : index
    %c0_253 = arith.constant 0 : index
    %270 = vector.load %arg12[%c7_252, %c0_253] : memref<9x256xbf16, #tpu.memory_space<vmem>>, vector<1x256xbf16>
    %271 = vector.broadcast %270 : vector<1x256xbf16> to vector<32x256xbf16>
    %272 = arith.mulf %269, %271 : vector<32x256xbf16>
    %c224_254 = arith.constant 224 : index
    %c0_255 = arith.constant 0 : index
    %273 = vector.load %arg17[%c224_254, %c0_255] : memref<288x256xbf16, #tpu.memory_space<vmem>>, vector<32x256xbf16>
    tpu.vector_store %arg17[%c224_254, %c0_255], %272 {strides = array<i32>} : memref<288x256xbf16, #tpu.memory_space<vmem>>, vector<32x256xbf16>,
    %c0_256 = arith.constant 0 : index
    %c145_257 = arith.constant 145 : index
    %274 = vector.load %arg16[%c0_256, %c145_257] : memref<32x512xbf16, #tpu.memory_space<vmem>>, vector<32x256xbf16>
    %c8_258 = arith.constant 8 : index
    %c0_259 = arith.constant 0 : index
    %275 = vector.load %arg12[%c8_258, %c0_259] : memref<9x256xbf16, #tpu.memory_space<vmem>>, vector<1x256xbf16>
    %276 = vector.broadcast %275 : vector<1x256xbf16> to vector<32x256xbf16>
    %277 = arith.mulf %274, %276 : vector<32x256xbf16>
    %c256_260 = arith.constant 256 : index
    %c0_261 = arith.constant 0 : index
    %278 = vector.load %arg17[%c256_260, %c0_261] : memref<288x256xbf16, #tpu.memory_space<vmem>>, vector<32x256xbf16>
    tpu.vector_store %arg17[%c256_260, %c0_261], %277 {strides = array<i32>} : memref<288x256xbf16, #tpu.memory_space<vmem>>, vector<32x256xbf16>,
    %c0_262 = arith.constant 0 : index
    %c0_263 = arith.constant 0 : index
    %279 = vector.load %arg17[%c0_262, %c0_263] : memref<288x256xbf16, #tpu.memory_space<vmem>>, vector<288x256xbf16>
    %cst_264 = arith.constant dense<0.000000e+00> : vector<32x256xf32>
    %280 = tpu.matmul %233, %279, %cst_264 {dimension_numbers = #tpu.dot_dimension_numbers<[1], [0], [0], [1], [0, 0, 1, 1], [], []>} : vector<32x288xbf16>, vector<288x256xbf16>, vector<32x256xf32> -> vector<32x256xf32>
    %281 = vector.broadcast %234 : vector<32x1xf32> to vector<32x256xf32>
    %282 = arith.addf %280, %281 : vector<32x256xf32>
    %283 = arith.truncf %282 : vector<32x256xf32> to vector<32x256xbf16>
    %c0_265 = arith.constant 0 : index
    %c0_266 = arith.constant 0 : index
    %284 = vector.load %arg14[%c0_265, %c0_266] : memref<256x64xbf16, #tpu.memory_space<vmem>>, vector<256x64xbf16>
    %cst_267 = arith.constant dense<0.000000e+00> : vector<32x64xf32>
    %285 = tpu.matmul %283, %284, %cst_267 {dimension_numbers = #tpu.dot_dimension_numbers<[1], [0], [0], [1], [0, 0, 1, 1], [], []>} : vector<32x256xbf16>, vector<256x64xbf16>, vector<32x64xf32> -> vector<32x64xf32>
    %cst_268 = arith.constant dense<0.000000e+00> : vector<32xf32>
    %286 = vector.multi_reduction <add>, %285, %cst_268 [1] : vector<32x64xf32> to vector<32xf32>
    %287 = vector.shape_cast %286 : vector<32xf32> to vector<32x1xf32>
    %c0_269 = arith.constant 0 : index
    %c0_270 = arith.constant 0 : index
    %288 = vector.load %arg18[%c0_269, %c0_270] : memref<32x2xf32, #tpu.memory_space<vmem>>, vector<32x1xf32>
    tpu.vector_store %arg18[%c0_269, %c0_270], %287 {strides = array<i32>} : memref<32x2xf32, #tpu.memory_space<vmem>>, vector<32x1xf32>,
    %289 = arith.mulf %285, %285 : vector<32x64xf32>
    %cst_271 = arith.constant dense<0.000000e+00> : vector<32xf32>
    %290 = vector.multi_reduction <add>, %289, %cst_271 [1] : vector<32x64xf32> to vector<32xf32>
    %291 = vector.shape_cast %290 : vector<32xf32> to vector<32x1xf32>
    %c0_272 = arith.constant 0 : index
    %c1_273 = arith.constant 1 : index
    %292 = vector.load %arg18[%c0_272, %c1_273] : memref<32x2xf32, #tpu.memory_space<vmem>>, vector<32x1xf32>
    tpu.vector_store %arg18[%c0_272, %c1_273], %291 {strides = array<i32>} : memref<32x2xf32, #tpu.memory_space<vmem>>, vector<32x1xf32>,
    %c0_274 = arith.constant 0 : index
    %c0_275 = arith.constant 0 : index
    %293 = vector.load %arg9[%c0_274, %c0_275] : memref<32x32xf32, #tpu.memory_space<vmem>>, vector<32x32xf32>
    %c0_276 = arith.constant 0 : index
    %c0_277 = arith.constant 0 : index
    %294 = vector.load %arg18[%c0_276, %c0_277] : memref<32x2xf32, #tpu.memory_space<vmem>>, vector<32x2xf32>
    %cst_278 = arith.constant dense<0.000000e+00> : vector<32x2xf32>
    %295 = tpu.matmul %293, %294, %cst_278 {dimension_numbers = #tpu.dot_dimension_numbers<[1], [0], [0], [1], [0, 0, 1, 1], [], []>} : vector<32x32xf32>, vector<32x2xf32>, vector<32x2xf32> -> vector<32x2xf32>
    %cst_279 = arith.constant 3.906250e-03 : f32
    %296 = vector.broadcast %cst_279 : f32 to vector<32x2xf32>
    %297 = arith.mulf %295, %296 : vector<32x2xf32>
    %298 = vector.extract_strided_slice %297 {offsets = [0, 0], sizes = [32, 1], strides = [1, 1]} : vector<32x2xf32> to vector<32x1xf32>
    %299 = vector.extract_strided_slice %297 {offsets = [0, 1], sizes = [32, 1], strides = [1, 1]} : vector<32x2xf32> to vector<32x1xf32>
    %300 = arith.mulf %298, %298 : vector<32x1xf32>
    %301 = arith.subf %299, %300 : vector<32x1xf32>
    %cst_280 = arith.constant 0.000000e+00 : f32
    %302 = vector.broadcast %cst_280 : f32 to vector<32x1xf32>
    %303 = arith.maximumf %301, %302 : vector<32x1xf32>
    %cst_281 = arith.constant 9.99999997E-7 : f32
    %304 = vector.broadcast %cst_281 : f32 to vector<32x1xf32>
    %305 = arith.addf %303, %304 : vector<32x1xf32>
    %306 = math.rsqrt %305 : vector<32x1xf32>
    %307 = vector.broadcast %298 : vector<32x1xf32> to vector<32x64xf32>
    %308 = arith.subf %285, %307 : vector<32x64xf32>
    %309 = vector.broadcast %306 : vector<32x1xf32> to vector<32x64xf32>
    %310 = arith.mulf %308, %309 : vector<32x64xf32>
    %c0_282 = arith.constant 0 : index
    %c2_283 = arith.constant 2 : index
    %311 = vector.load %arg7[%c0_282, %c2_283] : memref<32x5xf32, #tpu.memory_space<vmem>>, vector<32x1xf32>
    %312 = vector.broadcast %311 : vector<32x1xf32> to vector<32x64xf32>
    %313 = arith.mulf %310, %312 : vector<32x64xf32>
    %c0_284 = arith.constant 0 : index
    %c2_285 = arith.constant 2 : index
    %314 = vector.load %arg8[%c0_284, %c2_285] : memref<32x5xf32, #tpu.memory_space<vmem>>, vector<32x1xf32>
    %315 = vector.broadcast %314 : vector<32x1xf32> to vector<32x64xf32>
    %316 = arith.addf %313, %315 : vector<32x64xf32>
    %317 = arith.negf %316 : vector<32x64xf32>
    %318 = math.exp %317 : vector<32x64xf32>
    %cst_286 = arith.constant 1.000000e+00 : f32
    %319 = vector.broadcast %cst_286 : f32 to vector<32x64xf32>
    %320 = arith.addf %319, %318 : vector<32x64xf32>
    %321 = arith.divf %319, %320 : vector<32x64xf32>
    %322 = arith.mulf %316, %321 : vector<32x64xf32>
    %c3_287 = arith.constant 3 : index
    %c0_288 = arith.constant 0 : index
    %c0_289 = arith.constant 0 : index
    %323 = vector.load %arg4[%c3_287, %c0_288, %c0_289] : memref<5x32x288xbf16, #tpu.memory_space<vmem>>, vector<1x32x288xbf16>
    %324 = vector.shape_cast %323 : vector<1x32x288xbf16> to vector<32x288xbf16>
    %c0_290 = arith.constant 0 : index
    %c3_291 = arith.constant 3 : index
    %325 = vector.load %arg6[%c0_290, %c3_291] : memref<32x5xf32, #tpu.memory_space<vmem>>, vector<32x1xf32>
    %326 = arith.truncf %322 : vector<32x64xf32> to vector<32x64xbf16>
    %c0_292 = arith.constant 0 : index
    %c128_293 = arith.constant 128 : index
    %327 = vector.load %arg16[%c0_292, %c128_293] : memref<32x512xbf16, #tpu.memory_space<vmem>>, vector<32x64xbf16>
    tpu.vector_store %arg16[%c0_292, %c128_293], %326 {strides = array<i32>} : memref<32x512xbf16, #tpu.memory_space<vmem>>, vector<32x64xbf16>,
    %c0_294 = arith.constant 0 : index
    %c119 = arith.constant 119 : index
    %328 = vector.load %arg16[%c0_294, %c119] : memref<32x512xbf16, #tpu.memory_space<vmem>>, vector<32x64xbf16>
    %c0_295 = arith.constant 0 : index
    %c0_296 = arith.constant 0 : index
    %329 = vector.load %arg13[%c0_295, %c0_296] : memref<9x64xbf16, #tpu.memory_space<vmem>>, vector<1x64xbf16>
    %330 = vector.broadcast %329 : vector<1x64xbf16> to vector<32x64xbf16>
    %331 = arith.mulf %328, %330 : vector<32x64xbf16>
    %c0_297 = arith.constant 0 : index
    %c0_298 = arith.constant 0 : index
    %332 = vector.load %arg17[%c0_297, %c0_298] : memref<288x256xbf16, #tpu.memory_space<vmem>>, vector<32x64xbf16>
    tpu.vector_store %arg17[%c0_297, %c0_298], %331 {strides = array<i32>} : memref<288x256xbf16, #tpu.memory_space<vmem>>, vector<32x64xbf16>,
    %c0_299 = arith.constant 0 : index
    %c120 = arith.constant 120 : index
    %333 = vector.load %arg16[%c0_299, %c120] : memref<32x512xbf16, #tpu.memory_space<vmem>>, vector<32x64xbf16>
    %c1_300 = arith.constant 1 : index
    %c0_301 = arith.constant 0 : index
    %334 = vector.load %arg13[%c1_300, %c0_301] : memref<9x64xbf16, #tpu.memory_space<vmem>>, vector<1x64xbf16>
    %335 = vector.broadcast %334 : vector<1x64xbf16> to vector<32x64xbf16>
    %336 = arith.mulf %333, %335 : vector<32x64xbf16>
    %c32_302 = arith.constant 32 : index
    %c0_303 = arith.constant 0 : index
    %337 = vector.load %arg17[%c32_302, %c0_303] : memref<288x256xbf16, #tpu.memory_space<vmem>>, vector<32x64xbf16>
    tpu.vector_store %arg17[%c32_302, %c0_303], %336 {strides = array<i32>} : memref<288x256xbf16, #tpu.memory_space<vmem>>, vector<32x64xbf16>,
    %c0_304 = arith.constant 0 : index
    %c121 = arith.constant 121 : index
    %338 = vector.load %arg16[%c0_304, %c121] : memref<32x512xbf16, #tpu.memory_space<vmem>>, vector<32x64xbf16>
    %c2_305 = arith.constant 2 : index
    %c0_306 = arith.constant 0 : index
    %339 = vector.load %arg13[%c2_305, %c0_306] : memref<9x64xbf16, #tpu.memory_space<vmem>>, vector<1x64xbf16>
    %340 = vector.broadcast %339 : vector<1x64xbf16> to vector<32x64xbf16>
    %341 = arith.mulf %338, %340 : vector<32x64xbf16>
    %c64_307 = arith.constant 64 : index
    %c0_308 = arith.constant 0 : index
    %342 = vector.load %arg17[%c64_307, %c0_308] : memref<288x256xbf16, #tpu.memory_space<vmem>>, vector<32x64xbf16>
    tpu.vector_store %arg17[%c64_307, %c0_308], %341 {strides = array<i32>} : memref<288x256xbf16, #tpu.memory_space<vmem>>, vector<32x64xbf16>,
    %c0_309 = arith.constant 0 : index
    %c127_310 = arith.constant 127 : index
    %343 = vector.load %arg16[%c0_309, %c127_310] : memref<32x512xbf16, #tpu.memory_space<vmem>>, vector<32x64xbf16>
    %c3_311 = arith.constant 3 : index
    %c0_312 = arith.constant 0 : index
    %344 = vector.load %arg13[%c3_311, %c0_312] : memref<9x64xbf16, #tpu.memory_space<vmem>>, vector<1x64xbf16>
    %345 = vector.broadcast %344 : vector<1x64xbf16> to vector<32x64xbf16>
    %346 = arith.mulf %343, %345 : vector<32x64xbf16>
    %c96_313 = arith.constant 96 : index
    %c0_314 = arith.constant 0 : index
    %347 = vector.load %arg17[%c96_313, %c0_314] : memref<288x256xbf16, #tpu.memory_space<vmem>>, vector<32x64xbf16>
    tpu.vector_store %arg17[%c96_313, %c0_314], %346 {strides = array<i32>} : memref<288x256xbf16, #tpu.memory_space<vmem>>, vector<32x64xbf16>,
    %c0_315 = arith.constant 0 : index
    %c128_316 = arith.constant 128 : index
    %348 = vector.load %arg16[%c0_315, %c128_316] : memref<32x512xbf16, #tpu.memory_space<vmem>>, vector<32x64xbf16>
    %c128_317 = arith.constant 128 : index
    %c0_318 = arith.constant 0 : index
    %349 = vector.load %arg17[%c128_317, %c0_318] : memref<288x256xbf16, #tpu.memory_space<vmem>>, vector<32x64xbf16>
    tpu.vector_store %arg17[%c128_317, %c0_318], %348 {strides = array<i32>} : memref<288x256xbf16, #tpu.memory_space<vmem>>, vector<32x64xbf16>,
    %c0_319 = arith.constant 0 : index
    %c129_320 = arith.constant 129 : index
    %350 = vector.load %arg16[%c0_319, %c129_320] : memref<32x512xbf16, #tpu.memory_space<vmem>>, vector<32x64xbf16>
    %c5_321 = arith.constant 5 : index
    %c0_322 = arith.constant 0 : index
    %351 = vector.load %arg13[%c5_321, %c0_322] : memref<9x64xbf16, #tpu.memory_space<vmem>>, vector<1x64xbf16>
    %352 = vector.broadcast %351 : vector<1x64xbf16> to vector<32x64xbf16>
    %353 = arith.mulf %350, %352 : vector<32x64xbf16>
    %c160_323 = arith.constant 160 : index
    %c0_324 = arith.constant 0 : index
    %354 = vector.load %arg17[%c160_323, %c0_324] : memref<288x256xbf16, #tpu.memory_space<vmem>>, vector<32x64xbf16>
    tpu.vector_store %arg17[%c160_323, %c0_324], %353 {strides = array<i32>} : memref<288x256xbf16, #tpu.memory_space<vmem>>, vector<32x64xbf16>,
    %c0_325 = arith.constant 0 : index
    %c135 = arith.constant 135 : index
    %355 = vector.load %arg16[%c0_325, %c135] : memref<32x512xbf16, #tpu.memory_space<vmem>>, vector<32x64xbf16>
    %c6_326 = arith.constant 6 : index
    %c0_327 = arith.constant 0 : index
    %356 = vector.load %arg13[%c6_326, %c0_327] : memref<9x64xbf16, #tpu.memory_space<vmem>>, vector<1x64xbf16>
    %357 = vector.broadcast %356 : vector<1x64xbf16> to vector<32x64xbf16>
    %358 = arith.mulf %355, %357 : vector<32x64xbf16>
    %c192_328 = arith.constant 192 : index
    %c0_329 = arith.constant 0 : index
    %359 = vector.load %arg17[%c192_328, %c0_329] : memref<288x256xbf16, #tpu.memory_space<vmem>>, vector<32x64xbf16>
    tpu.vector_store %arg17[%c192_328, %c0_329], %358 {strides = array<i32>} : memref<288x256xbf16, #tpu.memory_space<vmem>>, vector<32x64xbf16>,
    %c0_330 = arith.constant 0 : index
    %c136 = arith.constant 136 : index
    %360 = vector.load %arg16[%c0_330, %c136] : memref<32x512xbf16, #tpu.memory_space<vmem>>, vector<32x64xbf16>
    %c7_331 = arith.constant 7 : index
    %c0_332 = arith.constant 0 : index
    %361 = vector.load %arg13[%c7_331, %c0_332] : memref<9x64xbf16, #tpu.memory_space<vmem>>, vector<1x64xbf16>
    %362 = vector.broadcast %361 : vector<1x64xbf16> to vector<32x64xbf16>
    %363 = arith.mulf %360, %362 : vector<32x64xbf16>
    %c224_333 = arith.constant 224 : index
    %c0_334 = arith.constant 0 : index
    %364 = vector.load %arg17[%c224_333, %c0_334] : memref<288x256xbf16, #tpu.memory_space<vmem>>, vector<32x64xbf16>
    tpu.vector_store %arg17[%c224_333, %c0_334], %363 {strides = array<i32>} : memref<288x256xbf16, #tpu.memory_space<vmem>>, vector<32x64xbf16>,
    %c0_335 = arith.constant 0 : index
    %c137 = arith.constant 137 : index
    %365 = vector.load %arg16[%c0_335, %c137] : memref<32x512xbf16, #tpu.memory_space<vmem>>, vector<32x64xbf16>
    %c8_336 = arith.constant 8 : index
    %c0_337 = arith.constant 0 : index
    %366 = vector.load %arg13[%c8_336, %c0_337] : memref<9x64xbf16, #tpu.memory_space<vmem>>, vector<1x64xbf16>
    %367 = vector.broadcast %366 : vector<1x64xbf16> to vector<32x64xbf16>
    %368 = arith.mulf %365, %367 : vector<32x64xbf16>
    %c256_338 = arith.constant 256 : index
    %c0_339 = arith.constant 0 : index
    %369 = vector.load %arg17[%c256_338, %c0_339] : memref<288x256xbf16, #tpu.memory_space<vmem>>, vector<32x64xbf16>
    tpu.vector_store %arg17[%c256_338, %c0_339], %368 {strides = array<i32>} : memref<288x256xbf16, #tpu.memory_space<vmem>>, vector<32x64xbf16>,
    %c0_340 = arith.constant 0 : index
    %c0_341 = arith.constant 0 : index
    %370 = vector.load %arg17[%c0_340, %c0_341] : memref<288x256xbf16, #tpu.memory_space<vmem>>, vector<288x64xbf16>
    %cst_342 = arith.constant dense<0.000000e+00> : vector<32x64xf32>
    %371 = tpu.matmul %324, %370, %cst_342 {dimension_numbers = #tpu.dot_dimension_numbers<[1], [0], [0], [1], [0, 0, 1, 1], [], []>} : vector<32x288xbf16>, vector<288x64xbf16>, vector<32x64xf32> -> vector<32x64xf32>
    %372 = vector.broadcast %325 : vector<32x1xf32> to vector<32x64xf32>
    %373 = arith.addf %371, %372 : vector<32x64xf32>
    %cst_343 = arith.constant dense<0.000000e+00> : vector<32xf32>
    %374 = vector.multi_reduction <add>, %373, %cst_343 [1] : vector<32x64xf32> to vector<32xf32>
    %375 = vector.shape_cast %374 : vector<32xf32> to vector<32x1xf32>
    %c0_344 = arith.constant 0 : index
    %c0_345 = arith.constant 0 : index
    %376 = vector.load %arg18[%c0_344, %c0_345] : memref<32x2xf32, #tpu.memory_space<vmem>>, vector<32x1xf32>
    tpu.vector_store %arg18[%c0_344, %c0_345], %375 {strides = array<i32>} : memref<32x2xf32, #tpu.memory_space<vmem>>, vector<32x1xf32>,
    %377 = arith.mulf %373, %373 : vector<32x64xf32>
    %cst_346 = arith.constant dense<0.000000e+00> : vector<32xf32>
    %378 = vector.multi_reduction <add>, %377, %cst_346 [1] : vector<32x64xf32> to vector<32xf32>
    %379 = vector.shape_cast %378 : vector<32xf32> to vector<32x1xf32>
    %c0_347 = arith.constant 0 : index
    %c1_348 = arith.constant 1 : index
    %380 = vector.load %arg18[%c0_347, %c1_348] : memref<32x2xf32, #tpu.memory_space<vmem>>, vector<32x1xf32>
    tpu.vector_store %arg18[%c0_347, %c1_348], %379 {strides = array<i32>} : memref<32x2xf32, #tpu.memory_space<vmem>>, vector<32x1xf32>,
    %c0_349 = arith.constant 0 : index
    %c0_350 = arith.constant 0 : index
    %381 = vector.load %arg9[%c0_349, %c0_350] : memref<32x32xf32, #tpu.memory_space<vmem>>, vector<32x32xf32>
    %c0_351 = arith.constant 0 : index
    %c0_352 = arith.constant 0 : index
    %382 = vector.load %arg18[%c0_351, %c0_352] : memref<32x2xf32, #tpu.memory_space<vmem>>, vector<32x2xf32>
    %cst_353 = arith.constant dense<0.000000e+00> : vector<32x2xf32>
    %383 = tpu.matmul %381, %382, %cst_353 {dimension_numbers = #tpu.dot_dimension_numbers<[1], [0], [0], [1], [0, 0, 1, 1], [], []>} : vector<32x32xf32>, vector<32x2xf32>, vector<32x2xf32> -> vector<32x2xf32>
    %cst_354 = arith.constant 3.906250e-03 : f32
    %384 = vector.broadcast %cst_354 : f32 to vector<32x2xf32>
    %385 = arith.mulf %383, %384 : vector<32x2xf32>
    %386 = vector.extract_strided_slice %385 {offsets = [0, 0], sizes = [32, 1], strides = [1, 1]} : vector<32x2xf32> to vector<32x1xf32>
    %387 = vector.extract_strided_slice %385 {offsets = [0, 1], sizes = [32, 1], strides = [1, 1]} : vector<32x2xf32> to vector<32x1xf32>
    %388 = arith.mulf %386, %386 : vector<32x1xf32>
    %389 = arith.subf %387, %388 : vector<32x1xf32>
    %cst_355 = arith.constant 0.000000e+00 : f32
    %390 = vector.broadcast %cst_355 : f32 to vector<32x1xf32>
    %391 = arith.maximumf %389, %390 : vector<32x1xf32>
    %cst_356 = arith.constant 9.99999997E-7 : f32
    %392 = vector.broadcast %cst_356 : f32 to vector<32x1xf32>
    %393 = arith.addf %391, %392 : vector<32x1xf32>
    %394 = math.rsqrt %393 : vector<32x1xf32>
    %395 = vector.broadcast %386 : vector<32x1xf32> to vector<32x64xf32>
    %396 = arith.subf %373, %395 : vector<32x64xf32>
    %397 = vector.broadcast %394 : vector<32x1xf32> to vector<32x64xf32>
    %398 = arith.mulf %396, %397 : vector<32x64xf32>
    %c0_357 = arith.constant 0 : index
    %c3_358 = arith.constant 3 : index
    %399 = vector.load %arg7[%c0_357, %c3_358] : memref<32x5xf32, #tpu.memory_space<vmem>>, vector<32x1xf32>
    %400 = vector.broadcast %399 : vector<32x1xf32> to vector<32x64xf32>
    %401 = arith.mulf %398, %400 : vector<32x64xf32>
    %c0_359 = arith.constant 0 : index
    %c3_360 = arith.constant 3 : index
    %402 = vector.load %arg8[%c0_359, %c3_360] : memref<32x5xf32, #tpu.memory_space<vmem>>, vector<32x1xf32>
    %403 = vector.broadcast %402 : vector<32x1xf32> to vector<32x64xf32>
    %404 = arith.addf %401, %403 : vector<32x64xf32>
    %405 = arith.negf %404 : vector<32x64xf32>
    %406 = math.exp %405 : vector<32x64xf32>
    %cst_361 = arith.constant 1.000000e+00 : f32
    %407 = vector.broadcast %cst_361 : f32 to vector<32x64xf32>
    %408 = arith.addf %407, %406 : vector<32x64xf32>
    %409 = arith.divf %407, %408 : vector<32x64xf32>
    %410 = arith.mulf %404, %409 : vector<32x64xf32>
    %c4 = arith.constant 4 : index
    %c0_362 = arith.constant 0 : index
    %c0_363 = arith.constant 0 : index
    %411 = vector.load %arg4[%c4, %c0_362, %c0_363] : memref<5x32x288xbf16, #tpu.memory_space<vmem>>, vector<1x32x288xbf16>
    %412 = vector.shape_cast %411 : vector<1x32x288xbf16> to vector<32x288xbf16>
    %c0_364 = arith.constant 0 : index
    %c4_365 = arith.constant 4 : index
    %413 = vector.load %arg6[%c0_364, %c4_365] : memref<32x5xf32, #tpu.memory_space<vmem>>, vector<32x1xf32>
    %414 = arith.truncf %410 : vector<32x64xf32> to vector<32x64xbf16>
    %c0_366 = arith.constant 0 : index
    %c128_367 = arith.constant 128 : index
    %415 = vector.load %arg16[%c0_366, %c128_367] : memref<32x512xbf16, #tpu.memory_space<vmem>>, vector<32x64xbf16>
    tpu.vector_store %arg16[%c0_366, %c128_367], %414 {strides = array<i32>} : memref<32x512xbf16, #tpu.memory_space<vmem>>, vector<32x64xbf16>,
    %c0_368 = arith.constant 0 : index
    %c119_369 = arith.constant 119 : index
    %416 = vector.load %arg16[%c0_368, %c119_369] : memref<32x512xbf16, #tpu.memory_space<vmem>>, vector<32x64xbf16>
    %c0_370 = arith.constant 0 : index
    %c0_371 = arith.constant 0 : index
    %417 = vector.load %arg13[%c0_370, %c0_371] : memref<9x64xbf16, #tpu.memory_space<vmem>>, vector<1x64xbf16>
    %418 = vector.broadcast %417 : vector<1x64xbf16> to vector<32x64xbf16>
    %419 = arith.mulf %416, %418 : vector<32x64xbf16>
    %c0_372 = arith.constant 0 : index
    %c0_373 = arith.constant 0 : index
    %420 = vector.load %arg17[%c0_372, %c0_373] : memref<288x256xbf16, #tpu.memory_space<vmem>>, vector<32x64xbf16>
    tpu.vector_store %arg17[%c0_372, %c0_373], %419 {strides = array<i32>} : memref<288x256xbf16, #tpu.memory_space<vmem>>, vector<32x64xbf16>,
    %c0_374 = arith.constant 0 : index
    %c120_375 = arith.constant 120 : index
    %421 = vector.load %arg16[%c0_374, %c120_375] : memref<32x512xbf16, #tpu.memory_space<vmem>>, vector<32x64xbf16>
    %c1_376 = arith.constant 1 : index
    %c0_377 = arith.constant 0 : index
    %422 = vector.load %arg13[%c1_376, %c0_377] : memref<9x64xbf16, #tpu.memory_space<vmem>>, vector<1x64xbf16>
    %423 = vector.broadcast %422 : vector<1x64xbf16> to vector<32x64xbf16>
    %424 = arith.mulf %421, %423 : vector<32x64xbf16>
    %c32_378 = arith.constant 32 : index
    %c0_379 = arith.constant 0 : index
    %425 = vector.load %arg17[%c32_378, %c0_379] : memref<288x256xbf16, #tpu.memory_space<vmem>>, vector<32x64xbf16>
    tpu.vector_store %arg17[%c32_378, %c0_379], %424 {strides = array<i32>} : memref<288x256xbf16, #tpu.memory_space<vmem>>, vector<32x64xbf16>,
    %c0_380 = arith.constant 0 : index
    %c121_381 = arith.constant 121 : index
    %426 = vector.load %arg16[%c0_380, %c121_381] : memref<32x512xbf16, #tpu.memory_space<vmem>>, vector<32x64xbf16>
    %c2_382 = arith.constant 2 : index
    %c0_383 = arith.constant 0 : index
    %427 = vector.load %arg13[%c2_382, %c0_383] : memref<9x64xbf16, #tpu.memory_space<vmem>>, vector<1x64xbf16>
    %428 = vector.broadcast %427 : vector<1x64xbf16> to vector<32x64xbf16>
    %429 = arith.mulf %426, %428 : vector<32x64xbf16>
    %c64_384 = arith.constant 64 : index
    %c0_385 = arith.constant 0 : index
    %430 = vector.load %arg17[%c64_384, %c0_385] : memref<288x256xbf16, #tpu.memory_space<vmem>>, vector<32x64xbf16>
    tpu.vector_store %arg17[%c64_384, %c0_385], %429 {strides = array<i32>} : memref<288x256xbf16, #tpu.memory_space<vmem>>, vector<32x64xbf16>,
    %c0_386 = arith.constant 0 : index
    %c127_387 = arith.constant 127 : index
    %431 = vector.load %arg16[%c0_386, %c127_387] : memref<32x512xbf16, #tpu.memory_space<vmem>>, vector<32x64xbf16>
    %c3_388 = arith.constant 3 : index
    %c0_389 = arith.constant 0 : index
    %432 = vector.load %arg13[%c3_388, %c0_389] : memref<9x64xbf16, #tpu.memory_space<vmem>>, vector<1x64xbf16>
    %433 = vector.broadcast %432 : vector<1x64xbf16> to vector<32x64xbf16>
    %434 = arith.mulf %431, %433 : vector<32x64xbf16>
    %c96_390 = arith.constant 96 : index
    %c0_391 = arith.constant 0 : index
    %435 = vector.load %arg17[%c96_390, %c0_391] : memref<288x256xbf16, #tpu.memory_space<vmem>>, vector<32x64xbf16>
    tpu.vector_store %arg17[%c96_390, %c0_391], %434 {strides = array<i32>} : memref<288x256xbf16, #tpu.memory_space<vmem>>, vector<32x64xbf16>,
    %c0_392 = arith.constant 0 : index
    %c128_393 = arith.constant 128 : index
    %436 = vector.load %arg16[%c0_392, %c128_393] : memref<32x512xbf16, #tpu.memory_space<vmem>>, vector<32x64xbf16>
    %c128_394 = arith.constant 128 : index
    %c0_395 = arith.constant 0 : index
    %437 = vector.load %arg17[%c128_394, %c0_395] : memref<288x256xbf16, #tpu.memory_space<vmem>>, vector<32x64xbf16>
    tpu.vector_store %arg17[%c128_394, %c0_395], %436 {strides = array<i32>} : memref<288x256xbf16, #tpu.memory_space<vmem>>, vector<32x64xbf16>,
    %c0_396 = arith.constant 0 : index
    %c129_397 = arith.constant 129 : index
    %438 = vector.load %arg16[%c0_396, %c129_397] : memref<32x512xbf16, #tpu.memory_space<vmem>>, vector<32x64xbf16>
    %c5_398 = arith.constant 5 : index
    %c0_399 = arith.constant 0 : index
    %439 = vector.load %arg13[%c5_398, %c0_399] : memref<9x64xbf16, #tpu.memory_space<vmem>>, vector<1x64xbf16>
    %440 = vector.broadcast %439 : vector<1x64xbf16> to vector<32x64xbf16>
    %441 = arith.mulf %438, %440 : vector<32x64xbf16>
    %c160_400 = arith.constant 160 : index
    %c0_401 = arith.constant 0 : index
    %442 = vector.load %arg17[%c160_400, %c0_401] : memref<288x256xbf16, #tpu.memory_space<vmem>>, vector<32x64xbf16>
    tpu.vector_store %arg17[%c160_400, %c0_401], %441 {strides = array<i32>} : memref<288x256xbf16, #tpu.memory_space<vmem>>, vector<32x64xbf16>,
    %c0_402 = arith.constant 0 : index
    %c135_403 = arith.constant 135 : index
    %443 = vector.load %arg16[%c0_402, %c135_403] : memref<32x512xbf16, #tpu.memory_space<vmem>>, vector<32x64xbf16>
    %c6_404 = arith.constant 6 : index
    %c0_405 = arith.constant 0 : index
    %444 = vector.load %arg13[%c6_404, %c0_405] : memref<9x64xbf16, #tpu.memory_space<vmem>>, vector<1x64xbf16>
    %445 = vector.broadcast %444 : vector<1x64xbf16> to vector<32x64xbf16>
    %446 = arith.mulf %443, %445 : vector<32x64xbf16>
    %c192_406 = arith.constant 192 : index
    %c0_407 = arith.constant 0 : index
    %447 = vector.load %arg17[%c192_406, %c0_407] : memref<288x256xbf16, #tpu.memory_space<vmem>>, vector<32x64xbf16>
    tpu.vector_store %arg17[%c192_406, %c0_407], %446 {strides = array<i32>} : memref<288x256xbf16, #tpu.memory_space<vmem>>, vector<32x64xbf16>,
    %c0_408 = arith.constant 0 : index
    %c136_409 = arith.constant 136 : index
    %448 = vector.load %arg16[%c0_408, %c136_409] : memref<32x512xbf16, #tpu.memory_space<vmem>>, vector<32x64xbf16>
    %c7_410 = arith.constant 7 : index
    %c0_411 = arith.constant 0 : index
    %449 = vector.load %arg13[%c7_410, %c0_411] : memref<9x64xbf16, #tpu.memory_space<vmem>>, vector<1x64xbf16>
    %450 = vector.broadcast %449 : vector<1x64xbf16> to vector<32x64xbf16>
    %451 = arith.mulf %448, %450 : vector<32x64xbf16>
    %c224_412 = arith.constant 224 : index
    %c0_413 = arith.constant 0 : index
    %452 = vector.load %arg17[%c224_412, %c0_413] : memref<288x256xbf16, #tpu.memory_space<vmem>>, vector<32x64xbf16>
    tpu.vector_store %arg17[%c224_412, %c0_413], %451 {strides = array<i32>} : memref<288x256xbf16, #tpu.memory_space<vmem>>, vector<32x64xbf16>,
    %c0_414 = arith.constant 0 : index
    %c137_415 = arith.constant 137 : index
    %453 = vector.load %arg16[%c0_414, %c137_415] : memref<32x512xbf16, #tpu.memory_space<vmem>>, vector<32x64xbf16>
    %c8_416 = arith.constant 8 : index
    %c0_417 = arith.constant 0 : index
    %454 = vector.load %arg13[%c8_416, %c0_417] : memref<9x64xbf16, #tpu.memory_space<vmem>>, vector<1x64xbf16>
    %455 = vector.broadcast %454 : vector<1x64xbf16> to vector<32x64xbf16>
    %456 = arith.mulf %453, %455 : vector<32x64xbf16>
    %c256_418 = arith.constant 256 : index
    %c0_419 = arith.constant 0 : index
    %457 = vector.load %arg17[%c256_418, %c0_419] : memref<288x256xbf16, #tpu.memory_space<vmem>>, vector<32x64xbf16>
    tpu.vector_store %arg17[%c256_418, %c0_419], %456 {strides = array<i32>} : memref<288x256xbf16, #tpu.memory_space<vmem>>, vector<32x64xbf16>,
    %c0_420 = arith.constant 0 : index
    %c0_421 = arith.constant 0 : index
    %458 = vector.load %arg17[%c0_420, %c0_421] : memref<288x256xbf16, #tpu.memory_space<vmem>>, vector<288x64xbf16>
    %cst_422 = arith.constant dense<0.000000e+00> : vector<32x64xf32>
    %459 = tpu.matmul %412, %458, %cst_422 {dimension_numbers = #tpu.dot_dimension_numbers<[1], [0], [0], [1], [0, 0, 1, 1], [], []>} : vector<32x288xbf16>, vector<288x64xbf16>, vector<32x64xf32> -> vector<32x64xf32>
    %460 = vector.broadcast %413 : vector<32x1xf32> to vector<32x64xf32>
    %461 = arith.addf %459, %460 : vector<32x64xf32>
    %462 = arith.addf %285, %461 : vector<32x64xf32>
    %cst_423 = arith.constant dense<0.000000e+00> : vector<32xf32>
    %463 = vector.multi_reduction <add>, %462, %cst_423 [1] : vector<32x64xf32> to vector<32xf32>
    %464 = vector.shape_cast %463 : vector<32xf32> to vector<32x1xf32>
    %c0_424 = arith.constant 0 : index
    %c0_425 = arith.constant 0 : index
    %465 = vector.load %arg18[%c0_424, %c0_425] : memref<32x2xf32, #tpu.memory_space<vmem>>, vector<32x1xf32>
    tpu.vector_store %arg18[%c0_424, %c0_425], %464 {strides = array<i32>} : memref<32x2xf32, #tpu.memory_space<vmem>>, vector<32x1xf32>,
    %466 = arith.mulf %462, %462 : vector<32x64xf32>
    %cst_426 = arith.constant dense<0.000000e+00> : vector<32xf32>
    %467 = vector.multi_reduction <add>, %466, %cst_426 [1] : vector<32x64xf32> to vector<32xf32>
    %468 = vector.shape_cast %467 : vector<32xf32> to vector<32x1xf32>
    %c0_427 = arith.constant 0 : index
    %c1_428 = arith.constant 1 : index
    %469 = vector.load %arg18[%c0_427, %c1_428] : memref<32x2xf32, #tpu.memory_space<vmem>>, vector<32x1xf32>
    tpu.vector_store %arg18[%c0_427, %c1_428], %468 {strides = array<i32>} : memref<32x2xf32, #tpu.memory_space<vmem>>, vector<32x1xf32>,
    %c0_429 = arith.constant 0 : index
    %c0_430 = arith.constant 0 : index
    %470 = vector.load %arg9[%c0_429, %c0_430] : memref<32x32xf32, #tpu.memory_space<vmem>>, vector<32x32xf32>
    %c0_431 = arith.constant 0 : index
    %c0_432 = arith.constant 0 : index
    %471 = vector.load %arg18[%c0_431, %c0_432] : memref<32x2xf32, #tpu.memory_space<vmem>>, vector<32x2xf32>
    %cst_433 = arith.constant dense<0.000000e+00> : vector<32x2xf32>
    %472 = tpu.matmul %470, %471, %cst_433 {dimension_numbers = #tpu.dot_dimension_numbers<[1], [0], [0], [1], [0, 0, 1, 1], [], []>} : vector<32x32xf32>, vector<32x2xf32>, vector<32x2xf32> -> vector<32x2xf32>
    %cst_434 = arith.constant 3.906250e-03 : f32
    %473 = vector.broadcast %cst_434 : f32 to vector<32x2xf32>
    %474 = arith.mulf %472, %473 : vector<32x2xf32>
    %475 = vector.extract_strided_slice %474 {offsets = [0, 0], sizes = [32, 1], strides = [1, 1]} : vector<32x2xf32> to vector<32x1xf32>
    %476 = vector.extract_strided_slice %474 {offsets = [0, 1], sizes = [32, 1], strides = [1, 1]} : vector<32x2xf32> to vector<32x1xf32>
    %477 = arith.mulf %475, %475 : vector<32x1xf32>
    %478 = arith.subf %476, %477 : vector<32x1xf32>
    %cst_435 = arith.constant 0.000000e+00 : f32
    %479 = vector.broadcast %cst_435 : f32 to vector<32x1xf32>
    %480 = arith.maximumf %478, %479 : vector<32x1xf32>
    %cst_436 = arith.constant 9.99999997E-7 : f32
    %481 = vector.broadcast %cst_436 : f32 to vector<32x1xf32>
    %482 = arith.addf %480, %481 : vector<32x1xf32>
    %483 = math.rsqrt %482 : vector<32x1xf32>
    %484 = vector.broadcast %475 : vector<32x1xf32> to vector<32x64xf32>
    %485 = arith.subf %462, %484 : vector<32x64xf32>
    %486 = vector.broadcast %483 : vector<32x1xf32> to vector<32x64xf32>
    %487 = arith.mulf %485, %486 : vector<32x64xf32>
    %c0_437 = arith.constant 0 : index
    %c4_438 = arith.constant 4 : index
    %488 = vector.load %arg7[%c0_437, %c4_438] : memref<32x5xf32, #tpu.memory_space<vmem>>, vector<32x1xf32>
    %489 = vector.broadcast %488 : vector<32x1xf32> to vector<32x64xf32>
    %490 = arith.mulf %487, %489 : vector<32x64xf32>
    %c0_439 = arith.constant 0 : index
    %c4_440 = arith.constant 4 : index
    %491 = vector.load %arg8[%c0_439, %c4_440] : memref<32x5xf32, #tpu.memory_space<vmem>>, vector<32x1xf32>
    %492 = vector.broadcast %491 : vector<32x1xf32> to vector<32x64xf32>
    %493 = arith.addf %490, %492 : vector<32x64xf32>
    %494 = arith.negf %493 : vector<32x64xf32>
    %495 = math.exp %494 : vector<32x64xf32>
    %cst_441 = arith.constant 1.000000e+00 : f32
    %496 = vector.broadcast %cst_441 : f32 to vector<32x64xf32>
    %497 = arith.addf %496, %495 : vector<32x64xf32>
    %498 = arith.divf %496, %497 : vector<32x64xf32>
    %499 = arith.mulf %493, %498 : vector<32x64xf32>
    %500 = arith.truncf %499 : vector<32x64xf32> to vector<32x64xbf16>
    %c0_442 = arith.constant 0 : index
    %c128_443 = arith.constant 128 : index
    %501 = vector.load %arg16[%c0_442, %c128_443] : memref<32x512xbf16, #tpu.memory_space<vmem>>, vector<32x64xbf16>
    tpu.vector_store %arg16[%c0_442, %c128_443], %500 {strides = array<i32>} : memref<32x512xbf16, #tpu.memory_space<vmem>>, vector<32x64xbf16>,
    %c0_444 = arith.constant 0 : index
    %c119_445 = arith.constant 119 : index
    %502 = vector.load %arg16[%c0_444, %c119_445] : memref<32x512xbf16, #tpu.memory_space<vmem>>, vector<32x64xbf16>
    %c0_446 = arith.constant 0 : index
    %c0_447 = arith.constant 0 : index
    %503 = vector.load %arg13[%c0_446, %c0_447] : memref<9x64xbf16, #tpu.memory_space<vmem>>, vector<1x64xbf16>
    %504 = vector.broadcast %503 : vector<1x64xbf16> to vector<32x64xbf16>
    %505 = arith.mulf %502, %504 : vector<32x64xbf16>
    %c0_448 = arith.constant 0 : index
    %c0_449 = arith.constant 0 : index
    %506 = vector.load %arg17[%c0_448, %c0_449] : memref<288x256xbf16, #tpu.memory_space<vmem>>, vector<32x64xbf16>
    tpu.vector_store %arg17[%c0_448, %c0_449], %505 {strides = array<i32>} : memref<288x256xbf16, #tpu.memory_space<vmem>>, vector<32x64xbf16>,
    %c0_450 = arith.constant 0 : index
    %c120_451 = arith.constant 120 : index
    %507 = vector.load %arg16[%c0_450, %c120_451] : memref<32x512xbf16, #tpu.memory_space<vmem>>, vector<32x64xbf16>
    %c1_452 = arith.constant 1 : index
    %c0_453 = arith.constant 0 : index
    %508 = vector.load %arg13[%c1_452, %c0_453] : memref<9x64xbf16, #tpu.memory_space<vmem>>, vector<1x64xbf16>
    %509 = vector.broadcast %508 : vector<1x64xbf16> to vector<32x64xbf16>
    %510 = arith.mulf %507, %509 : vector<32x64xbf16>
    %c32_454 = arith.constant 32 : index
    %c0_455 = arith.constant 0 : index
    %511 = vector.load %arg17[%c32_454, %c0_455] : memref<288x256xbf16, #tpu.memory_space<vmem>>, vector<32x64xbf16>
    tpu.vector_store %arg17[%c32_454, %c0_455], %510 {strides = array<i32>} : memref<288x256xbf16, #tpu.memory_space<vmem>>, vector<32x64xbf16>,
    %c0_456 = arith.constant 0 : index
    %c121_457 = arith.constant 121 : index
    %512 = vector.load %arg16[%c0_456, %c121_457] : memref<32x512xbf16, #tpu.memory_space<vmem>>, vector<32x64xbf16>
    %c2_458 = arith.constant 2 : index
    %c0_459 = arith.constant 0 : index
    %513 = vector.load %arg13[%c2_458, %c0_459] : memref<9x64xbf16, #tpu.memory_space<vmem>>, vector<1x64xbf16>
    %514 = vector.broadcast %513 : vector<1x64xbf16> to vector<32x64xbf16>
    %515 = arith.mulf %512, %514 : vector<32x64xbf16>
    %c64_460 = arith.constant 64 : index
    %c0_461 = arith.constant 0 : index
    %516 = vector.load %arg17[%c64_460, %c0_461] : memref<288x256xbf16, #tpu.memory_space<vmem>>, vector<32x64xbf16>
    tpu.vector_store %arg17[%c64_460, %c0_461], %515 {strides = array<i32>} : memref<288x256xbf16, #tpu.memory_space<vmem>>, vector<32x64xbf16>,
    %c0_462 = arith.constant 0 : index
    %c127_463 = arith.constant 127 : index
    %517 = vector.load %arg16[%c0_462, %c127_463] : memref<32x512xbf16, #tpu.memory_space<vmem>>, vector<32x64xbf16>
    %c3_464 = arith.constant 3 : index
    %c0_465 = arith.constant 0 : index
    %518 = vector.load %arg13[%c3_464, %c0_465] : memref<9x64xbf16, #tpu.memory_space<vmem>>, vector<1x64xbf16>
    %519 = vector.broadcast %518 : vector<1x64xbf16> to vector<32x64xbf16>
    %520 = arith.mulf %517, %519 : vector<32x64xbf16>
    %c96_466 = arith.constant 96 : index
    %c0_467 = arith.constant 0 : index
    %521 = vector.load %arg17[%c96_466, %c0_467] : memref<288x256xbf16, #tpu.memory_space<vmem>>, vector<32x64xbf16>
    tpu.vector_store %arg17[%c96_466, %c0_467], %520 {strides = array<i32>} : memref<288x256xbf16, #tpu.memory_space<vmem>>, vector<32x64xbf16>,
    %c0_468 = arith.constant 0 : index
    %c128_469 = arith.constant 128 : index
    %522 = vector.load %arg16[%c0_468, %c128_469] : memref<32x512xbf16, #tpu.memory_space<vmem>>, vector<32x64xbf16>
    %c128_470 = arith.constant 128 : index
    %c0_471 = arith.constant 0 : index
    %523 = vector.load %arg17[%c128_470, %c0_471] : memref<288x256xbf16, #tpu.memory_space<vmem>>, vector<32x64xbf16>
    tpu.vector_store %arg17[%c128_470, %c0_471], %522 {strides = array<i32>} : memref<288x256xbf16, #tpu.memory_space<vmem>>, vector<32x64xbf16>,
    %c0_472 = arith.constant 0 : index
    %c129_473 = arith.constant 129 : index
    %524 = vector.load %arg16[%c0_472, %c129_473] : memref<32x512xbf16, #tpu.memory_space<vmem>>, vector<32x64xbf16>
    %c5_474 = arith.constant 5 : index
    %c0_475 = arith.constant 0 : index
    %525 = vector.load %arg13[%c5_474, %c0_475] : memref<9x64xbf16, #tpu.memory_space<vmem>>, vector<1x64xbf16>
    %526 = vector.broadcast %525 : vector<1x64xbf16> to vector<32x64xbf16>
    %527 = arith.mulf %524, %526 : vector<32x64xbf16>
    %c160_476 = arith.constant 160 : index
    %c0_477 = arith.constant 0 : index
    %528 = vector.load %arg17[%c160_476, %c0_477] : memref<288x256xbf16, #tpu.memory_space<vmem>>, vector<32x64xbf16>
    tpu.vector_store %arg17[%c160_476, %c0_477], %527 {strides = array<i32>} : memref<288x256xbf16, #tpu.memory_space<vmem>>, vector<32x64xbf16>,
    %c0_478 = arith.constant 0 : index
    %c135_479 = arith.constant 135 : index
    %529 = vector.load %arg16[%c0_478, %c135_479] : memref<32x512xbf16, #tpu.memory_space<vmem>>, vector<32x64xbf16>
    %c6_480 = arith.constant 6 : index
    %c0_481 = arith.constant 0 : index
    %530 = vector.load %arg13[%c6_480, %c0_481] : memref<9x64xbf16, #tpu.memory_space<vmem>>, vector<1x64xbf16>
    %531 = vector.broadcast %530 : vector<1x64xbf16> to vector<32x64xbf16>
    %532 = arith.mulf %529, %531 : vector<32x64xbf16>
    %c192_482 = arith.constant 192 : index
    %c0_483 = arith.constant 0 : index
    %533 = vector.load %arg17[%c192_482, %c0_483] : memref<288x256xbf16, #tpu.memory_space<vmem>>, vector<32x64xbf16>
    tpu.vector_store %arg17[%c192_482, %c0_483], %532 {strides = array<i32>} : memref<288x256xbf16, #tpu.memory_space<vmem>>, vector<32x64xbf16>,
    %c0_484 = arith.constant 0 : index
    %c136_485 = arith.constant 136 : index
    %534 = vector.load %arg16[%c0_484, %c136_485] : memref<32x512xbf16, #tpu.memory_space<vmem>>, vector<32x64xbf16>
    %c7_486 = arith.constant 7 : index
    %c0_487 = arith.constant 0 : index
    %535 = vector.load %arg13[%c7_486, %c0_487] : memref<9x64xbf16, #tpu.memory_space<vmem>>, vector<1x64xbf16>
    %536 = vector.broadcast %535 : vector<1x64xbf16> to vector<32x64xbf16>
    %537 = arith.mulf %534, %536 : vector<32x64xbf16>
    %c224_488 = arith.constant 224 : index
    %c0_489 = arith.constant 0 : index
    %538 = vector.load %arg17[%c224_488, %c0_489] : memref<288x256xbf16, #tpu.memory_space<vmem>>, vector<32x64xbf16>
    tpu.vector_store %arg17[%c224_488, %c0_489], %537 {strides = array<i32>} : memref<288x256xbf16, #tpu.memory_space<vmem>>, vector<32x64xbf16>,
    %c0_490 = arith.constant 0 : index
    %c137_491 = arith.constant 137 : index
    %539 = vector.load %arg16[%c0_490, %c137_491] : memref<32x512xbf16, #tpu.memory_space<vmem>>, vector<32x64xbf16>
    %c8_492 = arith.constant 8 : index
    %c0_493 = arith.constant 0 : index
    %540 = vector.load %arg13[%c8_492, %c0_493] : memref<9x64xbf16, #tpu.memory_space<vmem>>, vector<1x64xbf16>
    %541 = vector.broadcast %540 : vector<1x64xbf16> to vector<32x64xbf16>
    %542 = arith.mulf %539, %541 : vector<32x64xbf16>
    %c256_494 = arith.constant 256 : index
    %c0_495 = arith.constant 0 : index
    %543 = vector.load %arg17[%c256_494, %c0_495] : memref<288x256xbf16, #tpu.memory_space<vmem>>, vector<32x64xbf16>
    tpu.vector_store %arg17[%c256_494, %c0_495], %542 {strides = array<i32>} : memref<288x256xbf16, #tpu.memory_space<vmem>>, vector<32x64xbf16>,
    %c0_496 = arith.constant 0 : index
    %c0_497 = arith.constant 0 : index
    %544 = vector.load %arg17[%c0_496, %c0_497] : memref<288x256xbf16, #tpu.memory_space<vmem>>, vector<288x64xbf16>
    %c0_498 = arith.constant 0 : index
    %c0_499 = arith.constant 0 : index
    %545 = vector.load %arg10[%c0_498, %c0_499] : memref<8x288xbf16, #tpu.memory_space<vmem>>, vector<8x288xbf16>
    %cst_500 = arith.constant dense<0.000000e+00> : vector<8x64xf32>
    %546 = tpu.matmul %545, %544, %cst_500 {dimension_numbers = #tpu.dot_dimension_numbers<[1], [0], [0], [1], [0, 0, 1, 1], [], []>} : vector<8x288xbf16>, vector<288x64xbf16>, vector<8x64xf32> -> vector<8x64xf32>
    %c0_501 = arith.constant 0 : index
    %c0_502 = arith.constant 0 : index
    %547 = vector.load %arg11[%c0_501, %c0_502] : memref<8x1xf32, #tpu.memory_space<vmem>>, vector<8x1xf32>
    %548 = vector.broadcast %547 : vector<8x1xf32> to vector<8x64xf32>
    %549 = arith.addf %546, %548 : vector<8x64xf32>
    %550 = vector.extract_strided_slice %549 {offsets = [0, 0], sizes = [4, 64], strides = [1, 1]} : vector<8x64xf32> to vector<4x64xf32>
    %551 = vector.extract_strided_slice %549 {offsets = [4, 0], sizes = [4, 64], strides = [1, 1]} : vector<8x64xf32> to vector<4x64xf32>
    %cst_503 = arith.constant -3.000000e+01 : f32
    %cst_504 = arith.constant 2.000000e+01 : f32
    %552 = vector.broadcast %cst_503 : f32 to vector<4x64xf32>
    %553 = arith.maximumf %552, %551 : vector<4x64xf32>
    %554 = vector.broadcast %cst_504 : f32 to vector<4x64xf32>
    %555 = arith.minimumf %554, %553 : vector<4x64xf32>
    %cst_505 = arith.constant 5.000000e-01 : f32
    %556 = vector.broadcast %cst_505 : f32 to vector<4x64xf32>
    %557 = arith.mulf %556, %555 : vector<4x64xf32>
    %558 = math.exp %557 : vector<4x64xf32>
    %c0_506 = arith.constant 0 : index
    %c0_507 = arith.constant 0 : index
    %c0_508 = arith.constant 0 : index
    %559 = vector.load %arg2[%c0_506, %c0_507, %c0_508] : memref<1x4x64xf32, #tpu.memory_space<vmem>>, vector<1x4x64xf32>
    %560 = vector.shape_cast %559 : vector<1x4x64xf32> to vector<4x64xf32>
    %561 = arith.mulf %558, %560 : vector<4x64xf32>
    %562 = arith.addf %550, %561 : vector<4x64xf32>
    %c0_509 = arith.constant 0 : index
    %c0_510 = arith.constant 0 : index
    %c0_511 = arith.constant 0 : index
    %563 = vector.load %arg15[%c0_509, %c0_510, %c0_511] : memref<1x4x64xf32, #tpu.memory_space<vmem>>, vector<1x4x64xf32>
    %564 = vector.shape_cast %563 : vector<1x4x64xf32> to vector<4x64xf32>
    %565 = vector.shape_cast %562 : vector<4x64xf32> to vector<1x4x64xf32>
    tpu.vector_store %arg15[%c0_509, %c0_510, %c0_511], %565 {strides = array<i32>} : memref<1x4x64xf32, #tpu.memory_space<vmem>>, vector<1x4x64xf32>,
    return
  }
  func.func @transform_0(%arg0: i32) -> (i32, i32, i32) {
    %c0_i32 = arith.constant 0 : i32
    %c0_i32_0 = arith.constant 0 : i32
    %c0_i32_1 = arith.constant 0 : i32
    return %arg0, %c0_i32, %c0_i32_0 : i32, i32, i32
  }
  func.func @transform_1(%arg0: i32) -> (i32, i32, i32) {
    %c0_i32 = arith.constant 0 : i32
    %c0_i32_0 = arith.constant 0 : i32
    %c0_i32_1 = arith.constant 0 : i32
    return %arg0, %c0_i32, %c0_i32_0 : i32, i32, i32
  }
  func.func @transform_2(%arg0: i32) -> (i32, i32) {
    %c0_i32 = arith.constant 0 : i32
    %c0_i32_0 = arith.constant 0 : i32
    %c0_i32_1 = arith.constant 0 : i32
    return %c0_i32, %c0_i32_0 : i32, i32
  }
  func.func @transform_3(%arg0: i32) -> (i32, i32, i32) {
    %c0_i32 = arith.constant 0 : i32
    %c0_i32_0 = arith.constant 0 : i32
    %c0_i32_1 = arith.constant 0 : i32
    %c0_i32_2 = arith.constant 0 : i32
    return %c0_i32, %c0_i32_0, %c0_i32_1 : i32, i32, i32
  }
  func.func @transform_4(%arg0: i32) -> (i32, i32) {
    %c0_i32 = arith.constant 0 : i32
    %c0_i32_0 = arith.constant 0 : i32
    %c0_i32_1 = arith.constant 0 : i32
    return %c0_i32, %c0_i32_0 : i32, i32
  }
  func.func @transform_5(%arg0: i32) -> (i32, i32) {
    %c0_i32 = arith.constant 0 : i32
    %c0_i32_0 = arith.constant 0 : i32
    %c0_i32_1 = arith.constant 0 : i32
    return %c0_i32, %c0_i32_0 : i32, i32
  }
  func.func @transform_6(%arg0: i32) -> (i32, i32) {
    %c0_i32 = arith.constant 0 : i32
    %c0_i32_0 = arith.constant 0 : i32
    %c0_i32_1 = arith.constant 0 : i32
    return %c0_i32, %c0_i32_0 : i32, i32
  }
  func.func @transform_7(%arg0: i32) -> (i32, i32) {
    %c0_i32 = arith.constant 0 : i32
    %c0_i32_0 = arith.constant 0 : i32
    %c0_i32_1 = arith.constant 0 : i32
    return %c0_i32, %c0_i32_0 : i32, i32
  }
  func.func @transform_8(%arg0: i32) -> (i32, i32) {
    %c0_i32 = arith.constant 0 : i32
    %c0_i32_0 = arith.constant 0 : i32
    %c0_i32_1 = arith.constant 0 : i32
    return %c0_i32, %c0_i32_0 : i32, i32
  }
  func.func @transform_9(%arg0: i32) -> (i32, i32) {
    %c0_i32 = arith.constant 0 : i32
    %c0_i32_0 = arith.constant 0 : i32
    %c0_i32_1 = arith.constant 0 : i32
    return %c0_i32, %c0_i32_0 : i32, i32
  }
  func.func @transform_10(%arg0: i32) -> (i32, i32) {
    %c0_i32 = arith.constant 0 : i32
    %c0_i32_0 = arith.constant 0 : i32
    %c0_i32_1 = arith.constant 0 : i32
    return %c0_i32, %c0_i32_0 : i32, i32
  }
  func.func @transform_11(%arg0: i32) -> (i32, i32) {
    %c0_i32 = arith.constant 0 : i32
    %c0_i32_0 = arith.constant 0 : i32
    %c0_i32_1 = arith.constant 0 : i32
    return %c0_i32, %c0_i32_0 : i32, i32
  }
  func.func @transform_12(%arg0: i32) -> (i32, i32) {
    %c0_i32 = arith.constant 0 : i32
    %c0_i32_0 = arith.constant 0 : i32
    %c0_i32_1 = arith.constant 0 : i32
    return %c0_i32, %c0_i32_0 : i32, i32
  }
  func.func @transform_13(%arg0: i32) -> (i32, i32) {
    %c0_i32 = arith.constant 0 : i32
    %c0_i32_0 = arith.constant 0 : i32
    %c0_i32_1 = arith.constant 0 : i32
    return %c0_i32, %c0_i32_0 : i32, i32
  }
  func.func @transform_14(%arg0: i32) -> (i32, i32, i32) {
    %c0_i32 = arith.constant 0 : i32
    %c0_i32_0 = arith.constant 0 : i32
    %c0_i32_1 = arith.constant 0 : i32
    return %arg0, %c0_i32, %c0_i32_0 : i32, i32, i32
  }
}

</mosaic_0001>

<bundles_post_ra>
// kernel: vae_encode_sample.1
= control target key start
LH: loop header
LB: loop body
LE: loop exit
PB: predicated region body
PF: predicated region fallthrough
CT: control target
= control target key end

     0   :  { %s7748_s29 = smov 0   ;;  %s9673_s0 = inlined_call_operand.vmem [shape: bf16[2,16,256], index: 0, kind: input, shape index: {}]   ;;  %s9674_s1 = inlined_call_operand.vmem [shape: f32[2,4,64], index: 1, kind: input, shape index: {}]   ;;  %s9675_s2 = inlined_call_operand.vmem [shape: bf16[32,144], index: 2, kind: input, shape index: {}]   ;;  %s9676_s3 = inlined_call_operand.vmem [shape: bf16[5,32,288], index: 3, kind: input, shape index: {}]   ;;  %s9677_s4 = inlined_call_operand.vmem [shape: f32[32,1], index: 4, kind: input, shape index: {}]   ;;  %s9678_s5 = inlined_call_operand.vmem [shape: f32[32,5], index: 5, kind: input, shape index: {}]   ;;  %s9679_s6 = inlined_call_operand.vmem [shape: f32[32,5], index: 6, kind: input, shape index: {}]   ;;  %s9680_s7 = inlined_call_operand.vmem [shape: f32[32,5], index: 7, kind: input, shape index: {}]   ;;  %s9681_s8 = inlined_call_operand.vmem [shape: f32[32,32], index: 8, kind: input, shape index: {}]   ;;  %s9682_s9 = inlined_call_operand.vmem [shape: bf16[8,288], index: 9, kind: input, shape index: {}]   ;;  %s9683_s10 = inlined_call_operand.vmem [shape: f32[8,1], index: 10, kind: input, shape index: {}]   ;;  %s9684_s11 = inlined_call_operand.vmem [shape: bf16[9,256], index: 11, kind: input, shape index: {}]   ;;  %s9685_s12 = inlined_call_operand.vmem [shape: bf16[9,64], index: 12, kind: input, shape index: {}]   ;;  %s9686_s13 = inlined_call_operand.vmem [shape: bf16[256,64], index: 13, kind: input, shape index: {}]   ;;  %s9687_s14 = inlined_call_operand.vmem [shape: f32[2,4,64], index: 14, kind: output, shape index: {}]  }
   0x1 LB: > { %s6721_s30 = sadd.s32 4294967295, %s7650_s29   ;;  %p6725_p0 = scmp.ge.s32.totalorder %s7650_s29, 1  ;;  %s7650_s29 = sphi %s7748_s29, %s24_s29  }
   0x2   : > { %p421_p1 = scmp.lt.s32.totalorder %s7650_s29, 3 }
   0x4   : > { %p422_p2 = pnand %p6725_p0, %p421_p1 }
   0x5   : > { %v513_v0 = vld [vmem:[%s9684_s11] sm:$0x11] (!%p422_p2)  ;;  %v522_v1 = vlaneseq (!%p422_p2)  ;;  %v621_v7 = vld [vmem:[%s9684_s11] sm:$0x22] (!%p422_p2)  ;;  %v733_v17 = vld [vmem:[%s9684_s11] sm:$0x44] (!%p422_p2) }
   0x6   : > { %425 = sbr.rel (%p422_p2) target bundleno = 6694 (0x1a26), region = 76  ;;  %v566_v2 = vld [vmem:[%s9684_s11] sm:$0x11] (!%p422_p2)  ;;  %v6732_v3 = vcombine.low (!%p422_p2), %v513_v0, %v513_v0  ;;  %v6733_v4 = vcombine.high (!%p422_p2), %v513_v0, %v513_v0  ;;  %v674_v9 = vld [vmem:[%s9684_s11] sm:$0x22] (!%p422_p2)  ;;  %v6736_v15 = vcombine.low (!%p422_p2), %v621_v7, %v621_v7  ;;  %v6737_v16 = vcombine.high (!%p422_p2), %v621_v7, %v621_v7  ;;  %p470_p3 = scmp.lt.s32.totalorder (!%p422_p2), %s6721_s30, 1 }
   0x7   : > { %v6734_v5 = vcombine.low (!%p422_p2), %v566_v2, %v566_v2  ;;  %v6735_v6 = vcombine.high (!%p422_p2), %v566_v2, %v566_v2  ;;  %v523_v8 = vshrl.u32 (!%p422_p2), %v522_v1, 7  ;;  %v6739_v20 = vcombine.high (!%p422_p2), %v674_v9, %v674_v9  ;;  %v837_v25 = vld [vmem:[%s9684_s11] sm:$0x88] (!%p422_p2)  ;;  %s7652_s27 = smov (!%p422_p2), 111   ;;  %s7653_s28 = smov (!%p422_p2), 112  }
   0x8   : > { %v520_v10 = vpack.i.b16 (!%p422_p2), %v6732_v3, %v6732_v3  ;;  %v527_v14 = vpack.i.b16 (!%p422_p2), %v6733_v4, %v6733_v4  ;;  %v6738_v21 = vcombine.low (!%p422_p2), %v674_v9, %v674_v9  ;;  %v628_v27 = vpack.i.b16 (!%p422_p2), %v6736_v15, %v6736_v15  ;;  %v786_v37 = vld [vmem:[%s9684_s11] sm:$0x88] (!%p422_p2)  ;;  %s9698_s21 = smov (!%p422_p2), 113   ;;  %v890_v53 = vld [vmem:[%s9684_s11 + $0x8] sm:$0x11] (!%p422_p2)  ;;  %s9694_s24 = smov (!%p422_p2), 127  }
   0x9   : > { %v573_v11 = vshrl.u32 (!%p422_p2), %v6734_v5, 16  ;;  %v581_v12 = vshrl.u32 (!%p422_p2), %v6735_v6, 16  ;;  %v7768_v13 = vsub.s32 (!%p422_p2), 0, %v523_v8  ;;  %v7777_v24 = vsub.s32 (!%p422_p2), 1, %v523_v8  ;;  %s9696_s25 = smov (!%p422_p2), 1   ;;  %s9692_s26 = smov (!%p422_p2), 15  }
   0xa   : > { %v681_v28 = vshrl.u32 (!%p422_p2), %v6738_v21, 16  ;;  %v6740_v29 = vcombine.low (!%p422_p2), %v733_v17, %v733_v17  ;;  %v635_v31 = vpack.i.b16 (!%p422_p2), %v6737_v16, %v6737_v16  ;;  %v689_v32 = vshrl.u32 (!%p422_p2), %v6739_v20, 16  ;;  %s9688_s16 = smov (!%p422_p2), 17   ;;  %s9712_s22 = smov (!%p422_p2), 16  }
   0xb   : > { %v574_v18 = vpack.i.b16 (!%p422_p2), %v573_v11, %v573_v11  ;;  %v582_v19 = vpack.i.b16 (!%p422_p2), %v581_v12, %v581_v12  ;;  %v525_v22 = vrot.slane (!%p422_p2), %v520_v10, %v7768_v13  ;;  %v532_v26 = vrot.slane (!%p422_p2), %v527_v14, %v7768_v13  ;;  %s9710_s23 = smov (!%p422_p2), 119   ;;  %s9704_s17 = smov (!%p422_p2), 7  }
   0xc   : > { %v6741_v33 = vcombine.high (!%p422_p2), %v733_v17, %v733_v17  ;;  %v633_v34 = vrot.slane (!%p422_p2), %v628_v27, %v7777_v24  ;;  %v682_v35 = vpack.i.b16 (!%p422_p2), %v681_v28, %v681_v28  ;;  %v740_v36 = vshrl.u32 (!%p422_p2), %v6740_v29, 16 }
   0xd   : > { %v579_v23 = vrot.slane %v574_v18, %v7768_v13  ;;  %s9725_s30 = smov (!%p470_p3, %s6721_s30), 1  ;;  %535 = vrot.lane.b32.xlu0 %v525_v22, %s7652_s27  ;;  %v587_v30 = vrot.slane %v582_v19, %v7768_v13  ;;  %v6744_v38 = vcombine.low %v837_v25, %v837_v25  ;;  %v640_v39 = vrot.slane %v635_v31, %v7777_v24 }
   0xe   : > { %s6944_s15 = sshll.u32 %s9725_s30, 4  ;;  %v690_v40 = vpack.i.b16 %v689_v32, %v689_v32  ;;  %v7803_v41 = vsub.s32 2, %v523_v8  ;;  %v748_v42 = vshrl.u32 %v6741_v33, 16  ;;  %v7805_v43 = vsub.s32 3, %v523_v8  ;;  %s6728_s19 = sshll.u32 %s9725_s30, 2 }
   0xf   : > { %590 = vrot.lane.b32.xlu1 %v579_v23, %s7653_s28  ;;  %s7794_s18 = scalar_lea.vmem %s9673_s0, %s6944_s15  ;;  %v7654_v44 = vmov 0   ;;  %v687_v45 = vrot.slane %v682_v35, %v7777_v24  ;;  %v741_v46 = vpack.i.b16 %v740_v36, %v740_v36  ;;  %v6742_v47 = vcombine.low %v786_v37, %v786_v37  ;;  %s9690_s15 = smov 16  }
  0x10   : > { %484 = vst [vmem:[#allocation2] sm:$0xff] %v7654_v44  ;;  %7314 = vset.pattern.permute.xlu1 %v7654_v44  ;;  %7313 = vset.pattern.permute.xlu0 %v7654_v44  ;;  %v844_v48 = vshrl.u32 %v6744_v38, 16  ;;  %v695_v49 = vrot.slane %v690_v40, %v7777_v24  ;;  %v749_v50 = vpack.i.b16 %v748_v42, %v748_v42  ;;  %v7836_v10 = vld [vmem:[%s7794_s18 + $0x4] ss:$8 sps:$4 sm:$0xff]   ;;  %vm539_vm0 = vcmask 908288  }
  0x11   : > { %537 = vrot.lane.b32.xlu0 %v532_v26, %s7652_s27  ;;  %v6743_v51 = vcombine.high %v786_v37, %v786_v37  ;;  %v6745_v52 = vcombine.high %v837_v25, %v837_v25  ;;  %v746_v54 = vrot.slane %v741_v46, %v7803_v41  ;;  %v793_v55 = vpack.i.b16 %v6742_v47, %v6742_v47  ;;  %v7842_v18 = vld [vmem:[%s7794_s18] ss:$8 sps:$4 sm:$0xff]   ;;  %s9713_s18 = smov 17  }
  0x12   : > { %v754_v56 = vrot.slane %v749_v50, %v7803_v41  ;;  %v845_v60 = vpack.i.b16 %v844_v48, %v844_v48  ;;  %v6746_v61 = vcombine.low %v890_v53, %v890_v53  ;;  %v6747_v0 = vcombine.high %v890_v53, %v890_v53 }
  0x13   : > { %592 = vrot.lane.b32.xlu1 %v587_v30, %s7653_s28  ;;  %v800_v57 = vpack.i.b16 %v6743_v51, %v6743_v51  ;;  %v852_v58 = vshrl.u32 %v6745_v52, 16  ;;  %v798_v59 = vrot.slane %v793_v55, %v7805_v43  ;;  %vm594_vm1 = vcmask 916480  }
  0x14   : > { %v850_v1 = vrot.slane %v845_v60, %v7805_v43  ;;  %v897_v2 = vpack.i.b16 %v6746_v61, %v6746_v61  ;;  %v904_v4 = vpack.i.b16 %v6747_v0, %v6747_v0  ;;  %vm647_vm2 = vcmask 924672   ;;  %v495_v0 = vld [vmem:[%s9677_s4 + $0x8] sm:$0xff] }
  0x15   : > { %643 = vrot.lane.b32.xlu0 %v633_v34, %s9698_s21  ;;  %v805_v62 = vrot.slane %v800_v57, %v7805_v43  ;;  %v853_v63 = vpack.i.b16 %v852_v58, %v852_v58  ;;  %vm702_vm3 = vcmask 1039360   ;;  %vm664_vm4 = vcmask 121856  }
  0x16   : > { %v902_v5 = vrot.slane %v897_v2, %v7768_v13  ;;  %v909_v6 = vrot.slane %v904_v4, %v7768_v13  ;;  %vm719_vm5 = vcmask 7168   ;;  %vm556_vm6 = vcmask 138240   ;;  %v496_v2 = vld [vmem:[%s9677_s4 + $0x10] sm:$0xff] }
  0x17   : > { %645 = vrot.lane.b32.xlu1 %v640_v39, %s9698_s21  ;;  %v858_v3 = vrot.slane %v853_v63, %v7805_v43  ;;  %vm611_vm7 = vcmask 130048   ;;  %v494_v63 = vld [vmem:[%s9677_s4] sm:$0xff]  ;;  %vm1104_vm8 = vcmask 261120   ;;  %vm1091_vm9 = vcmask 15368  }
  0x18   : > { %vm4400_vm10 = vcmask 523264   ;;  %vm4763_vm11 = vcmask 72704   ;;  %vm4803_vm12 = vcmask 64512   ;;  %vm4842_vm13 = vcmask 56320  }
  0x19   : > { %698 = vrot.lane.b32.xlu0 %v687_v45, %s9694_s24  ;;  %vm7672_vm14 = vmmov 0   ;;  %vm6654_vm15 = vcmask 519168  }
  0x1b   : > { %700 = vrot.lane.b32.xlu1 %v695_v49, %s9694_s24 }
  0x1d   : > { %757 = vrot.lane.b32.xlu0 %v746_v54, %s9696_s25 }
  0x1f   : > { %759 = vrot.lane.b32.xlu1 %v754_v56, %s9696_s25  ;;  %v7374_v56 = vld [vmem:[%s9675_s2 + $0x4] ss:$8 sps:$4 sm:$0xff]  }
  0x20   : > { %6752 = vmatprep.mubr.msk.bf16.mxu0 %vm611_vm7, %v7374_v56 }
  0x21   : > { %808 = vrot.lane.b32.xlu0 %v798_v59, %s9692_s26 }
  0x23   : > { %810 = vrot.lane.b32.xlu1 %v805_v62, %s9692_s26 }
  0x25   : > { %861 = vrot.lane.b32.xlu0 %v850_v1, %s9690_s15  ;;  %v497_v1 = vld [vmem:[%s9677_s4 + $0x18] sm:$0xff] }
  0x27   : > { %863 = vrot.lane.b32.xlu1 %v858_v3, %s9690_s15 }
  0x29   : > { %912 = vrot.lane.b32.xlu0 %v902_v5, %s9688_s16 }
  0x2b   : > { %914 = vrot.lane.b32.xlu1 %v909_v6, %s9688_s16 }
  0x7f   : > { %v536_v7 = vpop.permute.xlu0 %535 }
  0x80   : > { %v544_v8 = vmul.bf16 0, %v536_v7 }
  0x81   : > { %v591_v9 = vpop.permute.xlu1 %590 }
  0x82   : > { %550 = vrot.lane.b32.xlu0 %v544_v8, %s9688_s16  ;;  %v599_v22 = vmul.bf16 0, %v591_v9 }
  0x83   : > { %v538_v11 = vpop.permute.xlu0 %537 }
  0x84   : > { %v546_v12 = vmul.bf16 %v7836_v10, %v538_v11  ;;  %v540_v19 = vsel %vm539_vm0, %v536_v7, %v538_v11 }
  0x85   : > { %v593_v14 = vpop.permute.xlu1 %592  ;;  %v545_v21 = vmul.bf16 %v7842_v18, %v540_v19 }
  0x86   : > { %554 = vrot.lane.b32.xlu1 %v546_v12, %s9688_s16  ;;  %v595_v23 = vsel %vm594_vm1, %v591_v9, %v593_v14  ;;  %v601_v27 = vmul.bf16 %v7836_v10, %v593_v14 }
  0x87   : > { %v644_v15 = vpop.permute.xlu0 %643  ;;  %v600_v29 = vmul.bf16 %v7842_v18, %v595_v23 }
  0x88   : > { %v652_v16 = vmul.bf16 0, %v644_v15 }
  0x89   : > { %v646_v17 = vpop.permute.xlu1 %645 }
  0x8a   : > { %v654_v20 = vmul.bf16 %v7836_v10, %v646_v17  ;;  %658 = vrot.lane.b32.xlu0 %v652_v16, %s9692_s26  ;;  %v648_v28 = vsel %vm647_vm2, %v644_v15, %v646_v17 }
  0x8b   : > { %v699_v26 = vpop.permute.xlu0 %698  ;;  %v653_v33 = vmul.bf16 %v7842_v18, %v648_v28 }
  0x8c   : > { %662 = vrot.lane.b32.xlu1 %v654_v20, %s9692_s26  ;;  %v707_v30 = vmul.bf16 0, %v699_v26 }
  0x8d   : > { %v701_v25 = vpop.permute.xlu1 %700 }
  0x8e   : > { %552 = vrot.lane.b32.xlu0 %v545_v21, %s9688_s16  ;;  %v709_v34 = vmul.bf16 %v7836_v10, %v701_v25  ;;  %v703_v35 = vsel %vm702_vm3, %v699_v26, %v701_v25  ;;  %s9717_s16 = smov 1  }
  0x8f   : > { %v758_v32 = vpop.permute.xlu0 %757  ;;  %v708_v36 = vmul.bf16 %v7842_v18, %v703_v35 }
  0x90   : > { %605 = vrot.lane.b32.xlu1 %v599_v22, %s9690_s15  ;;  %v765_v39 = vmul.bf16 %v7842_v18, %v758_v32 }
  0x91   : > { %v760_v31 = vpop.permute.xlu1 %759 }
  0x92   : > { %609 = vrot.lane.b32.xlu0 %v601_v27, %s9690_s15  ;;  %v767_v40 = vmul.bf16 0, %v760_v31  ;;  %v761_v49 = vsel %vm719_vm5, %v758_v32, %v760_v31 }
  0x93   : > { %v809_v38 = vpop.permute.xlu0 %808  ;;  %v766_v50 = vmul.bf16 %v7836_v10, %v761_v49  ;;  %v7375_v49 = vld [vmem:[%s9675_s2 + $0x14] ss:$8 sps:$4 sm:$0xff]  }
  0x94   : > { %607 = vrot.lane.b32.xlu1 %v600_v29, %s9690_s15  ;;  %v816_v51 = vmul.bf16 %v7842_v18, %v809_v38  ;;  %s9716_s15 = smov 113  }
  0x95   : > { %v811_v37 = vpop.permute.xlu1 %810 }
  0x96   : > { %660 = vrot.lane.b32.xlu0 %v653_v33, %s9692_s26  ;;  %v812_v42 = vsel %vm664_vm4, %v809_v38, %v811_v37  ;;  %v818_v45 = vmul.bf16 0, %v811_v37 }
  0x97   : > { %v817_v46 = vmul.bf16 %v7836_v10, %v812_v42  ;;  %v862_v48 = vpop.permute.xlu0 %861 }
  0x98   : > { %713 = vrot.lane.b32.xlu1 %v707_v30, %s9696_s25  ;;  %v869_v54 = vmul.bf16 %v7842_v18, %v862_v48 }
  0x99   : > { %v864_v47 = vpop.permute.xlu1 %863 }
  0x9a   : > { %717 = vrot.lane.b32.xlu0 %v709_v34, %s9696_s25  ;;  %v871_v55 = vmul.bf16 0, %v864_v47  ;;  %v865_v58 = vsel %vm611_vm7, %v862_v48, %v864_v47  ;;  %v7372_v48 = vld [vmem:[%s9675_s2] ss:$8 sps:$4 sm:$0xff]  }
  0x9b   : > { %v913_v53 = vpop.permute.xlu0 %912  ;;  %v870_v60 = vmul.bf16 %v7836_v10, %v865_v58 }
  0x9c   : > { %715 = vrot.lane.b32.xlu1 %v708_v36, %s9696_s25  ;;  %v920_v62 = vmul.bf16 %v7842_v18, %v913_v53 }
  0x9d   : > { %v915_v52 = vpop.permute.xlu1 %914 }
  0x9e   : > { %771 = vrot.lane.b32.xlu0 %v765_v39, %s9694_s24  ;;  %v916_v57 = vsel %vm556_vm6, %v913_v53, %v915_v52  ;;  %v922_v61 = vmul.bf16 0, %v915_v52 }
  0x9f   : > { %v921_v59 = vmul.bf16 %v7836_v10, %v916_v57 }
  0xa0   : > { %775 = vrot.lane.b32.xlu1 %v767_v40, %s9694_s24 }
  0xa2   : > { %826 = vrot.lane.b32.xlu0 %v818_v45, %s9698_s21 }
  0xa4   : > { %824 = vrot.lane.b32.xlu1 %v817_v46, %s9698_s21 }
  0xa6   : > { %773 = vrot.lane.b32.xlu0 %v766_v50, %s9694_s24  ;;  %v7377_v50 = vld [vmem:[%s9675_s2 + $0x10] ss:$8 sps:$4 sm:$0xff]  }
  0xa8   : > { %822 = vrot.lane.b32.xlu1 %v816_v51, %s9698_s21 }
  0xaa   : > { %875 = vrot.lane.b32.xlu0 %v869_v54, %s7653_s28 }
  0xac   : > { %879 = vrot.lane.b32.xlu1 %v871_v55, %s7653_s28 }
  0xae   : > { %877 = vrot.lane.b32.xlu0 %v870_v60, %s7653_s28 }
  0xb0   : > { %928 = vrot.lane.b32.xlu1 %v921_v59, %s7652_s27 }
  0xb2   : > { %930 = vrot.lane.b32.xlu0 %v922_v61, %s7652_s27 }
  0xb4   : > { %926 = vrot.lane.b32.xlu1 %v920_v62, %s7652_s27 }
  0xb6   : > { %958 = vperm.xlu0 %7313, %v494_v63  }
  0xb8   : > { %963 = vperm.xlu1 %7314, %v495_v0  }
  0xba   : > { %973 = vperm.xlu0 %7313, %v497_v1  }
  0xbc   : > { %968 = vperm.xlu1 %7314, %v496_v2  }
  0xf4   : > { %v551_v3 = vpop.permute.xlu0 %550 }
  0xf8   : > { %v555_v4 = vpop.permute.xlu1 %554 }
  0xfc   : > { %v659_v5 = vpop.permute.xlu0 %658 }
  0xfe   : > { %v663_v6 = vpop.permute.xlu1 %662 }
 0x100   : > { %v553_v7 = vpop.permute.xlu0 %552 }
 0x101   : > { %v557_v8 = vsel %vm556_vm6, %v551_v3, %v553_v7  ;;  %v558_v9 = vsel %vm556_vm6, %v553_v7, %v555_v4 }
 0x102   : > { %v606_v11 = vpop.permute.xlu1 %605  ;;  %1001 = vmatprep.subr.bf16.mxu0 %v558_v9 }
 0x103   : > { %1002 = vmatpush1.bf16.msra.mxu0 %v557_v8 }
 0x104   : > { %v610_v12 = vpop.permute.xlu0 %609 }
 0x106   : > { %v608_v14 = vpop.permute.xlu1 %607 }
 0x107   : > { %v612_v15 = vsel %vm611_vm7, %v606_v11, %v608_v14  ;;  %v613_v16 = vsel %vm611_vm7, %v608_v14, %v610_v12 }
 0x108   : > { %1003 = vmatprep.subr.bf16.mxu0 %v613_v16  ;;  %v661_v17 = vpop.permute.xlu0 %660 }
 0x109   : > { %1004 = vmatpush1.bf16.msra.mxu0 %v612_v15  ;;  %v666_v19 = vsel %vm664_vm4, %v661_v17, %v663_v6  ;;  %v665_v21 = vsel %vm664_vm4, %v659_v5, %v661_v17 }
 0x10a   : > { %v714_v20 = vpop.permute.xlu1 %713  ;;  %1005 = vmatprep.subr.bf16.mxu0 %v666_v19 }
 0x10c   : > { %v718_v22 = vpop.permute.xlu0 %717 }
 0x10d   : > { %1006 = vmatpush1.bf16.msra.mxu0 %v665_v21 }
 0x10e   : > { %v716_v23 = vpop.permute.xlu1 %715 }
 0x10f   : > { %v720_v25 = vsel %vm719_vm5, %v714_v20, %v716_v23  ;;  %v721_v26 = vsel %vm719_vm5, %v716_v23, %v718_v22 }
 0x110   : > { %1007 = vmatprep.subr.bf16.mxu0 %v721_v26  ;;  %v772_v27 = vpop.permute.xlu0 %771 }
 0x111   : > { %1008 = vmatpush1.bf16.msra.mxu0 %v720_v25 }
 0x112   : > { %v776_v28 = vpop.permute.xlu1 %775  ;;  %1009 = vmatprep.subr.bf16.mxu0 %v7836_v10 }
 0x114   : > { %v827_v29 = vpop.permute.xlu0 %826 }
 0x115   : > { %1010 = vmatpush1.bf16.msra.mxu0 %v7842_v18 }
 0x116   : > { %v825_v30 = vpop.permute.xlu1 %824 }
 0x117   : > { %v829_v35 = vsel %vm647_vm2, %v825_v30, %v827_v29 }
 0x118   : > { %v774_v31 = vpop.permute.xlu0 %773 }
 0x119   : > { %v777_v32 = vsel %vm702_vm3, %v772_v27, %v774_v31  ;;  %v778_v33 = vsel %vm702_vm3, %v774_v31, %v776_v28  ;;  %v1096_v27 = vld [vmem:[%s9681_s8] sm:$0xff] }
 0x11a   : > { %v823_v34 = vpop.permute.xlu1 %822  ;;  %1011 = vmatprep.subr.bf16.mxu0 %v778_v33 }
 0x11b   : > { %1012 = vmatpush1.bf16.msra.mxu0 %v777_v32  ;;  %v828_v38 = vsel %vm647_vm2, %v823_v34, %v825_v30 }
 0x11c   : > { %v876_v36 = vpop.permute.xlu0 %875  ;;  %1013 = vmatprep.subr.bf16.mxu0 %v829_v35 }
 0x11e   : > { %v880_v37 = vpop.permute.xlu1 %879 }
 0x11f   : > { %1014 = vmatpush1.bf16.msra.mxu0 %v828_v38 }
 0x120   : > { %v878_v10 = vpop.permute.xlu0 %877 }
 0x121   : > { %v881_v18 = vsel %vm594_vm1, %v876_v36, %v878_v10  ;;  %v882_v39 = vsel %vm594_vm1, %v878_v10, %v880_v37 }
 0x122   : > { %v929_v40 = vpop.permute.xlu1 %928  ;;  %1015 = vmatprep.subr.bf16.mxu0 %v882_v39 }
 0x123   : > { %1016 = vmatpush1.bf16.msra.mxu0 %v881_v18 }
 0x124   : > { %v931_v42 = vpop.permute.xlu0 %930 }
 0x125   : > { %v933_v45 = vsel %vm539_vm0, %v929_v40, %v931_v42  ;;  %v1098_v42 = vld [vmem:[%s9681_s8 + $0x10] sm:$0xff] }
 0x126   : > { %v927_v46 = vpop.permute.xlu1 %926  ;;  %1017 = vmatprep.subr.bf16.mxu0 %v933_v45  ;;  %v1099_v45 = vld [vmem:[%s9681_s8 + $0x18] sm:$0xff] }
 0x127   : > { %v932_v47 = vsel %vm539_vm0, %v927_v46, %v929_v40  ;;  %v1097_v40 = vld [vmem:[%s9681_s8 + $0x8] sm:$0xff] }
 0x128   : > { %1018 = vmatpush1.bf16.msra.mxu0 %v932_v47 }
 0x12b   : > { %1034 = vmatmul.mubr.bf16.vlgmr.msra.gmra.mrb[0].mxu0 %v7372_v48 }
 0x12c   : > { %6753 = vmatprep.mubr.msk.bf16.mxu0 %vm611_vm7, %v7375_v49 }
 0x133   : > { %1044 = vmatmul.mubr.bf16.gmra.mrb[4].mxu0 %v7377_v50 }
 0x134   : > { %7110 = vmatprep.mubr.msk.f32.mxu0 %vm1104_vm8, %v1096_v27 }
 0x135   : > { %v959_v51 = vpop.permute.xlu0 %958 }
 0x137   : > { %v964_v55 = vpop.permute.xlu1 %963 }
 0x139   : > { %v974_v8 = vpop.permute.xlu0 %973 }
 0x13b   : > { %v969_v3 = vpop.permute.xlu1 %968 }
 0x1fe   : > { %v1035_v52 = vpop.f32.mrb[0].mxu0 }
 0x1ff   : > { %v7933_v53 = vadd.f32 %v1035_v52, %v959_v51  ;;  %v1037_v54 = vpop.f32.mrb[1].mxu0 }
 0x200   : > { %v7935_v56 = vadd.f32 %v1037_v54, %v959_v51  ;;  %v1039_v57 = vpop.f32.mrb[2].mxu0 }
 0x201   : > { %v7937_v58 = vadd.f32 %v1039_v57, %v964_v55  ;;  %v1041_v59 = vpop.f32.mrb[3].mxu0  ;;  %v1071_v1 = vmul.f32 %v7933_v53, %v7933_v53 }
 0x202   : > { %v7939_v60 = vadd.f32 %v1041_v59, %v964_v55  ;;  %v1054_v61 = vadd.f32 %v7935_v56, %v7933_v53  ;;  %v1072_v2 = vmul.f32 %v7935_v56, %v7935_v56 }
 0x203   : > { %v1073_v62 = vmul.f32 %v7937_v58, %v7937_v58 }
 0x204   : > { %1055 = vadd.xlane.f32.xlu1 %v1054_v61  ;;  %v1057_v63 = vadd.f32 %v7939_v60, %v7937_v58  ;;  %v1074_v0 = vmul.f32 %v7939_v60, %v7939_v60  ;;  %v1079_v12 = vadd.f32 %v1072_v2, %v1071_v1  ;;  %v7661_v1 = vmov 1   ;;  %v1330_v2 = vld [vmem:[%s9680_s7] sm:$0xff] }
 0x206   : > { %v1045_v4 = vpop.f32.mrb[4].mxu0  ;;  %1058 = vadd.xlane.f32.xlu0 %v1057_v63  ;;  %v1082_v5 = vadd.f32 %v1074_v0, %v1073_v62  ;;  %v1298_v62 = vld [vmem:[%s9679_s6] sm:$0xff]  ;;  %v1300_v63 = vld [vmem:[%s9679_s6 + $0x10] sm:$0xff]  ;;  %v1299_v0 = vld [vmem:[%s9679_s6 + $0x8] sm:$0xff] }
 0x207   : > { %v7953_v6 = vadd.f32 %v1045_v4, %v969_v3  ;;  %v1047_v7 = vpop.f32.mrb[5].mxu0  ;;  %v1301_v4 = vld [vmem:[%s9679_s6 + $0x18] sm:$0xff] }
 0x208   : > { %v7955_v9 = vadd.f32 %v1047_v7, %v969_v3  ;;  %v1049_v11 = vpop.f32.mrb[6].mxu0  ;;  %1083 = vadd.xlane.f32.xlu1 %v1082_v5  ;;  %v1331_v3 = vld [vmem:[%s9680_s7 + $0x8] sm:$0xff] }
 0x209   : > { %v7957_v14 = vadd.f32 %v1049_v11, %v974_v8  ;;  %v1051_v15 = vpop.f32.mrb[7].mxu0  ;;  %v1075_v19 = vmul.f32 %v7953_v6, %v7953_v6 }
 0x20a   : > { %v7959_v16 = vadd.f32 %v1051_v15, %v974_v8  ;;  %1080 = vadd.xlane.f32.xlu0 %v1079_v12  ;;  %v1060_v17 = vadd.f32 %v7955_v9, %v7953_v6  ;;  %v1076_v21 = vmul.f32 %v7955_v9, %v7955_v9 }
 0x20b   : > { %v1077_v22 = vmul.f32 %v7957_v14, %v7957_v14 }
 0x20c   : > { %v1063_v20 = vadd.f32 %v7959_v16, %v7957_v14  ;;  %v1078_v23 = vmul.f32 %v7959_v16, %v7959_v16  ;;  %v1085_v25 = vadd.f32 %v1076_v21, %v1075_v19 }
 0x20e   : > { %1061 = vadd.xlane.f32.xlu0 %v1060_v17  ;;  %1064 = vadd.xlane.f32.xlu1 %v1063_v20  ;;  %v1088_v26 = vadd.f32 %v1078_v23, %v1077_v22 }
 0x212   : > { %1086 = vadd.xlane.f32.xlu0 %v1085_v25  ;;  %1089 = vadd.xlane.f32.xlu1 %v1088_v26 }
 0x291   : > { %v1056_v28 = vpop.xlane.xlu1 %1055 }
 0x292   : > { %1067 = vst.msk [vmem:[#allocation4] sm:$0xff] %vm719_vm5, %v1056_v28 }
 0x293   : > { %v1059_v29 = vpop.xlane.xlu0 %1058 }
 0x294   : > { %1068 = vst.msk [vmem:[#allocation4 + $0x8] sm:$0xff] %vm719_vm5, %v1059_v29  ;;  %v1444_v29 = vld [vmem:[%s9684_s11] sm:$0x11] }
 0x295   : > { %v1084_v30 = vpop.xlane.xlu1 %1083 }
 0x296   : > { %1093 = vst.msk [vmem:[#allocation4 + $0x8] sm:$0xff] %vm1091_vm9, %v1084_v30 }
 0x297   : > { %v1081_v31 = vpop.xlane.xlu0 %1080 }
 0x298   : > { %1092 = vst.msk [vmem:[#allocation4] sm:$0xff] %vm1091_vm9, %v1081_v31  ;;  %v1516_v31 = vld [vmem:[%s9684_s11] sm:$0x11] }
 0x29b   : > { %v1065_v32 = vpop.xlane.xlu1 %1064  ;;  %v1062_v33 = vpop.xlane.xlu0 %1061 }
 0x29c   : > { %1070 = vst.msk [vmem:[#allocation4 + $0x18] sm:$0xff] %vm719_vm5, %v1065_v32  ;;  %1069 = vst.msk [vmem:[#allocation4 + $0x10] sm:$0xff] %vm719_vm5, %v1062_v33  ;;  %v6767_v33 = vcombine.high %v1444_v29, %v1444_v29 }
 0x29d   : > { %v1101_v37 = vld [vmem:[#allocation4 + $0x8] sm:$0xff] }
 0x29f   : > { %v1090_v34 = vpop.xlane.xlu1 %1089  ;;  %v1087_v35 = vpop.xlane.xlu0 %1086  ;;  %v1100_v36 = vld [vmem:[#allocation4] sm:$0xff] }
 0x2a0   : > { %1095 = vst.msk [vmem:[#allocation4 + $0x18] sm:$0xff] %vm1091_vm9, %v1090_v34  ;;  %1094 = vst.msk [vmem:[#allocation4 + $0x10] sm:$0xff] %vm1091_vm9, %v1087_v35  ;;  %v7196_v38 = vpack.c.bf16 %v1101_v37, %v1100_v36  ;;  %v6769_v34 = vcombine.high %v1516_v31, %v1516_v31  ;;  %v6766_v35 = vcombine.low %v1444_v29, %v1444_v29 }
 0x2a1   : > { %v6768_v36 = vcombine.low %v1516_v31, %v1516_v31 }
 0x2a2   : > { %7197 = vmatprep.subr.bf16.mxu0 %v7196_v38 }
 0x2a3   : > { %7199 = vmatpush3.bf16.msra.mxu0 %v7196_v38 }
 0x2a7   : > { %v1102_v10 = vld [vmem:[#allocation4 + $0x10] sm:$0xff]  ;;  %v1103_v18 = vld [vmem:[#allocation4 + $0x18] sm:$0xff] }
 0x2a8   : > { %v7200_v39 = vpack.c.bf16 %v1103_v18, %v1102_v10  ;;  %v1458_v10 = vpack.i.b16 %v6767_v33, %v6767_v33  ;;  %v1531_v18 = vshrl.u32 %v6769_v34, 16 }
 0x2aa   : > { %7201 = vmatprep.subr.bf16.mxu0 %v7200_v39 }
 0x2ab   : > { %7203 = vmatpush3.bf16.msra.mxu0 %v7200_v39  ;;  %v1333_v39 = vld [vmem:[%s9680_s7 + $0x18] sm:$0xff] }
 0x2ae   : > { %7111 = vmatmul.mubr.msk.f32.vlgmr.msra.gmra.mrb[8].mxu0 %vm1104_vm8, %v1097_v40  ;;  %v1451_v40 = vpack.i.b16 %v6766_v35, %v6766_v35 }
 0x2af   : > { %7113 = vmatprep.mubr.msk.f32.mxu0 %vm1104_vm8, %v1098_v42  ;;  %v1523_v42 = vshrl.u32 %v6768_v36, 16 }
 0x2b2   : > { %7114 = vmatmul.mubr.msk.f32.gmra.mrb[10].mxu0 %vm1104_vm8, %v1099_v45  ;;  %v1590_v45 = vld [vmem:[%s9684_s11] sm:$0x22] }
 0x381   : > { %v7112_v46 = vpop.f32.mrb[8].mxu0 }
 0x382   : > { %v1203_v47 = vmul.f32 0.0009765625, %v7112_v46  ;;  %v1183_v48 = vpop.f32.mrb[9].mxu0  ;;  %v1662_v46 = vld [vmem:[%s9684_s11] sm:$0x22] }
 0x383   : > { %v1202_v49 = vmul.f32 0.0009765625, %v1183_v48  ;;  %v1463_v48 = vrot.slane %v1458_v10, %v7768_v13 }
 0x384   : > { %v1207_v50 = vmul.f32 %v1203_v47, %v1203_v47 }
 0x385   : > { %v7115_v51 = vpop.f32.mrb[10].mxu0  ;;  %v1206_v52 = vmul.f32 %v1202_v49, %v1202_v49 }
 0x386   : > { %v1205_v54 = vmul.f32 0.0009765625, %v7115_v51  ;;  %1216 = vrot.lane.b32.xlu1 %v1207_v50, %s9696_s25  ;;  %v1193_v55 = vpop.f32.mrb[11].mxu0  ;;  %v6771_v50 = vcombine.high %v1590_v45, %v1590_v45  ;;  %v6773_v51 = vcombine.high %v1662_v46, %v1662_v46 }
 0x387   : > { %v1204_v57 = vmul.f32 0.0009765625, %v1193_v55  ;;  %1214 = vrot.lane.b32.xlu0 %v1206_v52, %s9696_s25  ;;  %v1456_v52 = vrot.slane %v1451_v40, %v7768_v13  ;;  %v6770_v55 = vcombine.low %v1590_v45, %v1590_v45 }
 0x388   : > { %v1209_v59 = vmul.f32 %v1205_v54, %v1205_v54 }
 0x389   : > { %v1208_v61 = vmul.f32 %v1204_v57, %v1204_v57 }
 0x38b   : > { %1220 = vrot.lane.b32.xlu0 %v1209_v59, %s9696_s25  ;;  %1218 = vrot.lane.b32.xlu1 %v1208_v61, %s9696_s25  ;;  %v1744_v59 = vld [vmem:[%s9684_s11] sm:$0x44] }
 0x38f   : > { %1249 = vperm.xlu0 %7313, %v1203_v47   ;;  %1244 = vperm.xlu1 %7314, %v1202_v49  }
 0x393   : > { %1304 = vperm.xlu0 %7313, %v1298_v62   ;;  %1254 = vperm.xlu1 %7314, %v1204_v57   ;;  %v1604_v62 = vpack.i.b16 %v6771_v50, %v6771_v50 }
 0x397   : > { %1314 = vperm.xlu0 %7313, %v1300_v63   ;;  %1259 = vperm.xlu1 %7314, %v1205_v54   ;;  %v6775_v63 = vcombine.high %v1744_v59, %v1744_v59 }
 0x39b   : > { %1309 = vperm.xlu1 %7314, %v1299_v0   ;;  %7315 = vset.pattern.permute.xlu0 %v7661_v1 }
 0x39f   : > { %1336 = vperm.xlu1 %7314, %v1330_v2   ;;  %v1597_v2 = vpack.i.b16 %v6770_v55, %v6770_v55 }
 0x3a3   : > { %1341 = vperm.xlu1 %7314, %v1331_v3  }
 0x3a7   : > { %1319 = vperm.xlu1 %7314, %v1301_v4   ;;  %v6774_v4 = vcombine.low %v1744_v59, %v1744_v59 }
 0x3ab   : > { %7316 = vset.pattern.permute.xlu1 %v7661_v1 }
 0x3f8   : > { %v1217_v5 = vpop.permute.xlu1 %1216 }
 0x3f9   : > { %v1227_v7 = vsub.f32 %v1203_v47, %v1217_v5  ;;  %v1215_v8 = vpop.permute.xlu0 %1214  ;;  %v1332_v47 = vld [vmem:[%s9680_s7 + $0x10] sm:$0xff]  ;;  %v1609_v5 = vrot.slane %v1604_v62, %v7777_v24 }
 0x3fa   : > { %v1226_v11 = vsub.f32 %v1202_v49, %v1215_v8  ;;  %v1532_v49 = vpack.i.b16 %v1531_v18, %v1531_v18  ;;  %v1759_v8 = vshrl.u32 %v6775_v63, 16 }
 0x3fb   : > { %v1231_v12 = vmax.f32 %v1227_v7, 0.0 }
 0x3fc   : > { %v1230_v15 = vmax.f32 %v1226_v11, 0.0  ;;  %v1537_v61 = vrot.slane %v1532_v49, %v7768_v13  ;;  %v1602_v11 = vrot.slane %v1597_v2, %v7777_v24 }
 0x3fd   : > { %v1235_v17 = vadd.f32 1e-06, %v1231_v12  ;;  %v1221_v19 = vpop.permute.xlu0 %1220  ;;  %v1219_v20 = vpop.permute.xlu1 %1218 }
 0x3fe   : > { %v1234_v21 = vadd.f32 1e-06, %v1230_v15  ;;  %v1229_v22 = vsub.f32 %v1205_v54, %v1221_v19  ;;  %v1228_v23 = vsub.f32 %v1204_v57, %v1219_v20  ;;  %v1524_v54 = vpack.i.b16 %v1523_v42, %v1523_v42  ;;  %v1890_v19 = vld [vmem:[%s9684_s11] sm:$0x88] }
 0x3ff   : > { %7485 = vrsqrt.f32 %v1235_v17  ;;  %v6772_v57 = vcombine.low %v1662_v46, %v1662_v46  ;;  %v1751_v15 = vshrl.u32 %v6774_v4, 16  ;;  %v1818_v17 = vld [vmem:[%s9684_s11] sm:$0x88] }
 0x400   : > { %7487 = vrsqrt.f32 %v1234_v21  ;;  %v1233_v25 = vmax.f32 %v1229_v22, 0.0  ;;  %v1232_v26 = vmax.f32 %v1228_v23, 0.0  ;;  %v1529_v0 = vrot.slane %v1524_v54, %v7768_v13 }
 0x401   : > { %v1669_v3 = vshrl.u32 %v6772_v57, 16  ;;  %v1760_v21 = vpack.i.b16 %v1759_v8, %v1759_v8  ;;  %v6777_v22 = vcombine.high %v1818_v17, %v1818_v17  ;;  %v6779_v23 = vcombine.high %v1890_v19, %v1890_v19 }
 0x402   : > { %v1237_v27 = vadd.f32 1e-06, %v1233_v25  ;;  %v1236_v28 = vadd.f32 1e-06, %v1232_v26  ;;  %v1752_v26 = vpack.i.b16 %v1751_v15, %v1751_v15 }
 0x403   : > { %v1670_v12 = vpack.i.b16 %v1669_v3, %v1669_v3  ;;  %v1765_v29 = vrot.slane %v1760_v21, %v7803_v41  ;;  %v1905_v31 = vshrl.u32 %v6779_v23, 16 }
 0x404   : > { %7489 = vrsqrt.f32 %v1237_v27  ;;  %v6776_v27 = vcombine.low %v1818_v17, %v1818_v17 }
 0x405   : > { %7491 = vrsqrt.f32 %v1236_v28  ;;  %v1675_v25 = vrot.slane %v1670_v12, %v7777_v24  ;;  %v6778_v28 = vcombine.low %v1890_v19, %v1890_v19  ;;  %v1906_v36 = vpack.i.b16 %v1905_v31, %v1905_v31 }
 0x406   : > { %v1825_v33 = vpack.i.b16 %v6776_v27, %v6776_v27 }
 0x407   : > { %v1897_v34 = vshrl.u32 %v6778_v28, 16  ;;  %v1911_v10 = vrot.slane %v1906_v36, %v7805_v43 }
 0x409   : > { %v7486_v30 = vpop.eup %7485 }
 0x40a   : > { %v7488_v32 = vpop.eup %7487  ;;  %1277 = vperm.xlu0 %7315, %v7486_v30   ;;  %v1832_v30 = vpack.i.b16 %v6777_v22, %v6777_v22 }
 0x40b   : > { %1272 = vperm.xlu1 %7316, %v7488_v32   ;;  %v1757_v32 = vrot.slane %v1752_v26, %v7803_v41 }
 0x40c   : > { %v1837_v35 = vrot.slane %v1832_v30, %v7805_v43  ;;  %v1964_v30 = vld [vmem:[%s9684_s11 + $0x8] sm:$0x11] }
 0x40e   : > { %v7490_v37 = vpop.eup %7489  ;;  %v1250_v46 = vpop.permute.xlu0 %1249 }
 0x40f   : > { %v7492_v38 = vpop.eup %7491  ;;  %1287 = vperm.xlu0 %7315, %v7490_v37   ;;  %v1830_v37 = vrot.slane %v1825_v33, %v7805_v43  ;;  %v1265_v54 = vsub.f32 %v7939_v60, %v1250_v46 }
 0x410   : > { %1282 = vperm.xlu1 %7316, %v7492_v38   ;;  %v1898_v38 = vpack.i.b16 %v1897_v34, %v1897_v34 }
 0x412   : > { %v1903_v18 = vrot.slane %v1898_v38, %v7805_v43  ;;  %v6780_v38 = vcombine.low %v1964_v30, %v1964_v30 }
 0x413   : > { %7318 = vset.pattern.permute.xlu0 %v7654_v44 }
 0x414   : > { %7317 = vset.pattern.permute.xlu1 %v7654_v44  ;;  %1351 = vperm.xlu0 %7318, %v1333_v39   ;;  %v1677_v44 = vshrl.u32 %v6773_v51, 16  ;;  %v1245_v39 = vpop.permute.xlu1 %1244 }
 0x415   : > { %1346 = vperm.xlu1 %7317, %v1332_v47   ;;  %v1262_v55 = vsub.f32 %v7933_v53, %v1245_v39  ;;  %v1263_v57 = vsub.f32 %v7935_v56, %v1245_v39 }
 0x416   : > { %v1678_v7 = vpack.i.b16 %v1677_v44, %v1677_v44 }
 0x418   : > { %1468 = vrot.lane.b32.xlu0 %v1463_v48, %s7652_s27  ;;  %v1683_v20 = vrot.slane %v1678_v7, %v7777_v24  ;;  %v1255_v40 = vpop.permute.xlu1 %1254  ;;  %v1305_v48 = vpop.permute.xlu0 %1304 }
 0x419   : > { %1466 = vrot.lane.b32.xlu1 %v1456_v52, %s7652_s27  ;;  %v1264_v52 = vsub.f32 %v7937_v58, %v1250_v46  ;;  %v1267_v12 = vsub.f32 %v7955_v9, %v1255_v40 }
 0x41c   : > { %1542 = vrot.lane.b32.xlu0 %v1537_v61, %s7653_s28  ;;  %v1260_v42 = vpop.permute.xlu1 %1259  ;;  %v1315_v50 = vpop.permute.xlu0 %1314 }
 0x41d   : > { %1540 = vrot.lane.b32.xlu1 %v1529_v0, %s7653_s28  ;;  %v1268_v4 = vsub.f32 %v7957_v14, %v1260_v42 }
 0x420   : > { %1614 = vrot.lane.b32.xlu0 %v1609_v5, %s9698_s21  ;;  %v1310_v45 = vpop.permute.xlu1 %1309  ;;  %v1269_v5 = vsub.f32 %v7959_v16, %v1260_v42 }
 0x421   : > { %1612 = vrot.lane.b32.xlu1 %v1602_v11, %s9698_s21  ;;  %v1266_v11 = vsub.f32 %v7953_v6, %v1255_v40 }
 0x424   : > { %1688 = vrot.lane.b32.xlu0 %v1683_v20, %s9694_s24  ;;  %v1337_v47 = vpop.permute.xlu1 %1336 }
 0x425   : > { %1686 = vrot.lane.b32.xlu1 %v1675_v25, %s9694_s24 }
 0x428   : > { %1770 = vrot.lane.b32.xlu0 %v1765_v29, %s9696_s25  ;;  %v1342_v49 = vpop.permute.xlu1 %1341 }
 0x429   : > { %1768 = vrot.lane.b32.xlu1 %v1757_v32, %s9696_s25 }
 0x42c   : > { %1842 = vrot.lane.b32.xlu0 %v1837_v35, %s9692_s26  ;;  %v1320_v51 = vpop.permute.xlu1 %1319 }
 0x42d   : > { %1840 = vrot.lane.b32.xlu1 %v1830_v37, %s9692_s26 }
 0x430   : > { %1916 = vrot.lane.b32.xlu0 %v1911_v10, %s9712_s22 }
 0x431   : > { %1914 = vrot.lane.b32.xlu1 %v1903_v18, %s9712_s22 }
 0x489   : > { %v1278_v59 = vpop.permute.xlu0 %1277 }
 0x48a   : > { %v1292_v61 = vmul.f32 %v1278_v59, %v1264_v52  ;;  %v1293_v62 = vmul.f32 %v1278_v59, %v1265_v54  ;;  %v1273_v44 = vpop.permute.xlu1 %1272  ;;  %v8113_v52 = vld [vmem:[#allocation2] sm:$0xff] }
 0x48b   : > { %v1290_v63 = vmul.f32 %v1273_v44, %v1262_v55  ;;  %v1291_v0 = vmul.f32 %v1273_v44, %v1263_v57 }
 0x48c   : > { %v1324_v2 = vmul.f32 %v1310_v45, %v1292_v61  ;;  %v1325_v3 = vmul.f32 %v1310_v45, %v1293_v62 }
 0x48d   : > { %v1322_v7 = vmul.f32 %v1305_v48, %v1290_v63  ;;  %v1323_v8 = vmul.f32 %v1305_v48, %v1291_v0 }
 0x48e   : > { %v8086_v15 = vadd.f32 %v1342_v49, %v1324_v2  ;;  %v8088_v17 = vadd.f32 %v1342_v49, %v1325_v3  ;;  %v1288_v19 = vpop.permute.xlu0 %1287  ;;  %v1971_v49 = vpack.i.b16 %v6780_v38, %v6780_v38 }
 0x48f   : > { %v8090_v20 = vadd.f32 %v1337_v47, %v1322_v7  ;;  %v8092_v21 = vadd.f32 %v1337_v47, %v1323_v8  ;;  %v1296_v22 = vmul.f32 %v1288_v19, %v1268_v4  ;;  %v1297_v23 = vmul.f32 %v1288_v19, %v1269_v5  ;;  %v1283_v25 = vpop.permute.xlu1 %1282 }
 0x490   : > { %v6760_v26 = vmul.f32 -1.442695, %v8086_v15  ;;  %v6761_v27 = vmul.f32 -1.442695, %v8088_v17  ;;  %v1294_v28 = vmul.f32 %v1283_v25, %v1266_v11  ;;  %v1295_v29 = vmul.f32 %v1283_v25, %v1267_v12 }
 0x491   : > { %v6758_v31 = vmul.f32 -1.442695, %v8090_v20  ;;  %v6759_v32 = vmul.f32 -1.442695, %v8092_v21  ;;  %v1328_v33 = vmul.f32 %v1320_v51, %v1296_v22  ;;  %v1329_v34 = vmul.f32 %v1320_v51, %v1297_v23 }
 0x492   : > { %7493 = vpow2.f32 %v6760_v26  ;;  %v1326_v35 = vmul.f32 %v1315_v50, %v1294_v28  ;;  %v1327_v36 = vmul.f32 %v1315_v50, %v1295_v29  ;;  %v6781_v50 = vcombine.high %v1964_v30, %v1964_v30 }
 0x493   : > { %7495 = vpow2.f32 %v6761_v27  ;;  %v1352_v37 = vpop.permute.xlu0 %1351  ;;  %v1976_v55 = vrot.slane %v1971_v49, %v7768_v13 }
 0x494   : > { %7497 = vpow2.f32 %v6758_v31  ;;  %v8101_v10 = vadd.f32 %v1352_v37, %v1328_v33  ;;  %v8103_v18 = vadd.f32 %v1352_v37, %v1329_v34  ;;  %v1347_v39 = vpop.permute.xlu1 %1346  ;;  %v1978_v57 = vpack.i.b16 %v6781_v50, %v6781_v50 }
 0x495   : > { %7499 = vpow2.f32 %v6759_v32  ;;  %v8105_v40 = vadd.f32 %v1347_v39, %v1326_v35  ;;  %v8107_v42 = vadd.f32 %v1347_v39, %v1327_v36 }
 0x496   : > { %v6764_v45 = vmul.f32 -1.442695, %v8101_v10  ;;  %v6765_v46 = vmul.f32 -1.442695, %v8103_v18  ;;  %v1983_v5 = vrot.slane %v1978_v57, %v7768_v13 }
 0x497   : > { %v6762_v47 = vmul.f32 -1.442695, %v8105_v40  ;;  %v6763_v48 = vmul.f32 -1.442695, %v8107_v42  ;;  %v1469_v30 = vpop.permute.xlu0 %1468 }
 0x498   : > { %7501 = vpow2.f32 %v6764_v45  ;;  %v1467_v51 = vpop.permute.xlu1 %1466 }
 0x499   : > { %7503 = vpow2.f32 %v6765_v46  ;;  %v1477_v54 = vmul.bf16 %v8113_v52, %v1467_v51  ;;  %v1470_v39 = vsel %vm539_vm0, %v1467_v51, %v1469_v30 }
 0x49a   : > { %7505 = vpow2.f32 %v6762_v47 }
 0x49b   : > { %7507 = vpow2.f32 %v6763_v48  ;;  %1492 = vrot.lane.b32.xlu0 %v1477_v54, %s9713_s18  ;;  %1486 = vrot.lane.b32.xlu1 %v1477_v54, %s9713_s18  ;;  %v1543_v45 = vpop.permute.xlu0 %1542 }
 0x49c   : > { %v7494_v59 = vpop.eup %7493  ;;  %v1541_v61 = vpop.permute.xlu1 %1540 }
 0x49d   : > { %v7496_v62 = vpop.eup %7495  ;;  %v1388_v44 = vadd.f32 1.0, %v7494_v59  ;;  %v1548_v63 = vmul.bf16 %v8113_v52, %v1541_v61 }
 0x49e   : > { %v7498_v0 = vpop.eup %7497  ;;  %v1389_v2 = vadd.f32 1.0, %v7496_v62 }
 0x49f   : > { %v7500_v3 = vpop.eup %7499  ;;  %7509 = vrcp.f32 %v1388_v44  ;;  %v1386_v4 = vadd.f32 1.0, %v7498_v0  ;;  %1986 = vrot.lane.b32.xlu0 %v1976_v55, %s9713_s18  ;;  %1560 = vrot.lane.b32.xlu1 %v1548_v63, %s9712_s22  ;;  %v1615_v55 = vpop.permute.xlu0 %1614 }
 0x4a0   : > { %7511 = vrcp.f32 %v1389_v2  ;;  %v1387_v7 = vadd.f32 1.0, %v7500_v3  ;;  %v1613_v11 = vpop.permute.xlu1 %1612 }
 0x4a1   : > { %7513 = vrcp.f32 %v1386_v4  ;;  %v1620_v19 = vmul.bf16 %v8113_v52, %v1613_v11  ;;  %v1616_v57 = vsel %vm647_vm2, %v1613_v11, %v1615_v55 }
 0x4a2   : > { %v7502_v8 = vpop.eup %7501  ;;  %7515 = vrcp.f32 %v1387_v7 }
 0x4a3   : > { %v7504_v12 = vpop.eup %7503  ;;  %1566 = vrot.lane.b32.xlu0 %v1548_v63, %s9712_s22  ;;  %1988 = vrot.lane.b32.xlu1 %v1983_v5, %s9713_s18  ;;  %v1392_v26 = vadd.f32 1.0, %v7502_v8  ;;  %v1689_v2 = vpop.permute.xlu0 %1688 }
 0x4a4   : > { %v7506_v22 = vpop.eup %7505  ;;  %v1393_v23 = vadd.f32 1.0, %v7504_v12 }
 0x4a5   : > { %v7508_v25 = vpop.eup %7507  ;;  %v1390_v28 = vadd.f32 1.0, %v7506_v22 }
 0x4a6   : > { %v1391_v27 = vadd.f32 1.0, %v7508_v25  ;;  %7517 = vrcp.f32 %v1393_v23 }
 0x4a7   : > { %1632 = vrot.lane.b32.xlu1 %v1620_v19, %s9692_s26  ;;  %v1771_v22 = vpop.permute.xlu0 %1770 }
 0x4a8   : > { %7519 = vrcp.f32 %v1391_v27 }
 0x4a9   : > { %v7510_v29 = vpop.eup %7509  ;;  %7521 = vrcp.f32 %v1392_v26 }
 0x4aa   : > { %v7512_v31 = vpop.eup %7511  ;;  %v1412_v32 = vmul.f32 %v7510_v29, %v8086_v15  ;;  %7523 = vrcp.f32 %v1390_v28 }
 0x4ab   : > { %v7514_v33 = vpop.eup %7513  ;;  %v1413_v35 = vmul.f32 %v7512_v31, %v8088_v17  ;;  %v1544_v17 = vsel %vm594_vm1, %v1541_v61, %v1543_v45  ;;  %v1843_v31 = vpop.permute.xlu0 %1842 }
 0x4ac   : > { %v7516_v34 = vpop.eup %7515  ;;  %v1410_v36 = vmul.f32 %v7514_v33, %v8090_v20  ;;  %v1850_v33 = vmul.bf16 %v8113_v52, %v1843_v31 }
 0x4ad   : > { %v1411_v37 = vmul.f32 %v7516_v34, %v8092_v21 }
 0x4ae   : > { %v8131_v38 = vpack.c.bf16 %v1412_v32, %v1410_v36 }
 0x4af   : > { %v8134_v46 = vpack.c.bf16 %v1413_v35, %v1411_v37  ;;  %v1917_v36 = vpop.permute.xlu0 %1916 }
 0x4b0   : > { %v1475_v47 = vmul.bf16 %v1470_v39, %v8131_v38  ;;  %v7518_v15 = vpop.eup %7517  ;;  %v1549_v51 = vmul.bf16 %v1544_v17, %v8131_v38  ;;  %v1924_v37 = vmul.bf16 %v8113_v52, %v1917_v36 }
 0x4b1   : > { %v1476_v20 = vmul.bf16 %v1469_v30, %v8134_v46  ;;  %v1417_v21 = vmul.f32 %v7518_v15, %v8103_v18  ;;  %v1550_v62 = vmul.bf16 %v1543_v45, %v8134_v46  ;;  %v1621_v18 = vmul.bf16 %v1616_v57, %v8131_v38 }
 0x4b2   : > { %v7520_v48 = vpop.eup %7519  ;;  %1488 = vrot.lane.b32.xlu1 %v1475_v47, %s9713_s18  ;;  %v1622_v63 = vmul.bf16 %v1615_v55, %v8134_v46  ;;  %v1696_v11 = vmul.bf16 %v1689_v2, %v8134_v46 }
 0x4b3   : > { %v7522_v49 = vpop.eup %7521  ;;  %v1415_v54 = vmul.f32 %v7520_v48, %v8107_v42  ;;  %1490 = vrot.lane.b32.xlu0 %v1476_v20, %s9713_s18 }
 0x4b4   : > { %v7524_v50 = vpop.eup %7523  ;;  %v1416_v59 = vmul.f32 %v7522_v49, %v8101_v10  ;;  %v1687_v10 = vpop.permute.xlu1 %1686 }
 0x4b5   : > { %v1414_v61 = vmul.f32 %v7524_v50, %v8105_v40  ;;  %v8149_v44 = vpack.c.bf16 %v1417_v21, %v1415_v54  ;;  %v1690_v40 = vsel %vm702_vm3, %v1687_v10, %v1689_v2  ;;  %v1694_v7 = vmul.bf16 %v8113_v52, %v1687_v10 }
 0x4b6   : > { %1562 = vrot.lane.b32.xlu1 %v1549_v51, %s9712_s22  ;;  %v1695_v4 = vmul.bf16 %v1690_v40, %v8131_v38  ;;  %v7396_v51 = vld [vmem:[%s9676_s3 + $0x4] ss:$12 sps:$4 sm:$0xff]  }
 0x4b7   : > { %1564 = vrot.lane.b32.xlu0 %v1550_v62, %s9712_s22  ;;  %v8154_v42 = vpack.c.bf16 %v1416_v59, %v1414_v61  ;;  %v1479_v0 = vmul.bf16 %v1469_v30, %v8149_v44  ;;  %v1553_v5 = vmul.bf16 %v1543_v45, %v8149_v44  ;;  %v1625_v12 = vmul.bf16 %v1615_v55, %v8149_v44 }
 0x4b8   : > { %v1769_v23 = vpop.permute.xlu1 %1768  ;;  %v1699_v27 = vmul.bf16 %v1689_v2, %v8149_v44  ;;  %v1778_v30 = vmul.bf16 %v8113_v52, %v1771_v22  ;;  %2154 = vmatprep.mubr.bf16.mxu1 %v7396_v51 }
 0x4b9   : > { %v1478_v3 = vmul.bf16 %v1470_v39, %v8154_v42  ;;  %v1552_v8 = vmul.bf16 %v1544_v17, %v8154_v42  ;;  %v1772_v25 = vsel %vm719_vm5, %v1769_v23, %v1771_v22  ;;  %v1698_v28 = vmul.bf16 %v1690_v40, %v8154_v42 }
 0x4ba   : > { %1634 = vrot.lane.b32.xlu1 %v1621_v18, %s9692_s26  ;;  %v1777_v26 = vmul.bf16 %v1772_v25, %v8134_v46  ;;  %v1776_v29 = vmul.bf16 %v1769_v23, %v8131_v38  ;;  %v1780_v47 = vmul.bf16 %v1772_v25, %v8149_v44  ;;  %v1779_v48 = vmul.bf16 %v1769_v23, %v8154_v42 }
 0x4bb   : > { %1636 = vrot.lane.b32.xlu0 %v1622_v63, %s9692_s26 }
 0x4bc   : > { %v1841_v32 = vpop.permute.xlu1 %1840 }
 0x4bd   : > { %v1844_v34 = vsel %vm664_vm4, %v1841_v32, %v1843_v31  ;;  %v1848_v39 = vmul.bf16 %v1841_v32, %v8131_v38  ;;  %v1851_v50 = vmul.bf16 %v1841_v32, %v8154_v42 }
 0x4be   : > { %1496 = vrot.lane.b32.xlu1 %v1479_v0, %s9713_s18  ;;  %v1849_v35 = vmul.bf16 %v1844_v34, %v8134_v46  ;;  %v1852_v17 = vmul.bf16 %v1844_v34, %v8149_v44 }
 0x4bf   : > { %1494 = vrot.lane.b32.xlu0 %v1478_v3, %s9713_s18 }
 0x4c0   : > { %v1915_v45 = vpop.permute.xlu1 %1914 }
 0x4c1   : > { %v1918_v15 = vsel %vm611_vm7, %v1915_v45, %v1917_v36  ;;  %v1922_v20 = vmul.bf16 %v1915_v45, %v8131_v38  ;;  %v1925_v54 = vmul.bf16 %v1915_v45, %v8154_v42 }
 0x4c2   : > { %1708 = vrot.lane.b32.xlu1 %v1695_v4, %s9696_s25  ;;  %v1923_v49 = vmul.bf16 %v1918_v15, %v8134_v46  ;;  %v1926_v21 = vmul.bf16 %v1918_v15, %v8149_v44  ;;  %v1427_v4 = vld [vmem:[%s9678_s5 + $0x8] sm:$0xff] }
 0x4c3   : > { %1638 = vrot.lane.b32.xlu0 %v1620_v19, %s9692_s26  ;;  %v1624_v19 = vmul.bf16 %v1616_v57, %v8154_v42 }
 0x4c6   : > { %1570 = vrot.lane.b32.xlu1 %v1553_v5, %s9712_s22  ;;  %v1426_v5 = vld [vmem:[%s9678_s5] sm:$0xff] }
 0x4c7   : > { %1568 = vrot.lane.b32.xlu0 %v1552_v8, %s9712_s22 }
 0x4ca   : > { %1706 = vrot.lane.b32.xlu1 %v1694_v7, %s9696_s25 }
 0x4cb   : > { %1710 = vrot.lane.b32.xlu0 %v1696_v11, %s9696_s25  ;;  %v1429_v11 = vld [vmem:[%s9678_s5 + $0x18] sm:$0xff] }
 0x4ce   : > { %1642 = vrot.lane.b32.xlu1 %v1625_v12, %s9692_s26  ;;  %v1428_v12 = vld [vmem:[%s9678_s5 + $0x10] sm:$0xff] }
 0x4cf   : > { %1640 = vrot.lane.b32.xlu0 %v1624_v19, %s9692_s26  ;;  %s9715_s26 = smov 15  }
 0x4d2   : > { %1790 = vrot.lane.b32.xlu1 %v1777_v26, %s9694_s24 }
 0x4d3   : > { %1712 = vrot.lane.b32.xlu0 %v1694_v7, %s9696_s25 }
 0x4d6   : > { %1716 = vrot.lane.b32.xlu1 %v1699_v27, %s9696_s25 }
 0x4d7   : > { %1714 = vrot.lane.b32.xlu0 %v1698_v28, %s9696_s25 }
 0x4da   : > { %1788 = vrot.lane.b32.xlu1 %v1776_v29, %s9694_s24 }
 0x4db   : > { %1792 = vrot.lane.b32.xlu0 %v1778_v30, %s9694_s24 }
 0x4de   : > { %1798 = vrot.lane.b32.xlu1 %v1778_v30, %s9694_s24 }
 0x4df   : > { %1864 = vrot.lane.b32.xlu0 %v1850_v33, %s9698_s21 }
 0x4e2   : > { %1862 = vrot.lane.b32.xlu1 %v1849_v35, %s9698_s21 }
 0x4e3   : > { %1938 = vrot.lane.b32.xlu0 %v1924_v37, %s7653_s28 }
 0x4e6   : > { %1860 = vrot.lane.b32.xlu1 %v1848_v39, %s9698_s21 }
 0x4e7   : > { %1796 = vrot.lane.b32.xlu0 %v1780_v47, %s9694_s24 }
 0x4ea   : > { %1870 = vrot.lane.b32.xlu1 %v1850_v33, %s9698_s21 }
 0x4eb   : > { %1794 = vrot.lane.b32.xlu0 %v1779_v48, %s9694_s24  ;;  %s9714_s24 = smov 127  }
 0x4ee   : > { %1936 = vrot.lane.b32.xlu1 %v1923_v49, %s7653_s28 }
 0x4ef   : > { %1868 = vrot.lane.b32.xlu0 %v1852_v17, %s9698_s21 }
 0x4f2   : > { %1934 = vrot.lane.b32.xlu1 %v1922_v20, %s7653_s28 }
 0x4f3   : > { %1866 = vrot.lane.b32.xlu0 %v1851_v50, %s9698_s21 }
 0x4f6   : > { %1944 = vrot.lane.b32.xlu1 %v1924_v37, %s7653_s28 }
 0x4f7   : > { %1942 = vrot.lane.b32.xlu0 %v1926_v21, %s7653_s28 }
 0x4fb   : > { %1940 = vrot.lane.b32.xlu0 %v1925_v54, %s7653_s28 }
 0x50d   : > { %v1487_v55 = vpop.permute.xlu1 %1486  ;;  %v1493_v57 = vpop.permute.xlu0 %1492 }
 0x511   : > { %v1561_v59 = vpop.permute.xlu1 %1560  ;;  %v1987_v61 = vpop.permute.xlu0 %1986 }
 0x512   : > { %v1994_v10 = vmul.bf16 %v1987_v61, %v8131_v38  ;;  %v1997_v40 = vmul.bf16 %v1987_v61, %v8154_v42 }
 0x515   : > { %v1989_v62 = vpop.permute.xlu1 %1988  ;;  %v1567_v7 = vpop.permute.xlu0 %1566 }
 0x516   : > { %v1990_v18 = vsel %vm556_vm6, %v1987_v61, %v1989_v62  ;;  %v1996_v63 = vmul.bf16 %v8113_v52, %v1989_v62 }
 0x517   : > { %v1995_v0 = vmul.bf16 %v1990_v18, %v8134_v46  ;;  %v1998_v2 = vmul.bf16 %v1990_v18, %v8149_v44 }
 0x518   : > { %2010 = vrot.lane.b32.xlu0 %v1996_v63, %s7652_s27 }
 0x519   : > { %2008 = vrot.lane.b32.xlu1 %v1995_v0, %s7652_s27  ;;  %v1633_v3 = vpop.permute.xlu1 %1632 }
 0x51c   : > { %2014 = vrot.lane.b32.xlu0 %v1998_v2, %s7652_s27 }
 0x51d   : > { %2006 = vrot.lane.b32.xlu1 %v1994_v10, %s7652_s27 }
 0x520   : > { %2012 = vrot.lane.b32.xlu0 %v1997_v40, %s7652_s27 }
 0x521   : > { %2016 = vrot.lane.b32.xlu1 %v1996_v63, %s7652_s27 }
 0x524   : > { %2073 = vperm.xlu0 %7318, %v1427_v4   ;;  %v1489_v8 = vpop.permute.xlu1 %1488 }
 0x525   : > { %2068 = vperm.xlu1 %7317, %v1426_v5   ;;  %v1491_v22 = vpop.permute.xlu0 %1490  ;;  %v1498_v23 = vsel %vm556_vm6, %v1487_v55, %v1489_v8 }
 0x526   : > { %v1499_v25 = vsel %vm556_vm6, %v1489_v8, %v1491_v22 }
 0x527   : > { %2122 = vmatprep.subr.bf16.mxu1 %v1499_v25 }
 0x528   : > { %2083 = vperm.xlu0 %7318, %v1429_v11   ;;  %v1563_v19 = vpop.permute.xlu1 %1562  ;;  %2123 = vmatpush1.bf16.msra.mxu1 %v1498_v23 }
 0x529   : > { %2078 = vperm.xlu1 %7317, %v1428_v12   ;;  %v1565_v26 = vpop.permute.xlu0 %1564  ;;  %v1572_v37 = vsel %vm611_vm7, %v1561_v59, %v1563_v19 }
 0x52a   : > { %v1573_v34 = vsel %vm611_vm7, %v1563_v19, %v1565_v26 }
 0x52c   : > { %v1635_v27 = vpop.permute.xlu1 %1634 }
 0x52d   : > { %v1637_v28 = vpop.permute.xlu0 %1636  ;;  %v1644_v20 = vsel %vm664_vm4, %v1633_v3, %v1635_v27 }
 0x52e   : > { %v1645_v48 = vsel %vm664_vm4, %v1635_v27, %v1637_v28 }
 0x530   : > { %v1497_v29 = vpop.permute.xlu1 %1496 }
 0x531   : > { %v1495_v30 = vpop.permute.xlu0 %1494 }
 0x532   : > { %v1500_v31 = vsel %vm556_vm6, %v1493_v57, %v1495_v30  ;;  %v1501_v32 = vsel %vm556_vm6, %v1495_v30, %v1497_v29 }
 0x533   : > { %2124 = vmatprep.subr.bf16.mxu1 %v1501_v32 }
 0x534   : > { %v1709_v33 = vpop.permute.xlu1 %1708  ;;  %2125 = vmatpush1.bf16.msra.mxu1 %v1500_v31 }
 0x535   : > { %v1639_v35 = vpop.permute.xlu0 %1638  ;;  %2126 = vmatprep.subr.bf16.mxu1 %v1573_v34 }
 0x538   : > { %v1571_v36 = vpop.permute.xlu1 %1570  ;;  %2127 = vmatpush1.bf16.msra.mxu1 %v1572_v37  ;;  %v7397_v37 = vld [vmem:[%s9676_s3 + $0x1c] ss:$12 sps:$4 sm:$0xff]  }
 0x539   : > { %v1569_v39 = vpop.permute.xlu0 %1568 }
 0x53a   : > { %v1574_v45 = vsel %vm611_vm7, %v1567_v7, %v1569_v39  ;;  %v1575_v47 = vsel %vm611_vm7, %v1569_v39, %v1571_v36  ;;  %v7394_v36 = vld [vmem:[%s9676_s3] ss:$12 sps:$4 sm:$0xff]   ;;  %v7399_v39 = vld [vmem:[%s9676_s3 + $0x18] ss:$12 sps:$4 sm:$0xff]  }
 0x53b   : > { %2128 = vmatprep.subr.bf16.mxu1 %v1575_v47 }
 0x53c   : > { %v1707_v15 = vpop.permute.xlu1 %1706  ;;  %2129 = vmatpush1.bf16.msra.mxu1 %v1574_v45 }
 0x53d   : > { %v1711_v49 = vpop.permute.xlu0 %1710  ;;  %2130 = vmatprep.subr.bf16.mxu1 %v1645_v48  ;;  %v1718_v61 = vsel %vm719_vm5, %v1707_v15, %v1709_v33 }
 0x53e   : > { %v1719_v55 = vsel %vm719_vm5, %v1709_v33, %v1711_v49 }
 0x540   : > { %v1643_v17 = vpop.permute.xlu1 %1642  ;;  %2131 = vmatpush1.bf16.msra.mxu1 %v1644_v20 }
 0x541   : > { %v1641_v50 = vpop.permute.xlu0 %1640 }
 0x542   : > { %v1646_v21 = vsel %vm664_vm4, %v1639_v35, %v1641_v50  ;;  %v1647_v54 = vsel %vm664_vm4, %v1641_v50, %v1643_v17 }
 0x543   : > { %2132 = vmatprep.subr.bf16.mxu1 %v1647_v54 }
 0x544   : > { %v1791_v51 = vpop.permute.xlu1 %1790  ;;  %2133 = vmatpush1.bf16.msra.mxu1 %v1646_v21 }
 0x545   : > { %v1713_v57 = vpop.permute.xlu0 %1712  ;;  %2134 = vmatprep.subr.bf16.mxu1 %v1719_v55  ;;  %v7401_v55 = vld [vmem:[%s9676_s3 + $0x20] ss:$12 sps:$4 sm:$0xff]  }
 0x548   : > { %v1717_v59 = vpop.permute.xlu1 %1716  ;;  %2135 = vmatpush1.bf16.msra.mxu1 %v1718_v61 }
 0x549   : > { %v1715_v62 = vpop.permute.xlu0 %1714 }
 0x54a   : > { %v1720_v18 = vsel %vm719_vm5, %v1713_v57, %v1715_v62  ;;  %v1721_v63 = vsel %vm719_vm5, %v1715_v62, %v1717_v59 }
 0x54b   : > { %2136 = vmatprep.subr.bf16.mxu1 %v1721_v63 }
 0x54c   : > { %v1789_v0 = vpop.permute.xlu1 %1788  ;;  %2137 = vmatpush1.bf16.msra.mxu1 %v1720_v18 }
 0x54d   : > { %v1793_v2 = vpop.permute.xlu0 %1792  ;;  %2138 = vmatprep.subr.bf16.mxu1 %v8134_v46  ;;  %v1800_v8 = vsel %vm702_vm3, %v1789_v0, %v1791_v51 }
 0x54e   : > { %v1801_v4 = vsel %vm702_vm3, %v1791_v51, %v1793_v2  ;;  %v7400_v51 = vld [vmem:[%s9676_s3 + $0x8] ss:$12 sps:$4 sm:$0xff]  }
 0x550   : > { %v1799_v10 = vpop.permute.xlu1 %1798  ;;  %2139 = vmatpush1.bf16.msra.mxu1 %v8131_v38 }
 0x551   : > { %v1865_v40 = vpop.permute.xlu0 %1864  ;;  %2140 = vmatprep.subr.bf16.mxu1 %v8149_v44 }
 0x554   : > { %v1863_v3 = vpop.permute.xlu1 %1862  ;;  %2141 = vmatpush1.bf16.msra.mxu1 %v8154_v42 }
 0x555   : > { %v1939_v5 = vpop.permute.xlu0 %1938  ;;  %2142 = vmatprep.subr.bf16.mxu1 %v1801_v4  ;;  %v1873_v23 = vsel %vm647_vm2, %v1863_v3, %v1865_v40 }
 0x558   : > { %v1861_v7 = vpop.permute.xlu1 %1860  ;;  %2143 = vmatpush1.bf16.msra.mxu1 %v1800_v8 }
 0x559   : > { %v1797_v11 = vpop.permute.xlu0 %1796  ;;  %v1872_v25 = vsel %vm647_vm2, %v1861_v7, %v1863_v3 }
 0x55a   : > { %v1803_v46 = vsel %vm702_vm3, %v1797_v11, %v1799_v10 }
 0x55b   : > { %2144 = vmatprep.subr.bf16.mxu1 %v1803_v46 }
 0x55c   : > { %v1871_v12 = vpop.permute.xlu1 %1870 }
 0x55d   : > { %v1795_v38 = vpop.permute.xlu0 %1794 }
 0x55e   : > { %v1802_v22 = vsel %vm702_vm3, %v1795_v38, %v1797_v11 }
 0x55f   : > { %2145 = vmatpush1.bf16.msra.mxu1 %v1802_v22 }
 0x560   : > { %v1937_v44 = vpop.permute.xlu1 %1936  ;;  %2146 = vmatprep.subr.bf16.mxu1 %v1873_v23 }
 0x561   : > { %v1869_v42 = vpop.permute.xlu0 %1868  ;;  %v1947_v29 = vsel %vm594_vm1, %v1937_v44, %v1939_v5 }
 0x562   : > { %v1875_v19 = vsel %vm647_vm2, %v1869_v42, %v1871_v12 }
 0x563   : > { %2147 = vmatpush1.bf16.msra.mxu1 %v1872_v25 }
 0x564   : > { %v1935_v26 = vpop.permute.xlu1 %1934  ;;  %2148 = vmatprep.subr.bf16.mxu1 %v1875_v19 }
 0x565   : > { %v1867_v27 = vpop.permute.xlu0 %1866  ;;  %v1946_v32 = vsel %vm594_vm1, %v1935_v26, %v1937_v44 }
 0x566   : > { %v1874_v28 = vsel %vm647_vm2, %v1867_v27, %v1869_v42 }
 0x567   : > { %2149 = vmatpush1.bf16.msra.mxu1 %v1874_v28 }
 0x568   : > { %v1945_v30 = vpop.permute.xlu1 %1944  ;;  %2150 = vmatprep.subr.bf16.mxu1 %v1947_v29 }
 0x569   : > { %v1943_v31 = vpop.permute.xlu0 %1942 }
 0x56a   : > { %v1949_v33 = vsel %vm594_vm1, %v1943_v31, %v1945_v30 }
 0x56b   : > { %2151 = vmatpush1.bf16.msra.mxu1 %v1946_v32 }
 0x56c   : > { %2152 = vmatprep.subr.bf16.mxu1 %v1949_v33 }
 0x56d   : > { %v1941_v34 = vpop.permute.xlu0 %1940 }
 0x56e   : > { %v1948_v35 = vsel %vm594_vm1, %v1941_v34, %v1943_v31 }
 0x56f   : > { %2153 = vmatpush1.bf16.msra.mxu1 %v1948_v35 }
 0x572   : > { %2155 = vmatmul.mubr.bf16.vlgmr.msra.gmra.mrb[0].mxu1 %v7394_v36  ;;  %v2268_v36 = vld [vmem:[%s9681_s8] sm:$0xff] }
 0x573   : > { %2164 = vmatprep.mubr.bf16.mxu1 %v7397_v37  ;;  %7124 = vmatprep.mubr.msk.f32.mxu0 %vm1104_vm8, %v2268_v36 }
 0x57a   : > { %2165 = vmatmul.mubr.bf16.gmra.mrb[4].mxu1 %v7399_v39 }
 0x57b   : > { %2207 = vmatprep.mubr.bf16.mxu1 %v8113_v52 }
 0x58a   : > { %v2011_v45 = vpop.permute.xlu0 %2010 }
 0x58b   : > { %v2009_v47 = vpop.permute.xlu1 %2008 }
 0x58c   : > { %v2019_v15 = vsel %vm539_vm0, %v2009_v47, %v2011_v45 }
 0x58d   : > { %2175 = vmatprep.subr.bf16.mxu1 %v2019_v15 }
 0x58e   : > { %v2015_v48 = vpop.permute.xlu0 %2014 }
 0x58f   : > { %v2007_v49 = vpop.permute.xlu1 %2006 }
 0x590   : > { %v2018_v17 = vsel %vm539_vm0, %v2007_v49, %v2009_v47 }
 0x591   : > { %2176 = vmatpush1.bf16.msra.mxu1 %v2018_v17 }
 0x592   : > { %v2013_v20 = vpop.permute.xlu0 %2012 }
 0x593   : > { %v2017_v50 = vpop.permute.xlu1 %2016  ;;  %v2020_v54 = vsel %vm539_vm0, %v2013_v20, %v2015_v48 }
 0x594   : > { %v2021_v21 = vsel %vm539_vm0, %v2015_v48, %v2017_v50 }
 0x595   : > { %2177 = vmatprep.subr.bf16.mxu1 %v2021_v21 }
 0x596   : > { %2178 = vmatpush1.bf16.msra.mxu1 %v2020_v54 }
 0x599   : > { %6788 = vmatmul.mubr.msk.bf16.vlgmr.msra.gmra.mrb[0].mxu1 %vm1104_vm8, %v7400_v51 }
 0x59a   : > { %2217 = vmatprep.mubr.bf16.mxu1 %v8113_v52 }
 0x5a1   : > { %6789 = vmatmul.mubr.msk.bf16.gmra.mrb[4].mxu1 %vm1104_vm8, %v7401_v55 }
 0x5a3   : > { %v2074_v18 = vpop.permute.xlu0 %2073 }
 0x5a4   : > { %v2069_v57 = vpop.permute.xlu1 %2068 }
 0x5a7   : > { %v2084_v44 = vpop.permute.xlu0 %2083 }
 0x5a8   : > { %v2079_v11 = vpop.permute.xlu1 %2078 }
 0x66c   : > { %v2209_v59 = vpop.f32.mrb[0].mxu1 }
 0x66d   : > { %v8301_v61 = vadd.f32 %v2209_v59, %v2069_v57  ;;  %v2211_v62 = vpop.f32.mrb[1].mxu1  ;;  %v2270_v59 = vld [vmem:[%s9681_s8 + $0x10] sm:$0xff] }
 0x66e   : > { %v8303_v63 = vadd.f32 %v2211_v62, %v2069_v57  ;;  %v2213_v0 = vpop.f32.mrb[2].mxu1  ;;  %v2269_v57 = vld [vmem:[%s9681_s8 + $0x8] sm:$0xff]  ;;  %v2271_v62 = vld [vmem:[%s9681_s8 + $0x18] sm:$0xff] }
 0x66f   : > { %v8305_v2 = vadd.f32 %v2213_v0, %v2074_v18  ;;  %v2215_v10 = vpop.f32.mrb[3].mxu1  ;;  %v2244_v4 = vmul.f32 %v8301_v61, %v8301_v61 }
 0x670   : > { %v8307_v40 = vadd.f32 %v2215_v10, %v2074_v18  ;;  %v2228_v52 = vadd.f32 %v8303_v63, %v8301_v61  ;;  %v2245_v5 = vmul.f32 %v8303_v63, %v8303_v63 }
 0x671   : > { %v2246_v3 = vmul.f32 %v8305_v2, %v8305_v2 }
 0x672   : > { %v2247_v7 = vmul.f32 %v8307_v40, %v8307_v40  ;;  %2229 = vadd.xlane.f32.xlu1 %v2228_v52  ;;  %v2231_v8 = vadd.f32 %v8307_v40, %v8305_v2  ;;  %v2252_v25 = vadd.f32 %v2245_v5, %v2244_v4 }
 0x674   : > { %v2219_v46 = vpop.f32.mrb[4].mxu1  ;;  %2232 = vadd.xlane.f32.xlu0 %v2231_v8  ;;  %v2255_v12 = vadd.f32 %v2247_v7, %v2246_v3 }
 0x675   : > { %v8321_v38 = vadd.f32 %v2219_v46, %v2079_v11  ;;  %v2221_v22 = vpop.f32.mrb[5].mxu1 }
 0x676   : > { %v8323_v23 = vadd.f32 %v2221_v22, %v2079_v11  ;;  %v2223_v42 = vpop.f32.mrb[6].mxu1  ;;  %2256 = vadd.xlane.f32.xlu1 %v2255_v12  ;;  %v2469_v22 = vld [vmem:[%s9679_s6] sm:$0xff] }
 0x677   : > { %v8325_v19 = vadd.f32 %v2223_v42, %v2084_v44  ;;  %v2225_v26 = vpop.f32.mrb[7].mxu1  ;;  %v2248_v28 = vmul.f32 %v8321_v38, %v8321_v38  ;;  %v2471_v42 = vld [vmem:[%s9679_s6 + $0x10] sm:$0xff] }
 0x678   : > { %v8327_v27 = vadd.f32 %v2225_v26, %v2084_v44  ;;  %2253 = vadd.xlane.f32.xlu0 %v2252_v25  ;;  %v2249_v29 = vmul.f32 %v8323_v23, %v8323_v23  ;;  %v2234_v33 = vadd.f32 %v8323_v23, %v8321_v38  ;;  %v2501_v44 = vld [vmem:[%s9680_s7] sm:$0xff]  ;;  %v2470_v25 = vld [vmem:[%s9679_s6 + $0x8] sm:$0xff] }
 0x679   : > { %v2250_v30 = vmul.f32 %v8325_v19, %v8325_v19  ;;  %v2502_v26 = vld [vmem:[%s9680_s7 + $0x8] sm:$0xff] }
 0x67a   : > { %v2251_v31 = vmul.f32 %v8327_v27, %v8327_v27  ;;  %v2237_v32 = vadd.f32 %v8327_v27, %v8325_v19  ;;  %v2258_v35 = vadd.f32 %v2249_v29, %v2248_v28  ;;  %v2472_v28 = vld [vmem:[%s9679_s6 + $0x18] sm:$0xff] }
 0x67c   : > { %2238 = vadd.xlane.f32.xlu1 %v2237_v32  ;;  %2235 = vadd.xlane.f32.xlu0 %v2234_v33  ;;  %v2261_v34 = vadd.f32 %v2251_v31, %v2250_v30 }
 0x680   : > { %2262 = vadd.xlane.f32.xlu1 %v2261_v34  ;;  %2259 = vadd.xlane.f32.xlu0 %v2258_v35 }
 0x6ff   : > { %v2230_v37 = vpop.xlane.xlu1 %2229 }
 0x700   : > { %2240 = vst.msk [vmem:[#allocation4] sm:$0xff] %vm719_vm5, %v2230_v37 }
 0x701   : > { %v2233_v39 = vpop.xlane.xlu0 %2232 }
 0x702   : > { %2241 = vst.msk [vmem:[#allocation4 + $0x8] sm:$0xff] %vm719_vm5, %v2233_v39 }
 0x703   : > { %v2257_v45 = vpop.xlane.xlu1 %2256 }
 0x704   : > { %2265 = vst.msk [vmem:[#allocation4 + $0x8] sm:$0xff] %vm1091_vm9, %v2257_v45 }
 0x705   : > { %v2254_v47 = vpop.xlane.xlu0 %2253 }
 0x706   : > { %2264 = vst.msk [vmem:[#allocation4] sm:$0xff] %vm1091_vm9, %v2254_v47 }
 0x709   : > { %v2236_v15 = vpop.xlane.xlu0 %2235  ;;  %v2239_v48 = vpop.xlane.xlu1 %2238 }
 0x70a   : > { %2242 = vst.msk [vmem:[#allocation4 + $0x10] sm:$0xff] %vm719_vm5, %v2236_v15  ;;  %2243 = vst.msk [vmem:[#allocation4 + $0x18] sm:$0xff] %vm719_vm5, %v2239_v48 }
 0x70b   : > { %v2273_v50 = vld [vmem:[#allocation4 + $0x8] sm:$0xff] }
 0x70d   : > { %v2260_v49 = vpop.xlane.xlu0 %2259  ;;  %v2263_v17 = vpop.xlane.xlu1 %2262  ;;  %v2272_v20 = vld [vmem:[#allocation4] sm:$0xff] }
 0x70e   : > { %2266 = vst.msk [vmem:[#allocation4 + $0x10] sm:$0xff] %vm1091_vm9, %v2260_v49  ;;  %2267 = vst.msk [vmem:[#allocation4 + $0x18] sm:$0xff] %vm1091_vm9, %v2263_v17  ;;  %v7204_v21 = vpack.c.bf16 %v2273_v50, %v2272_v20  ;;  %v2616_v20 = vld [vmem:[%s9684_s11] sm:$0x11] }
 0x70f   : > { %v2688_v50 = vld [vmem:[%s9684_s11] sm:$0x11] }
 0x710   : > { %7205 = vmatprep.subr.bf16.mxu0 %v7204_v21 }
 0x711   : > { %7207 = vmatpush3.bf16.msra.mxu0 %v7204_v21 }
 0x715   : > { %v2274_v54 = vld [vmem:[#allocation4 + $0x10] sm:$0xff]  ;;  %v2275_v51 = vld [vmem:[#allocation4 + $0x18] sm:$0xff] }
 0x716   : > { %v7208_v55 = vpack.c.bf16 %v2275_v51, %v2274_v54  ;;  %v6811_v51 = vcombine.high %v2616_v20, %v2616_v20 }
 0x718   : > { %7209 = vmatprep.subr.bf16.mxu0 %v7208_v55 }
 0x719   : > { %7211 = vmatpush3.bf16.msra.mxu0 %v7208_v55  ;;  %v6813_v55 = vcombine.high %v2688_v50, %v2688_v50 }
 0x71c   : > { %7125 = vmatmul.mubr.msk.f32.vlgmr.msra.gmra.mrb[12].mxu0 %vm1104_vm8, %v2269_v57  ;;  %v6810_v57 = vcombine.low %v2616_v20, %v2616_v20 }
 0x71d   : > { %7127 = vmatprep.mubr.msk.f32.mxu0 %vm1104_vm8, %v2270_v59  ;;  %v6812_v59 = vcombine.low %v2688_v50, %v2688_v50 }
 0x720   : > { %7128 = vmatmul.mubr.msk.f32.gmra.mrb[14].mxu0 %vm1104_vm8, %v2271_v62 }
 0x7ef   : > { %v7126_v18 = vpop.f32.mrb[12].mxu0 }
 0x7f0   : > { %v2374_v0 = vmul.f32 0.0009765625, %v7126_v18  ;;  %v2354_v10 = vpop.f32.mrb[13].mxu0 }
 0x7f1   : > { %v2373_v52 = vmul.f32 0.0009765625, %v2354_v10  ;;  %v2703_v10 = vshrl.u32 %v6813_v55, 16 }
 0x7f2   : > { %v2378_v3 = vmul.f32 %v2374_v0, %v2374_v0 }
 0x7f3   : > { %v2377_v4 = vmul.f32 %v2373_v52, %v2373_v52  ;;  %v7129_v5 = vpop.f32.mrb[14].mxu0 }
 0x7f4   : > { %v2376_v7 = vmul.f32 0.0009765625, %v7129_v5  ;;  %2387 = vrot.lane.b32.xlu1 %v2378_v3, %s9696_s25  ;;  %v2364_v8 = vpop.f32.mrb[15].mxu0  ;;  %v2623_v3 = vpack.i.b16 %v6810_v57, %v6810_v57  ;;  %v2762_v5 = vld [vmem:[%s9684_s11] sm:$0x22] }
 0x7f5   : > { %v2375_v11 = vmul.f32 0.0009765625, %v2364_v8  ;;  %2385 = vrot.lane.b32.xlu0 %v2377_v4, %s9696_s25  ;;  %v2695_v4 = vshrl.u32 %v6812_v59, 16  ;;  %v2503_v8 = vld [vmem:[%s9680_s7 + $0x10] sm:$0xff] }
 0x7f6   : > { %v2380_v46 = vmul.f32 %v2376_v7, %v2376_v7 }
 0x7f7   : > { %v2379_v12 = vmul.f32 %v2375_v11, %v2375_v11 }
 0x7f9   : > { %2391 = vrot.lane.b32.xlu0 %v2380_v46, %s9696_s25  ;;  %2389 = vrot.lane.b32.xlu1 %v2379_v12, %s9696_s25  ;;  %v2704_v46 = vpack.i.b16 %v2703_v10, %v2703_v10  ;;  %v6815_v12 = vcombine.high %v2762_v5, %v2762_v5 }
 0x7fd   : > { %2420 = vperm.xlu0 %7318, %v2374_v0   ;;  %2415 = vperm.xlu1 %7317, %v2373_v52  }
 0x801   : > { %2425 = vperm.xlu1 %7317, %v2375_v11   ;;  %7319 = vset.pattern.permute.xlu0 %v7661_v1 }
 0x802   : > { %2475 = vperm.xlu0 %7319, %v2469_v22  }
 0x805   : > { %2430 = vperm.xlu1 %7317, %v2376_v7  }
 0x806   : > { %2507 = vperm.xlu0 %7319, %v2501_v44   ;;  %v2628_v44 = vrot.slane %v2623_v3, %v7768_v13 }
 0x809   : > { %7320 = vset.pattern.permute.xlu1 %v7661_v1 }
 0x80a   : > { %2485 = vperm.xlu0 %7319, %v2471_v42   ;;  %2480 = vperm.xlu1 %7320, %v2470_v25   ;;  %v2696_v42 = vpack.i.b16 %v2695_v4, %v2695_v4  ;;  %v6814_v25 = vcombine.low %v2762_v5, %v2762_v5 }
 0x80e   : > { %2512 = vperm.xlu1 %7320, %v2502_v26  }
 0x812   : > { %2490 = vperm.xlu1 %7320, %v2472_v28   ;;  %v2916_v28 = vld [vmem:[%s9684_s11] sm:$0x44] }
 0x866   : > { %v2388_v29 = vpop.permute.xlu1 %2387 }
 0x867   : > { %v2398_v30 = vsub.f32 %v2374_v0, %v2388_v29  ;;  %v2386_v31 = vpop.permute.xlu0 %2385  ;;  %v2630_v0 = vpack.i.b16 %v6811_v51, %v6811_v51  ;;  %v2709_v29 = vrot.slane %v2704_v46, %v7768_v13 }
 0x868   : > { %v2397_v32 = vsub.f32 %v2373_v52, %v2386_v31  ;;  %v2504_v52 = vld [vmem:[%s9680_s7 + $0x18] sm:$0xff] }
 0x869   : > { %v2402_v33 = vmax.f32 %v2398_v30, 0.0  ;;  %v2776_v30 = vpack.i.b16 %v6815_v12, %v6815_v12 }
 0x86a   : > { %v2401_v34 = vmax.f32 %v2397_v32, 0.0  ;;  %v6819_v32 = vcombine.high %v2916_v28, %v2916_v28 }
 0x86b   : > { %v2406_v35 = vadd.f32 1e-06, %v2402_v33  ;;  %v2392_v36 = vpop.permute.xlu0 %2391  ;;  %v2390_v37 = vpop.permute.xlu1 %2389  ;;  %v2701_v33 = vrot.slane %v2696_v42, %v7768_v13 }
 0x86c   : > { %v2405_v39 = vadd.f32 1e-06, %v2401_v34  ;;  %v2400_v45 = vsub.f32 %v2376_v7, %v2392_v36  ;;  %v2399_v47 = vsub.f32 %v2375_v11, %v2390_v37  ;;  %v2834_v7 = vld [vmem:[%s9684_s11] sm:$0x22]  ;;  %v2635_v11 = vrot.slane %v2630_v0, %v7768_v13 }
 0x86d   : > { %7525 = vrsqrt.f32 %v2406_v35  ;;  %v6817_v22 = vcombine.high %v2834_v7, %v2834_v7  ;;  %v6816_v26 = vcombine.low %v2834_v7, %v2834_v7  ;;  %v2769_v34 = vpack.i.b16 %v6814_v25, %v6814_v25 }
 0x86e   : > { %7527 = vrsqrt.f32 %v2405_v39  ;;  %v2404_v15 = vmax.f32 %v2400_v45, 0.0  ;;  %v2403_v48 = vmax.f32 %v2399_v47, 0.0  ;;  %v6818_v36 = vcombine.low %v2916_v28, %v2916_v28 }
 0x86f   : > { %v2849_v31 = vshrl.u32 %v6817_v22, 16  ;;  %v2841_v35 = vshrl.u32 %v6816_v26, 16  ;;  %v2781_v37 = vrot.slane %v2776_v30, %v7777_v24  ;;  %v2931_v45 = vshrl.u32 %v6819_v32, 16 }
 0x870   : > { %v2408_v49 = vadd.f32 1e-06, %v2404_v15  ;;  %v2407_v17 = vadd.f32 1e-06, %v2403_v48  ;;  %v2774_v47 = vrot.slane %v2769_v34, %v7777_v24  ;;  %v2923_v48 = vshrl.u32 %v6818_v36, 16 }
 0x871   : > { %v2850_v39 = vpack.i.b16 %v2849_v31, %v2849_v31  ;;  %v2842_v15 = vpack.i.b16 %v2841_v35, %v2841_v35  ;;  %v2932_v50 = vpack.i.b16 %v2931_v45, %v2931_v45 }
 0x872   : > { %7529 = vrsqrt.f32 %v2408_v49  ;;  %v2990_v49 = vld [vmem:[%s9684_s11] sm:$0x88]  ;;  %v2924_v55 = vpack.i.b16 %v2923_v48, %v2923_v48  ;;  %v3136_v48 = vld [vmem:[%s9684_s11 + $0x8] sm:$0x11] }
 0x873   : > { %7531 = vrsqrt.f32 %v2407_v17  ;;  %v3062_v17 = vld [vmem:[%s9684_s11] sm:$0x88]  ;;  %v2855_v20 = vrot.slane %v2850_v39, %v7777_v24  ;;  %v2847_v51 = vrot.slane %v2842_v15, %v7777_v24  ;;  %v6820_v57 = vcombine.low %v2990_v49, %v2990_v49 }
 0x874   : > { %v6822_v59 = vcombine.low %v3062_v17, %v3062_v17  ;;  %v2929_v10 = vrot.slane %v2924_v55, %v7803_v41  ;;  %v6824_v55 = vcombine.low %v3136_v48, %v3136_v48 }
 0x876   : > { %v3069_v3 = vshrl.u32 %v6822_v59, 16 }
 0x877   : > { %v7526_v21 = vpop.eup %7525 }
 0x878   : > { %v7528_v54 = vpop.eup %7527  ;;  %2448 = vperm.xlu0 %7319, %v7526_v21   ;;  %v6821_v21 = vcombine.high %v2990_v49, %v2990_v49 }
 0x879   : > { %2443 = vperm.xlu1 %7320, %v7528_v54   ;;  %v6823_v54 = vcombine.high %v3062_v17, %v3062_v17 }
 0x87b   : > { %v3077_v0 = vshrl.u32 %v6823_v54, 16 }
 0x87c   : > { %v7530_v62 = vpop.eup %7529  ;;  %v2416_v12 = vpop.permute.xlu1 %2415 }
 0x87d   : > { %v7532_v18 = vpop.eup %7531  ;;  %2458 = vperm.xlu1 %7320, %v7530_v62   ;;  %v2937_v62 = vrot.slane %v2932_v50, %v7803_v41  ;;  %v3078_v5 = vpack.i.b16 %v3077_v0, %v3077_v0  ;;  %v2421_v42 = vpop.permute.xlu0 %2420  ;;  %v2433_v34 = vsub.f32 %v8301_v61, %v2416_v12  ;;  %v2434_v35 = vsub.f32 %v8303_v63, %v2416_v12 }
 0x87e   : > { %2453 = vperm.xlu0 %7319, %v7532_v18   ;;  %v3004_v18 = vpack.i.b16 %v6821_v21, %v6821_v21  ;;  %v2435_v32 = vsub.f32 %v8305_v2, %v2421_v42 }
 0x880   : > { %v3009_v4 = vrot.slane %v3004_v18, %v7805_v43  ;;  %v2426_v22 = vpop.permute.xlu1 %2425 }
 0x881   : > { %2522 = vperm.xlu1 %7320, %v2504_v52   ;;  %v2997_v52 = vpack.i.b16 %v6820_v57, %v6820_v57  ;;  %v2476_v26 = vpop.permute.xlu0 %2475  ;;  %v2437_v49 = vsub.f32 %v8321_v38, %v2426_v22  ;;  %v2438_v50 = vsub.f32 %v8323_v23, %v2426_v22 }
 0x882   : > { %2517 = vperm.xlu0 %7319, %v2503_v8   ;;  %v3070_v8 = vpack.i.b16 %v3069_v3, %v3069_v3 }
 0x883   : > { %v3002_v7 = vrot.slane %v2997_v52, %v7805_v43 }
 0x884   : > { %v3075_v46 = vrot.slane %v3070_v8, %v7805_v43 }
 0x885   : > { %2640 = vrot.lane.b32.xlu1 %v2635_v11, %s7652_s27  ;;  %v3083_v11 = vrot.slane %v3078_v5, %v7805_v43 }
 0x886   : > { %2638 = vrot.lane.b32.xlu0 %v2628_v44, %s7652_s27  ;;  %v2431_v44 = vpop.permute.xlu1 %2430 }
 0x887   : > { %v2440_v61 = vsub.f32 %v8327_v27, %v2431_v44 }
 0x889   : > { %2714 = vrot.lane.b32.xlu1 %v2709_v29, %s7653_s28  ;;  %v2508_v29 = vpop.permute.xlu0 %2507 }
 0x88a   : > { %2712 = vrot.lane.b32.xlu0 %v2701_v33, %s7653_s28  ;;  %v2481_v25 = vpop.permute.xlu1 %2480  ;;  %v2436_v33 = vsub.f32 %v8307_v40, %v2421_v42  ;;  %v2439_v40 = vsub.f32 %v8325_v19, %v2431_v44 }
 0x88d   : > { %2786 = vrot.lane.b32.xlu1 %v2781_v37, %s9698_s21  ;;  %v2486_v31 = vpop.permute.xlu0 %2485 }
 0x88e   : > { %2784 = vrot.lane.b32.xlu0 %v2774_v47, %s9698_s21  ;;  %v2513_v28 = vpop.permute.xlu1 %2512 }
 0x891   : > { %2860 = vrot.lane.b32.xlu1 %v2855_v20, %s9714_s24 }
 0x892   : > { %2858 = vrot.lane.b32.xlu0 %v2847_v51, %s9714_s24  ;;  %v2491_v30 = vpop.permute.xlu1 %2490 }
 0x895   : > { %2942 = vrot.lane.b32.xlu1 %v2937_v62, %s9696_s25 }
 0x896   : > { %2940 = vrot.lane.b32.xlu0 %v2929_v10, %s9696_s25 }
 0x899   : > { %3014 = vrot.lane.b32.xlu1 %v3009_v4, %s9715_s26 }
 0x89a   : > { %3012 = vrot.lane.b32.xlu0 %v3002_v7, %s9715_s26 }
 0x89d   : > { %3088 = vrot.lane.b32.xlu1 %v3083_v11, %s9712_s22 }
 0x89e   : > { %3086 = vrot.lane.b32.xlu0 %v3075_v46, %s9712_s22 }
 0x8f7   : > { %v2449_v36 = vpop.permute.xlu0 %2448 }
 0x8f8   : > { %v2463_v37 = vmul.f32 %v2449_v36, %v2435_v32  ;;  %v2464_v39 = vmul.f32 %v2449_v36, %v2436_v33  ;;  %v2444_v45 = vpop.permute.xlu1 %2443  ;;  %v8479_v32 = vld [vmem:[#allocation2] sm:$0xff] }
 0x8f9   : > { %v2461_v47 = vmul.f32 %v2444_v45, %v2433_v34  ;;  %v2462_v15 = vmul.f32 %v2444_v45, %v2434_v35 }
 0x8fa   : > { %v2495_v17 = vmul.f32 %v2481_v25, %v2463_v37  ;;  %v2496_v2 = vmul.f32 %v2481_v25, %v2464_v39  ;;  %v3143_v25 = vpack.i.b16 %v6824_v55, %v6824_v55 }
 0x8fb   : > { %v2493_v20 = vmul.f32 %v2476_v26, %v2461_v47  ;;  %v2494_v63 = vmul.f32 %v2476_v26, %v2462_v15 }
 0x8fc   : > { %v8455_v21 = vadd.f32 %v2513_v28, %v2495_v17  ;;  %v8457_v54 = vadd.f32 %v2513_v28, %v2496_v2  ;;  %v2459_v51 = vpop.permute.xlu1 %2458  ;;  %v3148_v34 = vrot.slane %v3143_v25, %v7768_v13 }
 0x8fd   : > { %v8459_v57 = vadd.f32 %v2508_v29, %v2493_v20  ;;  %v8461_v59 = vadd.f32 %v2508_v29, %v2494_v63  ;;  %v2454_v38 = vpop.permute.xlu0 %2453  ;;  %v2467_v62 = vmul.f32 %v2459_v51, %v2439_v40  ;;  %v2468_v18 = vmul.f32 %v2459_v51, %v2440_v61 }
 0x8fe   : > { %v6796_v19 = vmul.f32 -1.442695, %v8455_v21  ;;  %v6797_v27 = vmul.f32 -1.442695, %v8457_v54  ;;  %v2465_v0 = vmul.f32 %v2454_v38, %v2437_v49  ;;  %v2466_v10 = vmul.f32 %v2454_v38, %v2438_v50 }
 0x8ff   : > { %v6794_v23 = vmul.f32 -1.442695, %v8459_v57  ;;  %v6795_v52 = vmul.f32 -1.442695, %v8461_v59  ;;  %v2499_v3 = vmul.f32 %v2491_v30, %v2467_v62  ;;  %v2500_v4 = vmul.f32 %v2491_v30, %v2468_v18 }
 0x900   : > { %7533 = vpow2.f32 %v6796_v19  ;;  %v2497_v5 = vmul.f32 %v2486_v31, %v2465_v0  ;;  %v2498_v7 = vmul.f32 %v2486_v31, %v2466_v10  ;;  %v2523_v8 = vpop.permute.xlu1 %2522  ;;  %v6825_v30 = vcombine.high %v3136_v48, %v3136_v48 }
 0x901   : > { %7535 = vpow2.f32 %v6797_v27  ;;  %v2518_v11 = vpop.permute.xlu0 %2517  ;;  %v8467_v46 = vadd.f32 %v2523_v8, %v2499_v3  ;;  %v8469_v12 = vadd.f32 %v2523_v8, %v2500_v4 }
 0x902   : > { %7537 = vpow2.f32 %v6794_v23  ;;  %v8471_v22 = vadd.f32 %v2518_v11, %v2497_v5  ;;  %v8473_v44 = vadd.f32 %v2518_v11, %v2498_v7  ;;  %v3150_v35 = vpack.i.b16 %v6825_v30, %v6825_v30 }
 0x903   : > { %7539 = vpow2.f32 %v6795_v52  ;;  %v6800_v42 = vmul.f32 -1.442695, %v8467_v46  ;;  %v6801_v29 = vmul.f32 -1.442695, %v8469_v12 }
 0x904   : > { %v6798_v26 = vmul.f32 -1.442695, %v8471_v22  ;;  %v6799_v28 = vmul.f32 -1.442695, %v8473_v44  ;;  %v3155_v49 = vrot.slane %v3150_v35, %v7768_v13  ;;  %v2641_v27 = vpop.permute.xlu1 %2640 }
 0x905   : > { %7541 = vpow2.f32 %v6800_v42  ;;  %v2639_v31 = vpop.permute.xlu0 %2638 }
 0x906   : > { %7543 = vpow2.f32 %v6798_v26  ;;  %v2646_v33 = vmul.bf16 %v8479_v32, %v2639_v31  ;;  %v2642_v26 = vsel %vm539_vm0, %v2639_v31, %v2641_v27 }
 0x907   : > { %7545 = vpow2.f32 %v6799_v28 }
 0x908   : > { %7547 = vpow2.f32 %v6801_v29  ;;  %2664 = vrot.lane.b32.xlu1 %v2646_v33, %s9713_s18  ;;  %2658 = vrot.lane.b32.xlu0 %v2646_v33, %s9713_s18  ;;  %v2715_v11 = vpop.permute.xlu1 %2714 }
 0x909   : > { %v2713_v36 = vpop.permute.xlu0 %2712 }
 0x90a   : > { %v7534_v37 = vpop.eup %7533  ;;  %v2720_v39 = vmul.bf16 %v8479_v32, %v2713_v36 }
 0x90b   : > { %v7536_v45 = vpop.eup %7535  ;;  %v2559_v47 = vadd.f32 1.0, %v7534_v37 }
 0x90c   : > { %v7538_v15 = vpop.eup %7537  ;;  %v2560_v48 = vadd.f32 1.0, %v7536_v45  ;;  %3158 = vrot.lane.b32.xlu1 %v3148_v34, %s9713_s18  ;;  %2732 = vrot.lane.b32.xlu0 %v2720_v39, %s9712_s22  ;;  %v2787_v31 = vpop.permute.xlu1 %2786 }
 0x90d   : > { %v7540_v17 = vpop.eup %7539  ;;  %7549 = vrcp.f32 %v2559_v47  ;;  %v2557_v2 = vadd.f32 1.0, %v7538_v15  ;;  %v2785_v20 = vpop.permute.xlu0 %2784 }
 0x90e   : > { %7551 = vrcp.f32 %v2560_v48  ;;  %v2558_v40 = vadd.f32 1.0, %v7540_v17  ;;  %v2792_v51 = vmul.bf16 %v8479_v32, %v2785_v20  ;;  %v2788_v45 = vsel %vm647_vm2, %v2785_v20, %v2787_v31 }
 0x90f   : > { %v7542_v61 = vpop.eup %7541  ;;  %7553 = vrcp.f32 %v2557_v2 }
 0x910   : > { %v7544_v63 = vpop.eup %7543  ;;  %7555 = vrcp.f32 %v2558_v40  ;;  %v2563_v50 = vadd.f32 1.0, %v7542_v61  ;;  %2738 = vrot.lane.b32.xlu1 %v2720_v39, %s9712_s22  ;;  %3160 = vrot.lane.b32.xlu0 %v3155_v49, %s9713_s18  ;;  %v2861_v15 = vpop.permute.xlu1 %2860 }
 0x911   : > { %v7546_v55 = vpop.eup %7545  ;;  %v2561_v62 = vadd.f32 1.0, %v7544_v63 }
 0x912   : > { %v7548_v38 = vpop.eup %7547  ;;  %v2562_v18 = vadd.f32 1.0, %v7546_v55  ;;  %7557 = vrcp.f32 %v2563_v50 }
 0x913   : > { %v2564_v19 = vadd.f32 1.0, %v7548_v38 }
 0x914   : > { %7559 = vrcp.f32 %v2562_v18  ;;  %2804 = vrot.lane.b32.xlu0 %v2792_v51, %s9715_s26 }
 0x915   : > { %7561 = vrcp.f32 %v2564_v19 }
 0x916   : > { %7563 = vrcp.f32 %v2561_v62 }
 0x917   : > { %v7550_v0 = vpop.eup %7549 }
 0x918   : > { %v7552_v10 = vpop.eup %7551  ;;  %v2583_v23 = vmul.f32 %v7550_v0, %v8455_v21 }
 0x919   : > { %v7554_v52 = vpop.eup %7553  ;;  %v2584_v3 = vmul.f32 %v7552_v10, %v8457_v54 }
 0x91a   : > { %v7556_v4 = vpop.eup %7555  ;;  %v2581_v5 = vmul.f32 %v7554_v52, %v8459_v57  ;;  %v2716_v57 = vsel %vm594_vm1, %v2713_v36, %v2715_v11 }
 0x91b   : > { %v2582_v7 = vmul.f32 %v7556_v4, %v8461_v59 }
 0x91c   : > { %v8497_v8 = vpack.c.bf16 %v2583_v23, %v2581_v5  ;;  %v7558_v42 = vpop.eup %7557 }
 0x91d   : > { %v8499_v25 = vpack.c.bf16 %v2584_v3, %v2582_v7  ;;  %v2587_v37 = vmul.f32 %v7558_v42, %v8467_v46 }
 0x91e   : > { %v7560_v28 = vpop.eup %7559  ;;  %v2647_v29 = vmul.bf16 %v2642_v26, %v8497_v8  ;;  %v2721_v34 = vmul.bf16 %v2716_v57, %v8497_v8 }
 0x91f   : > { %v7562_v21 = vpop.eup %7561  ;;  %v2648_v30 = vmul.bf16 %v2641_v27, %v8499_v25  ;;  %v2586_v59 = vmul.f32 %v7560_v28, %v8473_v44  ;;  %v2722_v39 = vmul.bf16 %v2715_v11, %v8499_v25  ;;  %v2793_v44 = vmul.bf16 %v2788_v45, %v8497_v8 }
 0x920   : > { %v7564_v54 = vpop.eup %7563  ;;  %2660 = vrot.lane.b32.xlu0 %v2647_v29, %s9713_s18  ;;  %v2588_v33 = vmul.f32 %v7562_v21, %v8469_v12  ;;  %v2794_v47 = vmul.bf16 %v2787_v31, %v8499_v25  ;;  %v2868_v20 = vmul.bf16 %v2861_v15, %v8499_v25 }
 0x921   : > { %2662 = vrot.lane.b32.xlu1 %v2648_v30, %s9713_s18  ;;  %v2585_v35 = vmul.f32 %v7564_v54, %v8471_v22  ;;  %v2859_v22 = vpop.permute.xlu0 %2858 }
 0x922   : > { %v8516_v36 = vpack.c.bf16 %v2588_v33, %v2586_v59  ;;  %v2862_v49 = vsel %vm702_vm3, %v2859_v22, %v2861_v15  ;;  %v2866_v61 = vmul.bf16 %v8479_v32, %v2859_v22 }
 0x923   : > { %v8519_v12 = vpack.c.bf16 %v2587_v37, %v2585_v35  ;;  %v2867_v17 = vmul.bf16 %v2862_v49, %v8497_v8 }
 0x924   : > { %2734 = vrot.lane.b32.xlu0 %v2721_v34, %s9712_s22  ;;  %v2651_v46 = vmul.bf16 %v2641_v27, %v8516_v36  ;;  %v2725_v2 = vmul.bf16 %v2715_v11, %v8516_v36  ;;  %v2797_v63 = vmul.bf16 %v2787_v31, %v8516_v36  ;;  %v2871_v18 = vmul.bf16 %v2861_v15, %v8516_v36  ;;  %v7420_v31 = vld [vmem:[%s9676_s3 + $0x34] ss:$12 sps:$4 sm:$0xff]  }
 0x925   : > { %2736 = vrot.lane.b32.xlu1 %v2722_v39, %s9712_s22  ;;  %v2650_v48 = vmul.bf16 %v2642_v26, %v8519_v12  ;;  %v2724_v40 = vmul.bf16 %v2716_v57, %v8519_v12  ;;  %v2941_v50 = vpop.permute.xlu0 %2940  ;;  %v2796_v55 = vmul.bf16 %v2788_v45, %v8519_v12  ;;  %v2870_v19 = vmul.bf16 %v2862_v49, %v8519_v12 }
 0x926   : > { %v2948_v0 = vmul.bf16 %v2941_v50, %v8497_v8  ;;  %v2951_v28 = vmul.bf16 %v2941_v50, %v8519_v12  ;;  %3326 = vmatprep.mubr.bf16.mxu0 %v7420_v31 }
 0x928   : > { %2806 = vrot.lane.b32.xlu0 %v2793_v44, %s9715_s26 }
 0x929   : > { %2808 = vrot.lane.b32.xlu1 %v2794_v47, %s9715_s26  ;;  %v3013_v52 = vpop.permute.xlu0 %3012 }
 0x92a   : > { %v3020_v11 = vmul.bf16 %v3013_v52, %v8497_v8  ;;  %v3023_v57 = vmul.bf16 %v3013_v52, %v8519_v12 }
 0x92c   : > { %2668 = vrot.lane.b32.xlu0 %v2651_v46, %s9713_s18 }
 0x92d   : > { %2666 = vrot.lane.b32.xlu1 %v2650_v48, %s9713_s18  ;;  %v3087_v26 = vpop.permute.xlu0 %3086  ;;  %v3435_v48 = vld [vmem:[%s9684_s11] sm:$0x11] }
 0x92e   : > { %v3094_v54 = vmul.bf16 %v3087_v26, %v8497_v8  ;;  %v3097_v33 = vmul.bf16 %v3087_v26, %v8519_v12 }
 0x930   : > { %2880 = vrot.lane.b32.xlu0 %v2867_v17, %s9696_s25  ;;  %v3507_v17 = vld [vmem:[%s9684_s11] sm:$0x11] }
 0x931   : > { %2810 = vrot.lane.b32.xlu1 %v2792_v51, %s9715_s26  ;;  %v2943_v51 = vpop.permute.xlu1 %2942 }
 0x932   : > { %v2944_v38 = vsel %vm719_vm5, %v2941_v50, %v2943_v51  ;;  %v2950_v27 = vmul.bf16 %v8479_v32, %v2943_v51  ;;  %v2598_v50 = vld [vmem:[%s9678_s5] sm:$0xff] }
 0x933   : > { %v2949_v62 = vmul.bf16 %v2944_v38, %v8499_v25  ;;  %v2952_v42 = vmul.bf16 %v2944_v38, %v8516_v36 }
 0x934   : > { %2742 = vrot.lane.b32.xlu0 %v2725_v2, %s9712_s22 }
 0x935   : > { %2740 = vrot.lane.b32.xlu1 %v2724_v40, %s9712_s22  ;;  %v3015_v10 = vpop.permute.xlu1 %3014  ;;  %v6842_v40 = vcombine.low %v3435_v48, %v3435_v48 }
 0x936   : > { %v3022_v23 = vmul.bf16 %v8479_v32, %v3015_v10  ;;  %v3016_v3 = vsel %vm664_vm4, %v3013_v52, %v3015_v10  ;;  %v6845_v52 = vcombine.high %v3507_v17, %v3507_v17 }
 0x937   : > { %v3021_v7 = vmul.bf16 %v3016_v3, %v8499_v25  ;;  %v3024_v30 = vmul.bf16 %v3016_v3, %v8516_v36  ;;  %v3442_v51 = vpack.i.b16 %v6842_v40, %v6842_v40  ;;  %v3581_v3 = vld [vmem:[%s9684_s11] sm:$0x22] }
 0x938   : > { %2878 = vrot.lane.b32.xlu0 %v2866_v61, %s9696_s25 }
 0x939   : > { %2882 = vrot.lane.b32.xlu1 %v2868_v20, %s9696_s25  ;;  %v3089_v4 = vpop.permute.xlu1 %3088  ;;  %v6844_v20 = vcombine.low %v3507_v17, %v3507_v17  ;;  %v3447_v10 = vrot.slane %v3442_v51, %v7768_v13 }
 0x93a   : > { %v3096_v5 = vmul.bf16 %v8479_v32, %v3089_v4  ;;  %v3090_v29 = vsel %vm611_vm7, %v3087_v26, %v3089_v4  ;;  %v3653_v4 = vld [vmem:[%s9684_s11] sm:$0x22] }
 0x93b   : > { %v3095_v21 = vmul.bf16 %v3090_v29, %v8499_v25  ;;  %v3098_v59 = vmul.bf16 %v3090_v29, %v8516_v36  ;;  %v3522_v29 = vshrl.u32 %v6845_v52, 16 }
 0x93c   : > { %2814 = vrot.lane.b32.xlu0 %v2797_v63, %s9715_s26 }
 0x93d   : > { %2812 = vrot.lane.b32.xlu1 %v2796_v55, %s9715_s26  ;;  %v2601_v55 = vld [vmem:[%s9678_s5 + $0x18] sm:$0xff] }
 0x940   : > { %2962 = vrot.lane.b32.xlu0 %v2949_v62, %s9714_s24  ;;  %v3514_v62 = vshrl.u32 %v6844_v20, 16  ;;  %v3809_v20 = vld [vmem:[%s9684_s11] sm:$0x88] }
 0x941   : > { %2884 = vrot.lane.b32.xlu1 %v2866_v61, %s9696_s25  ;;  %v2599_v61 = vld [vmem:[%s9678_s5 + $0x8] sm:$0xff] }
 0x944   : > { %2888 = vrot.lane.b32.xlu0 %v2871_v18, %s9696_s25  ;;  %v2600_v18 = vld [vmem:[%s9678_s5 + $0x10] sm:$0xff] }
 0x945   : > { %2886 = vrot.lane.b32.xlu1 %v2870_v19, %s9696_s25  ;;  %s9723_s25 = smov 7  }
 0x948   : > { %2960 = vrot.lane.b32.xlu0 %v2948_v0, %s9714_s24 }
 0x949   : > { %2964 = vrot.lane.b32.xlu1 %v2950_v27, %s9714_s24 }
 0x94c   : > { %2970 = vrot.lane.b32.xlu0 %v2950_v27, %s9714_s24 }
 0x94d   : > { %3036 = vrot.lane.b32.xlu1 %v3022_v23, %s9698_s21 }
 0x950   : > { %3034 = vrot.lane.b32.xlu0 %v3021_v7, %s9698_s21  ;;  %v3515_v7 = vpack.i.b16 %v3514_v62, %v3514_v62 }
 0x951   : > { %3110 = vrot.lane.b32.xlu1 %v3096_v5, %s7653_s28 }
 0x952   : > { %v3520_v31 = vrot.slane %v3515_v7, %v7768_v13  ;;  %v6853_v7 = vcombine.high %v3809_v20, %v3809_v20 }
 0x954   : > { %3032 = vrot.lane.b32.xlu0 %v3020_v11, %s9698_s21  ;;  %v6846_v11 = vcombine.low %v3581_v3, %v3581_v3 }
 0x955   : > { %2968 = vrot.lane.b32.xlu1 %v2952_v42, %s9714_s24  ;;  %v6848_v42 = vcombine.low %v3653_v4, %v3653_v4 }
 0x958   : > { %3042 = vrot.lane.b32.xlu0 %v3022_v23, %s9698_s21  ;;  %v6843_v23 = vcombine.high %v3435_v48, %v3435_v48 }
 0x959   : > { %2966 = vrot.lane.b32.xlu1 %v2951_v28, %s9714_s24 }
 0x95a   : > { %v3449_v28 = vpack.i.b16 %v6843_v23, %v6843_v23 }
 0x95c   : > { %3108 = vrot.lane.b32.xlu0 %v3095_v21, %s7653_s28  ;;  %v6847_v21 = vcombine.high %v3581_v3, %v3581_v3 }
 0x95d   : > { %3040 = vrot.lane.b32.xlu1 %v3024_v30, %s9698_s21  ;;  %v6849_v30 = vcombine.high %v3653_v4, %v3653_v4 }
 0x960   : > { %3106 = vrot.lane.b32.xlu0 %v3094_v54, %s7653_s28  ;;  %v3735_v54 = vld [vmem:[%s9684_s11] sm:$0x44] }
 0x961   : > { %3038 = vrot.lane.b32.xlu1 %v3023_v57, %s9698_s21  ;;  %v3454_v57 = vrot.slane %v3449_v28, %v7768_v13 }
 0x964   : > { %3116 = vrot.lane.b32.xlu0 %v3096_v5, %s7653_s28 }
 0x965   : > { %3114 = vrot.lane.b32.xlu1 %v3098_v59, %s7653_s28  ;;  %v3523_v59 = vpack.i.b16 %v3522_v29, %v3522_v29 }
 0x969   : > { %3112 = vrot.lane.b32.xlu1 %v3097_v33, %s7653_s28  ;;  %v3660_v33 = vshrl.u32 %v6848_v42, 16 }
 0x96b   : > { %v3661_v48 = vpack.i.b16 %v3660_v33, %v3660_v33 }
 0x97a   : > { %v2659_v34 = vpop.permute.xlu0 %2658  ;;  %v8588_v35 = vpop.permute.xlu1 %2664 }
 0x97e   : > { %v8590_v37 = vpop.permute.xlu0 %2732  ;;  %v3159_v39 = vpop.permute.xlu1 %3158 }
 0x97f   : > { %v3166_v15 = vmul.bf16 %v3159_v39, %v8497_v8  ;;  %v3169_v49 = vmul.bf16 %v3159_v39, %v8519_v12 }
 0x982   : > { %v3161_v45 = vpop.permute.xlu0 %3160  ;;  %v8615_v63 = vpop.permute.xlu1 %2738 }
 0x983   : > { %v3162_v44 = vsel %vm556_vm6, %v3159_v39, %v3161_v45  ;;  %v3168_v47 = vmul.bf16 %v8479_v32, %v3161_v45  ;;  %v3588_v39 = vpack.i.b16 %v6846_v11, %v6846_v11  ;;  %v3668_v45 = vshrl.u32 %v6849_v30, 16 }
 0x984   : > { %v3167_v46 = vmul.bf16 %v3162_v44, %v8499_v25  ;;  %v3170_v22 = vmul.bf16 %v3162_v44, %v8516_v36  ;;  %v6850_v44 = vcombine.low %v3735_v54, %v3735_v54 }
 0x985   : > { %3182 = vrot.lane.b32.xlu1 %v3168_v47, %s7652_s27  ;;  %v3593_v17 = vrot.slane %v3588_v39, %v7777_v24  ;;  %v3669_v40 = vpack.i.b16 %v3668_v45, %v3668_v45 }
 0x986   : > { %3180 = vrot.lane.b32.xlu0 %v3167_v46, %s7652_s27  ;;  %v8608_v2 = vpop.permute.xlu0 %2804  ;;  %v3528_v46 = vrot.slane %v3523_v59, %v7768_v13 }
 0x987   : > { %v3674_v23 = vrot.slane %v3669_v40, %v7777_v24 }
 0x989   : > { %3186 = vrot.lane.b32.xlu1 %v3170_v22, %s7652_s27  ;;  %v3595_v22 = vpack.i.b16 %v6847_v21, %v6847_v21 }
 0x98a   : > { %3178 = vrot.lane.b32.xlu0 %v3166_v15, %s7652_s27  ;;  %v6851_v15 = vcombine.high %v3735_v54, %v3735_v54 }
 0x98b   : > { %v3600_v51 = vrot.slane %v3595_v22, %v7777_v24 }
 0x98d   : > { %3184 = vrot.lane.b32.xlu1 %v3169_v49, %s7652_s27 }
 0x98e   : > { %3188 = vrot.lane.b32.xlu0 %v3168_v47, %s7652_s27 }
 0x991   : > { %3245 = vperm.xlu1 %7320, %v2599_v61   ;;  %v3742_v61 = vshrl.u32 %v6850_v44, 16 }
 0x992   : > { %3240 = vperm.xlu0 %7319, %v2598_v50   ;;  %v2661_v38 = vpop.permute.xlu0 %2660 }
 0x993   : > { %v2670_v19 = vsel %vm556_vm6, %v2659_v34, %v2661_v38  ;;  %v2663_v27 = vpop.permute.xlu1 %2662  ;;  %v3743_v52 = vpack.i.b16 %v3742_v61, %v3742_v61 }
 0x994   : > { %v2671_v0 = vsel %vm556_vm6, %v2661_v38, %v2663_v27  ;;  %v3881_v38 = vld [vmem:[%s9684_s11] sm:$0x88]  ;;  %v3666_v27 = vrot.slane %v3661_v48, %v7777_v24 }
 0x995   : > { %3255 = vperm.xlu1 %7320, %v2601_v55   ;;  %3294 = vmatprep.subr.bf16.mxu0 %v2671_v0  ;;  %v3750_v55 = vshrl.u32 %v6851_v15, 16  ;;  %v6852_v0 = vcombine.low %v3809_v20, %v3809_v20  ;;  %v6854_v3 = vcombine.low %v3881_v38, %v3881_v38  ;;  %v6855_v11 = vcombine.high %v3881_v38, %v3881_v38 }
 0x996   : > { %3250 = vperm.xlu0 %7319, %v2600_v18   ;;  %v2735_v5 = vpop.permute.xlu0 %2734  ;;  %3295 = vmatpush1.bf16.msra.mxu0 %v2670_v19  ;;  %v3748_v28 = vrot.slane %v3743_v52, %v7803_v41 }
 0x997   : > { %v2737_v26 = vpop.permute.xlu1 %2736  ;;  %v2744_v42 = vsel %vm611_vm7, %v8590_v37, %v2735_v5  ;;  %v3816_v29 = vpack.i.b16 %v6852_v0, %v6852_v0  ;;  %v3888_v21 = vshrl.u32 %v6854_v3, 16  ;;  %v3896_v59 = vshrl.u32 %v6855_v11, 16 }
 0x998   : > { %v2745_v19 = vsel %vm611_vm7, %v2735_v5, %v2737_v26 }
 0x999   : > { %3459 = vrot.lane.b32.xlu1 %v3454_v57, %s7652_s27  ;;  %v3823_v57 = vpack.i.b16 %v6853_v7, %v6853_v7  ;;  %v3821_v39 = vrot.slane %v3816_v29, %v7805_v43  ;;  %v3889_v45 = vpack.i.b16 %v3888_v21, %v3888_v21 }
 0x99a   : > { %v8639_v34 = vpop.permute.xlu0 %2806  ;;  %3457 = vrot.lane.b32.xlu0 %v3447_v10, %s7652_s27 }
 0x99b   : > { %v2809_v47 = vpop.permute.xlu1 %2808  ;;  %v2816_v22 = vsel %vm664_vm4, %v8608_v2, %v8639_v34 }
 0x99c   : > { %v2817_v5 = vsel %vm664_vm4, %v8639_v34, %v2809_v47  ;;  %v3894_v47 = vrot.slane %v3889_v45, %v7805_v43  ;;  %v7425_v45 = vld [vmem:[%s9676_s3 + $0x48] ss:$12 sps:$4 sm:$0xff]  }
 0x99d   : > { %3533 = vrot.lane.b32.xlu1 %v3528_v46, %s7653_s28  ;;  %v3828_v46 = vrot.slane %v3823_v57, %v7805_v43 }
 0x99e   : > { %v2669_v49 = vpop.permute.xlu0 %2668  ;;  %3531 = vrot.lane.b32.xlu0 %v3520_v31, %s7653_s28 }
 0x99f   : > { %v2667_v50 = vpop.permute.xlu1 %2666 }
 0x9a0   : > { %v2672_v62 = vsel %vm556_vm6, %v8588_v35, %v2667_v50  ;;  %v2673_v18 = vsel %vm556_vm6, %v2667_v50, %v2669_v49  ;;  %v3751_v35 = vpack.i.b16 %v3750_v55, %v3750_v55 }
 0x9a1   : > { %3296 = vmatprep.subr.bf16.mxu0 %v2673_v18  ;;  %3605 = vrot.lane.b32.xlu1 %v3600_v51, %s9716_s15 }
 0x9a2   : > { %v2881_v10 = vpop.permute.xlu0 %2880  ;;  %3297 = vmatpush1.bf16.msra.mxu0 %v2672_v62  ;;  %3603 = vrot.lane.b32.xlu0 %v3593_v17, %s9716_s15  ;;  %v3756_v54 = vrot.slane %v3751_v35, %v7803_v41 }
 0x9a3   : > { %v2811_v4 = vpop.permute.xlu1 %2810  ;;  %3298 = vmatprep.subr.bf16.mxu0 %v2745_v19 }
 0x9a5   : > { %3679 = vrot.lane.b32.xlu1 %v3674_v23, %s9714_s24 }
 0x9a6   : > { %v2743_v26 = vpop.permute.xlu0 %2742  ;;  %3299 = vmatpush1.bf16.msra.mxu0 %v2744_v42  ;;  %3677 = vrot.lane.b32.xlu0 %v3666_v27, %s9714_s24 }
 0x9a7   : > { %v2741_v30 = vpop.permute.xlu1 %2740 }
 0x9a8   : > { %v2746_v33 = vsel %vm611_vm7, %v8615_v63, %v2741_v30  ;;  %v2747_v37 = vsel %vm611_vm7, %v2741_v30, %v2743_v26  ;;  %v3897_v63 = vpack.i.b16 %v3896_v59, %v3896_v59 }
 0x9a9   : > { %3300 = vmatprep.subr.bf16.mxu0 %v2747_v37  ;;  %3761 = vrot.lane.b32.xlu1 %v3756_v54, %s9717_s16 }
 0x9aa   : > { %v2879_v31 = vpop.permute.xlu0 %2878  ;;  %3301 = vmatpush1.bf16.msra.mxu0 %v2746_v33  ;;  %3759 = vrot.lane.b32.xlu0 %v3748_v28, %s9717_s16  ;;  %v3902_v49 = vrot.slane %v3897_v63, %v7805_v43 }
 0x9ab   : > { %v2883_v44 = vpop.permute.xlu1 %2882  ;;  %3302 = vmatprep.subr.bf16.mxu0 %v2817_v5  ;;  %v2890_v34 = vsel %vm719_vm5, %v2879_v31, %v2881_v10  ;;  %v7418_v31 = vld [vmem:[%s9676_s3 + $0x30] ss:$12 sps:$4 sm:$0xff]  }
 0x9ac   : > { %v2891_v61 = vsel %vm719_vm5, %v2881_v10, %v2883_v44 }
 0x9ad   : > { %3833 = vrot.lane.b32.xlu1 %v3828_v46, %s9715_s26 }
 0x9ae   : > { %v2815_v15 = vpop.permute.xlu0 %2814  ;;  %3303 = vmatpush1.bf16.msra.mxu0 %v2816_v22  ;;  %3831 = vrot.lane.b32.xlu0 %v3821_v39, %s9715_s26  ;;  %v7422_v39 = vld [vmem:[%s9676_s3 + $0x4c] ss:$12 sps:$4 sm:$0xff]  }
 0x9af   : > { %v2813_v48 = vpop.permute.xlu1 %2812 }
 0x9b0   : > { %v2818_v17 = vsel %vm664_vm4, %v2811_v4, %v2813_v48  ;;  %v2819_v40 = vsel %vm664_vm4, %v2813_v48, %v2815_v15 }
 0x9b1   : > { %3304 = vmatprep.subr.bf16.mxu0 %v2819_v40  ;;  %3907 = vrot.lane.b32.xlu1 %v3902_v49, %s9712_s22 }
 0x9b2   : > { %v2963_v20 = vpop.permute.xlu0 %2962  ;;  %3305 = vmatpush1.bf16.msra.mxu0 %v2818_v17  ;;  %3905 = vrot.lane.b32.xlu0 %v3894_v47, %s9712_s22 }
 0x9b3   : > { %v2885_v2 = vpop.permute.xlu1 %2884  ;;  %3306 = vmatprep.subr.bf16.mxu0 %v2891_v61  ;;  %v7426_v61 = vld [vmem:[%s9676_s3 + $0x38] ss:$12 sps:$4 sm:$0xff]  }
 0x9b6   : > { %v2889_v50 = vpop.permute.xlu0 %2888  ;;  %3307 = vmatpush1.bf16.msra.mxu0 %v2890_v34  ;;  %v3955_v34 = vld [vmem:[%s9684_s11 + $0x8] sm:$0x11] }
 0x9b7   : > { %v2887_v51 = vpop.permute.xlu1 %2886 }
 0x9b8   : > { %v2892_v55 = vsel %vm719_vm5, %v2885_v2, %v2887_v51  ;;  %v2893_v38 = vsel %vm719_vm5, %v2887_v51, %v2889_v50  ;;  %v6856_v50 = vcombine.low %v3955_v34, %v3955_v34 }
 0x9b9   : > { %3308 = vmatprep.subr.bf16.mxu0 %v2893_v38  ;;  %v6857_v38 = vcombine.high %v3955_v34, %v3955_v34 }
 0x9ba   : > { %v2961_v62 = vpop.permute.xlu0 %2960  ;;  %3309 = vmatpush1.bf16.msra.mxu0 %v2892_v55  ;;  %v3962_v55 = vpack.i.b16 %v6856_v50, %v6856_v50 }
 0x9bb   : > { %v2965_v18 = vpop.permute.xlu1 %2964  ;;  %3310 = vmatprep.subr.bf16.mxu0 %v8499_v25  ;;  %v2972_v52 = vsel %vm702_vm3, %v2961_v62, %v2963_v20 }
 0x9bc   : > { %v2973_v0 = vsel %vm702_vm3, %v2963_v20, %v2965_v18  ;;  %v7427_v20 = vld [vmem:[%s9676_s3 + $0x50] ss:$12 sps:$4 sm:$0xff]  }
 0x9be   : > { %v2971_v19 = vpop.permute.xlu0 %2970  ;;  %3311 = vmatpush1.bf16.msra.mxu0 %v8497_v8 }
 0x9bf   : > { %v3037_v27 = vpop.permute.xlu1 %3036  ;;  %3312 = vmatprep.subr.bf16.mxu0 %v8516_v36 }
 0x9c2   : > { %v3035_v10 = vpop.permute.xlu0 %3034  ;;  %3313 = vmatpush1.bf16.msra.mxu0 %v8519_v12 }
 0x9c3   : > { %v3111_v23 = vpop.permute.xlu1 %3110  ;;  %3314 = vmatprep.subr.bf16.mxu0 %v2973_v0  ;;  %v3045_v36 = vsel %vm647_vm2, %v3035_v10, %v3037_v27  ;;  %v3969_v27 = vpack.i.b16 %v6857_v38, %v6857_v38 }
 0x9c6   : > { %v3033_v3 = vpop.permute.xlu0 %3032  ;;  %3315 = vmatpush1.bf16.msra.mxu0 %v2972_v52 }
 0x9c7   : > { %v2969_v4 = vpop.permute.xlu1 %2968  ;;  %v3044_v42 = vsel %vm647_vm2, %v3033_v3, %v3035_v10 }
 0x9c8   : > { %v2975_v25 = vsel %vm702_vm3, %v2969_v4, %v2971_v19  ;;  %v3967_v19 = vrot.slane %v3962_v55, %v7768_v13 }
 0x9c9   : > { %3316 = vmatprep.subr.bf16.mxu0 %v2975_v25 }
 0x9ca   : > { %v3043_v35 = vpop.permute.xlu0 %3042 }
 0x9cb   : > { %v2967_v8 = vpop.permute.xlu1 %2966 }
 0x9cc   : > { %v2974_v7 = vsel %vm702_vm3, %v2967_v8, %v2969_v4 }
 0x9cd   : > { %3317 = vmatpush1.bf16.msra.mxu0 %v2974_v7 }
 0x9ce   : > { %v3109_v11 = vpop.permute.xlu0 %3108  ;;  %3318 = vmatprep.subr.bf16.mxu0 %v3045_v36 }
 0x9cf   : > { %v3041_v12 = vpop.permute.xlu1 %3040  ;;  %v3119_v30 = vsel %vm594_vm1, %v3109_v11, %v3111_v23  ;;  %v3974_v23 = vrot.slane %v3969_v27, %v7768_v13 }
 0x9d0   : > { %v3047_v26 = vsel %vm647_vm2, %v3041_v12, %v3043_v35 }
 0x9d1   : > { %3319 = vmatpush1.bf16.msra.mxu0 %v3044_v42 }
 0x9d2   : > { %v3107_v28 = vpop.permute.xlu0 %3106  ;;  %3320 = vmatprep.subr.bf16.mxu0 %v3047_v26 }
 0x9d3   : > { %v3039_v29 = vpop.permute.xlu1 %3038  ;;  %v3118_v59 = vsel %vm594_vm1, %v3107_v28, %v3109_v11 }
 0x9d4   : > { %v3046_v21 = vsel %vm647_vm2, %v3039_v29, %v3041_v12 }
 0x9d5   : > { %3321 = vmatpush1.bf16.msra.mxu0 %v3046_v21 }
 0x9d6   : > { %v3117_v54 = vpop.permute.xlu0 %3116  ;;  %3322 = vmatprep.subr.bf16.mxu0 %v3119_v30 }
 0x9d7   : > { %v3115_v57 = vpop.permute.xlu1 %3114 }
 0x9d8   : > { %v3121_v33 = vsel %vm594_vm1, %v3115_v57, %v3117_v54 }
 0x9d9   : > { %3323 = vmatpush1.bf16.msra.mxu0 %v3118_v59 }
 0x9da   : > { %3324 = vmatprep.subr.bf16.mxu0 %v3121_v33 }
 0x9db   : > { %v3113_v37 = vpop.permute.xlu1 %3112 }
 0x9dc   : > { %v3120_v5 = vsel %vm594_vm1, %v3113_v37, %v3115_v57 }
 0x9dd   : > { %3325 = vmatpush1.bf16.msra.mxu0 %v3120_v5 }
 0x9e0   : > { %3327 = vmatmul.mubr.bf16.vlgmr.msra.gmra.mrb[16].mxu0 %v7418_v31 }
 0x9e1   : > { %3336 = vmatprep.mubr.bf16.mxu0 %v7422_v39 }
 0x9e8   : > { %3337 = vmatmul.mubr.bf16.gmra.mrb[20].mxu0 %v7425_v45 }
 0x9e9   : > { %3379 = vmatprep.mubr.bf16.mxu0 %v8479_v32 }
 0x9f7   : > { %v3183_v44 = vpop.permute.xlu1 %3182 }
 0x9f8   : > { %v3181_v46 = vpop.permute.xlu0 %3180 }
 0x9f9   : > { %v3191_v63 = vsel %vm539_vm0, %v3181_v46, %v3183_v44 }
 0x9fa   : > { %3347 = vmatprep.subr.bf16.mxu0 %v3191_v63 }
 0x9fb   : > { %v3187_v22 = vpop.permute.xlu1 %3186 }
 0x9fc   : > { %v3179_v15 = vpop.permute.xlu0 %3178 }
 0x9fd   : > { %v3190_v47 = vsel %vm539_vm0, %v3179_v15, %v3181_v46 }
 0x9fe   : > { %3348 = vmatpush1.bf16.msra.mxu0 %v3190_v47 }
 0x9ff   : > { %v3185_v48 = vpop.permute.xlu1 %3184 }
 0xa00   : > { %v3189_v49 = vpop.permute.xlu0 %3188  ;;  %v3192_v40 = vsel %vm539_vm0, %v3185_v48, %v3187_v22 }
 0xa01   : > { %v3193_v17 = vsel %vm539_vm0, %v3187_v22, %v3189_v49 }
 0xa02   : > { %3349 = vmatprep.subr.bf16.mxu0 %v3193_v17 }
 0xa03   : > { %3350 = vmatpush1.bf16.msra.mxu0 %v3192_v40 }
 0xa06   : > { %6832 = vmatmul.mubr.msk.bf16.vlgmr.msra.gmra.mrb[16].mxu0 %vm1104_vm8, %v7426_v61 }
 0xa07   : > { %3389 = vmatprep.mubr.bf16.mxu0 %v8479_v32 }
 0xa0e   : > { %6833 = vmatmul.mubr.msk.bf16.gmra.mrb[20].mxu0 %vm1104_vm8, %v7427_v20 }
 0xa10   : > { %v3246_v4 = vpop.permute.xlu1 %3245 }
 0xa11   : > { %v3241_v2 = vpop.permute.xlu0 %3240 }
 0xa14   : > { %v3256_v25 = vpop.permute.xlu1 %3255 }
 0xa15   : > { %v3251_v51 = vpop.permute.xlu0 %3250 }
 0xa18   : > { %v3460_v12 = vpop.permute.xlu1 %3459 }
 0xa19   : > { %v3458_v62 = vpop.permute.xlu0 %3457 }
 0xa1a   : > { %v3465_v18 = vmul.bf16 %v8479_v32, %v3458_v62  ;;  %v3461_v59 = vsel %vm539_vm0, %v3458_v62, %v3460_v12 }
 0xa1c   : > { %3477 = vrot.lane.b32.xlu0 %v3465_v18, %s9713_s18  ;;  %3483 = vrot.lane.b32.xlu1 %v3465_v18, %s9713_s18  ;;  %v3534_v5 = vpop.permute.xlu1 %3533 }
 0xa1d   : > { %v3532_v0 = vpop.permute.xlu0 %3531 }
 0xa1e   : > { %v3539_v10 = vmul.bf16 %v8479_v32, %v3532_v0  ;;  %v3535_v46 = vsel %vm594_vm1, %v3532_v0, %v3534_v5 }
 0xa20   : > { %3551 = vrot.lane.b32.xlu0 %v3539_v10, %s9712_s22  ;;  %3977 = vrot.lane.b32.xlu1 %v3967_v19, %s9713_s18  ;;  %v3606_v22 = vpop.permute.xlu1 %3605 }
 0xa21   : > { %v3604_v52 = vpop.permute.xlu0 %3603 }
 0xa22   : > { %v3611_v3 = vmul.bf16 %v8479_v32, %v3604_v52  ;;  %v3607_v49 = vsel %vm647_vm2, %v3604_v52, %v3606_v22 }
 0xa24   : > { %3979 = vrot.lane.b32.xlu0 %v3974_v23, %s9713_s18  ;;  %3557 = vrot.lane.b32.xlu1 %v3539_v10, %s9712_s22 }
 0xa28   : > { %3623 = vrot.lane.b32.xlu0 %v3611_v3, %s9715_s26 }
 0xad9   : > { %v3381_v35 = vpop.f32.mrb[16].mxu0 }
 0xada   : > { %v7244_v8 = vadd.f32 %v3381_v35, %v3241_v2  ;;  %v3383_v7 = vpop.f32.mrb[17].mxu0 }
 0xadb   : > { %v7245_v36 = vadd.f32 %v3383_v7, %v3241_v2  ;;  %v3385_v11 = vpop.f32.mrb[18].mxu0 }
 0xadc   : > { %v7246_v42 = vadd.f32 %v3385_v11, %v3246_v4  ;;  %v3387_v26 = vpop.f32.mrb[19].mxu0  ;;  %v3400_v29 = vadd.f32 %v7244_v8, %v7933_v53 }
 0xadd   : > { %v7247_v28 = vadd.f32 %v3387_v26, %v3246_v4  ;;  %v3401_v30 = vadd.f32 %v7245_v36, %v7935_v56 }
 0xade   : > { %v3402_v21 = vadd.f32 %v7246_v42, %v7937_v58 }
 0xadf   : > { %v3403_v54 = vadd.f32 %v7247_v28, %v7939_v60 }
 0xae0   : > { %v8751_v57 = vpack.c.bf16 %v3402_v21, %v3400_v29 }
 0xae1   : > { %v8754_v33 = vpack.c.bf16 %v3403_v54, %v3401_v30  ;;  %v3391_v37 = vpop.f32.mrb[20].mxu0 }
 0xae2   : > { %3425 = vst [vmem:[#allocation2 + $0x8] sm:$0xff] %v8751_v57  ;;  %v7248_v31 = vadd.f32 %v3391_v37, %v3251_v51  ;;  %v3393_v39 = vpop.f32.mrb[21].mxu0  ;;  %v3466_v53 = vmul.bf16 %v3461_v59, %v8751_v57  ;;  %3725 = vst [vmem:[#allocation3 + $0x80] sm:$0xff] %v8751_v57  ;;  %v3540_v48 = vmul.bf16 %v3535_v46, %v8751_v57 }
 0xae3   : > { %v7249_v58 = vadd.f32 %v3393_v39, %v3251_v51  ;;  %v3395_v56 = vpop.f32.mrb[22].mxu0  ;;  %v3467_v44 = vmul.bf16 %v3460_v12, %v8754_v33  ;;  %v3541_v20 = vmul.bf16 %v3534_v5, %v8754_v33 }
 0xae4   : > { %v7250_v45 = vadd.f32 %v3395_v56, %v3256_v25  ;;  %v3397_v60 = vpop.f32.mrb[23].mxu0  ;;  %3479 = vrot.lane.b32.xlu0 %v3466_v53, %s9713_s18  ;;  %v3404_v15 = vadd.f32 %v7248_v31, %v7953_v6  ;;  %v3612_v6 = vmul.bf16 %v3607_v49, %v8751_v57 }
 0xae5   : > { %v7251_v63 = vadd.f32 %v3397_v60, %v3256_v25  ;;  %3481 = vrot.lane.b32.xlu1 %v3467_v44, %s9713_s18  ;;  %v3405_v17 = vadd.f32 %v7249_v58, %v7955_v9  ;;  %v3613_v9 = vmul.bf16 %v3606_v22, %v8754_v33  ;;  %v8841_v58 = vld [vmem:[#allocation2] sm:$0xff] }
 0xae6   : > { %v3406_v47 = vadd.f32 %v7250_v45, %v7957_v14  ;;  %v3678_v14 = vpop.permute.xlu0 %3677 }
 0xae7   : > { %v3407_v40 = vadd.f32 %v7251_v63, %v7959_v16  ;;  %v3680_v16 = vpop.permute.xlu1 %3679  ;;  %v3685_v18 = vmul.bf16 %v8479_v32, %v3678_v14  ;;  %v7444_v63 = vld [vmem:[%s9676_s3 + $0x64] ss:$12 sps:$4 sm:$0xff]  }
 0xae8   : > { %v8769_v61 = vpack.c.bf16 %v3406_v47, %v3404_v15  ;;  %3553 = vrot.lane.b32.xlu0 %v3540_v48, %s9712_s22  ;;  %v3681_v50 = vsel %vm702_vm3, %v3678_v14, %v3680_v16  ;;  %v3687_v52 = vmul.bf16 %v3680_v16, %v8754_v33  ;;  %4145 = vmatprep.mubr.bf16.mxu1 %v7444_v63  ;;  %v7451_v14 = vld [vmem:[%s9686_s13] sm:$0xff]  }
 0xae9   : > { %v8773_v2 = vpack.c.bf16 %v3407_v40, %v3405_v17  ;;  %3555 = vrot.lane.b32.xlu1 %v3541_v20, %s9712_s22  ;;  %v3686_v55 = vmul.bf16 %v3681_v50, %v8751_v57  ;;  %v3417_v40 = vld [vmem:[%s9678_s5] sm:$0xff]  ;;  %v3418_v20 = vld [vmem:[%s9678_s5 + $0x8] sm:$0xff] }
 0xaea   : > { %3427 = vst [vmem:[#allocation2 + $0x28] sm:$0xff] %v8769_v61  ;;  %3727 = vst [vmem:[#allocation3 + $0x90] sm:$0xff] %v8769_v61  ;;  %v3469_v51 = vmul.bf16 %v3461_v59, %v8769_v61  ;;  %v3543_v62 = vmul.bf16 %v3535_v46, %v8769_v61  ;;  %v3615_v19 = vmul.bf16 %v3607_v49, %v8769_v61  ;;  %v3760_v27 = vpop.permute.xlu0 %3759 }
 0xaeb   : > { %v3470_v34 = vmul.bf16 %v3460_v12, %v8773_v2  ;;  %v3544_v38 = vmul.bf16 %v3534_v5, %v8773_v2  ;;  %v3762_v0 = vpop.permute.xlu1 %3761  ;;  %v3616_v10 = vmul.bf16 %v3606_v22, %v8773_v2  ;;  %v3689_v4 = vmul.bf16 %v3681_v50, %v8769_v61  ;;  %v3420_v50 = vld [vmem:[%s9678_s5 + $0x18] sm:$0xff] }
 0xaec   : > { %3625 = vrot.lane.b32.xlu0 %v3612_v6, %s9715_s26  ;;  %v3763_v23 = vsel %vm719_vm5, %v3760_v27, %v3762_v0  ;;  %v3690_v25 = vmul.bf16 %v3680_v16, %v8773_v2  ;;  %v3767_v35 = vmul.bf16 %v3760_v27, %v8751_v57  ;;  %v3769_v7 = vmul.bf16 %v8479_v32, %v3762_v0  ;;  %v7452_v16 = vld [vmem:[%s9686_s13 + $0x48] sm:$0xff]  }
 0xaed   : > { %3627 = vrot.lane.b32.xlu1 %v3613_v9, %s9715_s26  ;;  %v3770_v12 = vmul.bf16 %v3760_v27, %v8769_v61  ;;  %v3771_v54 = vmul.bf16 %v3763_v23, %v8773_v2  ;;  %v7662_v6 = vmov 2   ;;  %v7450_v9 = vld [vmem:[%s9686_s13 + $0x40] sm:$0xff]   ;;  %v7460_v0 = vld [vmem:[%s9686_s13 + $0x68] sm:$0xff]  }
 0xaee   : > { %v3832_v8 = vpop.permute.xlu0 %3831  ;;  %7321 = vset.pattern.permute.xlu0 %v7662_v6  ;;  %7322 = vset.pattern.permute.xlu1 %v7662_v6  ;;  %v7459_v27 = vld [vmem:[%s9686_s13 + $0x20] sm:$0xff]  }
 0xaef   : > { %v3834_v36 = vpop.permute.xlu1 %3833  ;;  %v3839_v29 = vmul.bf16 %v3832_v8, %v8751_v57  ;;  %6961 = vmatprep.subr.bf16.mxu0 %v7450_v9 }
 0xaf0   : > { %3487 = vrot.lane.b32.xlu0 %v3470_v34, %s9713_s18  ;;  %v3835_v11 = vsel %vm664_vm4, %v3832_v8, %v3834_v36  ;;  %v3841_v28 = vmul.bf16 %v8479_v32, %v3834_v36  ;;  %v3842_v32 = vmul.bf16 %v3832_v8, %v8769_v61  ;;  %v3419_v34 = vld [vmem:[%s9678_s5 + $0x10] sm:$0xff]  ;;  %6962 = vmatpush3.bf16.msra.mxu0 %v7451_v14 }
 0xaf1   : > { %3485 = vrot.lane.b32.xlu1 %v3469_v51, %s9713_s18  ;;  %v3840_v26 = vmul.bf16 %v3835_v11, %v8754_v33  ;;  %v3843_v39 = vmul.bf16 %v3835_v11, %v8773_v2  ;;  %v7453_v51 = vld [vmem:[%s9686_s13 + $0x8] sm:$0xff]   ;;  %6963 = vmatprep.subr.bf16.mxu0 %v7452_v16  ;;  %s9702_s18 = smov 8  }
 0xaf2   : > { %v3906_v42 = vpop.permute.xlu0 %3905 }
 0xaf3   : > { %v3908_v30 = vpop.permute.xlu1 %3907  ;;  %v3913_v53 = vmul.bf16 %v3906_v42, %v8751_v57  ;;  %v3916_v15 = vmul.bf16 %v3906_v42, %v8769_v61 }
 0xaf4   : > { %3699 = vrot.lane.b32.xlu0 %v3686_v55, %s9717_s16  ;;  %v3909_v59 = vsel %vm611_vm7, %v3906_v42, %v3908_v30  ;;  %v3915_v56 = vmul.bf16 %v8841_v58, %v3908_v30  ;;  %v7454_v55 = vld [vmem:[%s9686_s13 + $0x50] sm:$0xff]   ;;  %6964 = vmatpush3.bf16.msra.mxu0 %v7453_v51 }
 0xaf5   : > { %3629 = vrot.lane.b32.xlu1 %v3611_v3, %s9715_s26  ;;  %v3768_v3 = vmul.bf16 %v3763_v23, %v8754_v33  ;;  %v3914_v37 = vmul.bf16 %v3909_v59, %v8754_v33  ;;  %v3917_v46 = vmul.bf16 %v3909_v59, %v8773_v2  ;;  %6965 = vmatprep.subr.bf16.mxu0 %v7454_v55  ;;  %v7461_v23 = vld [vmem:[%s9686_s13 + $0x28] sm:$0xff]  }
 0xaf6   : > { %v8823_v21 = vpop.permute.xlu0 %3477 }
 0xaf7   : > { %v8834_v31 = vpop.permute.xlu1 %3483 }
 0xaf8   : > { %3561 = vrot.lane.b32.xlu0 %v3544_v38, %s9712_s22  ;;  %v7455_v38 = vld [vmem:[%s9686_s13 + $0x10] sm:$0xff]  }
 0xaf9   : > { %3559 = vrot.lane.b32.xlu1 %v3543_v62, %s9712_s22  ;;  %v7456_v62 = vld [vmem:[%s9686_s13 + $0x58] sm:$0xff]   ;;  %6966 = vmatpush3.bf16.msra.mxu0 %v7455_v38  ;;  %s9700_s22 = smov 9  }
 0xafa   : > { %v8832_v5 = vpop.permute.xlu0 %3551  ;;  %6967 = vmatprep.subr.bf16.mxu0 %v7456_v62 }
 0xafb   : > { %v3978_v60 = vpop.permute.xlu1 %3977 }
 0xafc   : > { %3697 = vrot.lane.b32.xlu0 %v3685_v18, %s9717_s16  ;;  %v3985_v48 = vmul.bf16 %v3978_v60, %v8751_v57  ;;  %v3988_v17 = vmul.bf16 %v3978_v60, %v8769_v61 }
 0xafd   : > { %3631 = vrot.lane.b32.xlu1 %v3615_v19, %s9715_s26  ;;  %v7458_v19 = vld [vmem:[%s9686_s13 + $0x60] sm:$0xff]  }
 0xafe   : > { %v3980_v45 = vpop.permute.xlu0 %3979 }
 0xaff   : > { %v3981_v44 = vsel %vm556_vm6, %v3978_v60, %v3980_v45  ;;  %v3987_v47 = vmul.bf16 %v8841_v58, %v3980_v45 }
 0xb00   : > { %3633 = vrot.lane.b32.xlu0 %v3616_v10, %s9715_s26  ;;  %v3986_v22 = vmul.bf16 %v3981_v44, %v8754_v33  ;;  %v3989_v49 = vmul.bf16 %v3981_v44, %v8773_v2  ;;  %s9708_s26 = smov 120  }
 0xb01   : > { %3701 = vrot.lane.b32.xlu1 %v3687_v52, %s9717_s16  ;;  %v3558_v52 = vpop.permute.xlu1 %3557 }
 0xb02   : > { %v3624_v10 = vpop.permute.xlu0 %3623 }
 0xb04   : > { %3781 = vrot.lane.b32.xlu0 %v3768_v3, %s9714_s24 }
 0xb05   : > { %3705 = vrot.lane.b32.xlu1 %v3689_v4, %s9717_s16 }
 0xb08   : > { %3707 = vrot.lane.b32.xlu0 %v3690_v25, %s9717_s16 }
 0xb09   : > { %3703 = vrot.lane.b32.xlu1 %v3685_v18, %s9717_s16  ;;  %v7457_v18 = vld [vmem:[%s9686_s13 + $0x18] sm:$0xff]  }
 0xb0a   : > { %6968 = vmatpush3.bf16.msra.mxu0 %v7457_v18 }
 0xb0b   : > { %6969 = vmatprep.subr.bf16.mxu0 %v7458_v19 }
 0xb0c   : > { %3779 = vrot.lane.b32.xlu0 %v3767_v35, %s9714_s24 }
 0xb0d   : > { %3783 = vrot.lane.b32.xlu1 %v3769_v7, %s9714_s24 }
 0xb0e   : > { %6970 = vmatpush3.bf16.msra.mxu0 %v7459_v27 }
 0xb0f   : > { %6971 = vmatprep.subr.bf16.mxu0 %v7460_v0 }
 0xb10   : > { %3789 = vrot.lane.b32.xlu0 %v3769_v7, %s9714_s24 }
 0xb11   : > { %3785 = vrot.lane.b32.xlu1 %v3770_v12, %s9714_s24 }
 0xb12   : > { %6972 = vmatpush3.bf16.msra.mxu0 %v7461_v23 }
 0xb14   : > { %3853 = vrot.lane.b32.xlu0 %v3840_v26, %s9716_s15 }
 0xb15   : > { %3855 = vrot.lane.b32.xlu1 %v3841_v28, %s9716_s15 }
 0xb18   : > { %3851 = vrot.lane.b32.xlu0 %v3839_v29, %s9716_s15 }
 0xb19   : > { %3787 = vrot.lane.b32.xlu1 %v3771_v54, %s9714_s24 }
 0xb1c   : > { %3861 = vrot.lane.b32.xlu0 %v3841_v28, %s9716_s15 }
 0xb1d   : > { %3857 = vrot.lane.b32.xlu1 %v3842_v32, %s9716_s15 }
 0xb20   : > { %3927 = vrot.lane.b32.xlu0 %v3914_v37, %s7653_s28 }
 0xb21   : > { %3859 = vrot.lane.b32.xlu1 %v3843_v39, %s9716_s15  ;;  %s9720_s15 = smov 119  }
 0xb24   : > { %3925 = vrot.lane.b32.xlu0 %v3913_v53, %s7653_s28 }
 0xb25   : > { %3929 = vrot.lane.b32.xlu1 %v3915_v56, %s7653_s28 }
 0xb28   : > { %3935 = vrot.lane.b32.xlu0 %v3915_v56, %s7653_s28 }
 0xb29   : > { %3933 = vrot.lane.b32.xlu1 %v3917_v46, %s7653_s28 }
 0xb2c   : > { %3999 = vrot.lane.b32.xlu0 %v3986_v22, %s7652_s27 }
 0xb2d   : > { %3931 = vrot.lane.b32.xlu1 %v3916_v15, %s7653_s28  ;;  %s9722_s28 = smov 121  }
 0xb30   : > { %3997 = vrot.lane.b32.xlu0 %v3985_v48, %s7652_s27 }
 0xb31   : > { %4001 = vrot.lane.b32.xlu1 %v3987_v47, %s7652_s27 }
 0xb34   : > { %4007 = vrot.lane.b32.xlu0 %v3987_v47, %s7652_s27 }
 0xb35   : > { %4005 = vrot.lane.b32.xlu1 %v3989_v49, %s7652_s27 }
 0xb38   : > { %4059 = vperm.xlu0 %7321, %v3417_v40  }
 0xb39   : > { %4003 = vrot.lane.b32.xlu1 %v3988_v17, %s7652_s27  ;;  %s9706_s27 = smov 121  }
 0xb3c   : > { %4074 = vperm.xlu0 %7321, %v3420_v50  }
 0xb3d   : > { %4064 = vperm.xlu1 %7322, %v3418_v20  }
 0xb40   : > { %7324 = vset.pattern.permute.xlu0 %v8841_v58 }
 0xb41   : > { %4069 = vperm.xlu1 %7322, %v3419_v34  }
 0xb45   : > { %7323 = vset.pattern.permute.xlu1 %v8841_v58 }
 0xb56   : > { %v3480_v3 = vpop.permute.xlu0 %3479 }
 0xb57   : > { %v3489_v4 = vsel %vm556_vm6, %v8823_v21, %v3480_v3  ;;  %v3482_v25 = vpop.permute.xlu1 %3481 }
 0xb58   : > { %3497 = vst [vmem:[#allocation3] sm:$0xff] %v3489_v4  ;;  %v3490_v35 = vsel %vm556_vm6, %v3480_v3, %v3482_v25 }
 0xb59   : > { %4113 = vmatprep.subr.bf16.mxu1 %v3490_v35 }
 0xb5a   : > { %v3554_v8 = vpop.permute.xlu0 %3553  ;;  %4114 = vmatpush1.bf16.msra.mxu1 %v3489_v4 }
 0xb5b   : > { %v3563_v7 = vsel %vm611_vm7, %v8832_v5, %v3554_v8  ;;  %v3556_v36 = vpop.permute.xlu1 %3555 }
 0xb5c   : > { %3571 = vst [vmem:[#allocation3 + $0x20] sm:$0xff] %v3563_v7  ;;  %v3564_v11 = vsel %vm611_vm7, %v3554_v8, %v3556_v36 }
 0xb5e   : > { %v3626_v12 = vpop.permute.xlu0 %3625 }
 0xb5f   : > { %v3635_v42 = vsel %vm664_vm4, %v3624_v10, %v3626_v12  ;;  %v3628_v26 = vpop.permute.xlu1 %3627 }
 0xb60   : > { %3643 = vst [vmem:[#allocation3 + $0x40] sm:$0xff] %v3635_v42  ;;  %v3636_v28 = vsel %vm664_vm4, %v3626_v12, %v3628_v26 }
 0xb62   : > { %v3488_v29 = vpop.permute.xlu0 %3487 }
 0xb63   : > { %v3486_v21 = vpop.permute.xlu1 %3485 }
 0xb64   : > { %v3491_v30 = vsel %vm556_vm6, %v8834_v31, %v3486_v21  ;;  %v3492_v54 = vsel %vm556_vm6, %v3486_v21, %v3488_v29 }
 0xb65   : > { %3499 = vst [vmem:[#allocation3 + $0x10] sm:$0xff] %v3491_v30  ;;  %4115 = vmatprep.subr.bf16.mxu1 %v3492_v54 }
 0xb66   : > { %v3700_v59 = vpop.permute.xlu0 %3699  ;;  %4116 = vmatpush1.bf16.msra.mxu1 %v3491_v30 }
 0xb67   : > { %v3630_v32 = vpop.permute.xlu1 %3629  ;;  %4117 = vmatprep.subr.bf16.mxu1 %v3564_v11 }
 0xb6a   : > { %v3562_v37 = vpop.permute.xlu0 %3561  ;;  %4118 = vmatpush1.bf16.msra.mxu1 %v3563_v7 }
 0xb6b   : > { %v3560_v5 = vpop.permute.xlu1 %3559 }
 0xb6c   : > { %v3565_v39 = vsel %vm611_vm7, %v3558_v52, %v3560_v5  ;;  %v3566_v53 = vsel %vm611_vm7, %v3560_v5, %v3562_v37  ;;  %v7447_v37 = vld [vmem:[%s9676_s3 + $0x78] ss:$12 sps:$4 sm:$0xff]  }
 0xb6d   : > { %3573 = vst [vmem:[#allocation3 + $0x30] sm:$0xff] %v3565_v39  ;;  %4119 = vmatprep.subr.bf16.mxu1 %v3566_v53  ;;  %v7448_v53 = vld [vmem:[%s9676_s3 + $0x68] ss:$12 sps:$4 sm:$0xff]  }
 0xb6e   : > { %v3698_v56 = vpop.permute.xlu0 %3697  ;;  %4120 = vmatpush1.bf16.msra.mxu1 %v3565_v39 }
 0xb6f   : > { %v3709_v31 = vsel %vm719_vm5, %v3698_v56, %v3700_v59  ;;  %v3632_v45 = vpop.permute.xlu1 %3631  ;;  %4121 = vmatprep.subr.bf16.mxu1 %v3636_v28  ;;  %v7445_v28 = vld [vmem:[%s9676_s3 + $0x7c] ss:$12 sps:$4 sm:$0xff]   ;;  %v7449_v56 = vld [vmem:[%s9676_s3 + $0x80] ss:$12 sps:$4 sm:$0xff]  }
 0xb70   : > { %3717 = vst [vmem:[#allocation3 + $0x60] sm:$0xff] %v3709_v31  ;;  %v3637_v60 = vsel %vm664_vm4, %v3630_v32, %v3632_v45 }
 0xb71   : > { %3645 = vst [vmem:[#allocation3 + $0x50] sm:$0xff] %v3637_v60 }
 0xb72   : > { %v3634_v44 = vpop.permute.xlu0 %3633  ;;  %4122 = vmatpush1.bf16.msra.mxu1 %v3635_v42  ;;  %v7442_v42 = vld [vmem:[%s9676_s3 + $0x60] ss:$12 sps:$4 sm:$0xff]  }
 0xb73   : > { %v3638_v46 = vsel %vm664_vm4, %v3632_v45, %v3634_v44  ;;  %v3702_v63 = vpop.permute.xlu1 %3701  ;;  %v7463_v45 = vld [vmem:[%s9686_s13 + $0x30] sm:$0xff]   ;;  %v7465_v44 = vld [vmem:[%s9686_s13 + $0x38] sm:$0xff]  }
 0xb74   : > { %4123 = vmatprep.subr.bf16.mxu1 %v3638_v46  ;;  %v3710_v22 = vsel %vm719_vm5, %v3700_v59, %v3702_v63 }
 0xb76   : > { %v3782_v15 = vpop.permute.xlu0 %3781  ;;  %4124 = vmatpush1.bf16.msra.mxu1 %v3637_v60  ;;  %v7464_v60 = vld [vmem:[%s9686_s13 + $0x78] sm:$0xff]  }
 0xb77   : > { %v3706_v47 = vpop.permute.xlu1 %3705  ;;  %4125 = vmatprep.subr.bf16.mxu1 %v3710_v22 }
 0xb7a   : > { %v3708_v48 = vpop.permute.xlu0 %3707  ;;  %4126 = vmatpush1.bf16.msra.mxu1 %v3709_v31  ;;  %v7462_v31 = vld [vmem:[%s9686_s13 + $0x70] sm:$0xff]  }
 0xb7b   : > { %v3712_v49 = vsel %vm719_vm5, %v3706_v47, %v3708_v48  ;;  %v3704_v17 = vpop.permute.xlu1 %3703  ;;  %6973 = vmatprep.subr.bf16.mxu0 %v7462_v31 }
 0xb7c   : > { %4127 = vmatprep.subr.bf16.mxu1 %v3712_v49  ;;  %v3711_v40 = vsel %vm719_vm5, %v3704_v17, %v3706_v47  ;;  %6974 = vmatpush3.bf16.msra.mxu0 %v7463_v45 }
 0xb7d   : > { %3719 = vst [vmem:[#allocation3 + $0x70] sm:$0xff] %v3711_v40  ;;  %6975 = vmatprep.subr.bf16.mxu0 %v7464_v60 }
 0xb7e   : > { %v3780_v20 = vpop.permute.xlu0 %3779  ;;  %4128 = vmatpush1.bf16.msra.mxu1 %v3711_v40 }
 0xb7f   : > { %v3791_v9 = vsel %vm702_vm3, %v3780_v20, %v3782_v15  ;;  %v3784_v14 = vpop.permute.xlu1 %3783  ;;  %4129 = vmatprep.subr.bf16.mxu1 %v8754_v33 }
 0xb80   : > { %3799 = vst [vmem:[#allocation3 + $0xa0] sm:$0xff] %v3791_v9  ;;  %v3792_v16 = vsel %vm702_vm3, %v3782_v15, %v3784_v14  ;;  %6976 = vmatpush3.bf16.msra.mxu0 %v7465_v44 }
 0xb82   : > { %v3790_v34 = vpop.permute.xlu0 %3789  ;;  %4130 = vmatpush1.bf16.msra.mxu1 %v8751_v57 }
 0xb83   : > { %v3786_v50 = vpop.permute.xlu1 %3785  ;;  %4131 = vmatprep.subr.bf16.mxu1 %v8773_v2 }
 0xb86   : > { %v3854_v51 = vpop.permute.xlu0 %3853  ;;  %4132 = vmatpush1.bf16.msra.mxu1 %v8769_v61 }
 0xb87   : > { %v3856_v55 = vpop.permute.xlu1 %3855  ;;  %4133 = vmatprep.subr.bf16.mxu1 %v3792_v16 }
 0xb88   : > { %v3864_v38 = vsel %vm647_vm2, %v3854_v51, %v3856_v55 }
 0xb8a   : > { %v3852_v62 = vpop.permute.xlu0 %3851  ;;  %4134 = vmatpush1.bf16.msra.mxu1 %v3791_v9 }
 0xb8b   : > { %v3863_v18 = vsel %vm647_vm2, %v3852_v62, %v3854_v51  ;;  %v3788_v33 = vpop.permute.xlu1 %3787 }
 0xb8c   : > { %3871 = vst [vmem:[#allocation3 + $0xc0] sm:$0xff] %v3863_v18  ;;  %v3793_v19 = vsel %vm702_vm3, %v3786_v50, %v3788_v33  ;;  %v3794_v57 = vsel %vm702_vm3, %v3788_v33, %v3790_v34 }
 0xb8d   : > { %3801 = vst [vmem:[#allocation3 + $0xb0] sm:$0xff] %v3793_v19  ;;  %4135 = vmatprep.subr.bf16.mxu1 %v3794_v57 }
 0xb8e   : > { %v3862_v27 = vpop.permute.xlu0 %3861  ;;  %4136 = vmatpush1.bf16.msra.mxu1 %v3793_v19 }
 0xb8f   : > { %v3858_v2 = vpop.permute.xlu1 %3857  ;;  %4137 = vmatprep.subr.bf16.mxu1 %v3864_v38 }
 0xb92   : > { %v3928_v61 = vpop.permute.xlu0 %3927  ;;  %4138 = vmatpush1.bf16.msra.mxu1 %v3863_v18 }
 0xb93   : > { %v3860_v0 = vpop.permute.xlu1 %3859 }
 0xb94   : > { %v3865_v10 = vsel %vm647_vm2, %v3858_v2, %v3860_v0  ;;  %v3866_v23 = vsel %vm647_vm2, %v3860_v0, %v3862_v27 }
 0xb95   : > { %3873 = vst [vmem:[#allocation3 + $0xd0] sm:$0xff] %v3865_v10  ;;  %4139 = vmatprep.subr.bf16.mxu1 %v3866_v23 }
 0xb96   : > { %v3926_v52 = vpop.permute.xlu0 %3925  ;;  %4140 = vmatpush1.bf16.msra.mxu1 %v3865_v10 }
 0xb97   : > { %v3937_v3 = vsel %vm594_vm1, %v3926_v52, %v3928_v61  ;;  %v3930_v4 = vpop.permute.xlu1 %3929 }
 0xb98   : > { %3945 = vst [vmem:[#allocation3 + $0xe0] sm:$0xff] %v3937_v3  ;;  %v3938_v25 = vsel %vm594_vm1, %v3928_v61, %v3930_v4 }
 0xb99   : > { %4141 = vmatprep.subr.bf16.mxu1 %v3938_v25 }
 0xb9a   : > { %v3936_v35 = vpop.permute.xlu0 %3935  ;;  %4142 = vmatpush1.bf16.msra.mxu1 %v3937_v3 }
 0xb9b   : > { %v3934_v8 = vpop.permute.xlu1 %3933 }
 0xb9c   : > { %v3940_v7 = vsel %vm594_vm1, %v3934_v8, %v3936_v35 }
 0xb9d   : > { %4143 = vmatprep.subr.bf16.mxu1 %v3940_v7 }
 0xb9e   : > { %v4000_v36 = vpop.permute.xlu0 %3999 }
 0xb9f   : > { %v3932_v11 = vpop.permute.xlu1 %3931 }
 0xba0   : > { %v3939_v12 = vsel %vm594_vm1, %v3932_v11, %v3934_v8 }
 0xba1   : > { %3947 = vst [vmem:[#allocation3 + $0xf0] sm:$0xff] %v3939_v12  ;;  %4144 = vmatpush1.bf16.msra.mxu1 %v3939_v12 }
 0xba2   : > { %v3998_v26 = vpop.permute.xlu0 %3997 }
 0xba3   : > { %v4009_v29 = vsel %vm539_vm0, %v3998_v26, %v4000_v36  ;;  %v4002_v21 = vpop.permute.xlu1 %4001 }
 0xba4   : > { %4017 = vst [vmem:[#allocation3 + $0x100] sm:$0xff] %v4009_v29  ;;  %v4010_v30 = vsel %vm539_vm0, %v4000_v36, %v4002_v21  ;;  %4146 = vmatmul.mubr.bf16.vlgmr.msra.gmra.mrb[8].mxu1 %v7442_v42 }
 0xba5   : > { %4166 = vmatprep.subr.bf16.mxu1 %v4010_v30  ;;  %4155 = vmatprep.mubr.bf16.mxu1 %v7445_v28 }
 0xba6   : > { %v4008_v54 = vpop.permute.xlu0 %4007  ;;  %4167 = vmatpush1.bf16.msra.mxu1 %v4009_v29 }
 0xba7   : > { %v4006_v59 = vpop.permute.xlu1 %4005 }
 0xba8   : > { %v4012_v32 = vsel %vm539_vm0, %v4006_v59, %v4008_v54 }
 0xba9   : > { %4168 = vmatprep.subr.bf16.mxu1 %v4012_v32 }
 0xbab   : > { %v4004_v5 = vpop.permute.xlu1 %4003 }
 0xbac   : > { %v4011_v39 = vsel %vm539_vm0, %v4004_v5, %v4006_v59  ;;  %4156 = vmatmul.mubr.bf16.gmra.mrb[12].mxu1 %v7447_v37  ;;  %v9019_v37 = vld [vmem:[%s9681_s8] sm:$0xff] }
 0xbad   : > { %4019 = vst [vmem:[#allocation3 + $0x110] sm:$0xff] %v4011_v39  ;;  %4169 = vmatpush1.bf16.msra.mxu1 %v4011_v39  ;;  %4198 = vmatprep.mubr.bf16.mxu1 %v8841_v58 }
 0xbb4   : > { %6864 = vmatmul.mubr.msk.bf16.vlgmr.msra.gmra.mrb[8].mxu1 %vm1104_vm8, %v7448_v53 }
 0xbb5   : > { %4208 = vmatprep.mubr.bf16.mxu1 %v8841_v58 }
 0xbb7   : > { %v4060_v46 = vpop.permute.xlu0 %4059 }
 0xbbb   : > { %v4075_v34 = vpop.permute.xlu0 %4074 }
 0xbbc   : > { %6865 = vmatmul.mubr.msk.bf16.gmra.mrb[12].mxu1 %vm1104_vm8, %v7449_v56  ;;  %v4065_v47 = vpop.permute.xlu1 %4064 }
 0xbc0   : > { %v4070_v51 = vpop.permute.xlu1 %4069 }
 0xc87   : > { %v4200_v63 = vpop.f32.mrb[8].mxu1 }
 0xc88   : > { %v4202_v22 = vpop.f32.mrb[9].mxu1  ;;  %v7252_v48 = vadd.f32 %v4200_v63, %v4060_v46 }
 0xc89   : > { %v4204_v15 = vpop.f32.mrb[10].mxu1  ;;  %v7253_v40 = vadd.f32 %v4202_v22, %v4060_v46 }
 0xc8a   : > { %v7254_v49 = vadd.f32 %v4204_v15, %v4065_v47  ;;  %v4206_v17 = vpop.f32.mrb[11].mxu1 }
 0xc8b   : > { %v7255_v20 = vadd.f32 %v4206_v17, %v4065_v47  ;;  %v9039_v17 = vld [vmem:[%s9681_s8 + $0x10] sm:$0xff] }
 0xc8c   : > { %v4219_v9 = vpack.c.bf16 %v7254_v49, %v7252_v48  ;;  %v9034_v49 = vld [vmem:[%s9681_s8 + $0x8] sm:$0xff] }
 0xc8d   : > { %v4220_v14 = vpack.c.bf16 %v7255_v20, %v7253_v40  ;;  %v9048_v40 = vld [vmem:[%s9681_s8 + $0x18] sm:$0xff] }
 0xc8f   : > { %v4210_v16 = vpop.f32.mrb[12].mxu1  ;;  %4383 = vmatprep.mubr.bf16.mxu0 %v4220_v14 }
 0xc90   : > { %v4212_v50 = vpop.f32.mrb[13].mxu1  ;;  %4384 = vmatmul.mubr.bf16.vlgmr.msra.gmra.mrb[24].mxu0 %v4219_v9  ;;  %v7256_v38 = vadd.f32 %v4210_v16, %v4070_v51 }
 0xc91   : > { %v4214_v55 = vpop.f32.mrb[14].mxu1  ;;  %v7257_v33 = vadd.f32 %v4212_v50, %v4070_v51 }
 0xc92   : > { %v7258_v62 = vadd.f32 %v4214_v55, %v4075_v34  ;;  %v4216_v18 = vpop.f32.mrb[15].mxu1 }
 0xc93   : > { %v7259_v19 = vadd.f32 %v4216_v18, %v4075_v34 }
 0xc94   : > { %v4221_v57 = vpack.c.bf16 %v7258_v62, %v7256_v38 }
 0xc95   : > { %v4222_v27 = vpack.c.bf16 %v7259_v19, %v7257_v33  ;;  %v9059_v19 = vld [vmem:[%s9679_s6 + $0x8] sm:$0xff] }
 0xc97   : > { %4391 = vmatprep.mubr.bf16.mxu0 %v4222_v27  ;;  %v9073_v27 = vld [vmem:[%s9680_s7] sm:$0xff] }
 0xc98   : > { %4392 = vmatmul.mubr.bf16.gmra.mrb[28].mxu0 %v4221_v57  ;;  %v9064_v57 = vld [vmem:[%s9679_s6] sm:$0xff] }
 0xc99   : > { %7138 = vmatprep.mubr.msk.f32.mxu0 %vm1104_vm8, %v9019_v37 }
 0xd63   : > { %v6977_v2 = vpop.f32.mrb[24].mxu0 }
 0xd64   : > { %v6978_v61 = vpop.f32.mrb[25].mxu0 }
 0xd65   : > { %v8988_v0 = vadd.f32 %v6978_v61, %v6977_v2  ;;  %v6980_v10 = vpop.f32.mrb[26].mxu0  ;;  %v9078_v2 = vld [vmem:[%s9679_s6 + $0x10] sm:$0xff]  ;;  %v9085_v61 = vld [vmem:[%s9680_s7 + $0x8] sm:$0xff] }
 0xd66   : > { %v6981_v23 = vpop.f32.mrb[27].mxu0 }
 0xd67   : > { %v8990_v52 = vadd.f32 %v6981_v23, %v6980_v10  ;;  %v4401_v3 = vsel %vm4400_vm10, %v8988_v0, 0.0  ;;  %v4417_v35 = vmul.f32 %v8988_v0, %v8988_v0  ;;  %v9092_v10 = vld [vmem:[%s9679_s6 + $0x18] sm:$0xff] }
 0xd68   : > { %4402 = vadd.xlane.f32.xlu1 %v4401_v3 }
 0xd69   : > { %v4404_v4 = vsel %vm4400_vm10, %v8990_v52, 0.0  ;;  %v4418_v25 = vmul.f32 %v8990_v52, %v8990_v52  ;;  %v4421_v42 = vsel %vm4400_vm10, %v4417_v35, 0.0 }
 0xd6a   : > { %4405 = vadd.xlane.f32.xlu0 %v4404_v4 }
 0xd6b   : > { %v6983_v8 = vpop.f32.mrb[28].mxu0  ;;  %v4424_v7 = vsel %vm4400_vm10, %v4418_v25, 0.0 }
 0xd6c   : > { %4425 = vadd.xlane.f32.xlu1 %v4424_v7  ;;  %v6984_v36 = vpop.f32.mrb[29].mxu0 }
 0xd6d   : > { %v9001_v11 = vadd.f32 %v6984_v36, %v6983_v8  ;;  %v6986_v12 = vpop.f32.mrb[30].mxu0 }
 0xd6e   : > { %4422 = vadd.xlane.f32.xlu0 %v4421_v42  ;;  %v6987_v26 = vpop.f32.mrb[31].mxu0 }
 0xd6f   : > { %v9004_v28 = vadd.f32 %v6987_v26, %v6986_v12  ;;  %v4407_v21 = vsel %vm4400_vm10, %v9001_v11, 0.0  ;;  %v4419_v54 = vmul.f32 %v9001_v11, %v9001_v11 }
 0xd71   : > { %v4410_v29 = vsel %vm4400_vm10, %v9004_v28, 0.0  ;;  %v4420_v30 = vmul.f32 %v9004_v28, %v9004_v28  ;;  %v4427_v32 = vsel %vm4400_vm10, %v4419_v54, 0.0 }
 0xd72   : > { %4411 = vadd.xlane.f32.xlu1 %v4410_v29  ;;  %4408 = vadd.xlane.f32.xlu0 %v4407_v21 }
 0xd73   : > { %v4430_v59 = vsel %vm4400_vm10, %v4420_v30, 0.0 }
 0xd76   : > { %4431 = vadd.xlane.f32.xlu1 %v4430_v59  ;;  %4428 = vadd.xlane.f32.xlu0 %v4427_v32 }
 0xdf5   : > { %v4403_v5 = vpop.xlane.xlu1 %4402 }
 0xdf6   : > { %4413 = vst.msk [vmem:[#allocation4] sm:$0xff] %vm719_vm5, %v4403_v5  ;;  %v4774_v5 = vld [vmem:[%s9685_s12] sm:$0x1] }
 0xdf7   : > { %v4406_v39 = vpop.xlane.xlu0 %4405 }
 0xdf8   : > { %4414 = vst.msk [vmem:[#allocation4 + $0x8] sm:$0xff] %vm719_vm5, %v4406_v39  ;;  %v4776_v39 = vshrl.u32 %v4774_v5, 16 }
 0xdf9   : > { %v4426_v53 = vpop.xlane.xlu1 %4425 }
 0xdfa   : > { %4434 = vst.msk [vmem:[#allocation4 + $0x8] sm:$0xff] %vm1091_vm9, %v4426_v53 }
 0xdfb   : > { %v4423_v56 = vpop.xlane.xlu0 %4422 }
 0xdfc   : > { %4433 = vst.msk [vmem:[#allocation4] sm:$0xff] %vm1091_vm9, %v4423_v56 }
 0xdff   : > { %v4409_v31 = vpop.xlane.xlu0 %4408  ;;  %v4412_v45 = vpop.xlane.xlu1 %4411 }
 0xe00   : > { %4415 = vst.msk [vmem:[#allocation4 + $0x10] sm:$0xff] %vm719_vm5, %v4409_v31  ;;  %4416 = vst.msk [vmem:[#allocation4 + $0x18] sm:$0xff] %vm719_vm5, %v4412_v45  ;;  %v4735_v31 = vld [vmem:[%s9685_s12] sm:$0x1]  ;;  %v4777_v45 = vpack.i.b16 %v4776_v39, %v4776_v39 }
 0xe01   : > { %v4442_v63 = vld [vmem:[#allocation4 + $0x8] sm:$0xff] }
 0xe03   : > { %v4429_v60 = vpop.xlane.xlu0 %4428  ;;  %v4432_v44 = vpop.xlane.xlu1 %4431  ;;  %v4441_v46 = vld [vmem:[#allocation4] sm:$0xff] }
 0xe04   : > { %4435 = vst.msk [vmem:[#allocation4 + $0x10] sm:$0xff] %vm1091_vm9, %v4429_v60  ;;  %4436 = vst.msk [vmem:[#allocation4 + $0x18] sm:$0xff] %vm1091_vm9, %v4432_v44  ;;  %v7212_v22 = vpack.c.bf16 %v4442_v63, %v4441_v46  ;;  %v4894_v60 = vld [vmem:[%s9685_s12] sm:$0x4]  ;;  %v9108_v46 = vld [vmem:[%s9680_s7 + $0x18] sm:$0xff] }
 0xe05   : > { %v4814_v63 = vld [vmem:[%s9685_s12] sm:$0x2] }
 0xe06   : > { %7213 = vmatprep.subr.bf16.mxu0 %v7212_v22 }
 0xe07   : > { %7215 = vmatpush3.bf16.msra.mxu0 %v7212_v22  ;;  %v4853_v22 = vld [vmem:[%s9685_s12] sm:$0x2] }
 0xe0b   : > { %v4443_v15 = vld [vmem:[#allocation4 + $0x10] sm:$0xff]  ;;  %v4444_v47 = vld [vmem:[#allocation4 + $0x18] sm:$0xff] }
 0xe0c   : > { %v7216_v48 = vpack.c.bf16 %v4444_v47, %v4443_v15  ;;  %v4737_v15 = vpack.i.b16 %v4735_v31, %v4735_v31  ;;  %v4896_v47 = vshrl.u32 %v4894_v60, 16 }
 0xe0e   : > { %7217 = vmatprep.subr.bf16.mxu0 %v7216_v48 }
 0xe0f   : > { %7219 = vmatpush3.bf16.msra.mxu0 %v7216_v48  ;;  %v9121_v48 = vld [vmem:[%s9680_s7 + $0x10] sm:$0xff] }
 0xe12   : > { %7139 = vmatmul.mubr.msk.f32.vlgmr.msra.gmra.mrb[32].mxu0 %vm1104_vm8, %v9034_v49 }
 0xe13   : > { %7141 = vmatprep.mubr.msk.f32.mxu0 %vm1104_vm8, %v9039_v17 }
 0xe16   : > { %7142 = vmatmul.mubr.msk.f32.gmra.mrb[34].mxu0 %vm1104_vm8, %v9048_v40 }
 0xee5   : > { %v7140_v20 = vpop.f32.mrb[32].mxu0 }
 0xee6   : > { %v4543_v9 = vmul.f32 0.00390625, %v7140_v20  ;;  %v4523_v14 = vpop.f32.mrb[33].mxu0  ;;  %v4782_v20 = vrot.slane %v4777_v45, %v7768_v13 }
 0xee7   : > { %v4542_v16 = vmul.f32 0.00390625, %v4523_v14  ;;  %v4855_v14 = vshrl.u32 %v4853_v22, 16 }
 0xee8   : > { %v4547_v34 = vmul.f32 %v4543_v9, %v4543_v9 }
 0xee9   : > { %v4546_v50 = vmul.f32 %v4542_v16, %v4542_v16  ;;  %v7143_v51 = vpop.f32.mrb[34].mxu0 }
 0xeea   : > { %v4545_v55 = vmul.f32 0.00390625, %v7143_v51  ;;  %4556 = vrot.lane.b32.xlu1 %v4547_v34, %s9717_s16  ;;  %v4533_v38 = vpop.f32.mrb[35].mxu0  ;;  %v4897_v34 = vpack.i.b16 %v4896_v47, %v4896_v47  ;;  %v4856_v51 = vpack.i.b16 %v4855_v14, %v4855_v14 }
 0xeeb   : > { %v4544_v62 = vmul.f32 0.00390625, %v4533_v38  ;;  %4554 = vrot.lane.b32.xlu0 %v4546_v50, %s9717_s16  ;;  %v4947_v38 = vld [vmem:[%s9685_s12] sm:$0x8] }
 0xeec   : > { %v4549_v18 = vmul.f32 %v4545_v55, %v4545_v55 }
 0xeed   : > { %v4548_v33 = vmul.f32 %v4544_v62, %v4544_v62 }
 0xeef   : > { %4560 = vrot.lane.b32.xlu0 %v4549_v18, %s9717_s16  ;;  %4558 = vrot.lane.b32.xlu1 %v4548_v33, %s9717_s16  ;;  %v4949_v33 = vshrl.u32 %v4947_v38, 16 }
 0xef3   : > { %4589 = vperm.xlu0 %7324, %v4543_v9   ;;  %4584 = vperm.xlu1 %7323, %v4542_v16  }
 0xef7   : > { %4594 = vperm.xlu0 %7324, %v4544_v62   ;;  %4599 = vperm.xlu1 %7323, %v4545_v55  }
 0xefb   : > { %7326 = vset.pattern.permute.xlu1 %v7662_v6  ;;  %7325 = vset.pattern.permute.xlu0 %v7662_v6 }
 0xefc   : > { %4641 = vperm.xlu1 %7326, %v9059_v19   ;;  %4636 = vperm.xlu0 %7325, %v9064_v57  }
 0xf00   : > { %4664 = vperm.xlu1 %7326, %v9073_v27   ;;  %4646 = vperm.xlu0 %7325, %v9078_v2  }
 0xf04   : > { %4669 = vperm.xlu1 %7326, %v9085_v61   ;;  %7328 = vset.pattern.permute.xlu0 %v7661_v1 }
 0xf08   : > { %4651 = vperm.xlu1 %7326, %v9092_v10  }
 0xf0c   : > { %7327 = vset.pattern.permute.xlu1 %v7661_v1 }
 0xf5c   : > { %v4557_v23 = vpop.permute.xlu1 %4556 }
 0xf5d   : > { %v4567_v3 = vsub.f32 %v4543_v9, %v4557_v23  ;;  %v4555_v4 = vpop.permute.xlu0 %4554  ;;  %v4816_v9 = vpack.i.b16 %v4814_v63, %v4814_v63  ;;  %v4861_v23 = vrot.slane %v4856_v51, %v7777_v24 }
 0xf5e   : > { %v4566_v25 = vsub.f32 %v4542_v16, %v4555_v4  ;;  %v4742_v16 = vrot.slane %v4737_v15, %v7768_v13 }
 0xf5f   : > { %v4571_v35 = vmax.f32 %v4567_v3, 0.0  ;;  %v4821_v50 = vrot.slane %v4816_v9, %v7777_v24 }
 0xf60   : > { %v4570_v8 = vmax.f32 %v4566_v25, 0.0  ;;  %v4950_v25 = vpack.i.b16 %v4949_v33, %v4949_v33 }
 0xf61   : > { %v4575_v7 = vadd.f32 1e-06, %v4571_v35  ;;  %v4561_v36 = vpop.permute.xlu0 %4560  ;;  %v4559_v12 = vpop.permute.xlu1 %4558 }
 0xf62   : > { %v4569_v42 = vsub.f32 %v4545_v55, %v4561_v36  ;;  %v4568_v26 = vsub.f32 %v4544_v62, %v4559_v12  ;;  %v4574_v29 = vadd.f32 1e-06, %v4570_v8  ;;  %v4921_v55 = vld [vmem:[%s9685_s12] sm:$0x8]  ;;  %v4902_v62 = vrot.slane %v4897_v34, %v7803_v41 }
 0xf63   : > { %7565 = vrsqrt.f32 %v4575_v7  ;;  %v4923_v18 = vpack.i.b16 %v4921_v55, %v4921_v55  ;;  %v4955_v8 = vrot.slane %v4950_v25, %v7805_v43 }
 0xf64   : > { %v4573_v21 = vmax.f32 %v4569_v42, 0.0  ;;  %v4572_v30 = vmax.f32 %v4568_v26, 0.0  ;;  %7567 = vrsqrt.f32 %v4574_v29 }
 0xf65   : > { %v4928_v4 = vrot.slane %v4923_v18, %v7805_v43 }
 0xf66   : > { %v4577_v54 = vadd.f32 1e-06, %v4573_v21  ;;  %v4576_v59 = vadd.f32 1e-06, %v4572_v30 }
 0xf68   : > { %7569 = vrsqrt.f32 %v4577_v54 }
 0xf69   : > { %7571 = vrsqrt.f32 %v4576_v59 }
 0xf6d   : > { %v7566_v32 = vpop.eup %7565 }
 0xf6e   : > { %4613 = vperm.xlu1 %7327, %v7566_v32   ;;  %v7568_v53 = vpop.eup %7567 }
 0xf72   : > { %v7570_v56 = vpop.eup %7569  ;;  %4608 = vperm.xlu1 %7327, %v7568_v53   ;;  %v4585_v7 = vpop.permute.xlu1 %4584 }
 0xf73   : > { %4623 = vperm.xlu0 %7328, %v7570_v56   ;;  %v7572_v44 = vpop.eup %7571  ;;  %v4590_v42 = vpop.permute.xlu0 %4589  ;;  %v4602_v53 = vsub.f32 %v8988_v0, %v4585_v7 }
 0xf74   : > { %v4603_v59 = vsub.f32 %v8990_v52, %v4590_v42 }
 0xf76   : > { %4618 = vperm.xlu1 %7327, %v7572_v44   ;;  %v4600_v36 = vpop.permute.xlu1 %4599 }
 0xf77   : > { %7330 = vset.pattern.permute.xlu0 %v7662_v6  ;;  %v4595_v29 = vpop.permute.xlu0 %4594  ;;  %v4605_v31 = vsub.f32 %v9004_v28, %v4600_v36 }
 0xf78   : > { %4679 = vperm.xlu0 %7330, %v9108_v46   ;;  %v4604_v15 = vsub.f32 %v9001_v11, %v4595_v29 }
 0xf7a   : > { %7329 = vset.pattern.permute.xlu1 %v7662_v6  ;;  %v4974_v6 = vld [vmem:[%s9685_s12 + $0x4] sm:$0x1] }
 0xf7b   : > { %4674 = vperm.xlu1 %7329, %v9121_v48   ;;  %v4976_v3 = vpack.i.b16 %v4974_v6, %v4974_v6  ;;  %v4642_v12 = vpop.permute.xlu1 %4641  ;;  %v4637_v30 = vpop.permute.xlu0 %4636 }
 0xf7c   : > { %4784 = vrot.lane.b32.xlu0 %v4782_v20, %s9708_s26 }
 0xf7d   : > { %v4981_v35 = vrot.slane %v4976_v3, %v7768_v13 }
 0xf7f   : > { %4744 = vrot.lane.b32.xlu1 %v4742_v16, %s9710_s23  ;;  %v4665_v26 = vpop.permute.xlu1 %4664  ;;  %v4647_v32 = vpop.permute.xlu0 %4646 }
 0xf80   : > { %4823 = vrot.lane.b32.xlu0 %v4821_v50, %s9706_s27 }
 0xf83   : > { %4904 = vrot.lane.b32.xlu1 %v4902_v62, %s9717_s16  ;;  %v4670_v21 = vpop.permute.xlu1 %4669 }
 0xf84   : > { %4863 = vrot.lane.b32.xlu0 %v4861_v23, %s9714_s24 }
 0xf87   : > { %4930 = vrot.lane.b32.xlu1 %v4928_v4, %s9704_s17  ;;  %v4652_v54 = vpop.permute.xlu1 %4651 }
 0xf88   : > { %4983 = vrot.lane.b32.xlu0 %v4981_v35, %s9700_s22 }
 0xf8b   : > { %4957 = vrot.lane.b32.xlu1 %v4955_v8, %s9702_s18 }
 0xfed   : > { %v4614_v5 = vpop.permute.xlu1 %4613 }
 0xfee   : > { %v4627_v39 = vmul.f32 %v4614_v5, %v4603_v59 }
 0xff0   : > { %v4655_v56 = vmul.f32 %v4642_v12, %v4627_v39 }
 0xff1   : > { %v4609_v45 = vpop.permute.xlu1 %4608 }
 0xff2   : > { %v4683_v60 = vadd.f32 %v4670_v21, %v4655_v56  ;;  %v4626_v44 = vmul.f32 %v4609_v45, %v4602_v53  ;;  %v4624_v63 = vpop.permute.xlu0 %4623 }
 0xff3   : > { %v4629_v22 = vmul.f32 %v4624_v63, %v4605_v31 }
 0xff4   : > { %v6887_v47 = vmul.f32 -1.442695, %v4683_v60  ;;  %v4654_v20 = vmul.f32 %v4637_v30, %v4626_v44 }
 0xff5   : > { %v4619_v9 = vpop.permute.xlu1 %4618  ;;  %v4657_v14 = vmul.f32 %v4652_v54, %v4629_v22 }
 0xff6   : > { %7573 = vpow2.f32 %v6887_v47  ;;  %v4682_v16 = vadd.f32 %v4665_v26, %v4654_v20  ;;  %v4628_v34 = vmul.f32 %v4619_v9, %v4604_v15 }
 0xff7   : > { %v4680_v50 = vpop.permute.xlu0 %4679 }
 0xff8   : > { %v6886_v51 = vmul.f32 -1.442695, %v4682_v16  ;;  %v4685_v55 = vadd.f32 %v4680_v50, %v4657_v14  ;;  %v4656_v38 = vmul.f32 %v4647_v32, %v4628_v34 }
 0xffa   : > { %7575 = vpow2.f32 %v6886_v51  ;;  %v6889_v6 = vmul.f32 -1.442695, %v4685_v55  ;;  %v4675_v62 = vpop.permute.xlu1 %4674  ;;  %v9171_v51 = vld [vmem:[#allocation2] sm:$0xff] }
 0xffb   : > { %v4684_v18 = vadd.f32 %v4675_v62, %v4656_v38  ;;  %v4785_v33 = vpop.permute.xlu0 %4784 }
 0xffc   : > { %7577 = vpow2.f32 %v6889_v6  ;;  %v4787_v23 = vmul.bf16 %v8841_v58, %v4785_v33 }
 0xffd   : > { %v6888_v3 = vmul.f32 -1.442695, %v4684_v18 }
 0xffe   : > { %v4745_v4 = vpop.permute.xlu1 %4744  ;;  %4799 = vrot.lane.b32.xlu0 %v4787_v23, %s9702_s18 }
 0xfff   : > { %7579 = vpow2.f32 %v6888_v3  ;;  %v4747_v25 = vmul.bf16 %v8841_v58, %v4745_v4  ;;  %v4824_v26 = vpop.permute.xlu0 %4823 }
0x1000   : > { %v7574_v35 = vpop.eup %7573  ;;  %v4826_v21 = vmul.bf16 %v8841_v58, %v4824_v26 }
0x1001   : > { %v4699_v8 = vadd.f32 1.0, %v7574_v35  ;;  %4755 = vrot.lane.b32.xlu1 %v4747_v25, %s9700_s22 }
0x1002   : > { %v4905_v58 = vpop.permute.xlu1 %4904 }
0x1003   : > { %7581 = vrcp.f32 %v4699_v8  ;;  %v4864_v34 = vpop.permute.xlu0 %4863  ;;  %v7468_v8 = vld [vmem:[%s9676_s3 + $0x94] ss:$12 sps:$4 sm:$0xff]  }
0x1004   : > { %v7576_v7 = vpop.eup %7575  ;;  %5104 = vmatprep.mubr.bf16.mxu1 %v7468_v8 }
0x1005   : > { %v4698_v36 = vadd.f32 1.0, %v7576_v7  ;;  %4759 = vrot.lane.b32.xlu1 %v4747_v25, %s9700_s22 }
0x1006   : > { %v7578_v12 = vpop.eup %7577 }
0x1007   : > { %7583 = vrcp.f32 %v4698_v36  ;;  %v4701_v42 = vadd.f32 1.0, %v7578_v12  ;;  %v4984_v3 = vpop.permute.xlu0 %4983  ;;  %v7469_v36 = vld [vmem:[%s9676_s3 + $0x98] ss:$12 sps:$4 sm:$0xff]  }
0x1008   : > { %7148 = vmatprep.mubr.msk.bf16.mxu0 %vm1104_vm8, %v7469_v36 }
0x1009   : > { %v7580_v29 = vpop.eup %7579  ;;  %4795 = vrot.lane.b32.xlu1 %v4787_v23, %s9702_s18  ;;  %7585 = vrcp.f32 %v4701_v42  ;;  %v9198_v42 = vld [vmem:[%s9678_s5] sm:$0xff] }
0x100a   : > { %v4700_v30 = vadd.f32 1.0, %v7580_v29  ;;  %v7669_v29 = vmov 3  }
0x100b   : > { %7331 = vset.pattern.permute.xlu1 %v7669_v29  ;;  %7332 = vset.pattern.permute.xlu0 %v7669_v29 }
0x100c   : > { %7587 = vrcp.f32 %v4700_v30  ;;  %v9219_v30 = vld [vmem:[%s9678_s5 + $0x18] sm:$0xff] }
0x100d   : > { %4834 = vrot.lane.b32.xlu1 %v4826_v21, %s9704_s17  ;;  %v7582_v54 = vpop.eup %7581 }
0x100e   : > { %v4711_v32 = vmul.f32 %v7582_v54, %v4683_v60  ;;  %v4931_v60 = vpop.permute.xlu1 %4930 }
0x1011   : > { %v7584_v59 = vpop.eup %7583 }
0x1012   : > { %v4710_v5 = vmul.f32 %v7584_v59, %v4682_v16  ;;  %v4958_v62 = vpop.permute.xlu1 %4957 }
0x1013   : > { %v7586_v39 = vpop.eup %7585 }
0x1014   : > { %v4727_v53 = vpack.c.bf16 %v4711_v32, %v4710_v5  ;;  %v4713_v31 = vmul.f32 %v7586_v39, %v4685_v55  ;;  %v4866_v55 = vmul.bf16 %v9171_v51, %v4864_v34 }
0x1016   : > { %v7588_v56 = vpop.eup %7587  ;;  %4729 = vst.msk [vmem:[#allocation2 + $0x8] sm:$0xff] %vm4400_vm10, %v4727_v53 }
0x1017   : > { %v4712_v45 = vmul.f32 %v7588_v56, %v4684_v18 }
0x1019   : > { %v4728_v44 = vpack.c.bf16 %v4713_v31, %v4712_v45 }
0x101b   : > { %4730 = vst.msk [vmem:[#allocation2 + $0x28] sm:$0xff] %vm4400_vm10, %v4728_v44 }
0x101d   : > { %v4892_v63 = vld [vmem:[#allocation2 + $0x8] sm:$0xff] }
0x101e   : > { %v4907_v22 = vmul.bf16 %v4905_v58, %v4892_v63  ;;  %4890 = vst.msk [vmem:[#allocation3 + $0x80] sm:$0xff] %vm4400_vm10, %v4892_v63  ;;  %v4748_v15 = vmul.bf16 %v4892_v63, %v4745_v4  ;;  %v4933_v20 = vmul.bf16 %v4931_v60, %v4892_v63  ;;  %v4788_v9 = vmul.bf16 %v4892_v63, %v4785_v33 }
0x101f   : > { %v4827_v50 = vmul.bf16 %v4892_v63, %v4824_v26  ;;  %v4960_v18 = vmul.bf16 %v4958_v62, %v4892_v63  ;;  %v4867_v25 = vmul.bf16 %v4892_v63, %v4864_v34 }
0x1020   : > { %4911 = vrot.lane.b32.xlu1 %v4907_v22, %s9714_s24  ;;  %4757 = vrot.lane.b32.xlu0 %v4748_v15, %s9700_s22 }
0x1022   : > { %v4893_v47 = vld [vmem:[#allocation2 + $0x28] sm:$0xff] }
0x1023   : > { %4891 = vst.msk [vmem:[#allocation3 + $0x90] sm:$0xff] %vm4400_vm10, %v4893_v47  ;;  %v4790_v16 = vmul.bf16 %v4893_v47, %v4785_v33  ;;  %v4750_v38 = vmul.bf16 %v4893_v47, %v4745_v4  ;;  %v4829_v6 = vmul.bf16 %v4893_v47, %v4824_v26  ;;  %v4908_v33 = vmul.bf16 %v4905_v58, %v4893_v47  ;;  %v9203_v26 = vld [vmem:[%s9678_s5 + $0x8] sm:$0xff] }
0x1024   : > { %4937 = vrot.lane.b32.xlu1 %v4933_v20, %s9706_s27  ;;  %4797 = vrot.lane.b32.xlu0 %v4788_v9, %s9702_s18  ;;  %v4869_v23 = vmul.bf16 %v4893_v47, %v4864_v34  ;;  %v4986_v4 = vmul.bf16 %v4984_v3, %v4892_v63  ;;  %v4934_v35 = vmul.bf16 %v4931_v60, %v4893_v47 }
0x1025   : > { %v5006_v14 = vld [vmem:[#allocation3 + $0x80] sm:$0xff]  ;;  %v4961_v7 = vmul.bf16 %v4958_v62, %v4893_v47  ;;  %v4987_v12 = vmul.bf16 %v4984_v3, %v4893_v47 }
0x1026   : > { %6997 = vmatprep.subr.bf16.mxu1 %v5006_v14 }
0x1028   : > { %4801 = vrot.lane.b32.xlu1 %v4790_v16, %s9702_s18  ;;  %4836 = vrot.lane.b32.xlu0 %v4827_v50, %s9704_s17  ;;  %s9719_s18 = smov 9  }
0x102a   : > { %v5007_v20 = vld [vmem:[#allocation3 + $0x90] sm:$0xff] }
0x102c   : > { %4874 = vrot.lane.b32.xlu1 %v4866_v55, %s9717_s16  ;;  %4761 = vrot.lane.b32.xlu0 %v4750_v38, %s9700_s22  ;;  %s9718_s22 = smov 8  }
0x1030   : > { %4840 = vrot.lane.b32.xlu1 %v4829_v6, %s9704_s17  ;;  %4838 = vrot.lane.b32.xlu0 %v4826_v21, %s9704_s17  ;;  %v9212_v21 = vld [vmem:[%s9678_s5 + $0x10] sm:$0xff] }
0x1034   : > { %4964 = vrot.lane.b32.xlu1 %v4960_v18, %s9708_s26  ;;  %4913 = vrot.lane.b32.xlu0 %v4908_v33, %s9714_s24 }
0x1038   : > { %4880 = vrot.lane.b32.xlu1 %v4869_v23, %s9717_s16  ;;  %4876 = vrot.lane.b32.xlu0 %v4867_v25, %s9717_s16 }
0x103c   : > { %4990 = vrot.lane.b32.xlu1 %v4986_v4, %s9710_s23  ;;  %4939 = vrot.lane.b32.xlu0 %v4934_v35, %s9706_s27 }
0x1040   : > { %4878 = vrot.lane.b32.xlu0 %v4866_v55, %s9717_s16  ;;  %5018 = vperm.xlu1 %7331, %v9198_v42  }
0x1044   : > { %4966 = vrot.lane.b32.xlu0 %v4961_v7, %s9708_s26  ;;  %5028 = vperm.xlu1 %7331, %v9212_v21  }
0x1048   : > { %4992 = vrot.lane.b32.xlu0 %v4987_v12, %s9710_s23  ;;  %5033 = vperm.xlu1 %7331, %v9219_v30  }
0x104c   : > { %5023 = vperm.xlu0 %7332, %v9203_v26   ;;  %7334 = vset.pattern.permute.xlu1 %v9171_v51 }
0x1050   : > { %7333 = vset.pattern.permute.xlu0 %v9171_v51 }
0x1070   : > { %v4800_v39 = vpop.permute.xlu0 %4799 }
0x1073   : > { %v4756_v54 = vpop.permute.xlu1 %4755 }
0x1077   : > { %v4760_v59 = vpop.permute.xlu1 %4759 }
0x107b   : > { %v4796_v32 = vpop.permute.xlu1 %4795 }
0x107f   : > { %v4835_v5 = vpop.permute.xlu1 %4834 }
0x1092   : > { %v4912_v53 = vpop.permute.xlu1 %4911  ;;  %v4758_v56 = vpop.permute.xlu0 %4757 }
0x1093   : > { %4917 = vst.msk [vmem:[#allocation3 + $0xa0] sm:$0xff] %vm4400_vm10, %v4912_v53  ;;  %v4764_v31 = vsel %vm4763_vm11, %v4756_v54, %v4758_v56 }
0x1094   : > { %4768 = vst.msk [vmem:[#allocation3] sm:$0xff] %vm4400_vm10, %v4764_v31 }
0x1096   : > { %v4938_v45 = vpop.permute.xlu1 %4937  ;;  %v4798_v44 = vpop.permute.xlu0 %4797 }
0x1097   : > { %4943 = vst.msk [vmem:[#allocation3 + $0xc0] sm:$0xff] %vm4400_vm10, %v4938_v45  ;;  %v4804_v58 = vsel %vm4803_vm12, %v4796_v32, %v4798_v44 }
0x1098   : > { %4808 = vst.msk [vmem:[#allocation3 + $0x20] sm:$0xff] %vm4400_vm10, %v4804_v58 }
0x109a   : > { %v4802_v63 = vpop.permute.xlu1 %4801  ;;  %v4837_v22 = vpop.permute.xlu0 %4836  ;;  %v5008_v18 = vld [vmem:[#allocation3 + $0xa0] sm:$0xff] }
0x109b   : > { %v4805_v15 = vsel %vm4803_vm12, %v4800_v39, %v4802_v63  ;;  %v4843_v60 = vsel %vm4842_vm13, %v4835_v5, %v4837_v22  ;;  %v4998_v47 = vld [vmem:[#allocation3] sm:$0xff]  ;;  %v7466_v63 = vld [vmem:[%s9676_s3 + $0x90] ss:$12 sps:$4 sm:$0xff]   ;;  %v7471_v22 = vld [vmem:[%s9676_s3 + $0xac] ss:$12 sps:$4 sm:$0xff]  }
0x109c   : > { %4809 = vst.msk [vmem:[#allocation3 + $0x30] sm:$0xff] %vm4400_vm10, %v4805_v15  ;;  %4847 = vst.msk [vmem:[#allocation3 + $0x40] sm:$0xff] %vm4400_vm10, %v4843_v60  ;;  %6998 = vmatpush3.bf16.msra.mxu1 %v4998_v47  ;;  %v7470_v60 = vld [vmem:[%s9676_s3 + $0xb0] ss:$12 sps:$4 sm:$0xff]   ;;  %v7473_v47 = vld [vmem:[%s9676_s3 + $0xa8] ss:$12 sps:$4 sm:$0xff]  }
0x109d   : > { %6999 = vmatprep.subr.bf16.mxu1 %v5007_v20 }
0x109e   : > { %v4875_v9 = vpop.permute.xlu1 %4874  ;;  %v4762_v14 = vpop.permute.xlu0 %4761  ;;  %v5010_v36 = vld [vmem:[#allocation3 + $0xc0] sm:$0xff] }
0x109f   : > { %v4765_v16 = vsel %vm4763_vm11, %v4760_v59, %v4762_v14  ;;  %v5000_v25 = vld [vmem:[#allocation3 + $0x20] sm:$0xff] }
0x10a0   : > { %4769 = vst.msk [vmem:[#allocation3 + $0x10] sm:$0xff] %vm4400_vm10, %v4765_v16 }
0x10a2   : > { %v4841_v34 = vpop.permute.xlu1 %4840  ;;  %v4839_v50 = vpop.permute.xlu0 %4838 }
0x10a3   : > { %v4844_v55 = vsel %vm4842_vm13, %v4839_v50, %v4841_v34  ;;  %v5001_v7 = vld [vmem:[#allocation3 + $0x30] sm:$0xff]  ;;  %v5002_v59 = vld [vmem:[#allocation3 + $0x40] sm:$0xff] }
0x10a4   : > { %4848 = vst.msk [vmem:[#allocation3 + $0x50] sm:$0xff] %vm4400_vm10, %v4844_v55 }
0x10a6   : > { %v4965_v38 = vpop.permute.xlu1 %4964  ;;  %v4914_v6 = vpop.permute.xlu0 %4913 }
0x10a7   : > { %4970 = vst.msk [vmem:[#allocation3 + $0xe0] sm:$0xff] %vm4400_vm10, %v4965_v38  ;;  %4918 = vst.msk [vmem:[#allocation3 + $0xb0] sm:$0xff] %vm4400_vm10, %v4914_v6  ;;  %v4999_v62 = vld [vmem:[#allocation3 + $0x10] sm:$0xff] }
0x10a8   : > { %7000 = vmatpush3.bf16.msra.mxu1 %v4999_v62 }
0x10a9   : > { %7001 = vmatprep.subr.bf16.mxu1 %v5008_v18 }
0x10aa   : > { %v4881_v33 = vpop.permute.xlu1 %4880  ;;  %v4877_v23 = vpop.permute.xlu0 %4876 }
0x10ab   : > { %v4882_v3 = vsel %vm719_vm5, %v4875_v9, %v4877_v23  ;;  %v5003_v53 = vld [vmem:[#allocation3 + $0x50] sm:$0xff] }
0x10ac   : > { %4886 = vst.msk [vmem:[#allocation3 + $0x60] sm:$0xff] %vm4400_vm10, %v4882_v3  ;;  %7002 = vmatpush3.bf16.msra.mxu1 %v5000_v25 }
0x10ae   : > { %v4991_v4 = vpop.permute.xlu1 %4990  ;;  %v4940_v35 = vpop.permute.xlu0 %4939  ;;  %v5009_v8 = vld [vmem:[#allocation3 + $0xb0] sm:$0xff]  ;;  %v5012_v56 = vld [vmem:[#allocation3 + $0xe0] sm:$0xff] }
0x10af   : > { %4996 = vst.msk [vmem:[#allocation3 + $0x100] sm:$0xff] %vm4400_vm10, %v4991_v4  ;;  %4944 = vst.msk [vmem:[#allocation3 + $0xd0] sm:$0xff] %vm4400_vm10, %v4940_v35  ;;  %7003 = vmatprep.subr.bf16.mxu1 %v5009_v8 }
0x10b0   : > { %7004 = vmatpush3.bf16.msra.mxu1 %v5001_v7 }
0x10b1   : > { %7005 = vmatprep.subr.bf16.mxu1 %v5010_v36 }
0x10b2   : > { %v4879_v12 = vpop.permute.xlu0 %4878 }
0x10b3   : > { %v4883_v54 = vsel %vm719_vm5, %v4879_v12, %v4881_v33  ;;  %v5004_v45 = vld [vmem:[#allocation3 + $0x60] sm:$0xff] }
0x10b4   : > { %4887 = vst.msk [vmem:[#allocation3 + $0x70] sm:$0xff] %vm4400_vm10, %v4883_v54  ;;  %7006 = vmatpush3.bf16.msra.mxu1 %v5002_v59 }
0x10b6   : > { %v5014_v32 = vld [vmem:[#allocation3 + $0x100] sm:$0xff]  ;;  %v4967_v5 = vpop.permute.xlu0 %4966  ;;  %v5011_v39 = vld [vmem:[#allocation3 + $0xd0] sm:$0xff] }
0x10b7   : > { %7144 = vmatprep.subr.bf16.mxu0 %v5014_v32  ;;  %4971 = vst.msk [vmem:[#allocation3 + $0xf0] sm:$0xff] %vm4400_vm10, %v4967_v5  ;;  %7007 = vmatprep.subr.bf16.mxu1 %v5011_v39 }
0x10b8   : > { %7145 = vmatpush3.bf16.msra.mxu0 %v5014_v32  ;;  %7008 = vmatpush3.bf16.msra.mxu1 %v5003_v53 }
0x10b9   : > { %7009 = vmatprep.subr.bf16.mxu1 %v5012_v56 }
0x10ba   : > { %v4993_v31 = vpop.permute.xlu0 %4992 }
0x10bb   : > { %4997 = vst.msk [vmem:[#allocation3 + $0x110] sm:$0xff] %vm4400_vm10, %v4993_v31  ;;  %v5005_v58 = vld [vmem:[#allocation3 + $0x70] sm:$0xff] }
0x10bc   : > { %7010 = vmatpush3.bf16.msra.mxu1 %v5004_v45 }
0x10be   : > { %v5013_v44 = vld [vmem:[#allocation3 + $0xf0] sm:$0xff] }
0x10bf   : > { %7011 = vmatprep.subr.bf16.mxu1 %v5013_v44  ;;  %v5019_v9 = vpop.permute.xlu1 %5018 }
0x10c0   : > { %7012 = vmatpush3.bf16.msra.mxu1 %v5005_v58 }
0x10c2   : > { %v5015_v15 = vld [vmem:[#allocation3 + $0x110] sm:$0xff] }
0x10c3   : > { %5105 = vmatmul.mubr.bf16.vlgmr.msra.gmra.mrb[16].mxu1 %v7466_v63  ;;  %7146 = vmatprep.subr.bf16.mxu0 %v5015_v15  ;;  %v5029_v25 = vpop.permute.xlu1 %5028 }
0x10c4   : > { %7147 = vmatpush3.bf16.msra.mxu0 %v5015_v15  ;;  %5112 = vmatprep.mubr.bf16.mxu1 %v7471_v22 }
0x10c7   : > { %7149 = vmatmul.mubr.msk.bf16.vlgmr.msra.gmra.mrb[36].mxu0 %vm1104_vm8, %v7470_v60  ;;  %v5034_v31 = vpop.permute.xlu1 %5033 }
0x10c8   : > { %7160 = vmatprep.mubr.msk.f32.mxu0 %vm1104_vm8, %v9019_v37 }
0x10cb   : > { %5113 = vmatmul.mubr.bf16.gmra.mrb[20].mxu1 %v7473_v47  ;;  %v5024_v55 = vpop.permute.xlu0 %5023 }
0x1196   : > { %v7013_v20 = vpop.f32.mrb[16].mxu1 }
0x1197   : > { %v7014_v14 = vpop.f32.mrb[17].mxu1 }
0x1198   : > { %v7015_v16 = vadd.f32 %v7014_v14, %v7013_v20  ;;  %v7016_v34 = vpop.f32.mrb[18].mxu1 }
0x1199   : > { %v7017_v50 = vpop.f32.mrb[19].mxu1 }
0x119a   : > { %v7018_v38 = vadd.f32 %v7017_v50, %v7016_v34  ;;  %v7150_v6 = vpop.f32.mrb[36].mxu0  ;;  %v5107_v62 = vadd.f32 %v7015_v16, %v5019_v9 }
0x119b   : > { %v5155_v18 = vpop.f32.mrb[37].mxu0 }
0x119c   : > { %v5110_v33 = vadd.f32 %v7018_v38, %v5024_v55  ;;  %v9262_v23 = vadd.f32 %v5155_v18, %v5107_v62  ;;  %v7151_v3 = vpop.f32.mrb[38].mxu0 }
0x119d   : > { %v5158_v4 = vpop.f32.mrb[39].mxu0 }
0x119e   : > { %v9264_v35 = vadd.f32 %v5158_v4, %v5110_v33  ;;  %v7019_v37 = vpop.f32.mrb[20].mxu1  ;;  %v5170_v8 = vsel %vm4400_vm10, %v9262_v23, 0.0  ;;  %v5186_v7 = vmul.f32 %v9262_v23, %v9262_v23 }
0x119f   : > { %v7020_v36 = vpop.f32.mrb[21].mxu1  ;;  %5171 = vadd.xlane.f32.xlu0 %v5170_v8 }
0x11a0   : > { %v7021_v12 = vadd.f32 %v7020_v36, %v7019_v37  ;;  %v7022_v54 = vpop.f32.mrb[22].mxu1  ;;  %v5173_v59 = vsel %vm4400_vm10, %v9264_v35, 0.0  ;;  %v5190_v53 = vsel %vm4400_vm10, %v5186_v7, 0.0  ;;  %v5187_v56 = vmul.f32 %v9264_v35, %v9264_v35 }
0x11a1   : > { %v7023_v32 = vpop.f32.mrb[23].mxu1  ;;  %5174 = vadd.xlane.f32.xlu1 %v5173_v59 }
0x11a2   : > { %v5115_v5 = vadd.f32 %v7021_v12, %v5029_v25  ;;  %v7024_v39 = vadd.f32 %v7023_v32, %v7022_v54  ;;  %v5193_v63 = vsel %vm4400_vm10, %v5187_v56, 0.0 }
0x11a3   : > { %5191 = vadd.xlane.f32.xlu0 %v5190_v53 }
0x11a4   : > { %v9275_v45 = vadd.f32 %v7150_v6, %v5115_v5  ;;  %v5118_v44 = vadd.f32 %v7024_v39, %v5034_v31 }
0x11a6   : > { %v9277_v58 = vadd.f32 %v7151_v3, %v5118_v44  ;;  %v5176_v22 = vsel %vm4400_vm10, %v9275_v45, 0.0  ;;  %v5188_v15 = vmul.f32 %v9275_v45, %v9275_v45 }
0x11a7   : > { %5194 = vadd.xlane.f32.xlu0 %v5193_v63  ;;  %5177 = vadd.xlane.f32.xlu1 %v5176_v22 }
0x11a8   : > { %v5196_v60 = vsel %vm4400_vm10, %v5188_v15, 0.0  ;;  %v5179_v47 = vsel %vm4400_vm10, %v9277_v58, 0.0  ;;  %v5189_v20 = vmul.f32 %v9277_v58, %v9277_v58 }
0x11aa   : > { %v5199_v9 = vsel %vm4400_vm10, %v5189_v20, 0.0 }
0x11ab   : > { %5197 = vadd.xlane.f32.xlu1 %v5196_v60  ;;  %5180 = vadd.xlane.f32.xlu0 %v5179_v47 }
0x11af   : > { %5200 = vadd.xlane.f32.xlu0 %v5199_v9 }
0x122c   : > { %v5172_v14 = vpop.xlane.xlu0 %5171 }
0x122d   : > { %5182 = vst.msk [vmem:[#allocation4] sm:$0xff] %vm719_vm5, %v5172_v14 }
0x122e   : > { %v5175_v16 = vpop.xlane.xlu1 %5174 }
0x122f   : > { %5183 = vst.msk [vmem:[#allocation4 + $0x8] sm:$0xff] %vm719_vm5, %v5175_v16  ;;  %v5542_v16 = vld [vmem:[%s9685_s12] sm:$0x1] }
0x1230   : > { %v5192_v34 = vpop.xlane.xlu0 %5191 }
0x1231   : > { %5202 = vst.msk [vmem:[#allocation4] sm:$0xff] %vm1091_vm9, %v5192_v34  ;;  %v5504_v34 = vld [vmem:[%s9685_s12] sm:$0x1] }
0x1234   : > { %v5195_v50 = vpop.xlane.xlu0 %5194  ;;  %v5178_v55 = vpop.xlane.xlu1 %5177 }
0x1235   : > { %5203 = vst.msk [vmem:[#allocation4 + $0x8] sm:$0xff] %vm1091_vm9, %v5195_v50  ;;  %v5660_v50 = vld [vmem:[%s9685_s12] sm:$0x4] }
0x1236   : > { %5184 = vst.msk [vmem:[#allocation4 + $0x10] sm:$0xff] %vm719_vm5, %v5178_v55 }
0x1238   : > { %v5181_v38 = vpop.xlane.xlu0 %5180  ;;  %v5198_v6 = vpop.xlane.xlu1 %5197  ;;  %v5210_v18 = vld [vmem:[#allocation4] sm:$0xff] }
0x1239   : > { %5185 = vst.msk [vmem:[#allocation4 + $0x18] sm:$0xff] %vm719_vm5, %v5181_v38  ;;  %v5544_v38 = vshrl.u32 %v5542_v16, 16 }
0x123a   : > { %5204 = vst.msk [vmem:[#allocation4 + $0x10] sm:$0xff] %vm1091_vm9, %v5198_v6  ;;  %v5506_v6 = vpack.i.b16 %v5504_v34, %v5504_v34 }
0x123c   : > { %v5201_v62 = vpop.xlane.xlu0 %5200  ;;  %v5211_v33 = vld [vmem:[#allocation4 + $0x8] sm:$0xff] }
0x123d   : > { %5205 = vst.msk [vmem:[#allocation4 + $0x18] sm:$0xff] %vm1091_vm9, %v5201_v62  ;;  %v7220_v3 = vpack.c.bf16 %v5211_v33, %v5210_v18  ;;  %v5662_v62 = vshrl.u32 %v5660_v50, 16  ;;  %v5545_v33 = vpack.i.b16 %v5544_v38, %v5544_v38 }
0x123f   : > { %7221 = vmatprep.subr.bf16.mxu0 %v7220_v3 }
0x1240   : > { %7223 = vmatpush3.bf16.msra.mxu0 %v7220_v3  ;;  %v5511_v3 = vrot.slane %v5506_v6, %v7768_v13 }
0x1241   : > { %v5212_v25 = vld [vmem:[#allocation4 + $0x10] sm:$0xff] }
0x1244   : > { %v5213_v4 = vld [vmem:[#allocation4 + $0x18] sm:$0xff] }
0x1245   : > { %v7224_v37 = vpack.c.bf16 %v5213_v4, %v5212_v25  ;;  %v5663_v25 = vpack.i.b16 %v5662_v62, %v5662_v62  ;;  %v5581_v4 = vld [vmem:[%s9685_s12] sm:$0x2] }
0x1247   : > { %7225 = vmatprep.subr.bf16.mxu0 %v7224_v37 }
0x1248   : > { %7227 = vmatpush3.bf16.msra.mxu0 %v7224_v37  ;;  %v5687_v37 = vld [vmem:[%s9685_s12] sm:$0x8] }
0x124b   : > { %7161 = vmatmul.mubr.msk.f32.vlgmr.msra.gmra.mrb[40].mxu0 %vm1104_vm8, %v9034_v49 }
0x124c   : > { %7163 = vmatprep.mubr.msk.f32.mxu0 %vm1104_vm8, %v9039_v17 }
0x124f   : > { %7164 = vmatmul.mubr.msk.f32.gmra.mrb[42].mxu0 %vm1104_vm8, %v9048_v40 }
0x131e   : > { %v7162_v8 = vpop.f32.mrb[40].mxu0 }
0x131f   : > { %v5312_v7 = vmul.f32 0.00390625, %v7162_v8  ;;  %v5292_v36 = vpop.f32.mrb[41].mxu0  ;;  %v5619_v8 = vld [vmem:[%s9685_s12] sm:$0x2] }
0x1320   : > { %v5311_v12 = vmul.f32 0.00390625, %v5292_v36  ;;  %v5583_v36 = vpack.i.b16 %v5581_v4, %v5581_v4 }
0x1321   : > { %v5316_v54 = vmul.f32 %v5312_v7, %v5312_v7 }
0x1322   : > { %v5315_v59 = vmul.f32 %v5311_v12, %v5311_v12  ;;  %v7165_v32 = vpop.f32.mrb[42].mxu0 }
0x1323   : > { %5325 = vrot.lane.b32.xlu0 %v5316_v54, %s9717_s16  ;;  %v5302_v5 = vpop.f32.mrb[43].mxu0  ;;  %v5314_v49 = vmul.f32 0.00390625, %v7165_v32  ;;  %v5689_v54 = vpack.i.b16 %v5687_v37, %v5687_v37 }
0x1324   : > { %v5313_v39 = vmul.f32 0.00390625, %v5302_v5  ;;  %5323 = vrot.lane.b32.xlu1 %v5315_v59, %s9717_s16  ;;  %v5621_v59 = vshrl.u32 %v5619_v8, 16  ;;  %v5588_v5 = vrot.slane %v5583_v36, %v7777_v24 }
0x1325   : > { %v5318_v17 = vmul.f32 %v5314_v49, %v5314_v49 }
0x1326   : > { %v5317_v53 = vmul.f32 %v5313_v39, %v5313_v39 }
0x1327   : > { %5353 = vperm.xlu0 %7333, %v5311_v12  }
0x1328   : > { %5327 = vrot.lane.b32.xlu1 %v5317_v53, %s9717_s16 }
0x132b   : > { %7335 = vset.pattern.permute.xlu0 %v7669_v29 }
0x132c   : > { %5329 = vrot.lane.b32.xlu1 %v5318_v17, %s9717_s16  ;;  %5405 = vperm.xlu0 %7335, %v9064_v57  }
0x1330   : > { %5358 = vperm.xlu1 %7334, %v5312_v7   ;;  %5415 = vperm.xlu0 %7335, %v9078_v2  }
0x1334   : > { %5363 = vperm.xlu1 %7334, %v5313_v39   ;;  %7337 = vset.pattern.permute.xlu0 %v7661_v1 }
0x1338   : > { %5368 = vperm.xlu1 %7334, %v5314_v49  }
0x133c   : > { %7336 = vset.pattern.permute.xlu1 %v7669_v29 }
0x133d   : > { %5410 = vperm.xlu1 %7336, %v9059_v19  }
0x1341   : > { %5433 = vperm.xlu1 %7336, %v9073_v27  }
0x1345   : > { %5438 = vperm.xlu1 %7336, %v9085_v61  }
0x1349   : > { %5420 = vperm.xlu1 %7336, %v9092_v10  }
0x134d   : > { %7338 = vset.pattern.permute.xlu1 %v7661_v1 }
0x1395   : > { %v5326_v40 = vpop.permute.xlu0 %5325 }
0x1396   : > { %v5336_v57 = vsub.f32 %v5312_v7, %v5326_v40  ;;  %v5324_v56 = vpop.permute.xlu1 %5323  ;;  %v5713_v7 = vld [vmem:[%s9685_s12] sm:$0x8] }
0x1397   : > { %v5335_v2 = vsub.f32 %v5311_v12, %v5324_v56  ;;  %v5668_v12 = vrot.slane %v5663_v25, %v7803_v41  ;;  %v5715_v32 = vshrl.u32 %v5713_v7, 16 }
0x1398   : > { %v5340_v31 = vmax.f32 %v5336_v57, 0.0 }
0x1399   : > { %v5339_v44 = vmax.f32 %v5335_v2, 0.0 }
0x139a   : > { %v5344_v63 = vadd.f32 1e-06, %v5340_v31  ;;  %v5328_v22 = vpop.permute.xlu1 %5327 }
0x139b   : > { %v5343_v15 = vadd.f32 1e-06, %v5339_v44  ;;  %v5337_v60 = vsub.f32 %v5313_v39, %v5328_v22  ;;  %v5622_v39 = vpack.i.b16 %v5621_v59, %v5621_v59 }
0x139c   : > { %7589 = vrsqrt.f32 %v5344_v63 }
0x139d   : > { %7591 = vrsqrt.f32 %v5343_v15  ;;  %v5341_v19 = vmax.f32 %v5337_v60, 0.0  ;;  %v5627_v53 = vrot.slane %v5622_v39, %v7777_v24 }
0x139e   : > { %v5330_v27 = vpop.permute.xlu1 %5329 }
0x139f   : > { %v5345_v47 = vadd.f32 1e-06, %v5341_v19  ;;  %v5338_v61 = vsub.f32 %v5314_v49, %v5330_v27  ;;  %v5716_v49 = vpack.i.b16 %v5715_v32, %v5715_v32 }
0x13a1   : > { %7593 = vrsqrt.f32 %v5345_v47  ;;  %v5342_v10 = vmax.f32 %v5338_v61, 0.0  ;;  %v5721_v17 = vrot.slane %v5716_v49, %v7805_v43 }
0x13a3   : > { %v5346_v20 = vadd.f32 1e-06, %v5342_v10 }
0x13a5   : > { %7595 = vrsqrt.f32 %v5346_v20 }
0x13a6   : > { %v7590_v9 = vpop.eup %7589  ;;  %v5354_v22 = vpop.permute.xlu0 %5353 }
0x13a7   : > { %v7592_v14 = vpop.eup %7591  ;;  %5382 = vperm.xlu0 %7337, %v7590_v9   ;;  %v5371_v61 = vsub.f32 %v9262_v23, %v5354_v22 }
0x13a8   : > { %5377 = vperm.xlu1 %7338, %v7592_v14  }
0x13ab   : > { %v7594_v55 = vpop.eup %7593  ;;  %v5406_v15 = vpop.permute.xlu0 %5405 }
0x13ac   : > { %5387 = vperm.xlu1 %7338, %v7594_v55  }
0x13af   : > { %v7596_v18 = vpop.eup %7595  ;;  %v5359_v56 = vpop.permute.xlu1 %5358 }
0x13b0   : > { %7339 = vset.pattern.permute.xlu1 %v7669_v29  ;;  %5392 = vperm.xlu0 %7337, %v7596_v18   ;;  %v5416_v19 = vpop.permute.xlu0 %5415  ;;  %v5372_v47 = vsub.f32 %v9264_v35, %v5359_v56 }
0x13b1   : > { %5443 = vperm.xlu1 %7339, %v9121_v48   ;;  %v5550_v48 = vrot.slane %v5545_v33, %v7768_v13 }
0x13b3   : > { %v5364_v2 = vpop.permute.xlu1 %5363 }
0x13b4   : > { %7340 = vset.pattern.permute.xlu0 %v7669_v29  ;;  %v5694_v29 = vrot.slane %v5689_v54, %v7805_v43  ;;  %v5373_v34 = vsub.f32 %v9275_v45, %v5364_v2 }
0x13b5   : > { %5448 = vperm.xlu0 %7340, %v9108_v46   ;;  %5513 = vrot.lane.b32.xlu1 %v5511_v3, %s9710_s23  ;;  %v5740_v46 = vld [vmem:[%s9685_s12 + $0x4] sm:$0x1] }
0x13b6   : > { %v5742_v40 = vpack.i.b16 %v5740_v46, %v5740_v46 }
0x13b7   : > { %v5369_v31 = vpop.permute.xlu1 %5368 }
0x13b8   : > { %v5747_v57 = vrot.slane %v5742_v40, %v7768_v13  ;;  %v5374_v33 = vsub.f32 %v9277_v58, %v5369_v31 }
0x13b9   : > { %5552 = vrot.lane.b32.xlu0 %v5550_v48, %s9708_s26  ;;  %5670 = vrot.lane.b32.xlu1 %v5668_v12, %s9717_s16 }
0x13bc   : > { %v5411_v44 = vpop.permute.xlu1 %5410 }
0x13bd   : > { %5590 = vrot.lane.b32.xlu0 %v5588_v5, %s9706_s27  ;;  %5696 = vrot.lane.b32.xlu1 %v5694_v29, %s9704_s17 }
0x13c0   : > { %v5434_v63 = vpop.permute.xlu1 %5433 }
0x13c1   : > { %5629 = vrot.lane.b32.xlu0 %v5627_v53, %s9714_s24  ;;  %5723 = vrot.lane.b32.xlu1 %v5721_v17, %s9718_s22 }
0x13c4   : > { %v5439_v60 = vpop.permute.xlu1 %5438 }
0x13c5   : > { %5749 = vrot.lane.b32.xlu0 %v5747_v57, %s9719_s18 }
0x13c8   : > { %v5421_v27 = vpop.permute.xlu1 %5420 }
0x1426   : > { %v5383_v10 = vpop.permute.xlu0 %5382 }
0x1427   : > { %v5396_v20 = vmul.f32 %v5383_v10, %v5372_v47  ;;  %v5378_v9 = vpop.permute.xlu1 %5377 }
0x1428   : > { %v5395_v14 = vmul.f32 %v5378_v9, %v5371_v61 }
0x1429   : > { %v5424_v16 = vmul.f32 %v5411_v44, %v5396_v20 }
0x142a   : > { %v5423_v50 = vmul.f32 %v5406_v15, %v5395_v14 }
0x142b   : > { %v5452_v55 = vadd.f32 %v5439_v60, %v5424_v16  ;;  %v5388_v38 = vpop.permute.xlu1 %5387 }
0x142c   : > { %v5451_v6 = vadd.f32 %v5434_v63, %v5423_v50  ;;  %v5397_v62 = vmul.f32 %v5388_v38, %v5373_v34 }
0x142d   : > { %v6911_v18 = vmul.f32 -1.442695, %v5452_v55 }
0x142e   : > { %v6910_v3 = vmul.f32 -1.442695, %v5451_v6  ;;  %v5425_v25 = vmul.f32 %v5416_v19, %v5397_v62 }
0x142f   : > { %7597 = vpow2.f32 %v6911_v18  ;;  %v5393_v35 = vpop.permute.xlu0 %5392 }
0x1430   : > { %7599 = vpow2.f32 %v6910_v3  ;;  %v5398_v23 = vmul.f32 %v5393_v35, %v5374_v33  ;;  %v5444_v4 = vpop.permute.xlu1 %5443 }
0x1431   : > { %v5453_v37 = vadd.f32 %v5444_v4, %v5425_v25 }
0x1432   : > { %v5426_v8 = vmul.f32 %v5421_v27, %v5398_v23 }
0x1433   : > { %v6912_v7 = vmul.f32 -1.442695, %v5453_v37 }
0x1434   : > { %v5449_v48 = vpop.permute.xlu0 %5448  ;;  %v5514_v45 = vpop.permute.xlu1 %5513 }
0x1435   : > { %7601 = vpow2.f32 %v6912_v7  ;;  %v5454_v36 = vadd.f32 %v5449_v48, %v5426_v8  ;;  %v5516_v12 = vmul.bf16 %v9171_v51, %v5514_v45  ;;  %v7476_v48 = vld [vmem:[%s9676_s3 + $0xc4] ss:$12 sps:$4 sm:$0xff]  }
0x1436   : > { %5870 = vmatprep.mubr.bf16.mxu0 %v7476_v48 }
0x1437   : > { %v6913_v54 = vmul.f32 -1.442695, %v5454_v36  ;;  %5524 = vrot.lane.b32.xlu1 %v5516_v12, %s9719_s18 }
0x1438   : > { %v5553_v58 = vpop.permute.xlu0 %5552  ;;  %v5671_v27 = vpop.permute.xlu1 %5670 }
0x1439   : > { %v7598_v59 = vpop.eup %7597  ;;  %7603 = vpow2.f32 %v6913_v54  ;;  %v5555_v32 = vmul.bf16 %v9171_v51, %v5553_v58  ;;  %v7670_v54 = vmov 4  }
0x143a   : > { %v7600_v5 = vpop.eup %7599  ;;  %v5468_v29 = vadd.f32 1.0, %v7598_v59  ;;  %7341 = vset.pattern.permute.xlu1 %v7670_v54  ;;  %7342 = vset.pattern.permute.xlu0 %v7670_v54 }
0x143b   : > { %v5467_v39 = vadd.f32 1.0, %v7600_v5  ;;  %5528 = vrot.lane.b32.xlu1 %v5516_v12, %s9719_s18  ;;  %5567 = vrot.lane.b32.xlu0 %v5555_v32, %s9718_s22 }
0x143c   : > { %7605 = vrcp.f32 %v5468_v29  ;;  %v5591_v49 = vpop.permute.xlu0 %5590  ;;  %v5697_v9 = vpop.permute.xlu1 %5696 }
0x143d   : > { %7607 = vrcp.f32 %v5467_v39  ;;  %v5593_v53 = vmul.bf16 %v9171_v51, %v5591_v49 }
0x143f   : > { %v7602_v46 = vpop.eup %7601  ;;  %5563 = vrot.lane.b32.xlu1 %v5555_v32, %s9718_s22 }
0x1440   : > { %v5469_v17 = vadd.f32 1.0, %v7602_v46  ;;  %v5724_v3 = vpop.permute.xlu1 %5723 }
0x1442   : > { %7609 = vrcp.f32 %v5469_v17 }
0x1443   : > { %v7604_v40 = vpop.eup %7603  ;;  %5601 = vrot.lane.b32.xlu1 %v5593_v53, %s9704_s17 }
0x1444   : > { %v5470_v57 = vadd.f32 1.0, %v7604_v40 }
0x1446   : > { %v7606_v56 = vpop.eup %7605  ;;  %7611 = vrcp.f32 %v5470_v57 }
0x1447   : > { %v7608_v2 = vpop.eup %7607  ;;  %v5480_v31 = vmul.f32 %v7606_v56, %v5452_v55 }
0x1448   : > { %v5479_v44 = vmul.f32 %v7608_v2, %v5451_v6  ;;  %v5630_v6 = vpop.permute.xlu0 %5629 }
0x1449   : > { %v5632_v62 = vmul.bf16 %v9171_v51, %v5630_v6 }
0x144a   : > { %v5496_v63 = vpack.c.bf16 %v5480_v31, %v5479_v44 }
0x144c   : > { %5498 = vst.msk [vmem:[#allocation2 + $0x8] sm:$0xff] %vm4400_vm10, %v5496_v63  ;;  %v7610_v22 = vpop.eup %7609 }
0x144d   : > { %v5481_v60 = vmul.f32 %v7610_v22, %v5453_v37  ;;  %v5750_v37 = vpop.permute.xlu0 %5749 }
0x1450   : > { %v7612_v15 = vpop.eup %7611 }
0x1451   : > { %v5482_v19 = vmul.f32 %v7612_v15, %v5454_v36  ;;  %v7477_v36 = vld [vmem:[%s9676_s3 + $0xc8] ss:$12 sps:$4 sm:$0xff]  }
0x1452   : > { %7170 = vmatprep.mubr.msk.bf16.mxu1 %vm1104_vm8, %v7477_v36  ;;  %v7481_v36 = vld [vmem:[%s9676_s3 + $0xd8] ss:$12 sps:$4 sm:$0xff]  }
0x1453   : > { %v5497_v47 = vpack.c.bf16 %v5482_v19, %v5481_v60  ;;  %v5539_v61 = vld [vmem:[#allocation2 + $0x8] sm:$0xff] }
0x1454   : > { %v5673_v10 = vmul.bf16 %v5671_v27, %v5539_v61  ;;  %5656 = vst.msk [vmem:[#allocation3 + $0x80] sm:$0xff] %vm4400_vm10, %v5539_v61  ;;  %v5517_v20 = vmul.bf16 %v5539_v61, %v5514_v45  ;;  %v5699_v14 = vmul.bf16 %v5697_v9, %v5539_v61  ;;  %v5556_v16 = vmul.bf16 %v5553_v58, %v5539_v61 }
0x1455   : > { %5499 = vst.msk [vmem:[#allocation2 + $0x28] sm:$0xff] %vm4400_vm10, %v5497_v47  ;;  %v5594_v38 = vmul.bf16 %v5591_v49, %v5539_v61  ;;  %v5726_v35 = vmul.bf16 %v5724_v3, %v5539_v61  ;;  %v5633_v23 = vmul.bf16 %v5630_v6, %v5539_v61  ;;  %v5752_v7 = vmul.bf16 %v5750_v37, %v5539_v61 }
0x1456   : > { %5677 = vrot.lane.b32.xlu1 %v5673_v10, %s9714_s24  ;;  %5526 = vrot.lane.b32.xlu0 %v5517_v20, %s9719_s18 }
0x145a   : > { %5703 = vrot.lane.b32.xlu1 %v5699_v14, %s9706_s27  ;;  %5565 = vrot.lane.b32.xlu0 %v5556_v16, %s9718_s22 }
0x145b   : > { %v5772_v34 = vld [vmem:[#allocation3 + $0x80] sm:$0xff] }
0x145c   : > { %v5541_v50 = vld [vmem:[#allocation2 + $0x28] sm:$0xff]  ;;  %7037 = vmatprep.subr.bf16.mxu0 %v5772_v34 }
0x145d   : > { %v5558_v55 = vmul.bf16 %v5553_v58, %v5541_v50  ;;  %5657 = vst.msk [vmem:[#allocation3 + $0x90] sm:$0xff] %vm4400_vm10, %v5541_v50  ;;  %v5519_v18 = vmul.bf16 %v5541_v50, %v5514_v45  ;;  %v5596_v33 = vmul.bf16 %v5591_v49, %v5541_v50  ;;  %v5674_v25 = vmul.bf16 %v5671_v27, %v5541_v50 }
0x145e   : > { %5603 = vrot.lane.b32.xlu0 %v5594_v38, %s9704_s17  ;;  %v5635_v4 = vmul.bf16 %v5630_v6, %v5541_v50  ;;  %v5700_v8 = vmul.bf16 %v5697_v9, %v5541_v50  ;;  %v5727_v45 = vmul.bf16 %v5724_v3, %v5541_v50  ;;  %v5753_v12 = vmul.bf16 %v5750_v37, %v5541_v50 }
0x145f   : > { %5569 = vrot.lane.b32.xlu1 %v5558_v55, %s9718_s22 }
0x1462   : > { %5530 = vrot.lane.b32.xlu0 %v5519_v18, %s9719_s18 }
0x1463   : > { %5640 = vrot.lane.b32.xlu1 %v5632_v62, %s9717_s16 }
0x1464   : > { %v5773_v57 = vld [vmem:[#allocation3 + $0x90] sm:$0xff] }
0x1466   : > { %5605 = vrot.lane.b32.xlu0 %v5593_v53, %s9704_s17 }
0x1467   : > { %5607 = vrot.lane.b32.xlu1 %v5596_v33, %s9704_s17 }
0x146a   : > { %5679 = vrot.lane.b32.xlu0 %v5674_v25, %s9714_s24 }
0x146b   : > { %5730 = vrot.lane.b32.xlu1 %v5726_v35, %s9708_s26 }
0x146e   : > { %5642 = vrot.lane.b32.xlu0 %v5633_v23, %s9717_s16 }
0x146f   : > { %5646 = vrot.lane.b32.xlu1 %v5635_v4, %s9717_s16 }
0x1472   : > { %5705 = vrot.lane.b32.xlu0 %v5700_v8, %s9706_s27  ;;  %v7474_v8 = vld [vmem:[%s9676_s3 + $0xc0] ss:$12 sps:$4 sm:$0xff]  }
0x1473   : > { %5756 = vrot.lane.b32.xlu1 %v5752_v7, %s9710_s23  ;;  %v7479_v7 = vld [vmem:[%s9676_s3 + $0xdc] ss:$12 sps:$4 sm:$0xff]  }
0x1476   : > { %5644 = vrot.lane.b32.xlu0 %v5632_v62, %s9717_s16 }
0x1477   : > { %5784 = vperm.xlu1 %7341, %v9198_v42  }
0x147a   : > { %5732 = vrot.lane.b32.xlu0 %v5727_v45, %s9708_s26  ;;  %v7478_v45 = vld [vmem:[%s9676_s3 + $0xe0] ss:$12 sps:$4 sm:$0xff]   ;;  %s9721_s26 = smov 120  }
0x147b   : > { %5794 = vperm.xlu1 %7341, %v9212_v21  }
0x147e   : > { %5758 = vrot.lane.b32.xlu0 %v5753_v12, %s9710_s23 }
0x147f   : > { %5799 = vperm.xlu1 %7341, %v9219_v30  }
0x1482   : > { %5789 = vperm.xlu0 %7342, %v9203_v26  }
0x1483   : > { %7344 = vset.pattern.permute.xlu1 %v9171_v51 }
0x1486   : > { %7343 = vset.pattern.permute.xlu0 %v9171_v51 }
0x14a9   : > { %v5525_v58 = vpop.permute.xlu1 %5524 }
0x14ad   : > { %v5529_v59 = vpop.permute.xlu1 %5528  ;;  %v5568_v29 = vpop.permute.xlu0 %5567 }
0x14b1   : > { %v5564_v32 = vpop.permute.xlu1 %5563 }
0x14b5   : > { %v5602_v5 = vpop.permute.xlu1 %5601 }
0x14c8   : > { %v5678_v39 = vpop.permute.xlu1 %5677  ;;  %v5527_v49 = vpop.permute.xlu0 %5526 }
0x14c9   : > { %5683 = vst.msk [vmem:[#allocation3 + $0xa0] sm:$0xff] %vm4400_vm10, %v5678_v39  ;;  %v5532_v42 = vsel %vm4763_vm11, %v5525_v58, %v5527_v49 }
0x14ca   : > { %5536 = vst.msk [vmem:[#allocation3] sm:$0xff] %vm4400_vm10, %v5532_v42 }
0x14cc   : > { %v5704_v26 = vpop.permute.xlu1 %5703  ;;  %v5566_v21 = vpop.permute.xlu0 %5565 }
0x14cd   : > { %5709 = vst.msk [vmem:[#allocation3 + $0xc0] sm:$0xff] %vm4400_vm10, %v5704_v26  ;;  %v5571_v30 = vsel %vm4803_vm12, %v5564_v32, %v5566_v21 }
0x14ce   : > { %5575 = vst.msk [vmem:[#allocation3 + $0x20] sm:$0xff] %vm4400_vm10, %v5571_v30 }
0x14d0   : > { %v5604_v51 = vpop.permute.xlu0 %5603  ;;  %v5774_v27 = vld [vmem:[#allocation3 + $0xa0] sm:$0xff] }
0x14d1   : > { %v5570_v46 = vpop.permute.xlu1 %5569  ;;  %v5609_v53 = vsel %vm4842_vm13, %v5602_v5, %v5604_v51  ;;  %v5764_v40 = vld [vmem:[#allocation3] sm:$0xff] }
0x14d2   : > { %v5572_v17 = vsel %vm4803_vm12, %v5568_v29, %v5570_v46  ;;  %5613 = vst.msk [vmem:[#allocation3 + $0x40] sm:$0xff] %vm4400_vm10, %v5609_v53  ;;  %7038 = vmatpush3.bf16.msra.mxu0 %v5764_v40 }
0x14d3   : > { %5576 = vst.msk [vmem:[#allocation3 + $0x30] sm:$0xff] %vm4400_vm10, %v5572_v17  ;;  %7039 = vmatprep.subr.bf16.mxu0 %v5773_v57 }
0x14d4   : > { %v5531_v56 = vpop.permute.xlu0 %5530  ;;  %v5776_v50 = vld [vmem:[#allocation3 + $0xc0] sm:$0xff] }
0x14d5   : > { %v5641_v2 = vpop.permute.xlu1 %5640  ;;  %v5533_v31 = vsel %vm4763_vm11, %v5529_v59, %v5531_v56  ;;  %v5766_v20 = vld [vmem:[#allocation3 + $0x20] sm:$0xff] }
0x14d6   : > { %5537 = vst.msk [vmem:[#allocation3 + $0x10] sm:$0xff] %vm4400_vm10, %v5533_v31 }
0x14d8   : > { %v5606_v44 = vpop.permute.xlu0 %5605 }
0x14d9   : > { %v5608_v63 = vpop.permute.xlu1 %5607  ;;  %v5768_v6 = vld [vmem:[#allocation3 + $0x40] sm:$0xff] }
0x14da   : > { %v5610_v22 = vsel %vm4842_vm13, %v5606_v44, %v5608_v63  ;;  %v5767_v34 = vld [vmem:[#allocation3 + $0x30] sm:$0xff] }
0x14db   : > { %5614 = vst.msk [vmem:[#allocation3 + $0x50] sm:$0xff] %vm4400_vm10, %v5610_v22 }
0x14dc   : > { %v5680_v15 = vpop.permute.xlu0 %5679 }
0x14dd   : > { %v5731_v60 = vpop.permute.xlu1 %5730  ;;  %5684 = vst.msk [vmem:[#allocation3 + $0xb0] sm:$0xff] %vm4400_vm10, %v5680_v15  ;;  %v5765_v19 = vld [vmem:[#allocation3 + $0x10] sm:$0xff] }
0x14de   : > { %5736 = vst.msk [vmem:[#allocation3 + $0xe0] sm:$0xff] %vm4400_vm10, %v5731_v60  ;;  %7040 = vmatpush3.bf16.msra.mxu0 %v5765_v19 }
0x14df   : > { %7041 = vmatprep.subr.bf16.mxu0 %v5774_v27 }
0x14e0   : > { %v5643_v47 = vpop.permute.xlu0 %5642 }
0x14e1   : > { %v5647_v61 = vpop.permute.xlu1 %5646  ;;  %v5648_v10 = vsel %vm719_vm5, %v5641_v2, %v5643_v47 }
0x14e2   : > { %5652 = vst.msk [vmem:[#allocation3 + $0x60] sm:$0xff] %vm4400_vm10, %v5648_v10  ;;  %7042 = vmatpush3.bf16.msra.mxu0 %v5766_v20  ;;  %v5769_v3 = vld [vmem:[#allocation3 + $0x50] sm:$0xff] }
0x14e4   : > { %v5706_v9 = vpop.permute.xlu0 %5705  ;;  %v5775_v14 = vld [vmem:[#allocation3 + $0xb0] sm:$0xff] }
0x14e5   : > { %v5757_v16 = vpop.permute.xlu1 %5756  ;;  %5710 = vst.msk [vmem:[#allocation3 + $0xd0] sm:$0xff] %vm4400_vm10, %v5706_v9  ;;  %7043 = vmatprep.subr.bf16.mxu0 %v5775_v14  ;;  %v5778_v25 = vld [vmem:[#allocation3 + $0xe0] sm:$0xff] }
0x14e6   : > { %5762 = vst.msk [vmem:[#allocation3 + $0x100] sm:$0xff] %vm4400_vm10, %v5757_v16  ;;  %7044 = vmatpush3.bf16.msra.mxu0 %v5767_v34 }
0x14e7   : > { %7045 = vmatprep.subr.bf16.mxu0 %v5776_v50 }
0x14e8   : > { %v5645_v55 = vpop.permute.xlu0 %5644 }
0x14e9   : > { %v5649_v38 = vsel %vm719_vm5, %v5645_v55, %v5647_v61  ;;  %v5770_v23 = vld [vmem:[#allocation3 + $0x60] sm:$0xff] }
0x14ea   : > { %5653 = vst.msk [vmem:[#allocation3 + $0x70] sm:$0xff] %vm4400_vm10, %v5649_v38  ;;  %7046 = vmatpush3.bf16.msra.mxu0 %v5768_v6 }
0x14ec   : > { %v5733_v62 = vpop.permute.xlu0 %5732  ;;  %v5777_v18 = vld [vmem:[#allocation3 + $0xd0] sm:$0xff] }
0x14ed   : > { %v5780_v33 = vld [vmem:[#allocation3 + $0x100] sm:$0xff]  ;;  %5737 = vst.msk [vmem:[#allocation3 + $0xf0] sm:$0xff] %vm4400_vm10, %v5733_v62  ;;  %7047 = vmatprep.subr.bf16.mxu0 %v5777_v18 }
0x14ee   : > { %7166 = vmatprep.subr.bf16.mxu1 %v5780_v33  ;;  %7048 = vmatpush3.bf16.msra.mxu0 %v5769_v3 }
0x14ef   : > { %7167 = vmatpush3.bf16.msra.mxu1 %v5780_v33  ;;  %7049 = vmatprep.subr.bf16.mxu0 %v5778_v25 }
0x14f0   : > { %v5759_v35 = vpop.permute.xlu0 %5758 }
0x14f1   : > { %5763 = vst.msk [vmem:[#allocation3 + $0x110] sm:$0xff] %vm4400_vm10, %v5759_v35  ;;  %v5771_v37 = vld [vmem:[#allocation3 + $0x70] sm:$0xff] }
0x14f2   : > { %7050 = vmatpush3.bf16.msra.mxu0 %v5770_v23 }
0x14f4   : > { %v5779_v4 = vld [vmem:[#allocation3 + $0xf0] sm:$0xff] }
0x14f5   : > { %7051 = vmatprep.subr.bf16.mxu0 %v5779_v4 }
0x14f6   : > { %7052 = vmatpush3.bf16.msra.mxu0 %v5771_v37  ;;  %v5785_v58 = vpop.permute.xlu1 %5784 }
0x14f8   : > { %v5781_v48 = vld [vmem:[#allocation3 + $0x110] sm:$0xff] }
0x14f9   : > { %5871 = vmatmul.mubr.bf16.vlgmr.msra.gmra.mrb[44].mxu0 %v7474_v8  ;;  %7168 = vmatprep.subr.bf16.mxu1 %v5781_v48 }
0x14fa   : > { %7169 = vmatpush3.bf16.msra.mxu1 %v5781_v48  ;;  %5878 = vmatprep.mubr.bf16.mxu0 %v7479_v7  ;;  %v5795_v53 = vpop.permute.xlu1 %5794 }
0x14fd   : > { %7171 = vmatmul.mubr.msk.bf16.vlgmr.msra.gmra.mrb[24].mxu1 %vm1104_vm8, %v7478_v45 }
0x14fe   : > { %v5800_v47 = vpop.permute.xlu1 %5799 }
0x1501   : > { %5879 = vmatmul.mubr.bf16.gmra.mrb[48].mxu0 %v7481_v36  ;;  %v5790_v39 = vpop.permute.xlu0 %5789 }
0x15cc   : > { %v7053_v12 = vpop.f32.mrb[44].mxu0 }
0x15cd   : > { %v7054_v59 = vpop.f32.mrb[45].mxu0 }
0x15ce   : > { %v7055_v32 = vadd.f32 %v7054_v59, %v7053_v12  ;;  %v7056_v5 = vpop.f32.mrb[46].mxu0  ;;  %v5978_v59 = vld [vmem:[%s9681_s8 + $0x10] sm:$0xff] }
0x15cf   : > { %v7057_v29 = vpop.f32.mrb[47].mxu0 }
0x15d0   : > { %v7058_v49 = vadd.f32 %v7057_v29, %v7056_v5  ;;  %v7172_v42 = vpop.f32.mrb[24].mxu1  ;;  %v5873_v26 = vadd.f32 %v7055_v32, %v5785_v58  ;;  %v5977_v58 = vld [vmem:[%s9681_s8 + $0x8] sm:$0xff]  ;;  %v5979_v32 = vld [vmem:[%s9681_s8 + $0x18] sm:$0xff] }
0x15d1   : > { %v5921_v21 = vpop.f32.mrb[25].mxu1 }
0x15d2   : > { %v5876_v30 = vadd.f32 %v7058_v49, %v5790_v39  ;;  %v5922_v51 = vadd.f32 %v5921_v21, %v5873_v26  ;;  %v7173_v46 = vpop.f32.mrb[26].mxu1 }
0x15d3   : > { %v5924_v17 = vpop.f32.mrb[27].mxu1 }
0x15d4   : > { %v9451_v40 = vadd.f32 %v8988_v0, %v5922_v51  ;;  %v5925_v57 = vadd.f32 %v5924_v17, %v5876_v30  ;;  %v7059_v56 = vpop.f32.mrb[48].mxu0  ;;  %v6169_v17 = vld [vmem:[%s9679_s6] sm:$0xff] }
0x15d5   : > { %v7060_v2 = vpop.f32.mrb[49].mxu0 }
0x15d6   : > { %v9454_v31 = vadd.f32 %v8990_v52, %v5925_v57  ;;  %v7061_v44 = vadd.f32 %v7060_v2, %v7059_v56  ;;  %v7062_v63 = vpop.f32.mrb[50].mxu0  ;;  %v5940_v22 = vsel %vm4400_vm10, %v9451_v40, 0.0  ;;  %v5956_v15 = vmul.f32 %v9451_v40, %v9451_v40  ;;  %v6171_v56 = vld [vmem:[%s9679_s6 + $0x10] sm:$0xff]  ;;  %v6170_v2 = vld [vmem:[%s9679_s6 + $0x8] sm:$0xff] }
0x15d7   : > { %v7063_v60 = vpop.f32.mrb[51].mxu0  ;;  %5941 = vadd.xlane.f32.xlu0 %v5940_v22  ;;  %v6172_v22 = vld [vmem:[%s9679_s6 + $0x18] sm:$0xff] }
0x15d8   : > { %v5881_v19 = vadd.f32 %v7061_v44, %v5795_v53  ;;  %v7064_v27 = vadd.f32 %v7063_v60, %v7062_v63  ;;  %v5943_v0 = vsel %vm4400_vm10, %v9454_v31, 0.0  ;;  %v5960_v10 = vsel %vm4400_vm10, %v5956_v15, 0.0  ;;  %v6197_v44 = vld [vmem:[%s9680_s7] sm:$0xff]  ;;  %v6198_v63 = vld [vmem:[%s9680_s7 + $0x8] sm:$0xff] }
0x15d9   : > { %5944 = vadd.xlane.f32.xlu1 %v5943_v0  ;;  %v5957_v20 = vmul.f32 %v9454_v31, %v9454_v31 }
0x15da   : > { %v5930_v61 = vadd.f32 %v7172_v42, %v5881_v19  ;;  %v5884_v52 = vadd.f32 %v7064_v27, %v5800_v47 }
0x15db   : > { %5961 = vadd.xlane.f32.xlu0 %v5960_v10  ;;  %v5963_v16 = vsel %vm4400_vm10, %v5957_v20, 0.0 }
0x15dc   : > { %v5933_v9 = vadd.f32 %v7173_v46, %v5884_v52  ;;  %v9466_v14 = vadd.f32 %v9001_v11, %v5930_v61 }
0x15de   : > { %v5946_v34 = vsel %vm4400_vm10, %v9466_v14, 0.0  ;;  %v5958_v50 = vmul.f32 %v9466_v14, %v9466_v14  ;;  %v9474_v55 = vadd.f32 %v9004_v28, %v5933_v9  ;;  %v5976_v28 = vld [vmem:[%s9681_s8] sm:$0xff] }
0x15df   : > { %5964 = vadd.xlane.f32.xlu0 %v5963_v16  ;;  %5947 = vadd.xlane.f32.xlu1 %v5946_v34 }
0x15e0   : > { %v5966_v38 = vsel %vm4400_vm10, %v5958_v50, 0.0  ;;  %v5949_v6 = vsel %vm4400_vm10, %v9474_v55, 0.0  ;;  %v5959_v11 = vmul.f32 %v9474_v55, %v9474_v55  ;;  %7182 = vmatprep.mubr.msk.f32.mxu1 %vm1104_vm8, %v5976_v28  ;;  %v6261_v28 = vld [vmem:[%s9685_s12] sm:$0x1] }
0x15e2   : > { %v5969_v62 = vsel %vm4400_vm10, %v5959_v11, 0.0 }
0x15e3   : > { %5967 = vadd.xlane.f32.xlu1 %v5966_v38  ;;  %5950 = vadd.xlane.f32.xlu0 %v5949_v6 }
0x15e7   : > { %5970 = vadd.xlane.f32.xlu0 %v5969_v62  ;;  %v6299_v62 = vld [vmem:[%s9685_s12] sm:$0x1] }
0x1664   : > { %v5942_v18 = vpop.xlane.xlu0 %5941 }
0x1665   : > { %5952 = vst.msk [vmem:[#allocation4] sm:$0xff] %vm719_vm5, %v5942_v18  ;;  %v6417_v18 = vld [vmem:[%s9685_s12] sm:$0x4] }
0x1666   : > { %v5945_v33 = vpop.xlane.xlu1 %5944 }
0x1667   : > { %5953 = vst.msk [vmem:[#allocation4 + $0x8] sm:$0xff] %vm719_vm5, %v5945_v33 }
0x1668   : > { %v5962_v3 = vpop.xlane.xlu0 %5961 }
0x1669   : > { %5972 = vst.msk [vmem:[#allocation4] sm:$0xff] %vm1091_vm9, %v5962_v3  ;;  %v6301_v3 = vshrl.u32 %v6299_v62, 16 }
0x166c   : > { %v5965_v25 = vpop.xlane.xlu0 %5964  ;;  %v5948_v35 = vpop.xlane.xlu1 %5947 }
0x166d   : > { %5973 = vst.msk [vmem:[#allocation4 + $0x8] sm:$0xff] %vm1091_vm9, %v5965_v25  ;;  %v6263_v25 = vpack.i.b16 %v6261_v28, %v6261_v28 }
0x166e   : > { %5954 = vst.msk [vmem:[#allocation4 + $0x10] sm:$0xff] %vm719_vm5, %v5948_v35  ;;  %v6419_v35 = vshrl.u32 %v6417_v18, 16 }
0x1670   : > { %v5951_v23 = vpop.xlane.xlu0 %5950  ;;  %v5968_v4 = vpop.xlane.xlu1 %5967  ;;  %v5980_v8 = vld [vmem:[#allocation4] sm:$0xff] }
0x1671   : > { %5955 = vst.msk [vmem:[#allocation4 + $0x18] sm:$0xff] %vm719_vm5, %v5951_v23  ;;  %v6199_v23 = vld [vmem:[%s9680_s7 + $0x10] sm:$0xff] }
0x1672   : > { %5974 = vst.msk [vmem:[#allocation4 + $0x10] sm:$0xff] %vm1091_vm9, %v5968_v4 }
0x1674   : > { %v5971_v37 = vpop.xlane.xlu0 %5970  ;;  %v5981_v7 = vld [vmem:[#allocation4 + $0x8] sm:$0xff] }
0x1675   : > { %5975 = vst.msk [vmem:[#allocation4 + $0x18] sm:$0xff] %vm1091_vm9, %v5971_v37  ;;  %v7228_v48 = vpack.c.bf16 %v5981_v7, %v5980_v8  ;;  %v6302_v37 = vpack.i.b16 %v6301_v3, %v6301_v3  ;;  %v6200_v8 = vld [vmem:[%s9680_s7 + $0x18] sm:$0xff]  ;;  %v6268_v7 = vrot.slane %v6263_v25, %v7768_v13 }
0x1677   : > { %7229 = vmatprep.subr.bf16.mxu1 %v7228_v48 }
0x1678   : > { %7231 = vmatpush3.bf16.msra.mxu1 %v7228_v48  ;;  %v6420_v48 = vpack.i.b16 %v6419_v35, %v6419_v35 }
0x1679   : > { %v5982_v45 = vld [vmem:[#allocation4 + $0x10] sm:$0xff] }
0x167c   : > { %v5983_v36 = vld [vmem:[#allocation4 + $0x18] sm:$0xff] }
0x167d   : > { %v7232_v12 = vpack.c.bf16 %v5983_v36, %v5982_v45  ;;  %v6338_v45 = vld [vmem:[%s9685_s12] sm:$0x2]  ;;  %v6444_v36 = vld [vmem:[%s9685_s12] sm:$0x8] }
0x167f   : > { %7233 = vmatprep.subr.bf16.mxu1 %v7232_v12 }
0x1680   : > { %7235 = vmatpush3.bf16.msra.mxu1 %v7232_v12  ;;  %v6376_v12 = vld [vmem:[%s9685_s12] sm:$0x2] }
0x1683   : > { %7183 = vmatmul.mubr.msk.f32.vlgmr.msra.gmra.mrb[28].mxu1 %vm1104_vm8, %v5977_v58  ;;  %v6470_v58 = vld [vmem:[%s9685_s12] sm:$0x8] }
0x1684   : > { %7185 = vmatprep.mubr.msk.f32.mxu1 %vm1104_vm8, %v5978_v59  ;;  %v6307_v59 = vrot.slane %v6302_v37, %v7768_v13 }
0x1687   : > { %7186 = vmatmul.mubr.msk.f32.gmra.mrb[30].mxu1 %vm1104_vm8, %v5979_v32  ;;  %v6340_v32 = vpack.i.b16 %v6338_v45, %v6338_v45 }
0x1756   : > { %v7184_v5 = vpop.f32.mrb[28].mxu1 }
0x1757   : > { %v6082_v29 = vmul.f32 0.00390625, %v7184_v5  ;;  %v6062_v39 = vpop.f32.mrb[29].mxu1  ;;  %v6425_v5 = vrot.slane %v6420_v48, %v7803_v41  ;;  %v6497_v41 = vld [vmem:[%s9685_s12 + $0x4] sm:$0x1] }
0x1758   : > { %v6081_v49 = vmul.f32 0.00390625, %v6062_v39  ;;  %v6378_v39 = vshrl.u32 %v6376_v12, 16 }
0x1759   : > { %v6086_v42 = vmul.f32 %v6082_v29, %v6082_v29 }
0x175a   : > { %v6085_v26 = vmul.f32 %v6081_v49, %v6081_v49  ;;  %v7187_v21 = vpop.f32.mrb[30].mxu1 }
0x175b   : > { %6095 = vrot.lane.b32.xlu0 %v6086_v42, %s9717_s16  ;;  %v6072_v30 = vpop.f32.mrb[31].mxu1  ;;  %v6084_v46 = vmul.f32 0.00390625, %v7187_v21  ;;  %v9565_v42 = vld [vmem:[#allocation2] sm:$0xff]  ;;  %v6379_v21 = vpack.i.b16 %v6378_v39, %v6378_v39 }
0x175c   : > { %v6083_v51 = vmul.f32 0.00390625, %v6072_v30  ;;  %6093 = vrot.lane.b32.xlu1 %v6085_v26, %s9717_s16  ;;  %v6345_v26 = vrot.slane %v6340_v32, %v7777_v24 }
0x175d   : > { %v6088_v57 = vmul.f32 %v6084_v46, %v6084_v46 }
0x175e   : > { %v6087_v53 = vmul.f32 %v6083_v51, %v6083_v51 }
0x175f   : > { %6123 = vperm.xlu0 %7343, %v6081_v49  }
0x1760   : > { %6097 = vrot.lane.b32.xlu1 %v6087_v53, %s9717_s16  ;;  %v6499_v53 = vpack.i.b16 %v6497_v41, %v6497_v41 }
0x1763   : > { %7345 = vset.pattern.permute.xlu0 %v7670_v54 }
0x1764   : > { %6099 = vrot.lane.b32.xlu1 %v6088_v57, %s9717_s16  ;;  %6175 = vperm.xlu0 %7345, %v6169_v17   ;;  %v6504_v17 = vrot.slane %v6499_v53, %v7768_v13 }
0x1768   : > { %6128 = vperm.xlu1 %7344, %v6082_v29   ;;  %6185 = vperm.xlu0 %7345, %v6171_v56  }
0x176c   : > { %6133 = vperm.xlu1 %7344, %v6083_v51   ;;  %7347 = vset.pattern.permute.xlu0 %v7661_v1 }
0x1770   : > { %6138 = vperm.xlu1 %7344, %v6084_v46  }
0x1774   : > { %7346 = vset.pattern.permute.xlu1 %v7670_v54 }
0x1775   : > { %6180 = vperm.xlu1 %7346, %v6170_v2  }
0x1779   : > { %6203 = vperm.xlu1 %7346, %v6197_v44  }
0x177d   : > { %6208 = vperm.xlu1 %7346, %v6198_v63  }
0x1781   : > { %6190 = vperm.xlu1 %7346, %v6172_v22  }
0x1785   : > { %7348 = vset.pattern.permute.xlu1 %v7661_v1 }
0x17cd   : > { %v6096_v15 = vpop.permute.xlu0 %6095 }
0x17ce   : > { %v6106_v60 = vsub.f32 %v6082_v29, %v6096_v15  ;;  %v6094_v19 = vpop.permute.xlu1 %6093  ;;  %v6446_v29 = vpack.i.b16 %v6444_v36, %v6444_v36 }
0x17cf   : > { %v6105_v27 = vsub.f32 %v6081_v49, %v6094_v19  ;;  %v6472_v49 = vshrl.u32 %v6470_v58, 16 }
0x17d0   : > { %v6110_v0 = vmax.f32 %v6106_v60, 0.0 }
0x17d1   : > { %v6109_v47 = vmax.f32 %v6105_v27, 0.0  ;;  %v6473_v30 = vpack.i.b16 %v6472_v49, %v6472_v49 }
0x17d2   : > { %v6114_v61 = vadd.f32 1e-06, %v6110_v0  ;;  %v6098_v52 = vpop.permute.xlu1 %6097 }
0x17d3   : > { %v6113_v10 = vadd.f32 1e-06, %v6109_v47  ;;  %v6107_v20 = vsub.f32 %v6083_v51, %v6098_v52  ;;  %v6384_v51 = vrot.slane %v6379_v21, %v7777_v24 }
0x17d4   : > { %7613 = vrsqrt.f32 %v6114_v61 }
0x17d5   : > { %7615 = vrsqrt.f32 %v6113_v10  ;;  %v6111_v9 = vmax.f32 %v6107_v20, 0.0 }
0x17d6   : > { %v6100_v16 = vpop.permute.xlu1 %6099 }
0x17d7   : > { %v6115_v34 = vadd.f32 1e-06, %v6111_v9  ;;  %v6108_v50 = vsub.f32 %v6084_v46, %v6100_v16  ;;  %v6478_v46 = vrot.slane %v6473_v30, %v7805_v43 }
0x17d9   : > { %7617 = vrsqrt.f32 %v6115_v34  ;;  %v6112_v38 = vmax.f32 %v6108_v50, 0.0 }
0x17db   : > { %v6116_v6 = vadd.f32 1e-06, %v6112_v38 }
0x17dd   : > { %7619 = vrsqrt.f32 %v6116_v6 }
0x17de   : > { %v7614_v1 = vpop.eup %7613  ;;  %v6124_v22 = vpop.permute.xlu0 %6123 }
0x17df   : > { %v7616_v11 = vpop.eup %7615  ;;  %6152 = vperm.xlu0 %7347, %v7614_v1   ;;  %v6141_v27 = vsub.f32 %v9451_v40, %v6124_v22 }
0x17e0   : > { %6147 = vperm.xlu1 %7348, %v7616_v11  }
0x17e3   : > { %v7618_v33 = vpop.eup %7617  ;;  %v6176_v15 = vpop.permute.xlu0 %6175 }
0x17e4   : > { %6157 = vperm.xlu1 %7348, %v7618_v33  }
0x17e7   : > { %v7620_v4 = vpop.eup %7619  ;;  %v6129_v57 = vpop.permute.xlu1 %6128 }
0x17e8   : > { %7349 = vset.pattern.permute.xlu1 %v7670_v54  ;;  %6162 = vperm.xlu0 %7347, %v7620_v4   ;;  %v6186_v24 = vpop.permute.xlu0 %6185 }
0x17e9   : > { %6213 = vperm.xlu1 %7349, %v6199_v23  }
0x17eb   : > { %v6134_v56 = vpop.permute.xlu1 %6133 }
0x17ec   : > { %7350 = vset.pattern.permute.xlu0 %v7670_v54  ;;  %v6451_v54 = vrot.slane %v6446_v29, %v7805_v43  ;;  %v6142_v43 = vsub.f32 %v9454_v31, %v6129_v57  ;;  %v6143_v10 = vsub.f32 %v9466_v14, %v6134_v56 }
0x17ed   : > { %6218 = vperm.xlu0 %7350, %v6200_v8   ;;  %6270 = vrot.lane.b32.xlu1 %v6268_v7, %s9720_s15 }
0x17ee   : > { %7351 = vset.pattern.permute.xlu1 %v9565_v42 }
0x17ef   : > { %v6139_v2 = vpop.permute.xlu1 %6138 }
0x17f0   : > { %v6144_v6 = vsub.f32 %v9474_v55, %v6139_v2 }
0x17f1   : > { %6309 = vrot.lane.b32.xlu0 %v6307_v59, %s9721_s26  ;;  %6427 = vrot.lane.b32.xlu1 %v6425_v5, %s9717_s16 }
0x17f2   : > { %7352 = vset.pattern.permute.xlu0 %v9565_v42 }
0x17f4   : > { %v6181_v44 = vpop.permute.xlu1 %6180 }
0x17f5   : > { %6347 = vrot.lane.b32.xlu0 %v6345_v26, %s9722_s28  ;;  %6453 = vrot.lane.b32.xlu1 %v6451_v54, %s9723_s25 }
0x17f8   : > { %v6204_v63 = vpop.permute.xlu1 %6203 }
0x17f9   : > { %6386 = vrot.lane.b32.xlu0 %v6384_v51, %s9714_s24  ;;  %6480 = vrot.lane.b32.xlu1 %v6478_v46, %s9718_s22 }
0x17fc   : > { %v6209_v60 = vpop.permute.xlu1 %6208 }
0x17fd   : > { %6506 = vrot.lane.b32.xlu0 %v6504_v17, %s9719_s18 }
0x1800   : > { %v6191_v19 = vpop.permute.xlu1 %6190 }
0x185e   : > { %v6153_v0 = vpop.permute.xlu0 %6152 }
0x185f   : > { %v6166_v47 = vmul.f32 %v6153_v0, %v6142_v43  ;;  %v6148_v61 = vpop.permute.xlu1 %6147 }
0x1860   : > { %v6165_v13 = vmul.f32 %v6148_v61, %v6141_v27 }
0x1861   : > { %v6194_v52 = vmul.f32 %v6181_v44, %v6166_v47 }
0x1862   : > { %v6193_v20 = vmul.f32 %v6176_v15, %v6165_v13 }
0x1863   : > { %v6222_v9 = vadd.f32 %v6209_v60, %v6194_v52  ;;  %v6158_v16 = vpop.permute.xlu1 %6157 }
0x1864   : > { %v6221_v34 = vadd.f32 %v6204_v63, %v6193_v20  ;;  %v6167_v50 = vmul.f32 %v6158_v16, %v6143_v10  ;;  %v7671_v10 = vmov 0.0   ;;  %v9622_v16 = vld [vmem:[%s9682_s9] sm:$0xff] }
0x1865   : > { %v6935_v38 = vmul.f32 -1.442695, %v6222_v9  ;;  %7188 = vmatprep.subr.bf16.mxu0 %v7671_v10  ;;  %7192 = vmatprep.mubr.msk.bf16.mxu0 %vm7672_vm14, %v7671_v10 }
0x1866   : > { %v6934_v1 = vmul.f32 -1.442695, %v6221_v34  ;;  %v6195_v11 = vmul.f32 %v6186_v24, %v6167_v50 }
0x1867   : > { %7621 = vpow2.f32 %v6935_v38  ;;  %v6163_v31 = vpop.permute.xlu0 %6162 }
0x1868   : > { %7623 = vpow2.f32 %v6934_v1  ;;  %v6168_v40 = vmul.f32 %v6163_v31, %v6144_v6  ;;  %v6214_v62 = vpop.permute.xlu1 %6213  ;;  %v6541_v6 = vld [vmem:[%s9683_s10] sm:$0xff] }
0x1869   : > { %v6223_v28 = vadd.f32 %v6214_v62, %v6195_v11 }
0x186a   : > { %v6196_v18 = vmul.f32 %v6191_v19, %v6168_v40 }
0x186b   : > { %v6936_v33 = vmul.f32 -1.442695, %v6223_v28 }
0x186c   : > { %v6219_v3 = vpop.permute.xlu0 %6218  ;;  %v6271_v14 = vpop.permute.xlu1 %6270 }
0x186d   : > { %7625 = vpow2.f32 %v6936_v33  ;;  %v6224_v25 = vadd.f32 %v6219_v3, %v6196_v18  ;;  %v6273_v35 = vmul.bf16 %v9565_v42, %v6271_v14 }
0x186f   : > { %v6937_v23 = vmul.f32 -1.442695, %v6224_v25  ;;  %6281 = vrot.lane.b32.xlu1 %v6273_v35, %s9719_s18 }
0x1870   : > { %v6310_v55 = vpop.permute.xlu0 %6309  ;;  %v6428_v51 = vpop.permute.xlu1 %6427 }
0x1871   : > { %v7622_v4 = vpop.eup %7621  ;;  %7627 = vpow2.f32 %v6937_v23  ;;  %v6312_v37 = vmul.bf16 %v9565_v42, %v6310_v55 }
0x1872   : > { %v7624_v8 = vpop.eup %7623  ;;  %v6238_v7 = vadd.f32 1.0, %v7622_v4 }
0x1873   : > { %v6237_v48 = vadd.f32 1.0, %v7624_v8  ;;  %6285 = vrot.lane.b32.xlu1 %v6273_v35, %s9719_s18  ;;  %6324 = vrot.lane.b32.xlu0 %v6312_v37, %s9718_s22 }
0x1874   : > { %7629 = vrcp.f32 %v6238_v7  ;;  %v6348_v45 = vpop.permute.xlu0 %6347  ;;  %v6454_v56 = vpop.permute.xlu1 %6453 }
0x1875   : > { %7631 = vrcp.f32 %v6237_v48  ;;  %v6350_v12 = vmul.bf16 %v9565_v42, %v6348_v45 }
0x1877   : > { %v7626_v36 = vpop.eup %7625  ;;  %6320 = vrot.lane.b32.xlu1 %v6312_v37, %s9718_s22 }
0x1878   : > { %v6239_v58 = vadd.f32 1.0, %v7626_v36  ;;  %v6387_v24 = vpop.permute.xlu0 %6386  ;;  %v6481_v0 = vpop.permute.xlu1 %6480 }
0x1879   : > { %v6389_v19 = vmul.bf16 %v9565_v42, %v6387_v24 }
0x187a   : > { %7633 = vrcp.f32 %v6239_v58 }
0x187b   : > { %v7628_v59 = vpop.eup %7627  ;;  %6358 = vrot.lane.b32.xlu1 %v6350_v12, %s9723_s25 }
0x187c   : > { %v6240_v32 = vadd.f32 1.0, %v7628_v59  ;;  %v6507_v52 = vpop.permute.xlu0 %6506 }
0x187e   : > { %v7630_v5 = vpop.eup %7629  ;;  %7635 = vrcp.f32 %v6240_v32 }
0x187f   : > { %v7632_v29 = vpop.eup %7631  ;;  %v6250_v39 = vmul.f32 %v7630_v5, %v6222_v9 }
0x1880   : > { %v6249_v49 = vmul.f32 %v7632_v29, %v6221_v34  ;;  %v6939_v34 = vcombine.high %v9622_v16, %v9622_v16 }
0x1882   : > { %v6253_v26 = vpack.c.bf16 %v6250_v39, %v6249_v49  ;;  %6592 = vmatprep.mubr.bf16.mxu1 %v6939_v34 }
0x1884   : > { %6255 = vst.msk [vmem:[#allocation2 + $0x8] sm:$0xff] %vm4400_vm10, %v6253_v26  ;;  %v7634_v54 = vpop.eup %7633 }
0x1885   : > { %v6251_v30 = vmul.f32 %v7634_v54, %v6223_v28 }
0x1888   : > { %v7636_v21 = vpop.eup %7635 }
0x1889   : > { %v6252_v41 = vmul.f32 %v7636_v21, %v6224_v25 }
0x188b   : > { %v6254_v46 = vpack.c.bf16 %v6252_v41, %v6251_v30  ;;  %v6258_v53 = vld [vmem:[#allocation2 + $0x8] sm:$0xff] }
0x188c   : > { %v6274_v17 = vmul.bf16 %v6271_v14, %v6258_v53  ;;  %v6430_v57 = vmul.bf16 %v6428_v51, %v6258_v53  ;;  %6413 = vst.msk [vmem:[#allocation3 + $0x80] sm:$0xff] %vm4400_vm10, %v6258_v53  ;;  %v6313_v2 = vmul.bf16 %v6310_v55, %v6258_v53  ;;  %v6456_v44 = vmul.bf16 %v6454_v56, %v6258_v53 }
0x188d   : > { %6256 = vst.msk [vmem:[#allocation2 + $0x28] sm:$0xff] %vm4400_vm10, %v6254_v46  ;;  %v6351_v15 = vmul.bf16 %v6348_v45, %v6258_v53  ;;  %v6483_v61 = vmul.bf16 %v6481_v0, %v6258_v53  ;;  %v6390_v42 = vmul.bf16 %v6387_v24, %v6258_v53  ;;  %v6509_v9 = vmul.bf16 %v6507_v52, %v6258_v53 }
0x188e   : > { %6283 = vrot.lane.b32.xlu0 %v6274_v17, %s9719_s18  ;;  %6434 = vrot.lane.b32.xlu1 %v6430_v57, %s9714_s24 }
0x1892   : > { %6322 = vrot.lane.b32.xlu0 %v6313_v2, %s9718_s22  ;;  %6460 = vrot.lane.b32.xlu1 %v6456_v44, %s9722_s28 }
0x1893   : > { %v6529_v63 = vld [vmem:[#allocation3 + $0x80] sm:$0xff] }
0x1894   : > { %v6260_v22 = vld [vmem:[#allocation2 + $0x28] sm:$0xff]  ;;  %7077 = vmatprep.subr.bf16.mxu1 %v6529_v63 }
0x1895   : > { %v6315_v60 = vmul.bf16 %v6310_v55, %v6260_v22  ;;  %6414 = vst.msk [vmem:[#allocation3 + $0x90] sm:$0xff] %vm4400_vm10, %v6260_v22  ;;  %v6276_v43 = vmul.bf16 %v6271_v14, %v6260_v22  ;;  %v6353_v27 = vmul.bf16 %v6348_v45, %v6260_v22  ;;  %v6431_v47 = vmul.bf16 %v6428_v51, %v6260_v22 }
0x1896   : > { %6360 = vrot.lane.b32.xlu0 %v6351_v15, %s9723_s25  ;;  %v6392_v13 = vmul.bf16 %v6387_v24, %v6260_v22  ;;  %v6457_v20 = vmul.bf16 %v6454_v56, %v6260_v22  ;;  %v6484_v50 = vmul.bf16 %v6481_v0, %v6260_v22  ;;  %v6510_v38 = vmul.bf16 %v6507_v52, %v6260_v22  ;;  %v7484_v0 = vld [vmem:[%s9682_s9 + $0x8] ss:$0 sps:$4 sm:$0xff]  }
0x1897   : > { %6326 = vrot.lane.b32.xlu1 %v6315_v60, %s9718_s22 }
0x189a   : > { %6287 = vrot.lane.b32.xlu0 %v6276_v43, %s9719_s18  ;;  %v6938_v43 = vcombine.low %v9622_v16, %v9622_v16 }
0x189b   : > { %6397 = vrot.lane.b32.xlu1 %v6389_v19, %s9717_s16 }
0x189c   : > { %v6530_v8 = vld [vmem:[#allocation3 + $0x90] sm:$0xff] }
0x189e   : > { %6362 = vrot.lane.b32.xlu0 %v6350_v12, %s9723_s25 }
0x189f   : > { %6364 = vrot.lane.b32.xlu1 %v6353_v27, %s9723_s25 }
0x18a2   : > { %6436 = vrot.lane.b32.xlu0 %v6431_v47, %s9714_s24 }
0x18a3   : > { %6487 = vrot.lane.b32.xlu1 %v6483_v61, %s9721_s26 }
0x18a6   : > { %6399 = vrot.lane.b32.xlu0 %v6390_v42, %s9717_s16 }
0x18a7   : > { %6403 = vrot.lane.b32.xlu1 %v6392_v13, %s9717_s16 }
0x18aa   : > { %6462 = vrot.lane.b32.xlu0 %v6457_v20, %s9722_s28  ;;  %s482_s28 = scalar_lea.vmem %s9687_s14, %s6728_s19 }
0x18ab   : > { %6513 = vrot.lane.b32.xlu1 %v6509_v9, %s9720_s15 }
0x18ae   : > { %6401 = vrot.lane.b32.xlu0 %v6389_v19, %s9717_s16 }
0x18af   : > { %6544 = vperm.xlu1 %7351, %v6541_v6  }
0x18b2   : > { %6489 = vrot.lane.b32.xlu0 %v6484_v50, %s9721_s26  ;;  %s478_s26 = scalar_lea.vmem %s9674_s1, %s6728_s19 }
0x18b6   : > { %6515 = vrot.lane.b32.xlu0 %v6510_v38, %s9720_s15 }
0x18e1   : > { %v6282_v1 = vpop.permute.xlu1 %6281 }
0x18e5   : > { %v6286_v11 = vpop.permute.xlu1 %6285  ;;  %v6325_v40 = vpop.permute.xlu0 %6324 }
0x18e9   : > { %v6321_v31 = vpop.permute.xlu1 %6320 }
0x18ed   : > { %v6359_v62 = vpop.permute.xlu1 %6358 }
0x1900   : > { %v6284_v28 = vpop.permute.xlu0 %6283  ;;  %v6435_v18 = vpop.permute.xlu1 %6434 }
0x1901   : > { %v6289_v33 = vsel %vm4763_vm11, %v6282_v1, %v6284_v28  ;;  %6440 = vst.msk [vmem:[#allocation3 + $0xa0] sm:$0xff] %vm4400_vm10, %v6435_v18 }
0x1902   : > { %6293 = vst.msk [vmem:[#allocation3] sm:$0xff] %vm4400_vm10, %v6289_v33 }
0x1904   : > { %v6323_v3 = vpop.permute.xlu0 %6322  ;;  %v6461_v14 = vpop.permute.xlu1 %6460 }
0x1905   : > { %v6328_v25 = vsel %vm4803_vm12, %v6321_v31, %v6323_v3  ;;  %6466 = vst.msk [vmem:[#allocation3 + $0xc0] sm:$0xff] %vm4400_vm10, %v6461_v14 }
0x1906   : > { %6332 = vst.msk [vmem:[#allocation3 + $0x20] sm:$0xff] %vm4400_vm10, %v6328_v25 }
0x1908   : > { %v6361_v35 = vpop.permute.xlu0 %6360  ;;  %v6531_v29 = vld [vmem:[#allocation3 + $0xa0] sm:$0xff] }
0x1909   : > { %v6366_v23 = vsel %vm4842_vm13, %v6359_v62, %v6361_v35  ;;  %v6327_v55 = vpop.permute.xlu1 %6326  ;;  %v6521_v4 = vld [vmem:[#allocation3] sm:$0xff] }
0x190a   : > { %6370 = vst.msk [vmem:[#allocation3 + $0x40] sm:$0xff] %vm4400_vm10, %v6366_v23  ;;  %v6329_v37 = vsel %vm4803_vm12, %v6325_v40, %v6327_v55  ;;  %7078 = vmatpush3.bf16.msra.mxu1 %v6521_v4  ;;  %v6645_v40 = vld [vmem:[%s478_s26] sm:$0xf] }
0x190b   : > { %6333 = vst.msk [vmem:[#allocation3 + $0x30] sm:$0xff] %vm4400_vm10, %v6329_v37  ;;  %7079 = vmatprep.subr.bf16.mxu1 %v6530_v8  ;;  %v6647_v62 = vrot.slane %v6645_v40, 4 }
0x190c   : > { %v6288_v7 = vpop.permute.xlu0 %6287  ;;  %v6533_v46 = vld [vmem:[#allocation3 + $0xc0] sm:$0xff] }
0x190d   : > { %v6290_v48 = vsel %vm4763_vm11, %v6286_v11, %v6288_v7  ;;  %v6398_v45 = vpop.permute.xlu1 %6397  ;;  %v6523_v54 = vld [vmem:[#allocation3 + $0x20] sm:$0xff] }
0x190e   : > { %6294 = vst.msk [vmem:[#allocation3 + $0x10] sm:$0xff] %vm4400_vm10, %v6290_v48 }
0x1910   : > { %v6363_v36 = vpop.permute.xlu0 %6362 }
0x1911   : > { %v6365_v12 = vpop.permute.xlu1 %6364  ;;  %v6525_v57 = vld [vmem:[#allocation3 + $0x40] sm:$0xff] }
0x1912   : > { %v6367_v58 = vsel %vm4842_vm13, %v6363_v36, %v6365_v12  ;;  %v6524_v51 = vld [vmem:[#allocation3 + $0x30] sm:$0xff] }
0x1913   : > { %6371 = vst.msk [vmem:[#allocation3 + $0x50] sm:$0xff] %vm4400_vm10, %v6367_v58 }
0x1914   : > { %v6437_v59 = vpop.permute.xlu0 %6436 }
0x1915   : > { %6441 = vst.msk [vmem:[#allocation3 + $0xb0] sm:$0xff] %vm4400_vm10, %v6437_v59  ;;  %v6488_v32 = vpop.permute.xlu1 %6487  ;;  %v6522_v5 = vld [vmem:[#allocation3 + $0x10] sm:$0xff] }
0x1916   : > { %6493 = vst.msk [vmem:[#allocation3 + $0xe0] sm:$0xff] %vm4400_vm10, %v6488_v32  ;;  %7080 = vmatpush3.bf16.msra.mxu1 %v6522_v5 }
0x1917   : > { %7081 = vmatprep.subr.bf16.mxu1 %v6531_v29 }
0x1918   : > { %v6400_v39 = vpop.permute.xlu0 %6399 }
0x1919   : > { %v6405_v49 = vsel %vm719_vm5, %v6398_v45, %v6400_v39  ;;  %v6404_v26 = vpop.permute.xlu1 %6403 }
0x191a   : > { %6409 = vst.msk [vmem:[#allocation3 + $0x60] sm:$0xff] %vm4400_vm10, %v6405_v49  ;;  %7082 = vmatpush3.bf16.msra.mxu1 %v6523_v54  ;;  %v6526_v44 = vld [vmem:[#allocation3 + $0x50] sm:$0xff] }
0x191c   : > { %v6463_v21 = vpop.permute.xlu0 %6462  ;;  %v6532_v30 = vld [vmem:[#allocation3 + $0xb0] sm:$0xff] }
0x191d   : > { %6467 = vst.msk [vmem:[#allocation3 + $0xd0] sm:$0xff] %vm4400_vm10, %v6463_v21  ;;  %7083 = vmatprep.subr.bf16.mxu1 %v6532_v30  ;;  %v6514_v41 = vpop.permute.xlu1 %6513  ;;  %v6535_v22 = vld [vmem:[#allocation3 + $0xe0] sm:$0xff] }
0x191e   : > { %6519 = vst.msk [vmem:[#allocation3 + $0x100] sm:$0xff] %vm4400_vm10, %v6514_v41  ;;  %7084 = vmatpush3.bf16.msra.mxu1 %v6524_v51 }
0x191f   : > { %7085 = vmatprep.subr.bf16.mxu1 %v6533_v46 }
0x1920   : > { %v6402_v53 = vpop.permute.xlu0 %6401 }
0x1921   : > { %v6406_v17 = vsel %vm719_vm5, %v6402_v53, %v6404_v26  ;;  %v6527_v60 = vld [vmem:[#allocation3 + $0x60] sm:$0xff] }
0x1922   : > { %6410 = vst.msk [vmem:[#allocation3 + $0x70] sm:$0xff] %vm4400_vm10, %v6406_v17  ;;  %7086 = vmatpush3.bf16.msra.mxu1 %v6525_v57 }
0x1924   : > { %v6490_v56 = vpop.permute.xlu0 %6489  ;;  %v6534_v2 = vld [vmem:[#allocation3 + $0xd0] sm:$0xff] }
0x1925   : > { %6494 = vst.msk [vmem:[#allocation3 + $0xf0] sm:$0xff] %vm4400_vm10, %v6490_v56  ;;  %7087 = vmatprep.subr.bf16.mxu1 %v6534_v2  ;;  %v6537_v63 = vld [vmem:[#allocation3 + $0x100] sm:$0xff] }
0x1926   : > { %7088 = vmatpush3.bf16.msra.mxu1 %v6526_v44  ;;  %7189 = vmatpush3.bf16.msra.mxu0 %v6537_v63 }
0x1927   : > { %7089 = vmatprep.subr.bf16.mxu1 %v6535_v22  ;;  %7190 = vmatprep.subr.bf16.mxu0 %v7671_v10 }
0x1928   : > { %v6516_v15 = vpop.permute.xlu0 %6515 }
0x1929   : > { %6520 = vst.msk [vmem:[#allocation3 + $0x110] sm:$0xff] %vm4400_vm10, %v6516_v15  ;;  %v6528_v19 = vld [vmem:[#allocation3 + $0x70] sm:$0xff] }
0x192a   : > { %7090 = vmatpush3.bf16.msra.mxu1 %v6527_v60 }
0x192c   : > { %v6536_v24 = vld [vmem:[#allocation3 + $0xf0] sm:$0xff] }
0x192d   : > { %7091 = vmatprep.subr.bf16.mxu1 %v6536_v24 }
0x192e   : > { %7092 = vmatpush3.bf16.msra.mxu1 %v6528_v19  ;;  %v6545_v42 = vpop.permute.xlu1 %6544 }
0x1930   : > { %v6538_v27 = vld [vmem:[#allocation3 + $0x110] sm:$0xff] }
0x1931   : > { %6593 = vmatmul.mubr.bf16.vlgmr.msra.gmra.mrb[32].mxu1 %v6938_v43  ;;  %7191 = vmatpush3.bf16.msra.mxu0 %v6538_v27 }
0x1934   : > { %7193 = vmatmul.mubr.msk.bf16.vlgmr.msra.gmra.mrb[52].mxu0 %vm1104_vm8, %v7484_v0 }
0x1a04   : > { %v7093_v47 = vpop.f32.mrb[32].mxu1 }
0x1a05   : > { %v7094_v61 = vpop.f32.mrb[33].mxu1 }
0x1a06   : > { %v7095_v13 = vadd.f32 %v7094_v61, %v7093_v47  ;;  %v7096_v52 = vpop.f32.mrb[34].mxu1 }
0x1a07   : > { %v6634_v10 = vpop.f32.mrb[52].mxu0  ;;  %v7097_v20 = vpop.f32.mrb[35].mxu1 }
0x1a08   : > { %v6595_v9 = vadd.f32 %v7095_v13, %v6545_v42  ;;  %v7194_v16 = vpop.f32.mrb[53].mxu0 }
0x1a09   : > { %v6637_v34 = vpop.f32.mrb[54].mxu0 }
0x1a0a   : > { %v6635_v50 = vadd.f32 %v6634_v10, %v6595_v9  ;;  %v7195_v38 = vpop.f32.mrb[55].mxu0 }
0x1a0c   : > { %v6640_v6 = vmax.f32 %v6635_v50, -30.0 }
0x1a0e   : > { %v6641_v1 = vmin.f32 %v6640_v6, 20.0 }
0x1a10   : > { %v6642_v11 = vmul.f32 0.5, %v6641_v1 }
0x1a12   : > { %v6643_v31 = vmul.f32 1.442695, %v6642_v11 }
0x1a14   : > { %7637 = vpow2.f32 %v6643_v31 }
0x1a1e   : > { %v7638_v28 = vpop.eup %7637 }
0x1a1f   : > { %v6649_v18 = vmul.f32 %v7638_v28, %v6647_v62 }
0x1a21   : > { %v6651_v33 = vrot.slane %v6649_v18, 4 }
0x1a23   : > { %v6653_v3 = vadd.f32 %v6651_v33, %v6635_v50 }
0x1a25   : > { %6655 = vst.msk [vmem:[%s482_s28] sm:$0xf] %vm6654_vm15, %v6653_v3 }
0x1a26 PF: > { %s24_s29 = sadd.s32 1, %s7650_s29  }
0x1a27   : > { %p21_p4 = scmp.ge.s32.totalorder %s24_s29, 4  }
0x1a29   :  { %23 = sbr.rel (!%p21_p4) target bundleno = 1 (0x1), region = 113 }

</bundles_post_ra>
